<compile_context>
chip_gen: v5e
topology: v5e:2x2
jax: 0.10.0
libtpu: 0.0.40
codegen_flags: <defaults>
</compile_context>

<pallas_src>
import jax
import jax.numpy as jnp
from jax.experimental import pallas as pl
from jax.experimental.pallas import tpu as pltpu


def net_forward(x, w_conv, b_conv, w_fc, b_fc):
    """x: [N, C, H, W] float32 (NCHW, PyTorch convention). Returns [N, 1] f32."""
    N, C, H, W = x.shape
    F = w_conv.shape[0]
    HW = H * W
    P = W + 2                    # padded row pitch
    L = H * P                    # per-image "superset" conv-output rows
    R = (H + 3) * P              # per-image flat rows: (H+2)*P + 2 are needed for
                                 # the furthest tap offset (2P+2); rounding up to a
                                 # whole extra padded row lets ONE jnp.pad do it all.
    B = N                        # images per grid step: whole batch in one step
                                 # (maximal block; amortizes per-step overhead).
    # TODO(synk): for large N pick B = N / n_steps with B*R a multiple of 8 so the
    # (B*R, C) input block satisfies the (8,128) block rule across a >1 grid.
    LT = (B - 1) * R + L         # superset rows covering all B images in one dot

    # ---- wrapper-side layout prep: ONE transpose + ONE pad (no im2col in HBM) ----
    x_nhwc = jnp.pad(x.transpose(0, 2, 3, 1).astype(jnp.float32),
                     ((0, 0), (1, 2), (1, 1), (0, 0)))            # (N, H+3, P, C)
    x_flat = x_nhwc.reshape(N * R, C)                             # (N*R, C) f32

    # Conv weights laid out tap-major to match the lane layout of the im2col
    # scratch: row (k*C + c) of w9 holds w_conv[f, c, kh, kw] with k = kh*3+kw.
    w9 = w_conv.transpose(2, 3, 1, 0).reshape(9 * C, F).astype(jnp.bfloat16)
    b_row = b_conv.reshape(1, F).astype(jnp.float32)
    wfc_row = w_fc.reshape(1, F).astype(jnp.float32)
    bfc = b_fc.reshape(1, 1).astype(jnp.float32)

    # Pooling matrix (B, LT): fuses the junk-column mask, the image-boundary
    # mask and the 1/HW average into one MXU dot.
    #   pool[b, s] = 1/HW  iff  s = b*R + q  with q < L and q % P < W, else 0.
    s = jnp.arange(LT, dtype=jnp.int32)[None, :]
    q = s - jnp.arange(B, dtype=jnp.int32)[:, None] * R
    valid = (q >= 0) & (q < L) & ((q % P) < W)
    pool = jnp.where(valid, 1.0 / HW, 0.0).astype(jnp.bfloat16)   # (B, LT)

    def fused_kernel(x_ref, w_ref, bc_ref, pool_ref, wfc_ref, bfc_ref,
                     o_ref, patches_ref):
        xp = x_ref[...]                                        # (B*R, C) f32
        # In-VMEM im2col: 9 shifted sublane windows, each cast once to bf16 and
        # stored into its lane-slice of the (LT, 9C) scratch.
        for kh in range(3):
            for kw in range(3):
                k = kh * 3 + kw
                off = kh * P + kw
                patches_ref[:, k * C:(k + 1) * C] = \
                    xp[off:off + LT, :].astype(jnp.bfloat16)
        # 3x3 conv for ALL B images as ONE MXU dot (bf16 operands, f32 acc).
        acc = jnp.dot(patches_ref[...], w_ref[...],
                      preferred_element_type=jnp.float32)          # (LT, F)
        feat = jnp.maximum(acc + bc_ref[...], 0.0)                 # f32 bias+ReLU
        # Masked global-average-pool of every image as ONE MXU dot: the pooling
        # matrix zeroes junk/padding/boundary rows and carries the 1/HW scale.
        pooled = jnp.dot(pool_ref[...], feat.astype(jnp.bfloat16),
                         preferred_element_type=jnp.float32)       # (B, F)
        # FC head (F -> 1): elementwise mul + lane reduction, f32.
        score = jnp.sum(pooled * wfc_ref[...], axis=1, keepdims=True) \
            + bfc_ref[...]                                         # (B, 1)
        o_ref[...] = score

    return pl.pallas_call(
        fused_kernel,
        out_shape=jax.ShapeDtypeStruct((N, 1), jnp.float32),
        grid_spec=pltpu.PrefetchScalarGridSpec(
            num_scalar_prefetch=0,
            grid=(N // B,),                                    # B images per step
            in_specs=[
                pl.BlockSpec((B * R, C), lambda n: (n, 0)),    # B flat images
                pl.BlockSpec((9 * C, F), lambda n: (0, 0)),    # resident conv w
                pl.BlockSpec((1, F), lambda n: (0, 0)),        # resident conv b
                pl.BlockSpec((B, LT), lambda n: (0, 0)),       # resident pool mat
                pl.BlockSpec((1, F), lambda n: (0, 0)),        # resident fc w
                pl.BlockSpec((1, 1), lambda n: (0, 0)),        # resident fc b
            ],
            # Per-step disjoint (B, 1) output block -> grid axis can be parallel
            # (megacore shards the batch on v7x when there is >1 step).
            out_specs=pl.BlockSpec((B, 1), lambda n: (n, 0)),
            scratch_shapes=[pltpu.VMEM((LT, 9 * C), jnp.bfloat16)],  # im2col temp
        ),
        compiler_params=pltpu.CompilerParams(
            dimension_semantics=("parallel",)),
    )(x_flat, w9, b_row, pool, wfc_row, bfc)


def net_forward_ref(x, w_conv, b_conv, w_fc, b_fc):
    """Pure-JAX reference with the same bf16 operands / f32 accumulation."""
    F = w_conv.shape[0]
    feat = jax.lax.conv_general_dilated(
        x.astype(jnp.bfloat16), w_conv.astype(jnp.bfloat16),
        window_strides=(1, 1), padding=((1, 1), (1, 1)),
        dimension_numbers=("NCHW", "OIHW", "NCHW"),
        preferred_element_type=jnp.float32)
    feat = jnp.maximum(feat + b_conv.reshape(1, F, 1, 1), 0.0)
    pooled = feat.mean(axis=(2, 3))                      # global average pool
    return pooled @ w_fc + b_fc.reshape(1, 1)


def init_params(key, C=4, F=32):
    k1, k2, k3, k4 = jax.random.split(key, 4)
    w_conv = jax.random.normal(k1, (F, C, 3, 3), jnp.float32) * 0.05
    b_conv = jax.random.normal(k2, (F,), jnp.float32) * 0.01
    w_fc = jax.random.normal(k3, (F, 1), jnp.float32) * 0.1
    b_fc = jax.random.normal(k4, (1,), jnp.float32) * 0.01
    return w_conv, b_conv, w_fc, b_fc


if __name__ == "__main__":
    key = jax.random.PRNGKey(0)
    kx, kp = jax.random.split(key)

    N, C, H, W, F = 2, 4, 16, 16, 32
    x = jax.random.normal(kx, (N, C, H, W), jnp.float32)
    w_conv, b_conv, w_fc, b_fc = init_params(kp, C=C, F=F)

    out = net_forward(x, w_conv, b_conv, w_fc, b_fc)
    out = jax.block_until_ready(out)
    assert out.shape == (N, 1) and out.dtype == jnp.float32

    ref = net_forward_ref(x, w_conv, b_conv, w_fc, b_fc)
    assert jnp.allclose(out, ref, atol=1e-2, rtol=1e-2), (out, ref)
    print("KERNEL_OK")
</pallas_src>

<mosaic_0001>
module attributes {stable_mosaic.version = 11 : i64} {
  func.func @fused_kernel(%arg0: i32, %arg1: memref<684x4xf32, #tpu.memory_space<vmem>>, %arg2: memref<36x32xbf16, #tpu.memory_space<vmem>>, %arg3: memref<1x32xf32, #tpu.memory_space<vmem>>, %arg4: memref<2x630xbf16, #tpu.memory_space<vmem>>, %arg5: memref<1x32xf32, #tpu.memory_space<vmem>>, %arg6: memref<1x1xf32, #tpu.memory_space<vmem>>, %arg7: memref<2x1xf32, #tpu.memory_space<vmem>>, %arg8: memref<630x36xbf16, #tpu.memory_space<vmem>>) attributes {dimension_semantics = [#tpu.dimension_semantics<parallel>], iteration_bounds = array<i64: 1>, scalar_prefetch = 0 : i64, scratch_operands = 1 : i64, tpu.core_type = #tpu.core_type<tc>, window_params = [{transform_indices = @transform_0, window_bounds = array<i64: 684, 4>}, {pipeline_mode = #tpu.pipeline_mode<synchronous>, transform_indices = @transform_1, window_bounds = array<i64: 36, 32>}, {pipeline_mode = #tpu.pipeline_mode<synchronous>, transform_indices = @transform_2, window_bounds = array<i64: 1, 32>}, {pipeline_mode = #tpu.pipeline_mode<synchronous>, transform_indices = @transform_3, window_bounds = array<i64: 2, 630>}, {pipeline_mode = #tpu.pipeline_mode<synchronous>, transform_indices = @transform_4, window_bounds = array<i64: 1, 32>}, {pipeline_mode = #tpu.pipeline_mode<synchronous>, transform_indices = @transform_5, window_bounds = array<i64: 1, 1>}, {transform_indices = @transform_6, window_bounds = array<i64: 2, 1>}]} {
    %c0 = arith.constant 0 : index
    %c0_0 = arith.constant 0 : index
    %0 = vector.load %arg1[%c0, %c0_0] : memref<684x4xf32, #tpu.memory_space<vmem>>, vector<684x4xf32>
    %1 = vector.extract_strided_slice %0 {offsets = [0, 0], sizes = [630, 4], strides = [1, 1]} : vector<684x4xf32> to vector<630x4xf32>
    %2 = arith.truncf %1 : vector<630x4xf32> to vector<630x4xbf16>
    %c0_1 = arith.constant 0 : index
    %c0_2 = arith.constant 0 : index
    %3 = vector.load %arg8[%c0_1, %c0_2] : memref<630x36xbf16, #tpu.memory_space<vmem>>, vector<630x4xbf16>
    tpu.vector_store %arg8[%c0_1, %c0_2], %2 {strides = array<i32>} : memref<630x36xbf16, #tpu.memory_space<vmem>>, vector<630x4xbf16>,
    %4 = vector.extract_strided_slice %0 {offsets = [1, 0], sizes = [630, 4], strides = [1, 1]} : vector<684x4xf32> to vector<630x4xf32>
    %5 = arith.truncf %4 : vector<630x4xf32> to vector<630x4xbf16>
    %c0_3 = arith.constant 0 : index
    %c4 = arith.constant 4 : index
    %6 = vector.load %arg8[%c0_3, %c4] : memref<630x36xbf16, #tpu.memory_space<vmem>>, vector<630x4xbf16>
    tpu.vector_store %arg8[%c0_3, %c4], %5 {strides = array<i32>} : memref<630x36xbf16, #tpu.memory_space<vmem>>, vector<630x4xbf16>,
    %7 = vector.extract_strided_slice %0 {offsets = [2, 0], sizes = [630, 4], strides = [1, 1]} : vector<684x4xf32> to vector<630x4xf32>
    %8 = arith.truncf %7 : vector<630x4xf32> to vector<630x4xbf16>
    %c0_4 = arith.constant 0 : index
    %c8 = arith.constant 8 : index
    %9 = vector.load %arg8[%c0_4, %c8] : memref<630x36xbf16, #tpu.memory_space<vmem>>, vector<630x4xbf16>
    tpu.vector_store %arg8[%c0_4, %c8], %8 {strides = array<i32>} : memref<630x36xbf16, #tpu.memory_space<vmem>>, vector<630x4xbf16>,
    %10 = vector.extract_strided_slice %0 {offsets = [18, 0], sizes = [630, 4], strides = [1, 1]} : vector<684x4xf32> to vector<630x4xf32>
    %11 = arith.truncf %10 : vector<630x4xf32> to vector<630x4xbf16>
    %c0_5 = arith.constant 0 : index
    %c12 = arith.constant 12 : index
    %12 = vector.load %arg8[%c0_5, %c12] : memref<630x36xbf16, #tpu.memory_space<vmem>>, vector<630x4xbf16>
    tpu.vector_store %arg8[%c0_5, %c12], %11 {strides = array<i32>} : memref<630x36xbf16, #tpu.memory_space<vmem>>, vector<630x4xbf16>,
    %13 = vector.extract_strided_slice %0 {offsets = [19, 0], sizes = [630, 4], strides = [1, 1]} : vector<684x4xf32> to vector<630x4xf32>
    %14 = arith.truncf %13 : vector<630x4xf32> to vector<630x4xbf16>
    %c0_6 = arith.constant 0 : index
    %c16 = arith.constant 16 : index
    %15 = vector.load %arg8[%c0_6, %c16] : memref<630x36xbf16, #tpu.memory_space<vmem>>, vector<630x4xbf16>
    tpu.vector_store %arg8[%c0_6, %c16], %14 {strides = array<i32>} : memref<630x36xbf16, #tpu.memory_space<vmem>>, vector<630x4xbf16>,
    %16 = vector.extract_strided_slice %0 {offsets = [20, 0], sizes = [630, 4], strides = [1, 1]} : vector<684x4xf32> to vector<630x4xf32>
    %17 = arith.truncf %16 : vector<630x4xf32> to vector<630x4xbf16>
    %c0_7 = arith.constant 0 : index
    %c20 = arith.constant 20 : index
    %18 = vector.load %arg8[%c0_7, %c20] : memref<630x36xbf16, #tpu.memory_space<vmem>>, vector<630x4xbf16>
    tpu.vector_store %arg8[%c0_7, %c20], %17 {strides = array<i32>} : memref<630x36xbf16, #tpu.memory_space<vmem>>, vector<630x4xbf16>,
    %19 = vector.extract_strided_slice %0 {offsets = [36, 0], sizes = [630, 4], strides = [1, 1]} : vector<684x4xf32> to vector<630x4xf32>
    %20 = arith.truncf %19 : vector<630x4xf32> to vector<630x4xbf16>
    %c0_8 = arith.constant 0 : index
    %c24 = arith.constant 24 : index
    %21 = vector.load %arg8[%c0_8, %c24] : memref<630x36xbf16, #tpu.memory_space<vmem>>, vector<630x4xbf16>
    tpu.vector_store %arg8[%c0_8, %c24], %20 {strides = array<i32>} : memref<630x36xbf16, #tpu.memory_space<vmem>>, vector<630x4xbf16>,
    %22 = vector.extract_strided_slice %0 {offsets = [37, 0], sizes = [630, 4], strides = [1, 1]} : vector<684x4xf32> to vector<630x4xf32>
    %23 = arith.truncf %22 : vector<630x4xf32> to vector<630x4xbf16>
    %c0_9 = arith.constant 0 : index
    %c28 = arith.constant 28 : index
    %24 = vector.load %arg8[%c0_9, %c28] : memref<630x36xbf16, #tpu.memory_space<vmem>>, vector<630x4xbf16>
    tpu.vector_store %arg8[%c0_9, %c28], %23 {strides = array<i32>} : memref<630x36xbf16, #tpu.memory_space<vmem>>, vector<630x4xbf16>,
    %25 = vector.extract_strided_slice %0 {offsets = [38, 0], sizes = [630, 4], strides = [1, 1]} : vector<684x4xf32> to vector<630x4xf32>
    %26 = arith.truncf %25 : vector<630x4xf32> to vector<630x4xbf16>
    %c0_10 = arith.constant 0 : index
    %c32 = arith.constant 32 : index
    %27 = vector.load %arg8[%c0_10, %c32] : memref<630x36xbf16, #tpu.memory_space<vmem>>, vector<630x4xbf16>
    tpu.vector_store %arg8[%c0_10, %c32], %26 {strides = array<i32>} : memref<630x36xbf16, #tpu.memory_space<vmem>>, vector<630x4xbf16>,
    %c0_11 = arith.constant 0 : index
    %c0_12 = arith.constant 0 : index
    %28 = vector.load %arg8[%c0_11, %c0_12] : memref<630x36xbf16, #tpu.memory_space<vmem>>, vector<630x36xbf16>
    %c0_13 = arith.constant 0 : index
    %c0_14 = arith.constant 0 : index
    %29 = vector.load %arg2[%c0_13, %c0_14] : memref<36x32xbf16, #tpu.memory_space<vmem>>, vector<36x32xbf16>
    %cst = arith.constant dense<0.000000e+00> : vector<630x32xf32>
    %30 = tpu.matmul %28, %29, %cst {dimension_numbers = #tpu.dot_dimension_numbers<[1], [0], [0], [1], [0, 0, 1, 1], [], []>} : vector<630x36xbf16>, vector<36x32xbf16>, vector<630x32xf32> -> vector<630x32xf32>
    %c0_15 = arith.constant 0 : index
    %c0_16 = arith.constant 0 : index
    %31 = vector.load %arg3[%c0_15, %c0_16] : memref<1x32xf32, #tpu.memory_space<vmem>>, vector<1x32xf32>
    %32 = vector.broadcast %31 : vector<1x32xf32> to vector<630x32xf32>
    %33 = arith.addf %30, %32 : vector<630x32xf32>
    %cst_17 = arith.constant 0.000000e+00 : f32
    %34 = vector.broadcast %cst_17 : f32 to vector<630x32xf32>
    %35 = arith.maximumf %33, %34 : vector<630x32xf32>
    %c0_18 = arith.constant 0 : index
    %c0_19 = arith.constant 0 : index
    %36 = vector.load %arg4[%c0_18, %c0_19] : memref<2x630xbf16, #tpu.memory_space<vmem>>, vector<2x630xbf16>
    %37 = arith.truncf %35 : vector<630x32xf32> to vector<630x32xbf16>
    %cst_20 = arith.constant dense<0.000000e+00> : vector<2x32xf32>
    %38 = tpu.matmul %36, %37, %cst_20 {dimension_numbers = #tpu.dot_dimension_numbers<[1], [0], [0], [1], [0, 0, 1, 1], [], []>} : vector<2x630xbf16>, vector<630x32xbf16>, vector<2x32xf32> -> vector<2x32xf32>
    %c0_21 = arith.constant 0 : index
    %c0_22 = arith.constant 0 : index
    %39 = vector.load %arg5[%c0_21, %c0_22] : memref<1x32xf32, #tpu.memory_space<vmem>>, vector<1x32xf32>
    %40 = vector.broadcast %39 : vector<1x32xf32> to vector<2x32xf32>
    %41 = arith.mulf %38, %40 : vector<2x32xf32>
    %cst_23 = arith.constant dense<0.000000e+00> : vector<2xf32>
    %42 = vector.multi_reduction <add>, %41, %cst_23 [1] : vector<2x32xf32> to vector<2xf32>
    %43 = vector.shape_cast %42 : vector<2xf32> to vector<2x1xf32>
    %c0_24 = arith.constant 0 : index
    %c0_25 = arith.constant 0 : index
    %44 = vector.load %arg6[%c0_24, %c0_25] : memref<1x1xf32, #tpu.memory_space<vmem>>, vector<1x1xf32>
    %45 = vector.broadcast %44 : vector<1x1xf32> to vector<2x1xf32>
    %46 = arith.addf %43, %45 : vector<2x1xf32>
    %c0_26 = arith.constant 0 : index
    %c0_27 = arith.constant 0 : index
    %47 = vector.load %arg7[%c0_26, %c0_27] : memref<2x1xf32, #tpu.memory_space<vmem>>, vector<2x1xf32>
    tpu.vector_store %arg7[%c0_26, %c0_27], %46 {strides = array<i32>} : memref<2x1xf32, #tpu.memory_space<vmem>>, vector<2x1xf32>,
    return
  }
  func.func @transform_0(%arg0: i32) -> (i32, i32) {
    %c0_i32 = arith.constant 0 : i32
    %c0_i32_0 = arith.constant 0 : i32
    return %arg0, %c0_i32 : i32, i32
  }
  func.func @transform_1(%arg0: i32) -> (i32, i32) {
    %c0_i32 = arith.constant 0 : i32
    %c0_i32_0 = arith.constant 0 : i32
    %c0_i32_1 = arith.constant 0 : i32
    return %c0_i32, %c0_i32_0 : i32, i32
  }
  func.func @transform_2(%arg0: i32) -> (i32, i32) {
    %c0_i32 = arith.constant 0 : i32
    %c0_i32_0 = arith.constant 0 : i32
    %c0_i32_1 = arith.constant 0 : i32
    return %c0_i32, %c0_i32_0 : i32, i32
  }
  func.func @transform_3(%arg0: i32) -> (i32, i32) {
    %c0_i32 = arith.constant 0 : i32
    %c0_i32_0 = arith.constant 0 : i32
    %c0_i32_1 = arith.constant 0 : i32
    return %c0_i32, %c0_i32_0 : i32, i32
  }
  func.func @transform_4(%arg0: i32) -> (i32, i32) {
    %c0_i32 = arith.constant 0 : i32
    %c0_i32_0 = arith.constant 0 : i32
    %c0_i32_1 = arith.constant 0 : i32
    return %c0_i32, %c0_i32_0 : i32, i32
  }
  func.func @transform_5(%arg0: i32) -> (i32, i32) {
    %c0_i32 = arith.constant 0 : i32
    %c0_i32_0 = arith.constant 0 : i32
    %c0_i32_1 = arith.constant 0 : i32
    return %c0_i32, %c0_i32_0 : i32, i32
  }
  func.func @transform_6(%arg0: i32) -> (i32, i32) {
    %c0_i32 = arith.constant 0 : i32
    %c0_i32_0 = arith.constant 0 : i32
    return %arg0, %c0_i32 : i32, i32
  }
}

</mosaic_0001>

<bundles_post_ra>
// kernel: tpu_custom_call.1
= control target key start
LH: loop header
LB: loop body
LE: loop exit
PB: predicated region body
PF: predicated region fallthrough
CT: control target
= control target key end

     0   :  { %vm270_vm0 = vsmask.f32 3328  ;;  %vm271_vm1 = vsmask.f32 7440  ;;  %s6380_s19 = smov 4   ;;  %vm189_vm3 = vcmask 27648   ;;  %s11733_s0 = inlined_call_operand.vmem [shape: f32[684,4], index: 0, kind: input, shape index: {}]   ;;  %s11734_s1 = inlined_call_operand.vmem [shape: bf16[36,32], index: 1, kind: input, shape index: {}]   ;;  %s11735_s2 = inlined_call_operand.vmem [shape: f32[1,32], index: 2, kind: input, shape index: {}]   ;;  %s11736_s3 = inlined_call_operand.vmem [shape: bf16[2,630], index: 3, kind: input, shape index: {}]   ;;  %s11737_s4 = inlined_call_operand.vmem [shape: f32[1,32], index: 4, kind: input, shape index: {}]   ;;  %s11738_s5 = inlined_call_operand.<no memory space> [shape: f32[1,1], index: 5, kind: input, shape index: {}]   ;;  %s11739_s6 = inlined_call_operand.vmem [shape: f32[2,1], index: 6, kind: output, shape index: {}]  }
   0x1   :  { %v28_v0 = vld [vmem:[%s11733_s0 + $0x10] sm:$0xff]  ;;  %v29_v1 = vld [vmem:[%s11733_s0 + $0x18] sm:$0xff]  ;;  %v26_v4 = vld [vmem:[%s11733_s0] sm:$0xff]  ;;  %vm1299_vm4 = vcmask 60448   ;;  %vm1459_vm5 = vcmask 1042432   ;;  %vm1460_vm6 = vcmask 1046532  }
   0x2   :  { %v6429_v2 = vpack.c.bf16 %v28_v0, %v28_v0  ;;  %v6431_v3 = vpack.c.bf16 %v29_v1, %v29_v1  ;;  %v27_v5 = vld [vmem:[%s11733_s0 + $0x8] sm:$0xff]  ;;  %v30_v6 = vld [vmem:[%s11733_s0 + $0x20] sm:$0xff]  ;;  %v6442_v7 = vpack.c.bf16 %v26_v4, %v26_v4  ;;  %v33_v17 = vld [vmem:[%s11733_s0 + $0x38] sm:$0xff]  ;;  %s6381_s17 = smov 8   ;;  %vm268_vm8 = vcmask 26624   ;;  %s6383_s23 = smov 16  }
   0x3   :  { %v6444_v8 = vpack.c.bf16 %v27_v5, %v27_v5  ;;  %v6446_v9 = vpack.c.bf16 %v30_v6, %v30_v6  ;;  %v32_v20 = vld [vmem:[%s11733_s0 + $0x30] sm:$0xff]  ;;  %v6476_v28 = vpack.c.bf16 %v33_v17, %v33_v17  ;;  %vm6479_vm2 = vmor %vm270_vm0, %vm271_vm1  ;;  %v34_v36 = vld [vmem:[%s11733_s0 + $0x40] sm:$0xff]  ;;  %vm1935_vm9 = vcmask 93248   ;;  %s6384_s26 = smov 20   ;;  %s6385_s27 = smov 24  }
   0x4   :  { %12271 = vst [vmem:[#allocation4_spill] sm:$0xff] %v6429_v2  ;;  %v11740_v10 = vshll.u32 %v6429_v2, 16  ;;  %v11741_v11 = vshrl.u32 %v6429_v2, 16  ;;  %v11743_v12 = vshll.u32 %v6431_v3, 16  ;;  %v11742_v13 = vshrl.u32 %v6431_v3, 16  ;;  %v31_v41 = vld [vmem:[%s11733_s0 + $0x28] sm:$0xff]  ;;  %vm7979_vm7 = vmor %vm1459_vm5, %vm1460_vm6 }
   0x5   :  { %12272 = vst [vmem:[#allocation5_spill] sm:$0xff] %v6431_v3  ;;  %v274_v14 = vshrl.u32 %v6442_v7, 16  ;;  %v277_v15 = vshll.u32 %v6442_v7, 16  ;;  %v283_v16 = vshll.u32 %v6444_v8, 16  ;;  %v6473_v26 = vshll.u32 %v6446_v9, 16  ;;  %v36_v45 = vld [vmem:[%s11733_s0 + $0x50] sm:$0xff] }
   0x6   :  { %12273 = vst [vmem:[#allocation6_spill] sm:$0xff] %v6446_v9  ;;  %v6460_v18 = vrot.slane %v11740_v10, 5  ;;  %v299_v19 = vrot.slane %v11741_v11, 4  ;;  %v305_v21 = vrot.slane %v11743_v12, 5  ;;  %v309_v24 = vrot.slane %v11742_v13, 4  ;;  %v35_v46 = vld [vmem:[%s11733_s0 + $0x48] sm:$0xff] }
   0x7   :  { %v276_v22 = vrot.slane %v274_v14, 4  ;;  %v279_v23 = vrot.slane %v277_v15, 5  ;;  %12274 = vst [vmem:[#allocation7_spill] sm:$0xff] %v6473_v26  ;;  %v287_v27 = vshrl.u32 %v6444_v8, 16  ;;  %v285_v31 = vrot.slane %v283_v16, 5  ;;  %v37_v0 = vld [vmem:[%s11733_s0 + $0x58] sm:$0xff] }
   0x8   :  { %v300_v25 = vor.u32 %v299_v19, %v6460_v18  ;;  %12275 = vst [vmem:[#allocation8_spill] sm:$0xff] %v6476_v28  ;;  %v310_v32 = vor.u32 %v309_v24, %v305_v21  ;;  %v6483_v33 = vpack.c.bf16 %v32_v20, %v32_v20  ;;  %v6489_v37 = vshll.u32 %v6476_v28, 16  ;;  %v39_v14 = vld [vmem:[%s11733_s0 + $0x68] sm:$0xff]  ;;  %s6386_s28 = smov 28   ;;  %s6387_s29 = smov 32  }
   0x9   :  { %v280_v30 = vor.u32 %v279_v23, %v276_v22  ;;  %v289_v35 = vrot.slane %v287_v27, 4  ;;  %v6492_v38 = vshrl.u32 %v6476_v28, 16  ;;  %v315_v43 = vrot.slane %v6473_v26, 5  ;;  %194 = vst.msk [vmem:[#allocation2 + $0x10] sm:$0xf] %vm189_vm3, %v6446_v9 }
   0xa   :  { %12278 = vst [vmem:[#allocation9_spill] sm:$0xff] %v6483_v33  ;;  %v301_v34 = vrot.slane %v300_v25, 4  ;;  %v6495_v40 = vshll.u32 %v6483_v33, 16  ;;  %v6512_v48 = vpack.c.bf16 %v34_v36, %v34_v36  ;;  %v345_v49 = vrot.slane %v6489_v37, 5 }
   0xb   :  { %12279 = vst [vmem:[#allocation10_spill] sm:$0xff] %v6489_v37  ;;  %v281_v39 = vrot.slane %v280_v30, 4  ;;  %v290_v44 = vor.u32 %v289_v35, %v285_v31  ;;  %v349_v50 = vrot.slane %v6492_v38, 4  ;;  %v311_v51 = vrot.slane %v310_v32, 4 }
   0xc   :  { %12280 = vst [vmem:[#allocation11_spill] sm:$0xff] %v6492_v38  ;;  %v306_v42 = vsel %vm6479_vm2, %v301_v34, %v305_v21  ;;  %v6518_v53 = vshrl.u32 %v6483_v33, 16  ;;  %v6520_v54 = vpack.c.bf16 %v31_v41, %v31_v41  ;;  %v335_v55 = vrot.slane %v6495_v40, 5 }
   0xd   :  { %12281 = vst [vmem:[#allocation12_spill] sm:$0xff] %v6495_v40  ;;  %1066 = vrot.lane.b32.xlu1 %v306_v42, %s6380_s19  ;;  %v286_v47 = vsel %vm6479_vm2, %v281_v39, %v285_v31  ;;  %v291_v52 = vrot.slane %v290_v44, 4  ;;  %v6524_v56 = vshrl.u32 %v6446_v9, 16  ;;  %v6526_v57 = vpack.c.bf16 %v36_v45, %v36_v45  ;;  %v40_v45 = vld [vmem:[%s11733_s0 + $0x70] sm:$0xff] }
   0xe   :  { %12282 = vst [vmem:[#allocation13_spill] sm:$0xff] %v6512_v48  ;;  %1062 = vrot.lane.b32.xlu0 %v286_v47, %s6380_s19  ;;  %v6528_v58 = vpack.c.bf16 %v35_v46, %v35_v46  ;;  %v339_v59 = vrot.slane %v6518_v53, 4  ;;  %v6532_v60 = vshll.u32 %v6520_v54, 16  ;;  %v350_v61 = vor.u32 %v349_v50, %v345_v49 }
   0xf   :  { %12283 = vst [vmem:[#allocation14_spill] sm:$0xff] %v6518_v53  ;;  %v6535_v62 = vshll.u32 %v6512_v48, 16  ;;  %v319_v63 = vrot.slane %v6524_v56, 4  ;;  %v316_v1 = vsel %vm6479_vm2, %v311_v51, %v315_v43  ;;  %v296_v4 = vsel %vm6479_vm2, %v291_v52, %v6460_v18  ;;  %v38_v18 = vld [vmem:[%s11733_s0 + $0x60] sm:$0xff] }
  0x10   :  { %12284 = vst [vmem:[#allocation15_spill] sm:$0xff] %v6520_v54  ;;  %v6547_v5 = vshll.u32 %v6526_v57, 16  ;;  %v6550_v6 = vshrl.u32 %v6526_v57, 16  ;;  %v340_v15 = vor.u32 %v339_v59, %v335_v55  ;;  %v325_v17 = vrot.slane %v6532_v60, 5 }
  0x11   :  { %12285 = vst [vmem:[#allocation16_spill] sm:$0xff] %v6524_v56  ;;  %v320_v16 = vor.u32 %v319_v63, %v315_v43  ;;  %v6557_v19 = vshll.u32 %v6528_v58, 16  ;;  %v6562_v20 = vpack.c.bf16 %v37_v0, %v37_v0  ;;  %v6565_v21 = vshrl.u32 %v6528_v58, 16 }
  0x12   :  { %12286 = vst [vmem:[#allocation17_spill] sm:$0xff] %v6526_v57  ;;  %v6568_v22 = vshrl.u32 %v6520_v54, 16  ;;  %v351_v23 = vrot.slane %v350_v61, 4  ;;  %v355_v24 = vrot.slane %v6535_v62, 5  ;;  %v6572_v27 = vpack.c.bf16 %v39_v14, %v39_v14 }
  0x13   :  { %12287 = vst [vmem:[#allocation18_spill] sm:$0xff] %v6528_v58  ;;  %v321_v25 = vrot.slane %v320_v16, 4  ;;  %v375_v30 = vrot.slane %v6547_v5, 5  ;;  %v379_v31 = vrot.slane %v6550_v6, 4  ;;  %v6578_v34 = vpack.c.bf16 %v38_v18, %v38_v18 }
  0x14   :  { %12288 = vst [vmem:[#allocation19_spill] sm:$0xff] %v6532_v60  ;;  %v329_v32 = vrot.slane %v6568_v22, 4  ;;  %v341_v35 = vrot.slane %v340_v15, 4  ;;  %v365_v39 = vrot.slane %v6557_v19, 5  ;;  %v369_v41 = vrot.slane %v6565_v21, 4  ;;  %v41_v15 = vld [vmem:[%s11733_s0 + $0x78] sm:$0xff] }
  0x15   :  { %12289 = vst [vmem:[#allocation20_spill] sm:$0xff] %v6535_v62  ;;  %1068 = vrot.lane.b32.xlu1 %v316_v1, %s6380_s19  ;;  %v326_v36 = vsel %vm6479_vm2, %v321_v25, %v325_v17  ;;  %v6586_v42 = vshll.u32 %v6562_v20, 16  ;;  %v356_v44 = vsel %vm6479_vm2, %v351_v23, %v355_v24  ;;  %v6594_v46 = vshll.u32 %v6572_v27, 16  ;;  %v42_v1 = vld [vmem:[%s11733_s0 + $0x80] sm:$0xff] }
  0x16   :  { %12290 = vst [vmem:[#allocation21_spill] sm:$0xff] %v6547_v5  ;;  %1064 = vrot.lane.b32.xlu0 %v296_v4, %s6380_s19  ;;  %1070 = vrot.lane.b32.xlu2 %v326_v36, %s6380_s19  ;;  %v330_v43 = vor.u32 %v329_v32, %v325_v17  ;;  %v6597_v47 = vshrl.u32 %v6572_v27, 16  ;;  %v380_v50 = vor.u32 %v379_v31, %v375_v30  ;;  %v6600_v52 = vshll.u32 %v6578_v34, 16 }
  0x17   :  { %12291 = vst [vmem:[#allocation22_spill] sm:$0xff] %v6550_v6  ;;  %v6603_v59 = vshrl.u32 %v6578_v34, 16  ;;  %v346_v61 = vsel %vm6479_vm2, %v341_v35, %v345_v49  ;;  %v370_v63 = vor.u32 %v369_v41, %v365_v39  ;;  %v6608_v0 = vshrl.u32 %v6512_v48, 16 }
  0x18   :  { %12292 = vst [vmem:[#allocation23_spill] sm:$0xff] %v6557_v19  ;;  %v331_v51 = vrot.slane %v330_v43, 4  ;;  %v385_v4 = vrot.slane %v6586_v42, 5  ;;  %v6614_v14 = vpack.c.bf16 %v40_v45, %v40_v45  ;;  %v405_v16 = vrot.slane %v6594_v46, 5 }
  0x19   :  { %12293 = vst [vmem:[#allocation24_spill] sm:$0xff] %v6562_v20  ;;  %v409_v17 = vrot.slane %v6597_v47, 4  ;;  %v359_v18 = vrot.slane %v6608_v0, 4  ;;  %v381_v23 = vrot.slane %v380_v50, 4  ;;  %v395_v25 = vrot.slane %v6600_v52, 5 }
  0x1a   :  { %12294 = vst [vmem:[#allocation25_spill] sm:$0xff] %v6565_v21  ;;  %v336_v49 = vsel %vm6479_vm2, %v331_v51, %v335_v55  ;;  %v399_v31 = vrot.slane %v6603_v59, 4  ;;  %v6628_v32 = vpack.c.bf16 %v42_v1, %v42_v1  ;;  %v371_v35 = vrot.slane %v370_v63, 4 }
  0x1b   :  { %12295 = vst [vmem:[#allocation26_spill] sm:$0xff] %v6568_v22  ;;  %v360_v36 = vor.u32 %v359_v18, %v355_v24  ;;  %v6630_v41 = vpack.c.bf16 %v41_v15, %v41_v15  ;;  %v6634_v55 = vshll.u32 %v6614_v14, 16  ;;  %v410_v43 = vor.u32 %v409_v17, %v405_v16  ;;  %v43_v24 = vld [vmem:[%s11733_s0 + $0x88] sm:$0xff]  ;;  %v45_v18 = vld [vmem:[%s11733_s0 + $0x98] sm:$0xff] }
  0x1c   :  { %12296 = vst [vmem:[#allocation27_spill] sm:$0xff] %v6572_v27  ;;  %v6637_v45 = vshrl.u32 %v6562_v20, 16  ;;  %v386_v50 = vsel %vm6479_vm2, %v381_v23, %v385_v4  ;;  %v400_v51 = vor.u32 %v399_v31, %v395_v25  ;;  %v6648_v63 = vshrl.u32 %v6628_v32, 16  ;;  %v44_v31 = vld [vmem:[%s11733_s0 + $0x90] sm:$0xff] }
  0x1d   :  { %12297 = vst [vmem:[#allocation28_spill] sm:$0xff] %v6578_v34  ;;  %1076 = vrot.lane.b32.xlu1 %v356_v44, %s6380_s19  ;;  %v361_v44 = vrot.slane %v360_v36, 4  ;;  %v376_v1 = vsel %vm6479_vm2, %v371_v35, %v375_v30  ;;  %v6653_v15 = vshll.u32 %v6630_v41, 16  ;;  %v415_v23 = vrot.slane %v6634_v55, 5 }
  0x1e   :  { %12298 = vst [vmem:[#allocation29_spill] sm:$0xff] %v6586_v42  ;;  %1074 = vrot.lane.b32.xlu0 %v346_v61, %s6380_s19  ;;  %1072 = vrot.lane.b32.xlu2 %v336_v49, %s6380_s19  ;;  %v6645_v61 = vshll.u32 %v6628_v32, 16  ;;  %v6656_v49 = vshrl.u32 %v6630_v41, 16  ;;  %v389_v17 = vrot.slane %v6637_v45, 4  ;;  %v411_v30 = vrot.slane %v410_v43, 4 }
  0x1f   :  { %12299 = vst [vmem:[#allocation30_spill] sm:$0xff] %v6594_v46  ;;  %v366_v35 = vsel %vm6479_vm2, %v361_v44, %v365_v39  ;;  %v6669_v36 = vpack.c.bf16 %v43_v24, %v43_v24  ;;  %v401_v11 = vrot.slane %v400_v51, 4  ;;  %v439_v12 = vrot.slane %v6648_v63, 4  ;;  %v46_v51 = vld [vmem:[%s11733_s0 + $0xa0] sm:$0xff] }
  0x20   :  { %12300 = vst [vmem:[#allocation31_spill] sm:$0xff] %v6597_v47  ;;  %v390_v10 = vor.u32 %v389_v17, %v385_v4  ;;  %v435_v13 = vrot.slane %v6645_v61, 5  ;;  %v425_v46 = vrot.slane %v6653_v15, 5  ;;  %v6678_v43 = vpack.c.bf16 %v44_v31, %v44_v31 }
  0x21   :  { %12301 = vst [vmem:[#allocation32_spill] sm:$0xff] %v6600_v52  ;;  %v6681_v39 = vshrl.u32 %v6614_v14, 16  ;;  %v6685_v4 = vshll.u32 %v6669_v36, 16  ;;  %v1479_v29 = vrot.slane %v6483_v33, 5  ;;  %vm1378_vm10 = vcmask 59424  }
  0x22   :  { %12302 = vst [vmem:[#allocation33_spill] sm:$0xff] %v6603_v59  ;;  %v391_v44 = vrot.slane %v390_v10, 4  ;;  %v440_v17 = vor.u32 %v439_v12, %v435_v13  ;;  %v48_v12 = vld [vmem:[%s11733_s0 + $0xb0] sm:$0xff]  ;;  %vm2263_vm11 = vcmask 126048   ;;  %vm2014_vm12 = vcmask 92224  }
  0x23   :  { %12303 = vst [vmem:[#allocation34_spill] sm:$0xff] %v6608_v0  ;;  %v419_v24 = vrot.slane %v6681_v39, 4  ;;  %v6725_v42 = vpack.c.bf16 %v48_v12, %v48_v12  ;;  %vm2345_vm13 = vsmask.f32 2304  ;;  %vm2346_vm14 = vsmask.f32 6416 }
  0x24   :  { %12304 = vst [vmem:[#allocation35_spill] sm:$0xff] %v6614_v14  ;;  %vm8870_vm15 = vmor %vm2345_vm13, %vm2346_vm14  ;;  %vm2342_vm0 = vcmask 125024   ;;  %vm2994_vm1 = vcmask 158848   ;;  %vm3554_vm6 = vcmask 191648   ;;  %vm4694_vm13 = vcmask 1040384  }
  0x25   :  { %12305 = vst [vmem:[#allocation36_spill] sm:$0xff] %v6628_v32  ;;  %1082 = vrot.lane.b32.xlu1 %v386_v50, %s6380_s19  ;;  %v429_v50 = vrot.slane %v6656_v49, 4  ;;  %vm4695_vm14 = vcmask 1044484  }
  0x26   :  { %12306 = vst [vmem:[#allocation37_spill] sm:$0xff] %v6630_v41  ;;  %1080 = vrot.lane.b32.xlu0 %v376_v1, %s6380_s19  ;;  %1078 = vrot.lane.b32.xlu2 %v366_v35, %s6380_s19  ;;  %v416_v1 = vsel %vm6479_vm2, %v411_v30, %v415_v23  ;;  %v406_v35 = vsel %vm6479_vm2, %v401_v11, %v405_v16  ;;  %v445_v11 = vrot.slane %v6685_v4, 5 }
  0x27   :  { %12307 = vst [vmem:[#allocation38_spill] sm:$0xff] %v6634_v55  ;;  %v6674_v55 = vpack.c.bf16 %v45_v18, %v45_v18  ;;  %v430_v10 = vor.u32 %v429_v50, %v425_v46  ;;  %v6710_v30 = vpack.c.bf16 %v46_v51, %v46_v51  ;;  %v396_v16 = vsel %vm6479_vm2, %v391_v44, %v395_v25 }
  0x28   :  { %12308 = vst [vmem:[#allocation39_spill] sm:$0xff] %v6637_v45  ;;  %v420_v50 = vor.u32 %v419_v24, %v415_v23 }
  0x29   :  { %12309 = vst [vmem:[#allocation40_spill] sm:$0xff] %v6645_v61  ;;  %v6694_v18 = vshll.u32 %v6674_v55, 16  ;;  %v6697_v31 = vshrl.u32 %v6674_v55, 16  ;;  %v6702_v61 = vshll.u32 %v6678_v43, 16  ;;  %v431_v45 = vrot.slane %v430_v10, 4 }
  0x2a   :  { %12310 = vst [vmem:[#allocation41_spill] sm:$0xff] %v6648_v63  ;;  %v6705_v63 = vshrl.u32 %v6678_v43, 16  ;;  %v6733_v25 = vshll.u32 %v6710_v30, 16  ;;  %v421_v23 = vrot.slane %v420_v50, 4  ;;  %v6742_v10 = vshll.u32 %v6725_v42, 16 }
  0x2b   :  { %12311 = vst [vmem:[#allocation42_spill] sm:$0xff] %v6653_v15  ;;  %v6720_v15 = vshrl.u32 %v6669_v36, 16  ;;  %v465_v51 = vrot.slane %v6694_v18, 5  ;;  %v469_v47 = vrot.slane %v6697_v31, 4  ;;  %v436_v12 = vsel %vm6479_vm2, %v431_v45, %v435_v13 }
  0x2c   :  { %12312 = vst [vmem:[#allocation43_spill] sm:$0xff] %v6656_v49  ;;  %v441_v49 = vrot.slane %v440_v17, 4  ;;  %v426_v13 = vsel %vm6479_vm2, %v421_v23, %v425_v46 }
  0x2d   :  { %12313 = vst [vmem:[#allocation44_spill] sm:$0xff] %v6669_v36  ;;  %1088 = vrot.lane.b32.xlu1 %v416_v1, %s6380_s19  ;;  %v455_v1 = vrot.slane %v6702_v61, 5  ;;  %v449_v44 = vrot.slane %v6720_v15, 4  ;;  %v470_v17 = vor.u32 %v469_v47, %v465_v51  ;;  %v51_v47 = vld [vmem:[%s11733_s0 + $0xc8] sm:$0xff] }
  0x2e   :  { %12314 = vst [vmem:[#allocation45_spill] sm:$0xff] %v6674_v55  ;;  %1086 = vrot.lane.b32.xlu0 %v406_v35, %s6380_s19  ;;  %1084 = vrot.lane.b32.xlu2 %v396_v16, %s6380_s19  ;;  %v446_v24 = vsel %vm6479_vm2, %v441_v49, %v445_v11  ;;  %v49_v35 = vld [vmem:[%s11733_s0 + $0xb8] sm:$0xff]  ;;  %v6773_v59 = vpack.c.bf16 %v51_v47, %v51_v47 }
  0x2f   :  { %12315 = vst [vmem:[#allocation46_spill] sm:$0xff] %v6678_v43  ;;  %v6765_v45 = vpack.c.bf16 %v49_v35, %v49_v35 }
  0x30   :  { %12316 = vst [vmem:[#allocation47_spill] sm:$0xff] %v6681_v39  ;;  %v47_v39 = vld [vmem:[%s11733_s0 + $0xa8] sm:$0xff]  ;;  %v6790_v47 = vshll.u32 %v6773_v59, 16 }
  0x31   :  { %12317 = vst [vmem:[#allocation48_spill] sm:$0xff] %v6685_v4  ;;  %v459_v4 = vrot.slane %v6705_v63, 4  ;;  %v6729_v52 = vpack.c.bf16 %v47_v39, %v47_v39  ;;  %v6745_v39 = vshrl.u32 %v6725_v42, 16 }
  0x32   :  { %12318 = vst [vmem:[#allocation49_spill] sm:$0xff] %v6694_v18  ;;  %v475_v18 = vrot.slane %v6733_v25, 5 }
  0x33   :  { %12319 = vst [vmem:[#allocation50_spill] sm:$0xff] %v6697_v31  ;;  %v460_v16 = vor.u32 %v459_v4, %v455_v1  ;;  %v6750_v50 = vshll.u32 %v6729_v52, 16  ;;  %v6753_v49 = vshrl.u32 %v6729_v52, 16  ;;  %v50_v31 = vld [vmem:[%s11733_s0 + $0xc0] sm:$0xff]  ;;  %v450_v4 = vor.u32 %v449_v44, %v445_v11 }
  0x34   :  { %12320 = vst [vmem:[#allocation51_spill] sm:$0xff] %v6702_v61  ;;  %v471_v61 = vrot.slane %v470_v17, 4  ;;  %v6777_v23 = vpack.c.bf16 %v50_v31, %v50_v31  ;;  %v6781_v11 = vshll.u32 %v6765_v45, 16  ;;  %v52_v17 = vld [vmem:[%s11733_s0 + $0xd0] sm:$0xff]  ;;  %v6793_v31 = vshrl.u32 %v6773_v59, 16 }
  0x35   :  { %12321 = vst [vmem:[#allocation52_spill] sm:$0xff] %v6705_v63  ;;  %1094 = vrot.lane.b32.xlu1 %v446_v24, %s6380_s19  ;;  %v499_v63 = vrot.slane %v6745_v39, 4  ;;  %v461_v5 = vrot.slane %v460_v16, 4  ;;  %v485_v24 = vrot.slane %v6750_v50, 5  ;;  %v489_v46 = vrot.slane %v6753_v49, 4 }
  0x36   :  { %12322 = vst [vmem:[#allocation53_spill] sm:$0xff] %v6710_v30  ;;  %1092 = vrot.lane.b32.xlu0 %v436_v12, %s6380_s19  ;;  %1090 = vrot.lane.b32.xlu2 %v426_v13, %s6380_s19  ;;  %v451_v44 = vrot.slane %v450_v4, 4  ;;  %v476_v12 = vsel %vm6479_vm2, %v471_v61, %v475_v18  ;;  %v54_v61 = vld [vmem:[%s11733_s0 + $0xe0] sm:$0xff]  ;;  %v529_v6 = vrot.slane %v6793_v31, 4 }
  0x37   :  { %12323 = vst [vmem:[#allocation54_spill] sm:$0xff] %v6720_v15  ;;  %v6768_v15 = vshrl.u32 %v6710_v30, 16  ;;  %v466_v13 = vsel %vm6479_vm2, %v461_v5, %v465_v51  ;;  %v490_v4 = vor.u32 %v489_v46, %v485_v24  ;;  %v505_v5 = vrot.slane %v6781_v11, 5 }
  0x38   :  { %12324 = vst [vmem:[#allocation55_spill] sm:$0xff] %v6725_v42  ;;  %v456_v51 = vsel %vm6479_vm2, %v451_v44, %v455_v1  ;;  %v6821_v62 = vpack.c.bf16 %v54_v61, %v54_v61 }
  0x39   :  { %12325 = vst [vmem:[#allocation56_spill] sm:$0xff] %v6729_v52  ;;  %v479_v35 = vrot.slane %v6768_v15, 4  ;;  %v491_v0 = vrot.slane %v490_v4, 4 }
  0x3a   :  { %12326 = vst [vmem:[#allocation57_spill] sm:$0xff] %v6733_v25  ;;  %v495_v25 = vrot.slane %v6742_v10, 5  ;;  %v6838_v4 = vshll.u32 %v6821_v62, 16 }
  0x3b   :  { %12327 = vst [vmem:[#allocation58_spill] sm:$0xff] %v6742_v10  ;;  %v6798_v10 = vshll.u32 %v6777_v23, 16  ;;  %v480_v46 = vor.u32 %v479_v35, %v475_v18 }
  0x3c   :  { %12328 = vst [vmem:[#allocation59_spill] sm:$0xff] %v6745_v39  ;;  %v500_v16 = vor.u32 %v499_v63, %v495_v25  ;;  %v6801_v39 = vshrl.u32 %v6777_v23, 16  ;;  %v6806_v63 = vpack.c.bf16 %v52_v17, %v52_v17  ;;  %v525_v17 = vrot.slane %v6790_v47, 5 }
  0x3d   :  { %12329 = vst [vmem:[#allocation60_spill] sm:$0xff] %v6750_v50  ;;  %1100 = vrot.lane.b32.xlu1 %v476_v12, %s6380_s19  ;;  %v6816_v50 = vshrl.u32 %v6765_v45, 16  ;;  %v515_v12 = vrot.slane %v6798_v10, 5  ;;  %v481_v1 = vrot.slane %v480_v46, 4  ;;  %v496_v61 = vsel %vm6479_vm2, %v491_v0, %v495_v25 }
  0x3e   :  { %12330 = vst [vmem:[#allocation61_spill] sm:$0xff] %v6753_v49  ;;  %1098 = vrot.lane.b32.xlu0 %v466_v13, %s6380_s19  ;;  %v501_v49 = vrot.slane %v500_v16, 4  ;;  %1096 = vrot.lane.b32.xlu2 %v456_v51, %s6380_s19  ;;  %v6829_v18 = vshll.u32 %v6806_v63, 16  ;;  %v530_v16 = vor.u32 %v529_v6, %v525_v17  ;;  %v55_v13 = vld [vmem:[%s11733_s0 + $0xe8] sm:$0xff]  ;;  %v57_v6 = vld [vmem:[%s11733_s0 + $0xf8] sm:$0xff] }
  0x3f   :  { %12331 = vst [vmem:[#allocation62_spill] sm:$0xff] %v6765_v45  ;;  %v509_v44 = vrot.slane %v6816_v50, 4  ;;  %v486_v0 = vsel %vm6479_vm2, %v481_v1, %v485_v24  ;;  %v6861_v25 = vpack.c.bf16 %v55_v13, %v55_v13  ;;  %v6869_v21 = vpack.c.bf16 %v57_v6, %v57_v6  ;;  %v60_v13 = vld [vmem:[%s11733_s0 + $0x110] sm:$0xff] }
  0x40   :  { %12332 = vst [vmem:[#allocation63_spill] sm:$0xff] %v6768_v15  ;;  %v53_v15 = vld [vmem:[%s11733_s0 + $0xd8] sm:$0xff]  ;;  %v506_v35 = vsel %vm6479_vm2, %v501_v49, %v505_v5 }
  0x41   :  { %12333 = vst [vmem:[#allocation64_spill] sm:$0xff] %v6773_v59  ;;  %v6825_v19 = vpack.c.bf16 %v53_v15, %v53_v15  ;;  %v6841_v15 = vshrl.u32 %v6821_v62, 16  ;;  %v6886_v6 = vshll.u32 %v6869_v21, 16 }
  0x42   :  { %12334 = vst [vmem:[#allocation65_spill] sm:$0xff] %v6777_v23 }
  0x43   :  { %12335 = vst [vmem:[#allocation66_spill] sm:$0xff] %v6781_v11  ;;  %v519_v11 = vrot.slane %v6801_v39, 4  ;;  %v6846_v46 = vshll.u32 %v6825_v19, 16  ;;  %v6849_v49 = vshrl.u32 %v6825_v19, 16  ;;  %v585_v38 = vrot.slane %v6886_v6, 5 }
  0x44   :  { %12336 = vst [vmem:[#allocation67_spill] sm:$0xff] %v6790_v47  ;;  %v535_v47 = vrot.slane %v6829_v18, 5 }
  0x45   :  { %12337 = vst [vmem:[#allocation68_spill] sm:$0xff] %v6793_v31  ;;  %v520_v51 = vor.u32 %v519_v11, %v515_v12  ;;  %v56_v31 = vld [vmem:[%s11733_s0 + $0xf0] sm:$0xff]  ;;  %1106 = vrot.lane.b32.xlu1 %v506_v35, %s6380_s19  ;;  %v510_v11 = vor.u32 %v509_v44, %v505_v5  ;;  %v545_v35 = vrot.slane %v6846_v46, 5  ;;  %v549_v24 = vrot.slane %v6849_v49, 4 }
  0x46   :  { %12338 = vst [vmem:[#allocation69_spill] sm:$0xff] %v6798_v10  ;;  %1104 = vrot.lane.b32.xlu0 %v496_v61, %s6380_s19  ;;  %v531_v10 = vrot.slane %v530_v16, 4  ;;  %v6873_v1 = vpack.c.bf16 %v56_v31, %v56_v31  ;;  %1102 = vrot.lane.b32.xlu2 %v486_v0, %s6380_s19  ;;  %v6877_v5 = vshll.u32 %v6861_v25, 16  ;;  %v6889_v31 = vshrl.u32 %v6869_v21, 16 }
  0x47   :  { %12339 = vst [vmem:[#allocation70_spill] sm:$0xff] %v6801_v39  ;;  %v559_v39 = vrot.slane %v6841_v15, 4  ;;  %v521_v37 = vrot.slane %v520_v51, 4  ;;  %v511_v44 = vrot.slane %v510_v11, 4  ;;  %v550_v11 = vor.u32 %v549_v24, %v545_v35 }
  0x48   :  { %12340 = vst [vmem:[#allocation71_spill] sm:$0xff] %v6806_v63  ;;  %v536_v61 = vsel %vm6479_vm2, %v531_v10, %v535_v47  ;;  %v6900_v10 = vshrl.u32 %v6873_v1, 16  ;;  %v589_v60 = vrot.slane %v6889_v31, 4 }
  0x49   :  { %12341 = vst [vmem:[#allocation72_spill] sm:$0xff] %v6816_v50  ;;  %v6864_v50 = vshrl.u32 %v6806_v63, 16  ;;  %v526_v0 = vsel %vm6479_vm2, %v521_v37, %v525_v17  ;;  %v565_v37 = vrot.slane %v6877_v5, 5  ;;  %v516_v17 = vsel %vm6479_vm2, %v511_v44, %v515_v12  ;;  %v61_v44 = vld [vmem:[%s11733_s0 + $0x118] sm:$0xff] }
  0x4a   :  { %12342 = vst [vmem:[#allocation73_spill] sm:$0xff] %v6821_v62  ;;  %v551_v22 = vrot.slane %v550_v11, 4 }
  0x4b   :  { %12343 = vst [vmem:[#allocation74_spill] sm:$0xff] %v6825_v19  ;;  %v539_v16 = vrot.slane %v6864_v50, 4 }
  0x4c   :  { %12344 = vst [vmem:[#allocation75_spill] sm:$0xff] %v6829_v18  ;;  %v555_v18 = vrot.slane %v6838_v4, 5 }
  0x4d   :  { %12345 = vst [vmem:[#allocation76_spill] sm:$0xff] %v6838_v4  ;;  %v58_v4 = vld [vmem:[%s11733_s0 + $0x100] sm:$0xff]  ;;  %1112 = vrot.lane.b32.xlu1 %v536_v61, %s6380_s19  ;;  %v540_v24 = vor.u32 %v539_v16, %v535_v47 }
  0x4e   :  { %12346 = vst [vmem:[#allocation77_spill] sm:$0xff] %v6841_v15  ;;  %v560_v51 = vor.u32 %v559_v39, %v555_v18  ;;  %v6897_v15 = vshll.u32 %v6873_v1, 16  ;;  %v6902_v39 = vpack.c.bf16 %v60_v13, %v60_v13  ;;  %1110 = vrot.lane.b32.xlu0 %v526_v0, %s6380_s19  ;;  %v6915_v13 = vpack.c.bf16 %v58_v4, %v58_v4 }
  0x4f   :  { %12347 = vst [vmem:[#allocation78_spill] sm:$0xff] %v6846_v46  ;;  %v6912_v46 = vshrl.u32 %v6861_v25, 16  ;;  %1108 = vrot.lane.b32.xlu2 %v516_v17, %s6380_s19  ;;  %v541_v4 = vrot.slane %v540_v24, 4  ;;  %v556_v11 = vsel %vm6479_vm2, %v551_v22, %v555_v18  ;;  %v62_v22 = vld [vmem:[%s11733_s0 + $0x120] sm:$0xff] }
  0x50   :  { %12348 = vst [vmem:[#allocation79_spill] sm:$0xff] %v6849_v49  ;;  %v561_v49 = vrot.slane %v560_v51, 4  ;;  %v575_v61 = vrot.slane %v6897_v15, 5  ;;  %v6925_v47 = vshll.u32 %v6902_v39, 16  ;;  %v6928_v12 = vshrl.u32 %v6902_v39, 16 }
  0x51   :  { %12349 = vst [vmem:[#allocation80_spill] sm:$0xff] %v6861_v25  ;;  %v569_v16 = vrot.slane %v6912_v46, 4  ;;  %v6937_v0 = vshll.u32 %v6915_v13, 16  ;;  %v546_v18 = vsel %vm6479_vm2, %v541_v4, %v545_v35 }
  0x52   :  { %12350 = vst [vmem:[#allocation81_spill] sm:$0xff] %v6864_v50  ;;  %v59_v50 = vld [vmem:[%s11733_s0 + $0x108] sm:$0xff]  ;;  %v566_v51 = vsel %vm6479_vm2, %v561_v49, %v565_v37  ;;  %v619_v49 = vrot.slane %v6928_v12, 4 }
  0x53   :  { %12351 = vst [vmem:[#allocation82_spill] sm:$0xff] %v6869_v21  ;;  %v6921_v40 = vpack.c.bf16 %v59_v50, %v59_v50  ;;  %v590_v50 = vor.u32 %v589_v60, %v585_v38  ;;  %v615_v60 = vrot.slane %v6925_v47, 5 }
  0x54   :  { %12352 = vst [vmem:[#allocation83_spill] sm:$0xff] %v6873_v1 }
  0x55   :  { %12353 = vst [vmem:[#allocation84_spill] sm:$0xff] %v6877_v5  ;;  %v579_v5 = vrot.slane %v6900_v10, 4  ;;  %v6945_v24 = vshrl.u32 %v6921_v40, 16  ;;  %1118 = vrot.lane.b32.xlu1 %v566_v51, %s6380_s19  ;;  %v6969_v51 = vpack.c.bf16 %v62_v22, %v62_v22  ;;  %v620_v35 = vor.u32 %v619_v49, %v615_v60 }
  0x56   :  { %12354 = vst [vmem:[#allocation85_spill] sm:$0xff] %v6886_v6  ;;  %v6942_v6 = vshll.u32 %v6921_v40, 16  ;;  %1116 = vrot.lane.b32.xlu0 %v556_v11, %s6380_s19 }
  0x57   :  { %12355 = vst [vmem:[#allocation86_spill] sm:$0xff] %v6889_v31  ;;  %v580_v17 = vor.u32 %v579_v5, %v575_v61  ;;  %v63_v31 = vld [vmem:[%s11733_s0 + $0x128] sm:$0xff]  ;;  %v570_v5 = vor.u32 %v569_v16, %v565_v37  ;;  %v609_v26 = vrot.slane %v6945_v24, 4  ;;  %1114 = vrot.lane.b32.xlu2 %v546_v18, %s6380_s19  ;;  %v6990_v18 = vshll.u32 %v6969_v51, 16 }
  0x58   :  { %12356 = vst [vmem:[#allocation87_spill] sm:$0xff] %v6897_v15  ;;  %v6961_v15 = vshrl.u32 %v6915_v13, 16  ;;  %v605_v53 = vrot.slane %v6942_v6, 5 }
  0x59   :  { %12357 = vst [vmem:[#allocation88_spill] sm:$0xff] %v6900_v10  ;;  %v6965_v10 = vpack.c.bf16 %v63_v31, %v63_v31  ;;  %v571_v4 = vrot.slane %v570_v5, 4  ;;  %v6993_v5 = vshrl.u32 %v6969_v51, 16 }
  0x5a   :  { %12358 = vst [vmem:[#allocation89_spill] sm:$0xff] %v6902_v39  ;;  %v599_v16 = vrot.slane %v6961_v15, 4  ;;  %v610_v22 = vor.u32 %v609_v26, %v605_v53 }
  0x5b   :  { %12359 = vst [vmem:[#allocation90_spill] sm:$0xff] %v6912_v46  ;;  %v6950_v46 = vpack.c.bf16 %v61_v44, %v61_v44  ;;  %v591_v44 = vrot.slane %v590_v50, 4  ;;  %v64_v50 = vld [vmem:[%s11733_s0 + $0x130] sm:$0xff]  ;;  %v6982_v11 = vshll.u32 %v6965_v10, 16  ;;  %v576_v26 = vsel %vm6479_vm2, %v571_v4, %v575_v61 }
  0x5c   :  { %12360 = vst [vmem:[#allocation91_spill] sm:$0xff] %v6915_v13  ;;  %v639_v61 = vrot.slane %v6993_v5, 4 }
  0x5d   :  { %12361 = vst [vmem:[#allocation92_spill] sm:$0xff] %v6921_v40  ;;  %v6973_v37 = vshll.u32 %v6950_v46, 16 }
  0x5e   :  { %12362 = vst [vmem:[#allocation93_spill] sm:$0xff] %v6925_v47  ;;  %v595_v47 = vrot.slane %v6937_v0, 5 }
  0x5f   :  { %12363 = vst [vmem:[#allocation94_spill] sm:$0xff] %v6928_v12  ;;  %v581_v12 = vrot.slane %v580_v17, 4  ;;  %v6985_v17 = vshrl.u32 %v6965_v10, 16  ;;  %1120 = vrot.lane.b32.xlu2 %v576_v26, %s6380_s19  ;;  %v69_v26 = vld [vmem:[%s11733_s0 + $0x158] sm:$0xff] }
  0x60   :  { %12364 = vst [vmem:[#allocation95_spill] sm:$0xff] %v6937_v0  ;;  %v596_v31 = vsel %vm6479_vm2, %v591_v44, %v595_v47  ;;  %v66_v44 = vld [vmem:[%s11733_s0 + $0x140] sm:$0xff]  ;;  %v621_v0 = vrot.slane %v620_v35, 4  ;;  %v645_v35 = vrot.slane %v6982_v11, 5 }
  0x61   :  { %12365 = vst [vmem:[#allocation96_spill] sm:$0xff] %v6942_v6  ;;  %v586_v49 = vsel %vm6479_vm2, %v581_v12, %v585_v38  ;;  %v65_v6 = vld [vmem:[%s11733_s0 + $0x138] sm:$0xff]  ;;  %1124 = vrot.lane.b32.xlu1 %v596_v31, %s6380_s19  ;;  %v7005_v38 = vpack.c.bf16 %v64_v50, %v64_v50  ;;  %v600_v12 = vor.u32 %v599_v16, %v595_v47  ;;  %v11876_v31 = vrot.slane %v6990_v18, 5 }
  0x62   :  { %12366 = vst [vmem:[#allocation97_spill] sm:$0xff] %v6945_v24  ;;  %v7008_v24 = vshrl.u32 %v6950_v46, 16  ;;  %1122 = vrot.lane.b32.xlu0 %v586_v49, %s6380_s19  ;;  %v7013_v56 = vpack.c.bf16 %v66_v44, %v66_v44  ;;  %v7017_v4 = vpack.c.bf16 %v65_v6, %v65_v6 }
  0x63   :  { %12367 = vst [vmem:[#allocation98_spill] sm:$0xff] %v6950_v46  ;;  %v7025_v47 = vshll.u32 %v7005_v38, 16  ;;  %v601_v16 = vrot.slane %v600_v12, 4 }
  0x64   :  { %12368 = vst [vmem:[#allocation99_spill] sm:$0xff] %v6961_v15  ;;  %v625_v15 = vrot.slane %v6973_v37, 5  ;;  %v629_v50 = vrot.slane %v7008_v24, 4  ;;  %v7036_v44 = vshrl.u32 %v7013_v56, 16 }
  0x65   :  { %12369 = vst [vmem:[#allocation100_spill] sm:$0xff] %v6965_v10  ;;  %v611_v10 = vrot.slane %v610_v22, 4  ;;  %v7033_v22 = vshll.u32 %v7013_v56, 16 }
  0x66   :  { %12370 = vst [vmem:[#allocation101_spill] sm:$0xff] %v6969_v51  ;;  %v626_v6 = vsel %vm6479_vm2, %v621_v0, %v625_v15  ;;  %v640_v0 = vor.u32 %v639_v61, %v11876_v31  ;;  %v606_v61 = vsel %vm6479_vm2, %v601_v16, %v605_v53  ;;  %v630_v31 = vor.u32 %v629_v50, %v625_v15 }
  0x67   :  { %12371 = vst [vmem:[#allocation102_spill] sm:$0xff] %v6973_v37  ;;  %v649_v37 = vrot.slane %v6985_v17, 4  ;;  %v616_v12 = vsel %vm6479_vm2, %v611_v10, %v615_v60  ;;  %v68_v10 = vld [vmem:[%s11733_s0 + $0x150] sm:$0xff]  ;;  %v655_v60 = vrot.slane %v7025_v47, 5  ;;  %1126 = vrot.lane.b32.xlu2 %v606_v61, %s6380_s19 }
  0x68   :  { %12372 = vst [vmem:[#allocation103_spill] sm:$0xff] %v6982_v11  ;;  %v7051_v11 = vshll.u32 %v7017_v4, 16  ;;  %v7080_v16 = vpack.c.bf16 %v68_v10, %v68_v10  ;;  %v631_v50 = vrot.slane %v630_v31, 4  ;;  %v70_v31 = vld [vmem:[%s11733_s0 + $0x160] sm:$0xff]  ;;  %v7106_v10 = vshrl.u32 %v7005_v38, 16 }
  0x69   :  { %12373 = vst [vmem:[#allocation104_spill] sm:$0xff] %v6985_v17  ;;  %v650_v49 = vor.u32 %v649_v37, %v645_v35  ;;  %v67_v37 = vld [vmem:[%s11733_s0 + $0x148] sm:$0xff]  ;;  %v7054_v17 = vshrl.u32 %v7017_v4, 16  ;;  %1130 = vrot.lane.b32.xlu1 %v626_v6, %s6380_s19  ;;  %v679_v6 = vrot.slane %v7036_v44, 4 }
  0x6a   :  { %12374 = vst [vmem:[#allocation105_spill] sm:$0xff] %v6990_v18  ;;  %1128 = vrot.lane.b32.xlu0 %v616_v12, %s6380_s19  ;;  %v7072_v9 = vpack.c.bf16 %v67_v37, %v67_v37  ;;  %v11891_v53 = vrot.slane %v7051_v11, 5 }
  0x6b   :  { %12375 = vst [vmem:[#allocation106_spill] sm:$0xff] %v6993_v5  ;;  %v651_v5 = vrot.slane %v650_v49, 4  ;;  %v669_v15 = vrot.slane %v7054_v17, 4 }
  0x6c   :  { %12376 = vst [vmem:[#allocation107_spill] sm:$0xff] %v7005_v38  ;;  %v7098_v37 = vshll.u32 %v7072_v9, 16 }
  0x6d   :  { %12377 = vst [vmem:[#allocation108_spill] sm:$0xff] %v7008_v24  ;;  %v7067_v24 = vpack.c.bf16 %v69_v26, %v69_v26  ;;  %v656_v12 = vsel %vm6479_vm2, %v651_v5, %v655_v60  ;;  %v670_v5 = vor.u32 %v669_v15, %v11891_v53  ;;  %v12394_v15 = vrot.slane %v6990_v18, 5 }
  0x6e   :  { %12378 = vst [vmem:[#allocation109_spill] sm:$0xff] %v7013_v56 }
  0x6f   :  { %12379 = vst [vmem:[#allocation110_spill] sm:$0xff] %v7017_v4  ;;  %v7088_v49 = vshll.u32 %v7067_v24, 16  ;;  %v7091_v26 = vshrl.u32 %v7067_v24, 16  ;;  %v636_v53 = vsel %vm6479_vm2, %v631_v50, %v12394_v15  ;;  %v671_v50 = vrot.slane %v670_v5, 4 }
  0x70   :  { %190 = vst.msk [vmem:[#allocation2] sm:$0xf] %vm189_vm3, %v6442_v7  ;;  %1132 = vrot.lane.b32.xlu2 %v636_v53, %s6380_s19 }
  0x71   :  { %12380 = vst [vmem:[#allocation111_spill] sm:$0xff] %v7025_v47  ;;  %v641_v47 = vrot.slane %v640_v0, 4  ;;  %1136 = vrot.lane.b32.xlu1 %v656_v12, %s6380_s19 }
  0x72   :  { %191 = vst.msk [vmem:[#allocation2 + $0x4] sm:$0xf] %vm189_vm3, %v6444_v8 }
  0x73   :  { %12381 = vst [vmem:[#allocation112_spill] sm:$0xff] %v7033_v22  ;;  %v646_v61 = vsel %vm6479_vm2, %v641_v47, %v645_v35  ;;  %v659_v35 = vrot.slane %v7106_v10, 4  ;;  %v71_v47 = vld [vmem:[%s11733_s0 + $0x168] sm:$0xff] }
  0x74   :  { %12382 = vst [vmem:[#allocation113_spill] sm:$0xff] %v7036_v44  ;;  %v72_v44 = vld [vmem:[%s11733_s0 + $0x170] sm:$0xff]  ;;  %1134 = vrot.lane.b32.xlu0 %v646_v61, %s6380_s19 }
  0x75   :  { %192 = vst.msk [vmem:[#allocation2 + $0x8] sm:$0xf] %vm189_vm3, %v6429_v2  ;;  %v660_v12 = vor.u32 %v659_v35, %v655_v60  ;;  %v7144_v18 = vpack.c.bf16 %v72_v44, %v72_v44  ;;  %v1071_v35 = vpop.permute.xlu2 %1070 }
  0x76   :  { %12383 = vst [vmem:[#allocation114_spill] sm:$0xff] %v7051_v11 }
  0x77   :  { %12384 = vst [vmem:[#allocation115_spill] sm:$0xff] %v7054_v17  ;;  %v7134_v17 = vpack.c.bf16 %v70_v31, %v70_v31  ;;  %v661_v61 = vrot.slane %v660_v12, 4  ;;  %v7167_v53 = vshll.u32 %v7144_v18, 16  ;;  %v75_v12 = vld [vmem:[%s11733_s0 + $0x188] sm:$0xff] }
  0x78   :  { %193 = vst.msk [vmem:[#allocation2 + $0xc] sm:$0xf] %vm189_vm3, %v6431_v3 }
  0x79   :  { %195 = vst.msk [vmem:[#allocation2 + $0x14] sm:$0xf] %vm189_vm3, %v6520_v54  ;;  %v675_v54 = vrot.slane %v7033_v22, 5  ;;  %v7116_v22 = vshrl.u32 %v7080_v16, 16  ;;  %v7158_v44 = vshll.u32 %v7134_v17, 16 }
  0x7a   :  { %12385 = vst [vmem:[#allocation116_spill] sm:$0xff] %v7067_v24 }
  0x7b   :  { %196 = vst.msk [vmem:[#allocation2 + $0x18] sm:$0xf] %vm189_vm3, %v6483_v33  ;;  %v680_v0 = vor.u32 %v679_v6, %v675_v54  ;;  %v7113_v6 = vshll.u32 %v7080_v16, 16  ;;  %v699_v15 = vrot.slane %v7116_v22, 4 }
  0x7c   :  { %12386 = vst [vmem:[#allocation117_spill] sm:$0xff] %v7072_v9 }
  0x7d   :  { %197 = vst.msk [vmem:[#allocation2 + $0x1c] sm:$0xf] %vm189_vm3, %v6476_v28  ;;  %v11910_v31 = vrot.slane %v7113_v6, 5 }
  0x7e   :  { %12387 = vst [vmem:[#allocation118_spill] sm:$0xff] %v7080_v16 }
  0x7f   :  { %198 = vst.msk [vmem:[#allocation2 + $0x20] sm:$0xf] %vm189_vm3, %v6512_v48 }
  0x80   :  { %199 = vst.msk [vmem:[#allocation2 + $0x24] sm:$0xf] %vm189_vm3, %v6528_v58 }
  0x81   :  { %12388 = vst [vmem:[#allocation119_spill] sm:$0xff] %v7088_v49 }
  0x82   :  { %12389 = vst [vmem:[#allocation120_spill] sm:$0xff] %v7091_v26 }
  0x83   :  { %200 = vst.msk [vmem:[#allocation2 + $0x28] sm:$0xf] %vm189_vm3, %v6526_v57 }
  0x84   :  { %12390 = vst [vmem:[#allocation121_spill] sm:$0xff] %v7098_v37 }
  0x85   :  { %201 = vst.msk [vmem:[#allocation2 + $0x2c] sm:$0xf] %vm189_vm3, %v6562_v20  ;;  %v7150_v20 = vpack.c.bf16 %v71_v47, %v71_v47  ;;  %v7173_v47 = vshrl.u32 %v7072_v9, 16 }
  0x86   :  { %12391 = vst [vmem:[#allocation122_spill] sm:$0xff] %v7106_v10  ;;  %v681_v10 = vrot.slane %v680_v0, 4  ;;  %v12398_v0 = vrot.slane %v7088_v49, 5 }
  0x87   :  { %12392 = vst [vmem:[#allocation123_spill] sm:$0xff] %v7113_v6 }
  0x88   :  { %12393 = vst [vmem:[#allocation124_spill] sm:$0xff] %v7116_v22  ;;  %v7190_v22 = vshrl.u32 %v7150_v20, 16 }
  0x89   :  { %202 = vst.msk [vmem:[#allocation2 + $0x30] sm:$0xf] %vm189_vm3, %v6578_v34  ;;  %v709_v34 = vrot.slane %v7091_v26, 4  ;;  %v73_v26 = vld [vmem:[%s11733_s0 + $0x178] sm:$0xff] }
  0x8a   :  { %203 = vst.msk [vmem:[#allocation2 + $0x34] sm:$0xf] %vm189_vm3, %v6572_v27  ;;  %v685_v27 = vrot.slane %v7098_v37, 5  ;;  %v7187_v37 = vshll.u32 %v7150_v20, 16 }
  0x8b   :  { %12395 = vst [vmem:[#allocation125_spill] sm:$0xff] %v7134_v17  ;;  %v710_v60 = vor.u32 %v709_v34, %v12398_v0  ;;  %v7170_v34 = vshrl.u32 %v7144_v18, 16  ;;  %v700_v0 = vor.u32 %v699_v15, %v11910_v31  ;;  %v12405_v31 = vrot.slane %v7051_v11, 5 }
  0x8c   :  { %204 = vst.msk [vmem:[#allocation2 + $0x38] sm:$0xf] %vm189_vm3, %v6614_v14  ;;  %v686_v5 = vsel %vm6479_vm2, %v681_v10, %v685_v27  ;;  %v676_v10 = vsel %vm6479_vm2, %v671_v50, %v675_v54  ;;  %v689_v54 = vrot.slane %v7173_v47, 4  ;;  %v74_v50 = vld [vmem:[%s11733_s0 + $0x180] sm:$0xff] }
  0x8d   :  { %205 = vst.msk [vmem:[#allocation2 + $0x3c] sm:$0xf] %vm189_vm3, %v6630_v41  ;;  %1142 = vrot.lane.b32.xlu1 %v686_v5, %s6380_s19  ;;  %v711_v15 = vrot.slane %v710_v60, 4  ;;  %1140 = vrot.lane.b32.xlu0 %v676_v10, %s6380_s19  ;;  %v11923_v60 = vrot.slane %v7167_v53, 5  ;;  %v739_v5 = vrot.slane %v7170_v34, 4 }
  0x8e   :  { %12396 = vst [vmem:[#allocation126_spill] sm:$0xff] %v7144_v18 }
  0x8f   :  { %206 = vst.msk [vmem:[#allocation2 + $0x40] sm:$0xf] %vm189_vm3, %v6628_v32 }
  0x90   :  { %12397 = vst [vmem:[#allocation127_spill] sm:$0xff] %v7150_v20 }
  0x91   :  { %207 = vst.msk [vmem:[#allocation2 + $0x44] sm:$0xf] %vm189_vm3, %v6669_v36 }
  0x92   :  { %12399 = vst [vmem:[#allocation128_spill] sm:$0xff] %v7158_v44 }
  0x93   :  { %208 = vst.msk [vmem:[#allocation2 + $0x48] sm:$0xf] %vm189_vm3, %v6678_v43 }
  0x94   :  { %209 = vst.msk [vmem:[#allocation2 + $0x4c] sm:$0xf] %vm189_vm3, %v6674_v55  ;;  %v666_v55 = vsel %vm6479_vm2, %v661_v61, %v12405_v31  ;;  %v729_v61 = vrot.slane %v7190_v22, 4  ;;  %v7247_v31 = vshrl.u32 %v7134_v17, 16 }
  0x95   :  { %12400 = vst [vmem:[#allocation129_spill] sm:$0xff] %v7167_v53  ;;  %1138 = vrot.lane.b32.xlu2 %v666_v55, %s6380_s19 }
  0x96   :  { %12401 = vst [vmem:[#allocation130_spill] sm:$0xff] %v7170_v34 }
  0x97   :  { %12402 = vst [vmem:[#allocation131_spill] sm:$0xff] %v7173_v47  ;;  %v7211_v47 = vpack.c.bf16 %v73_v26, %v73_v26 }
  0x98   :  { %1304 = vst.msk [vmem:[#allocation2 + $0x10] sm:$0xf] %vm1299_vm4, %v1071_v35  ;;  %v715_v35 = vrot.slane %v7158_v44, 5  ;;  %v690_v44 = vor.u32 %v689_v54, %v685_v27  ;;  %v740_v54 = vor.u32 %v739_v5, %v11923_v60  ;;  %v12414_v5 = vrot.slane %v7187_v37, 5 }
  0x99   :  { %12403 = vst [vmem:[#allocation132_spill] sm:$0xff] %v7187_v37  ;;  %v7239_v55 = vshll.u32 %v7211_v47, 16 }
  0x9a   :  { %12404 = vst [vmem:[#allocation133_spill] sm:$0xff] %v7190_v22  ;;  %v691_v26 = vrot.slane %v690_v44, 4  ;;  %v76_v44 = vld [vmem:[%s11733_s0 + $0x190] sm:$0xff]  ;;  %v730_v60 = vor.u32 %v729_v61, %v12414_v5  ;;  %v12417_v61 = vrot.slane %v7113_v6, 5 }
  0x9b   :  { %210 = vst.msk [vmem:[#allocation2 + $0x50] sm:$0xf] %vm189_vm3, %v6710_v30  ;;  %v7206_v30 = vpack.c.bf16 %v75_v12, %v75_v12  ;;  %v7219_v12 = vpack.c.bf16 %v74_v50, %v74_v50  ;;  %v7241_v50 = vpop.permute.xlu2 %1072 }
  0x9c   :  { %211 = vst.msk [vmem:[#allocation2 + $0x54] sm:$0xf] %vm189_vm3, %v6729_v52  ;;  %v701_v52 = vrot.slane %v700_v0, 4  ;;  %v716_v0 = vsel %vm6479_vm2, %v711_v15, %v715_v35  ;;  %v12413_v15 = vrot.slane %v7088_v49, 5  ;;  %v696_v5 = vsel %vm6479_vm2, %v691_v26, %v12417_v61  ;;  %v7291_v26 = vpop.permute.xlu1 %1066  ;;  %v79_v61 = vld [vmem:[%s11733_s0 + $0x1a8] sm:$0xff] }
  0x9d   :  { %12406 = vst [vmem:[#allocation134_spill] sm:$0xff] %v7206_v30  ;;  %v7227_v27 = vshll.u32 %v7206_v30, 16  ;;  %v7230_v10 = vshrl.u32 %v7206_v30, 16  ;;  %v7258_v22 = vshll.u32 %v7219_v12, 16  ;;  %v7261_v11 = vshrl.u32 %v7219_v12, 16  ;;  %1148 = vrot.lane.b32.xlu1 %v716_v0, %s6380_s19  ;;  %1144 = vrot.lane.b32.xlu2 %v696_v5, %s6380_s19 }
  0x9e   :  { %212 = vst.msk [vmem:[#allocation2 + $0x58] sm:$0xf] %vm189_vm3, %v6725_v42  ;;  %v706_v34 = vsel %vm6479_vm2, %v701_v52, %v12413_v15  ;;  %v719_v52 = vrot.slane %v7247_v31, 4  ;;  %v77_v15 = vld [vmem:[%s11733_s0 + $0x198] sm:$0xff]  ;;  %v7279_v49 = vpack.c.bf16 %v76_v44, %v76_v44  ;;  %v741_v0 = vrot.slane %v740_v54, 4  ;;  %v7299_v54 = vpop.permute.xlu0 %1062 }
  0x9f   :  { %12407 = vst [vmem:[#allocation135_spill] sm:$0xff] %v7211_v47  ;;  %1146 = vrot.lane.b32.xlu0 %v706_v34, %s6380_s19  ;;  %v731_v44 = vrot.slane %v730_v60, 4  ;;  %v7295_v34 = vpack.c.bf16 %v77_v15, %v77_v15 }
  0xa0   :  { %213 = vst.msk [vmem:[#allocation2 + $0x5c] sm:$0xf] %vm189_vm3, %v6765_v45 }
  0xa1   :  { %12408 = vst [vmem:[#allocation136_spill] sm:$0xff] %v7219_v12 }
  0xa2   :  { %214 = vst.msk [vmem:[#allocation2 + $0x60] sm:$0xf] %vm189_vm3, %v6777_v23 }
  0xa3   :  { %215 = vst.msk [vmem:[#allocation2 + $0x64] sm:$0xf] %vm189_vm3, %v6773_v59 }
  0xa4   :  { %12409 = vst [vmem:[#allocation137_spill] sm:$0xff] %v7227_v27 }
  0xa5   :  { %12410 = vst [vmem:[#allocation138_spill] sm:$0xff] %v7230_v10 }
  0xa6   :  { %216 = vst.msk [vmem:[#allocation2 + $0x68] sm:$0xf] %vm189_vm3, %v6806_v63  ;;  %v78_v63 = vld [vmem:[%s11733_s0 + $0x1a0] sm:$0xff] }
  0xa7   :  { %12411 = vst [vmem:[#allocation139_spill] sm:$0xff] %v7239_v55  ;;  %v7287_v59 = vpack.c.bf16 %v78_v63, %v78_v63  ;;  %v7303_v63 = vshrl.u32 %v7211_v47, 16 }
  0xa8   :  { %12412 = vst [vmem:[#allocation140_spill] sm:$0xff] %v7247_v31  ;;  %v769_v31 = vrot.slane %v7230_v10, 4  ;;  %v7319_v10 = vpop.permute.xlu2 %1078 }
  0xa9   :  { %217 = vst.msk [vmem:[#allocation2 + $0x6c] sm:$0xf] %vm189_vm3, %v6825_v19  ;;  %v745_v19 = vrot.slane %v7239_v55, 5  ;;  %v7322_v55 = vshll.u32 %v7287_v59, 16 }
  0xaa   :  { %12415 = vst [vmem:[#allocation141_spill] sm:$0xff] %v7258_v22 }
  0xab   :  { %12416 = vst [vmem:[#allocation142_spill] sm:$0xff] %v7261_v11  ;;  %v746_v5 = vsel %vm6479_vm2, %v741_v0, %v745_v19  ;;  %v12427_v0 = vrot.slane %v7258_v22, 5 }
  0xac   :  { %218 = vst.msk [vmem:[#allocation2 + $0x70] sm:$0xf] %vm189_vm3, %v6821_v62  ;;  %v759_v62 = vrot.slane %v7261_v11, 4  ;;  %1154 = vrot.lane.b32.xlu1 %v746_v5, %s6380_s19  ;;  %v1069_v5 = vpop.permute.xlu1 %1068 }
  0xad   :  { %219 = vst.msk [vmem:[#allocation2 + $0x74] sm:$0xf] %vm189_vm3, %v6861_v25  ;;  %v720_v25 = vor.u32 %v719_v52, %v715_v35  ;;  %v12422_v35 = vrot.slane %v7227_v27, 5  ;;  %v7310_v52 = vshll.u32 %v7279_v49, 16 }
  0xae   :  { %12418 = vst [vmem:[#allocation143_spill] sm:$0xff] %v7279_v49  ;;  %v760_v6 = vor.u32 %v759_v62, %v12427_v0  ;;  %v12431_v62 = vld [vmem:[#allocation100_spill] sm:$0xff] }
  0xaf   :  { %220 = vst.msk [vmem:[#allocation2 + $0x78] sm:$0xf] %vm189_vm3, %v6873_v1  ;;  %v770_v60 = vor.u32 %v769_v31, %v12422_v35  ;;  %v721_v15 = vrot.slane %v720_v25, 4  ;;  %v7325_v31 = vshrl.u32 %v7287_v59, 16  ;;  %v749_v25 = vrot.slane %v7303_v63, 4 }
  0xb0   :  { %12419 = vst [vmem:[#allocation144_spill] sm:$0xff] %v7287_v59  ;;  %v12426_v35 = vrot.slane %v7167_v53, 5  ;;  %v7347_v53 = vpack.c.bf16 %v79_v61, %v79_v61  ;;  %v775_v0 = vrot.slane %v7310_v52, 5 }
  0xb1   :  { %221 = vst.msk [vmem:[#allocation2 + $0x7c] sm:$0xf] %vm189_vm3, %v6869_v21 }
  0xb2   :  { %12420 = vst [vmem:[#allocation145_spill] sm:$0xff] %v7295_v34  ;;  %v736_v11 = vsel %vm6479_vm2, %v731_v44, %v12426_v35  ;;  %v80_v44 = vld [vmem:[%s11733_s0 + $0x1b0] sm:$0xff]  ;;  %v771_v35 = vrot.slane %v770_v60, 4  ;;  %v7368_v60 = vshrl.u32 %v7279_v49, 16 }
  0xb3   :  { %222 = vst.msk [vmem:[#allocation2 + $0x80] sm:$0xf] %vm189_vm3, %v6915_v13  ;;  %v7340_v13 = vshrl.u32 %v7295_v34, 16  ;;  %1152 = vrot.lane.b32.xlu0 %v736_v11, %s6380_s19  ;;  %v1065_v11 = vpop.permute.xlu0 %1064 }
  0xb4   :  { %12421 = vst [vmem:[#allocation146_spill] sm:$0xff] %v7303_v63  ;;  %v81_v63 = vld [vmem:[%s11733_s0 + $0x1b8] sm:$0xff] }
  0xb5   :  { %223 = vst.msk [vmem:[#allocation2 + $0x84] sm:$0xf] %vm189_vm3, %v6921_v40  ;;  %v7365_v21 = vpack.c.bf16 %v81_v63, %v81_v63  ;;  %v7380_v63 = vshll.u32 %v7347_v53, 16 }
  0xb6   :  { %12423 = vst [vmem:[#allocation147_spill] sm:$0xff] %v7310_v52  ;;  %v7391_v52 = vpop.permute.xlu2 %1084 }
  0xb7   :  { %224 = vst.msk [vmem:[#allocation2 + $0x88] sm:$0xf] %vm189_vm3, %v6902_v39  ;;  %v7337_v39 = vshll.u32 %v7295_v34, 16 }
  0xb8   :  { %12424 = vst [vmem:[#allocation148_spill] sm:$0xff] %v7322_v55 }
  0xb9   :  { %12425 = vst [vmem:[#allocation149_spill] sm:$0xff] %v7325_v31 }
  0xba   :  { %225 = vst.msk [vmem:[#allocation2 + $0x8c] sm:$0xf] %vm189_vm3, %v6950_v46  ;;  %v12432_v46 = vrot.slane %v7187_v37, 5 }
  0xbb   :  { %12428 = vst [vmem:[#allocation150_spill] sm:$0xff] %v7337_v39 }
  0xbc   :  { %12429 = vst [vmem:[#allocation151_spill] sm:$0xff] %v7340_v13  ;;  %v726_v40 = vsel %vm6479_vm2, %v721_v15, %v12432_v46  ;;  %v761_v46 = vrot.slane %v760_v6, 4  ;;  %v789_v15 = vrot.slane %v7340_v13, 4  ;;  %v779_v6 = vrot.slane %v7368_v60, 4 }
  0xbd   :  { %226 = vst.msk [vmem:[#allocation2 + $0x90] sm:$0xf] %vm189_vm3, %v6969_v51  ;;  %v750_v51 = vor.u32 %v749_v25, %v745_v19  ;;  %v7374_v25 = vpack.c.bf16 %v80_v44, %v80_v44  ;;  %1150 = vrot.lane.b32.xlu2 %v726_v40, %s6380_s19  ;;  %v776_v44 = vsel %vm6479_vm2, %v771_v35, %v775_v0  ;;  %v12437_v19 = vrot.slane %v7322_v55, 5  ;;  %v82_v40 = vld [vmem:[%s11733_s0 + $0x1c0] sm:$0xff] }
  0xbe   :  { %12430 = vst [vmem:[#allocation152_spill] sm:$0xff] %v7347_v53  ;;  %v7397_v13 = vshll.u32 %v7365_v21, 16  ;;  %v12440_v35 = vrot.slane %v7227_v27, 5  ;;  %v805_v27 = vrot.slane %v7380_v63, 5  ;;  %1160 = vrot.lane.b32.xlu1 %v776_v44, %s6380_s19 }
  0xbf   :  { %227 = vst.msk [vmem:[#allocation2 + $0x94] sm:$0xf] %vm189_vm3, %v12431_v62  ;;  %v799_v62 = vrot.slane %v7325_v31, 4  ;;  %v751_v61 = vrot.slane %v750_v51, 4  ;;  %v7400_v51 = vshrl.u32 %v7365_v21, 16  ;;  %v7411_v37 = vshll.u32 %v7374_v25, 16 }
  0xc0   :  { %228 = vst.msk [vmem:[#allocation2 + $0x98] sm:$0xf] %vm189_vm3, %v7005_v38 }
  0xc1   :  { %12433 = vst [vmem:[#allocation153_spill] sm:$0xff] %v7365_v21  ;;  %v800_v31 = vor.u32 %v799_v62, %v12437_v19  ;;  %v766_v62 = vsel %vm6479_vm2, %v761_v46, %v12440_v35  ;;  %v12441_v19 = vrot.slane %v7337_v39, 5  ;;  %v83_v46 = vld [vmem:[%s11733_s0 + $0x1c8] sm:$0xff]  ;;  %v829_v44 = vrot.slane %v7400_v51, 4 }
  0xc2   :  { %12434 = vst [vmem:[#allocation154_spill] sm:$0xff] %v7368_v60  ;;  %1158 = vrot.lane.b32.xlu0 %v766_v62, %s6380_s19 }
  0xc3   :  { %229 = vst.msk [vmem:[#allocation2 + $0x9c] sm:$0xf] %vm189_vm3, %v7017_v4  ;;  %v790_v60 = vor.u32 %v789_v15, %v12441_v19  ;;  %v12444_v15 = vrot.slane %v7258_v22, 5  ;;  %v7432_v19 = vpack.c.bf16 %v82_v40, %v82_v40 }
  0xc4   :  { %12435 = vst [vmem:[#allocation155_spill] sm:$0xff] %v7374_v25 }
  0xc5   :  { %230 = vst.msk [vmem:[#allocation2 + $0xa0] sm:$0xf] %vm189_vm3, %v7013_v56  ;;  %v756_v35 = vsel %vm6479_vm2, %v751_v61, %v12444_v15  ;;  %v1077_v61 = vpop.permute.xlu1 %1076  ;;  %v7448_v15 = vpack.c.bf16 %v83_v46, %v83_v46 }
  0xc6   :  { %12436 = vst [vmem:[#allocation156_spill] sm:$0xff] %v7380_v63  ;;  %v801_v63 = vrot.slane %v800_v31, 4  ;;  %1156 = vrot.lane.b32.xlu2 %v756_v35, %s6380_s19 }
  0xc7   :  { %231 = vst.msk [vmem:[#allocation2 + $0xa4] sm:$0xf] %vm189_vm3, %v7072_v9  ;;  %v7414_v9 = vshrl.u32 %v7374_v25, 16 }
  0xc8   :  { %232 = vst.msk [vmem:[#allocation2 + $0xa8] sm:$0xf] %vm189_vm3, %v7080_v16  ;;  %v84_v16 = vld [vmem:[%s11733_s0 + $0x1d0] sm:$0xff]  ;;  %v806_v46 = vsel %vm6479_vm2, %v801_v63, %v805_v27  ;;  %v12453_v63 = vrot.slane %v7411_v37, 5 }
  0xc9   :  { %12438 = vst [vmem:[#allocation157_spill] sm:$0xff] %v7397_v13  ;;  %v7442_v22 = vpack.c.bf16 %v84_v16, %v84_v16  ;;  %v819_v40 = vrot.slane %v7414_v9, 4  ;;  %v7456_v16 = vshll.u32 %v7432_v19, 16  ;;  %1166 = vrot.lane.b32.xlu1 %v806_v46, %s6380_s19 }
  0xca   :  { %12439 = vst [vmem:[#allocation158_spill] sm:$0xff] %v7400_v51 }
  0xcb   :  { %233 = vst.msk [vmem:[#allocation2 + $0xac] sm:$0xf] %vm189_vm3, %v7067_v24  ;;  %v780_v24 = vor.u32 %v779_v6, %v775_v0  ;;  %v791_v0 = vrot.slane %v790_v60, 4  ;;  %v85_v60 = vld [vmem:[%s11733_s0 + $0x1d8] sm:$0xff]  ;;  %v7468_v6 = vpop.permute.xlu2 %1090  ;;  %v7471_v51 = vshll.u32 %v7442_v22, 16 }
  0xcc   :  { %12442 = vst [vmem:[#allocation159_spill] sm:$0xff] %v7411_v37 }
  0xcd   :  { %12443 = vst [vmem:[#allocation160_spill] sm:$0xff] %v7414_v9  ;;  %v781_v31 = vrot.slane %v780_v24, 4  ;;  %v7474_v24 = vshrl.u32 %v7442_v22, 16  ;;  %v820_v9 = vor.u32 %v819_v40, %v12453_v63  ;;  %v12457_v40 = vrot.slane %v7337_v39, 5 }
  0xce   :  { %234 = vst.msk [vmem:[#allocation2 + $0xb0] sm:$0xf] %vm189_vm3, %v7134_v17  ;;  %v7435_v17 = vshrl.u32 %v7347_v53, 16 }
  0xcf   :  { %1302 = vst.msk [vmem:[#allocation2 + $0x8] sm:$0xf] %vm1299_vm4, %v7291_v26  ;;  %v11996_v26 = vrot.slane %v7397_v13, 5  ;;  %v786_v63 = vsel %vm6479_vm2, %v781_v31, %v12457_v40  ;;  %v859_v46 = vrot.slane %v7474_v24, 4  ;;  %v1083_v31 = vpop.permute.xlu1 %1082 }
  0xd0   :  { %12445 = vst [vmem:[#allocation161_spill] sm:$0xff] %v7432_v19  ;;  %v809_v62 = vrot.slane %v7435_v17, 4  ;;  %1162 = vrot.lane.b32.xlu2 %v786_v63, %s6380_s19  ;;  %v88_v63 = vld [vmem:[%s11733_s0 + $0x1f0] sm:$0xff] }
  0xd1   :  { %12446 = vst [vmem:[#allocation162_spill] sm:$0xff] %v7435_v17  ;;  %v830_v35 = vor.u32 %v829_v44, %v11996_v26  ;;  %v12452_v17 = vrot.slane %v7322_v55, 5  ;;  %v7484_v44 = vshll.u32 %v7448_v15, 16  ;;  %v7487_v26 = vshrl.u32 %v7448_v15, 16 }
  0xd2   :  { %1300 = vst.msk [vmem:[#allocation2] sm:$0xf] %vm1299_vm4, %v7299_v54  ;;  %v1075_v54 = vpop.permute.xlu0 %1074  ;;  %v810_v55 = vor.u32 %v809_v62, %v805_v27  ;;  %v821_v27 = vrot.slane %v820_v9, 4 }
  0xd3   :  { %12447 = vst [vmem:[#allocation163_spill] sm:$0xff] %v7442_v22  ;;  %v849_v40 = vrot.slane %v7487_v26, 4 }
  0xd4   :  { %236 = vst.msk [vmem:[#allocation2 + $0xb8] sm:$0xf] %vm189_vm3, %v7144_v18 }
  0xd5   :  { %12448 = vst [vmem:[#allocation164_spill] sm:$0xff] %v7448_v15 }
  0xd6   :  { %237 = vst.msk [vmem:[#allocation2 + $0xbc] sm:$0xf] %vm189_vm3, %v7211_v47  ;;  %v87_v47 = vld [vmem:[%s11733_s0 + $0x1e8] sm:$0xff] }
  0xd7   :  { %235 = vst.msk [vmem:[#allocation2 + $0xb4] sm:$0xf] %vm189_vm3, %v7150_v20 }
  0xd8   :  { %12449 = vst [vmem:[#allocation165_spill] sm:$0xff] %v7456_v16 }
  0xd9   :  { %1305 = vst.msk [vmem:[#allocation2 + $0x14] sm:$0xf] %vm1299_vm4, %v7241_v50  ;;  %v796_v50 = vsel %vm6479_vm2, %v791_v0, %v12452_v17  ;;  %v86_v17 = vld [vmem:[%s11733_s0 + $0x1e0] sm:$0xff]  ;;  %v835_v0 = vrot.slane %v7456_v16, 5  ;;  %v7514_v16 = vpack.c.bf16 %v87_v47, %v87_v47 }
  0xda   :  { %12450 = vst [vmem:[#allocation166_spill] sm:$0xff] %v7471_v51  ;;  %1164 = vrot.lane.b32.xlu0 %v796_v50, %s6380_s19  ;;  %v7520_v39 = vpack.c.bf16 %v86_v17, %v86_v17  ;;  %v811_v50 = vrot.slane %v810_v55, 4 }
  0xdb   :  { %12451 = vst [vmem:[#allocation167_spill] sm:$0xff] %v7474_v24  ;;  %v7541_v24 = vshll.u32 %v7514_v16, 16  ;;  %v7544_v55 = vshrl.u32 %v7514_v16, 16 }
  0xdc   :  { %1303 = vst.msk [vmem:[#allocation2 + $0xc] sm:$0xf] %vm1299_vm4, %v1069_v5  ;;  %v7493_v5 = vpack.c.bf16 %v85_v60, %v85_v60  ;;  %v831_v60 = vrot.slane %v830_v35, 4  ;;  %v1081_v35 = vpop.permute.xlu0 %1080 }
  0xdd   :  { %12454 = vst [vmem:[#allocation168_spill] sm:$0xff] %v7484_v44 }
  0xde   :  { %12455 = vst [vmem:[#allocation169_spill] sm:$0xff] %v7487_v26  ;;  %v7526_v47 = vshll.u32 %v7493_v5, 16  ;;  %v836_v17 = vsel %vm6479_vm2, %v831_v60, %v835_v0  ;;  %v12465_v60 = vrot.slane %v7484_v44, 5  ;;  %v90_v26 = vld [vmem:[%s11733_s0 + $0x200] sm:$0xff] }
  0xdf   :  { %1301 = vst.msk [vmem:[#allocation2 + $0x4] sm:$0xf] %vm1299_vm4, %v1065_v11  ;;  %v7507_v11 = vshrl.u32 %v7432_v19, 16  ;;  %1172 = vrot.lane.b32.xlu1 %v836_v17, %s6380_s19  ;;  %v889_v17 = vrot.slane %v7544_v55, 4 }
  0xe0   :  { %12456 = vst [vmem:[#allocation170_spill] sm:$0xff] %v7493_v5 }
  0xe1   :  { %239 = vst.msk [vmem:[#allocation2 + $0xc4] sm:$0xf] %vm189_vm3, %v7206_v30  ;;  %v12009_v30 = vrot.slane %v7471_v51, 5  ;;  %v839_v9 = vrot.slane %v7507_v11, 4 }
  0xe2   :  { %12458 = vst [vmem:[#allocation171_spill] sm:$0xff] %v7507_v11  ;;  %v7558_v11 = vshrl.u32 %v7520_v39, 16 }
  0xe3   :  { %240 = vst.msk [vmem:[#allocation2 + $0xc8] sm:$0xf] %vm189_vm3, %v7279_v49  ;;  %v860_v62 = vor.u32 %v859_v46, %v12009_v30  ;;  %v850_v46 = vor.u32 %v849_v40, %v12465_v60  ;;  %v7555_v30 = vshll.u32 %v7520_v39, 16  ;;  %v12468_v40 = vrot.slane %v7411_v37, 5 }
  0xe4   :  { %12459 = vst [vmem:[#allocation172_spill] sm:$0xff] %v7514_v16  ;;  %v7576_v60 = vpack.c.bf16 %v88_v63, %v88_v63  ;;  %v12030_v49 = vrot.slane %v7541_v24, 5  ;;  %v7586_v37 = vpack.c.bf16 %v90_v26, %v90_v26 }
  0xe5   :  { %238 = vst.msk [vmem:[#allocation2 + $0xc0] sm:$0xf] %vm189_vm3, %v7219_v12  ;;  %v851_v63 = vrot.slane %v850_v46, 4 }
  0xe6   :  { %12460 = vst [vmem:[#allocation173_spill] sm:$0xff] %v7520_v39  ;;  %v7598_v26 = vshll.u32 %v7576_v60, 16  ;;  %v890_v46 = vor.u32 %v889_v17, %v12030_v49 }
  0xe7   :  { %1308 = vst.msk [vmem:[#allocation2 + $0x20] sm:$0xf] %vm1299_vm4, %v7319_v10  ;;  %v7535_v10 = vpop.permute.xlu2 %1096 }
  0xe8   :  { %12461 = vst [vmem:[#allocation174_spill] sm:$0xff] %v7526_v47 }
  0xe9   :  { %1307 = vst.msk [vmem:[#allocation2 + $0x1c] sm:$0xf] %vm1299_vm4, %v1077_v61  ;;  %v12464_v61 = vrot.slane %v7397_v13, 5  ;;  %v865_v13 = vrot.slane %v7526_v47, 5  ;;  %v861_v47 = vrot.slane %v860_v62, 4  ;;  %v91_v62 = vld [vmem:[%s11733_s0 + $0x208] sm:$0xff] }
  0xea   :  { %1306 = vst.msk [vmem:[#allocation2 + $0x18] sm:$0xf] %vm1299_vm4, %v1075_v54 }
  0xeb   :  { %12462 = vst [vmem:[#allocation175_spill] sm:$0xff] %v7541_v24  ;;  %v826_v54 = vsel %vm6479_vm2, %v821_v27, %v12464_v61  ;;  %v89_v27 = vld [vmem:[%s11733_s0 + $0x1f8] sm:$0xff]  ;;  %v816_v61 = vsel %vm6479_vm2, %v811_v50, %v12468_v40  ;;  %v1089_v50 = vpop.permute.xlu1 %1088 }
  0xec   :  { %12463 = vst [vmem:[#allocation176_spill] sm:$0xff] %v7544_v55  ;;  %1170 = vrot.lane.b32.xlu0 %v826_v54, %s6380_s19  ;;  %v7591_v40 = vpack.c.bf16 %v89_v27, %v89_v27  ;;  %1168 = vrot.lane.b32.xlu2 %v816_v61, %s6380_s19  ;;  %v7613_v61 = vshll.u32 %v7586_v37, 16 }
  0xed   :  { %242 = vst.msk [vmem:[#allocation2 + $0xd0] sm:$0xf] %vm189_vm3, %v7287_v59  ;;  %v840_v59 = vor.u32 %v839_v9, %v835_v0  ;;  %v879_v9 = vrot.slane %v7558_v11, 4  ;;  %v12476_v0 = vrot.slane %v7471_v51, 5  ;;  %v7637_v51 = vpack.c.bf16 %v91_v62, %v91_v62 }
  0xee   :  { %12466 = vst [vmem:[#allocation177_spill] sm:$0xff] %v7555_v30  ;;  %v7627_v17 = vshll.u32 %v7591_v40, 16  ;;  %v7630_v49 = vshrl.u32 %v7591_v40, 16  ;;  %v891_v62 = vrot.slane %v890_v46, 4 }
  0xef   :  { %12467 = vst [vmem:[#allocation178_spill] sm:$0xff] %v7558_v11  ;;  %v7610_v27 = vpop.permute.xlu2 %1102  ;;  %v856_v55 = vsel %vm6479_vm2, %v851_v63, %v12476_v0  ;;  %v93_v11 = vld [vmem:[%s11733_s0 + $0x218] sm:$0xff]  ;;  %v92_v63 = vld [vmem:[%s11733_s0 + $0x210] sm:$0xff]  ;;  %v895_v0 = vrot.slane %v7598_v26, 5 }
  0xf0   :  { %243 = vst.msk [vmem:[#allocation2 + $0xd4] sm:$0xf] %vm189_vm3, %v7347_v53  ;;  %v7579_v53 = vshrl.u32 %v7493_v5, 16 }
  0xf1   :  { %241 = vst.msk [vmem:[#allocation2 + $0xcc] sm:$0xf] %vm189_vm3, %v7295_v34  ;;  %v896_v46 = vsel %vm6479_vm2, %v891_v62, %v895_v0 }
  0xf2   :  { %12469 = vst [vmem:[#allocation179_spill] sm:$0xff] %v7576_v60  ;;  %v869_v54 = vrot.slane %v7579_v53, 4 }
  0xf3   :  { %12470 = vst [vmem:[#allocation180_spill] sm:$0xff] %v7579_v53 }
  0xf4   :  { %1311 = vst.msk [vmem:[#allocation2 + $0x2c] sm:$0xf] %vm1299_vm4, %v7391_v52  ;;  %v1087_v52 = vpop.permute.xlu0 %1086  ;;  %1176 = vrot.lane.b32.xlu0 %v856_v55, %s6380_s19 }
  0xf5   :  { %12471 = vst [vmem:[#allocation181_spill] sm:$0xff] %v7586_v37 }
  0xf6   :  { %1310 = vst.msk [vmem:[#allocation2 + $0x28] sm:$0xf] %vm1299_vm4, %v1083_v31  ;;  %v841_v31 = vrot.slane %v840_v59, 4  ;;  %v7616_v59 = vshrl.u32 %v7586_v37, 16 }
  0xf7   :  { %12472 = vst [vmem:[#allocation182_spill] sm:$0xff] %v7591_v40 }
  0xf8   :  { %1309 = vst.msk [vmem:[#allocation2 + $0x24] sm:$0xf] %vm1299_vm4, %v1081_v35  ;;  %v866_v35 = vsel %vm6479_vm2, %v861_v47, %v865_v13  ;;  %v12477_v47 = vrot.slane %v7555_v30, 5 }
  0xf9   :  { %245 = vst.msk [vmem:[#allocation2 + $0xdc] sm:$0xf] %vm189_vm3, %v7365_v21  ;;  %1178 = vrot.lane.b32.xlu1 %v866_v35, %s6380_s19  ;;  %v919_v35 = vrot.slane %v7616_v59, 4  ;;  %v7656_v21 = vpack.c.bf16 %v93_v11, %v93_v11  ;;  %v7668_v11 = vshll.u32 %v7637_v51, 16 }
  0xfa   :  { %12473 = vst [vmem:[#allocation183_spill] sm:$0xff] %v7598_v26  ;;  %v880_v53 = vor.u32 %v879_v9, %v12477_v47  ;;  %v12481_v9 = vrot.slane %v7484_v44, 5  ;;  %v1095_v26 = vpop.permute.xlu1 %1094  ;;  %v96_v44 = vld [vmem:[%s11733_s0 + $0x230] sm:$0xff] }
  0xfb   :  { %246 = vst.msk [vmem:[#allocation2 + $0xe0] sm:$0xf] %vm189_vm3, %v7432_v19  ;;  %v870_v19 = vor.u32 %v869_v54, %v865_v13  ;;  %v909_v54 = vrot.slane %v7630_v49, 4  ;;  %v1109_v13 = vpop.permute.xlu2 %1108 }
  0xfc   :  { %12474 = vst [vmem:[#allocation184_spill] sm:$0xff] %v7613_v61  ;;  %v846_v47 = vsel %vm6479_vm2, %v841_v31, %v12481_v9  ;;  %v881_v31 = vrot.slane %v880_v53, 4  ;;  %v7662_v9 = vpack.c.bf16 %v92_v63, %v92_v63  ;;  %v1093_v55 = vpop.permute.xlu0 %1092 }
  0xfd   :  { %12475 = vst [vmem:[#allocation185_spill] sm:$0xff] %v7616_v59  ;;  %1174 = vrot.lane.b32.xlu2 %v846_v47, %s6380_s19  ;;  %v94_v47 = vld [vmem:[%s11733_s0 + $0x220] sm:$0xff]  ;;  %v7683_v59 = vshll.u32 %v7656_v21, 16 }
  0xfe   :  { %244 = vst.msk [vmem:[#allocation2 + $0xd8] sm:$0xf] %vm189_vm3, %v7374_v25 }
  0xff   :  { %12478 = vst [vmem:[#allocation186_spill] sm:$0xff] %v7627_v17 }
 0x100   :  { %12479 = vst [vmem:[#allocation187_spill] sm:$0xff] %v7630_v49  ;;  %v7699_v49 = vshrl.u32 %v7662_v9, 16 }
 0x101   :  { %1314 = vst.msk [vmem:[#allocation2 + $0x38] sm:$0xf] %vm1299_vm4, %v7468_v6  ;;  %v7650_v6 = vshrl.u32 %v7576_v60, 16  ;;  %1184 = vrot.lane.b32.xlu1 %v896_v46, %s6380_s19 }
 0x102   :  { %12480 = vst [vmem:[#allocation188_spill] sm:$0xff] %v7637_v51 }
 0x103   :  { %1313 = vst.msk [vmem:[#allocation2 + $0x34] sm:$0xf] %vm1299_vm4, %v1089_v50  ;;  %v12043_v50 = vrot.slane %v7613_v61, 5  ;;  %v899_v53 = vrot.slane %v7650_v6, 4 }
 0x104   :  { %12482 = vst [vmem:[#allocation189_spill] sm:$0xff] %v7650_v6  ;;  %v7696_v6 = vshll.u32 %v7662_v9, 16 }
 0x105   :  { %1312 = vst.msk [vmem:[#allocation2 + $0x30] sm:$0xf] %vm1299_vm4, %v1087_v52  ;;  %v871_v52 = vrot.slane %v870_v19, 4  ;;  %v920_v63 = vor.u32 %v919_v35, %v12043_v50  ;;  %v7686_v19 = vshrl.u32 %v7656_v21, 16  ;;  %v12489_v35 = vrot.slane %v7627_v17, 5 }
 0x106   :  { %12483 = vst [vmem:[#allocation190_spill] sm:$0xff] %v7656_v21 }
 0x107   :  { %248 = vst.msk [vmem:[#allocation2 + $0xe8] sm:$0xf] %vm189_vm3, %v7442_v22  ;;  %v910_v50 = vor.u32 %v909_v54, %v12489_v35  ;;  %v12492_v54 = vrot.slane %v7555_v30, 5  ;;  %v7716_v35 = vpack.c.bf16 %v94_v47, %v94_v47  ;;  %v921_v46 = vrot.slane %v920_v63, 4  ;;  %v1099_v63 = vpop.permute.xlu0 %1098 }
 0x108   :  { %12484 = vst [vmem:[#allocation191_spill] sm:$0xff] %v7662_v9  ;;  %v7726_v30 = vpack.c.bf16 %v96_v44, %v96_v44  ;;  %v939_v47 = vrot.slane %v7699_v49, 4 }
 0x109   :  { %249 = vst.msk [vmem:[#allocation2 + $0xec] sm:$0xf] %vm189_vm3, %v7493_v5  ;;  %v7739_v44 = vshll.u32 %v7716_v35, 16 }
 0x10a   :  { %12485 = vst [vmem:[#allocation192_spill] sm:$0xff] %v7668_v11 }
 0x10b   :  { %247 = vst.msk [vmem:[#allocation2 + $0xe4] sm:$0xf] %vm189_vm3, %v7448_v15 }
 0x10c   :  { %1317 = vst.msk [vmem:[#allocation2 + $0x44] sm:$0xf] %vm1299_vm4, %v7535_v10  ;;  %v12488_v10 = vrot.slane %v7541_v24, 5  ;;  %v900_v24 = vor.u32 %v899_v53, %v895_v0  ;;  %v911_v0 = vrot.slane %v910_v50, 4  ;;  %v97_v50 = vld [vmem:[%s11733_s0 + $0x238] sm:$0xff] }
 0x10d   :  { %12486 = vst [vmem:[#allocation193_spill] sm:$0xff] %v7683_v59 }
 0x10e   :  { %12487 = vst [vmem:[#allocation194_spill] sm:$0xff] %v7686_v19  ;;  %v886_v62 = vsel %vm6479_vm2, %v881_v31, %v12488_v10  ;;  %v95_v31 = vld [vmem:[%s11733_s0 + $0x228] sm:$0xff]  ;;  %v876_v10 = vsel %vm6479_vm2, %v871_v52, %v12492_v54  ;;  %v1101_v52 = vpop.permute.xlu1 %1100 }
 0x10f   :  { %1316 = vst.msk [vmem:[#allocation2 + $0x40] sm:$0xf] %vm1299_vm4, %v1095_v26  ;;  %v925_v26 = vrot.slane %v7668_v11, 5  ;;  %1182 = vrot.lane.b32.xlu0 %v886_v62, %s6380_s19  ;;  %v12062_v11 = vrot.slane %v7683_v59, 5  ;;  %v7732_v54 = vpack.c.bf16 %v95_v31, %v95_v31  ;;  %1180 = vrot.lane.b32.xlu2 %v876_v10, %s6380_s19  ;;  %v901_v62 = vrot.slane %v900_v24, 4  ;;  %v1115_v10 = vpop.permute.xlu2 %1114 }
 0x110   :  { %12490 = vst [vmem:[#allocation195_spill] sm:$0xff] %v7696_v6  ;;  %v7754_v24 = vshrl.u32 %v7726_v30, 16 }
 0x111   :  { %12491 = vst [vmem:[#allocation196_spill] sm:$0xff] %v7699_v49  ;;  %v99_v49 = vld [vmem:[%s11733_s0 + $0x248] sm:$0xff] }
 0x112   :  { %1315 = vst.msk [vmem:[#allocation2 + $0x3c] sm:$0xf] %vm1299_vm4, %v1093_v55  ;;  %v7719_v55 = vshrl.u32 %v7637_v51, 16 }
 0x113   :  { %251 = vst.msk [vmem:[#allocation2 + $0xf4] sm:$0xf] %vm189_vm3, %v7514_v16  ;;  %v949_v16 = vrot.slane %v7686_v19, 4  ;;  %v12500_v19 = vrot.slane %v7613_v61, 5  ;;  %v7775_v61 = vpack.c.bf16 %v97_v50, %v97_v50  ;;  %v7789_v50 = vshrl.u32 %v7716_v35, 16 }
 0x114   :  { %12493 = vst [vmem:[#allocation197_spill] sm:$0xff] %v7716_v35  ;;  %v929_v53 = vrot.slane %v7719_v55, 4 }
 0x115   :  { %12494 = vst [vmem:[#allocation198_spill] sm:$0xff] %v7719_v55  ;;  %v950_v31 = vor.u32 %v949_v16, %v12062_v11  ;;  %v7765_v16 = vshll.u32 %v7732_v54, 16  ;;  %v7768_v11 = vshrl.u32 %v7732_v54, 16 }
 0x116   :  { %252 = vst.msk [vmem:[#allocation2 + $0xf8] sm:$0xf] %vm189_vm3, %v7576_v60  ;;  %v979_v60 = vrot.slane %v7754_v24, 4 }
 0x117   :  { %12495 = vst [vmem:[#allocation199_spill] sm:$0xff] %v7726_v30 }
 0x118   :  { %250 = vst.msk [vmem:[#allocation2 + $0xf0] sm:$0xf] %vm189_vm3, %v7520_v39 }
 0x119   :  { %12496 = vst [vmem:[#allocation200_spill] sm:$0xff] %v7732_v54 }
 0x11a   :  { %1320 = vst.msk [vmem:[#allocation2 + $0x50] sm:$0xf] %vm1299_vm4, %v7610_v27  ;;  %v926_v27 = vsel %vm6479_vm2, %v921_v46, %v925_v26  ;;  %v12501_v46 = vrot.slane %v7696_v6, 5 }
 0x11b   :  { %1319 = vst.msk [vmem:[#allocation2 + $0x4c] sm:$0xf] %vm1299_vm4, %v1101_v52  ;;  %v7751_v52 = vshll.u32 %v7726_v30, 16  ;;  %1190 = vrot.lane.b32.xlu1 %v926_v27, %s6380_s19 }
 0x11c   :  { %12497 = vst [vmem:[#allocation201_spill] sm:$0xff] %v7739_v44  ;;  %v940_v55 = vor.u32 %v939_v47, %v12501_v46  ;;  %v12505_v47 = vrot.slane %v7627_v17, 5 }
 0x11d   :  { %1318 = vst.msk [vmem:[#allocation2 + $0x48] sm:$0xf] %vm1299_vm4, %v1099_v63  ;;  %v916_v63 = vsel %vm6479_vm2, %v911_v0, %v12500_v19  ;;  %v98_v19 = vld [vmem:[%s11733_s0 + $0x240] sm:$0xff]  ;;  %v955_v0 = vrot.slane %v7739_v44, 5  ;;  %v12077_v27 = vrot.slane %v7751_v52, 5  ;;  %v1107_v44 = vpop.permute.xlu1 %1106 }
 0x11e   :  { %12498 = vst [vmem:[#allocation202_spill] sm:$0xff] %v7751_v52  ;;  %v906_v46 = vsel %vm6479_vm2, %v901_v62, %v12505_v47  ;;  %1188 = vrot.lane.b32.xlu0 %v916_v63, %s6380_s19  ;;  %v941_v62 = vrot.slane %v940_v55, 4  ;;  %v7801_v47 = vpack.c.bf16 %v98_v19, %v98_v19  ;;  %v959_v63 = vrot.slane %v7789_v50, 4  ;;  %v1121_v19 = vpop.permute.xlu2 %1120 }
 0x11f   :  { %12499 = vst [vmem:[#allocation203_spill] sm:$0xff] %v7754_v24  ;;  %1186 = vrot.lane.b32.xlu2 %v906_v46, %s6380_s19  ;;  %v100_v46 = vld [vmem:[%s11733_s0 + $0x250] sm:$0xff] }
 0x120   :  { %254 = vst.msk [vmem:[#allocation2 + $0x100] sm:$0xf] %vm189_vm3, %v7586_v37  ;;  %v930_v37 = vor.u32 %v929_v53, %v925_v26  ;;  %v969_v53 = vrot.slane %v7768_v11, 4  ;;  %v7834_v24 = vshll.u32 %v7801_v47, 16  ;;  %v960_v17 = vor.u32 %v959_v63, %v955_v0 }
 0x121   :  { %12502 = vst [vmem:[#allocation204_spill] sm:$0xff] %v7765_v16 }
 0x122   :  { %12503 = vst [vmem:[#allocation205_spill] sm:$0xff] %v7768_v11  ;;  %v102_v11 = vld [vmem:[%s11733_s0 + $0x260] sm:$0xff] }
 0x123   :  { %255 = vst.msk [vmem:[#allocation2 + $0x104] sm:$0xf] %vm189_vm3, %v7637_v51  ;;  %v951_v51 = vrot.slane %v950_v31, 4  ;;  %v7806_v31 = vshll.u32 %v7775_v61, 16 }
 0x124   :  { %12504 = vst [vmem:[#allocation206_spill] sm:$0xff] %v7775_v61 }
 0x125   :  { %253 = vst.msk [vmem:[#allocation2 + $0xfc] sm:$0xf] %vm189_vm3, %v7591_v40  ;;  %v7795_v40 = vpack.c.bf16 %v99_v49, %v99_v49  ;;  %v931_v49 = vrot.slane %v930_v37, 4  ;;  %v956_v55 = vsel %vm6479_vm2, %v951_v51, %v955_v0  ;;  %v995_v0 = vrot.slane %v7834_v24, 5 }
 0x126   :  { %12506 = vst [vmem:[#allocation207_spill] sm:$0xff] %v7789_v50  ;;  %v7837_v50 = vshrl.u32 %v7801_v47, 16  ;;  %1196 = vrot.lane.b32.xlu1 %v956_v55, %s6380_s19 }
 0x127   :  { %1323 = vst.msk [vmem:[#allocation2 + $0x5c] sm:$0xf] %vm1299_vm4, %v1109_v13  ;;  %v1105_v13 = vpop.permute.xlu0 %1104  ;;  %v7820_v26 = vshll.u32 %v7795_v40, 16  ;;  %v7823_v37 = vshrl.u32 %v7795_v40, 16 }
 0x128   :  { %12507 = vst [vmem:[#allocation208_spill] sm:$0xff] %v7795_v40  ;;  %v999_v63 = vrot.slane %v7837_v50, 4 }
 0x129   :  { %257 = vst.msk [vmem:[#allocation2 + $0x10c] sm:$0xf] %vm189_vm3, %v7656_v21  ;;  %v1005_v55 = vrot.slane %v7820_v26, 5 }
 0x12a   :  { %12508 = vst [vmem:[#allocation209_spill] sm:$0xff] %v7801_v47 }
 0x12b   :  { %1322 = vst.msk [vmem:[#allocation2 + $0x58] sm:$0xf] %vm1299_vm4, %v1107_v44  ;;  %v980_v44 = vor.u32 %v979_v60, %v12077_v27  ;;  %v12513_v60 = vrot.slane %v7765_v16, 5 }
 0x12c   :  { %12509 = vst [vmem:[#allocation210_spill] sm:$0xff] %v7806_v31 }
 0x12d   :  { %1321 = vst.msk [vmem:[#allocation2 + $0x54] sm:$0xf] %vm1299_vm4, %v1105_v13  ;;  %v12512_v13 = vrot.slane %v7683_v59, 5  ;;  %v970_v27 = vor.u32 %v969_v53, %v12513_v60  ;;  %v12516_v53 = vrot.slane %v7696_v6, 5  ;;  %v7854_v59 = vpack.c.bf16 %v100_v46, %v100_v46 }
 0x12e   :  { %258 = vst.msk [vmem:[#allocation2 + $0x110] sm:$0xf] %vm189_vm3, %v7716_v35  ;;  %v7864_v6 = vpack.c.bf16 %v102_v11, %v102_v11  ;;  %v1113_v35 = vpop.permute.xlu1 %1112 }
 0x12f   :  { %12510 = vst [vmem:[#allocation211_spill] sm:$0xff] %v7820_v26  ;;  %v946_v51 = vsel %vm6479_vm2, %v941_v62, %v12512_v13  ;;  %v985_v62 = vrot.slane %v7806_v31, 5  ;;  %v101_v13 = vld [vmem:[%s11733_s0 + $0x258] sm:$0xff]  ;;  %v936_v60 = vsel %vm6479_vm2, %v931_v49, %v12516_v53  ;;  %v981_v31 = vrot.slane %v980_v44, 4  ;;  %v1111_v44 = vpop.permute.xlu0 %1110  ;;  %v1127_v26 = vpop.permute.xlu2 %1126 }
 0x130   :  { %12511 = vst [vmem:[#allocation212_spill] sm:$0xff] %v7823_v37  ;;  %1194 = vrot.lane.b32.xlu0 %v946_v51, %s6380_s19  ;;  %v971_v49 = vrot.slane %v970_v27, 4  ;;  %v7870_v46 = vpack.c.bf16 %v101_v13, %v101_v13  ;;  %1192 = vrot.lane.b32.xlu2 %v936_v60, %s6380_s19  ;;  %v7876_v11 = vshll.u32 %v7854_v59, 16  ;;  %v961_v27 = vrot.slane %v960_v17, 4 }
 0x131   :  { %256 = vst.msk [vmem:[#allocation2 + $0x108] sm:$0xf] %vm189_vm3, %v7662_v9  ;;  %v986_v53 = vsel %vm6479_vm2, %v981_v31, %v985_v62  ;;  %v7886_v60 = vshrl.u32 %v7864_v6, 16 }
 0x132   :  { %12514 = vst [vmem:[#allocation213_spill] sm:$0xff] %v7834_v24  ;;  %v7898_v31 = vshll.u32 %v7870_v46, 16  ;;  %1202 = vrot.lane.b32.xlu1 %v986_v53, %s6380_s19  ;;  %v7914_v24 = vshrl.u32 %v7854_v59, 16 }
 0x133   :  { %12515 = vst [vmem:[#allocation214_spill] sm:$0xff] %v7837_v50 }
 0x134   :  { %1326 = vst.msk [vmem:[#allocation2 + $0x68] sm:$0xf] %vm1299_vm4, %v1115_v10  ;;  %v7857_v10 = vshrl.u32 %v7775_v61, 16 }
 0x135   :  { %260 = vst.msk [vmem:[#allocation2 + $0x118] sm:$0xf] %vm189_vm3, %v7726_v30  ;;  %v1009_v30 = vrot.slane %v7823_v37, 4  ;;  %v1000_v37 = vor.u32 %v999_v63, %v995_v0  ;;  %v12527_v63 = vrot.slane %v7765_v16, 5 }
 0x136   :  { %12517 = vst [vmem:[#allocation215_spill] sm:$0xff] %v7854_v59  ;;  %v989_v51 = vrot.slane %v7857_v10, 4 }
 0x137   :  { %12518 = vst [vmem:[#allocation216_spill] sm:$0xff] %v7857_v10  ;;  %v1010_v13 = vor.u32 %v1009_v30, %v1005_v55  ;;  %v103_v30 = vld [vmem:[%s11733_s0 + $0x268] sm:$0xff]  ;;  %v1001_v16 = vrot.slane %v1000_v37, 4  ;;  %v1019_v37 = vrot.slane %v7914_v24, 4 }
 0x138   :  { %261 = vst.msk [vmem:[#allocation2 + $0x11c] sm:$0xf] %vm189_vm3, %v7775_v61  ;;  %v990_v10 = vor.u32 %v989_v51, %v985_v62  ;;  %v7918_v53 = vpack.c.bf16 %v103_v30, %v103_v30  ;;  %v1025_v62 = vrot.slane %v7898_v31, 5  ;;  %v104_v51 = vld [vmem:[%s11733_s0 + $0x270] sm:$0xff] }
 0x139   :  { %12519 = vst [vmem:[#allocation217_spill] sm:$0xff] %v7864_v6  ;;  %v1011_v50 = vrot.slane %v1010_v13, 4 }
 0x13a   :  { %259 = vst.msk [vmem:[#allocation2 + $0x114] sm:$0xf] %vm189_vm3, %v7732_v54  ;;  %v991_v13 = vrot.slane %v990_v10, 4  ;;  %v7951_v10 = vshrl.u32 %v7918_v53, 16 }
 0x13b   :  { %12520 = vst [vmem:[#allocation218_spill] sm:$0xff] %v7870_v46 }
 0x13c   :  { %1325 = vst.msk [vmem:[#allocation2 + $0x64] sm:$0xf] %vm1299_vm4, %v1113_v35  ;;  %v7883_v35 = vshll.u32 %v7864_v6, 16 }
 0x13d   :  { %1324 = vst.msk [vmem:[#allocation2 + $0x60] sm:$0xf] %vm1299_vm4, %v1111_v44  ;;  %v12524_v44 = vrot.slane %v7751_v52, 5  ;;  %v1039_v52 = vrot.slane %v7886_v60, 4 }
 0x13e   :  { %12521 = vst [vmem:[#allocation219_spill] sm:$0xff] %v7876_v11 }
 0x13f   :  { %1329 = vst.msk [vmem:[#allocation2 + $0x74] sm:$0xf] %vm1299_vm4, %v1121_v19  ;;  %v976_v17 = vsel %vm6479_vm2, %v971_v49, %v12524_v44  ;;  %v7901_v19 = vshrl.u32 %v7870_v46, 16  ;;  %v1015_v49 = vrot.slane %v7876_v11, 5  ;;  %v966_v44 = vsel %vm6479_vm2, %v961_v27, %v12527_v63 }
 0x140   :  { %12522 = vst [vmem:[#allocation220_spill] sm:$0xff] %v7883_v35  ;;  %1200 = vrot.lane.b32.xlu0 %v976_v17, %s6380_s19  ;;  %v1035_v11 = vrot.slane %v7883_v35, 5  ;;  %1198 = vrot.lane.b32.xlu2 %v966_v44, %s6380_s19  ;;  %v7936_v63 = vshll.u32 %v7918_v53, 16  ;;  %v1133_v35 = vpop.permute.xlu2 %1132  ;;  %v1006_v44 = vsel %vm6479_vm2, %v1001_v16, %v1005_v55 }
 0x141   :  { %12523 = vst [vmem:[#allocation221_spill] sm:$0xff] %v7886_v60  ;;  %v1029_v27 = vrot.slane %v7901_v19, 4  ;;  %v1016_v17 = vsel %vm6479_vm2, %v1011_v50, %v1015_v49  ;;  %v1020_v50 = vor.u32 %v1019_v37, %v1015_v49  ;;  %v12547_v60 = vld [vmem:[#allocation71_spill] sm:$0xff] }
 0x142   :  { %263 = vst.msk [vmem:[#allocation2 + $0x124] sm:$0xf] %vm189_vm3, %v7795_v40  ;;  %v1119_v40 = vpop.permute.xlu1 %1118  ;;  %v1040_v30 = vor.u32 %v1039_v52, %v1035_v11  ;;  %1208 = vrot.lane.b32.xlu1 %v1016_v17, %s6380_s19  ;;  %v996_v52 = vsel %vm6479_vm2, %v991_v13, %v995_v0  ;;  %v1045_v16 = vrot.slane %v7936_v63, 5  ;;  %v1049_v13 = vrot.slane %v7951_v10, 4 }
 0x143   :  { %12525 = vst [vmem:[#allocation222_spill] sm:$0xff] %v7898_v31  ;;  %v1021_v49 = vrot.slane %v1020_v50, 4  ;;  %v12551_v31 = vld [vmem:[#allocation80_spill] sm:$0xff] }
 0x144   :  { %12526 = vst [vmem:[#allocation223_spill] sm:$0xff] %v7901_v19  ;;  %v1050_v50 = vor.u32 %v1049_v13, %v1045_v16 }
 0x145   :  { %264 = vst.msk [vmem:[#allocation2 + $0x128] sm:$0xf] %vm189_vm3, %v7854_v59 }
 0x146   :  { %262 = vst.msk [vmem:[#allocation2 + $0x120] sm:$0xf] %vm189_vm3, %v7801_v47 }
 0x147   :  { %12528 = vst [vmem:[#allocation224_spill] sm:$0xff] %v7914_v24 }
 0x148   :  { %1332 = vst.msk [vmem:[#allocation2 + $0x80] sm:$0xf] %vm1299_vm4, %v1127_v26  ;;  %v1117_v26 = vpop.permute.xlu0 %1116  ;;  %1206 = vrot.lane.b32.xlu0 %v1006_v44, %s6380_s19  ;;  %1204 = vrot.lane.b32.xlu2 %v996_v52, %s6380_s19  ;;  %v1026_v52 = vsel %vm6479_vm2, %v1021_v49, %v1025_v62  ;;  %v1467_v49 = vrot.slane %v6429_v2, 5 }
 0x149   :  { %12529 = vst [vmem:[#allocation225_spill] sm:$0xff] %v7918_v53 }
 0x14a   :  { %266 = vst.msk [vmem:[#allocation2 + $0x130] sm:$0xf] %vm189_vm3, %v7864_v6 }
 0x14b   :  { %1328 = vst.msk [vmem:[#allocation2 + $0x70] sm:$0xf] %vm1299_vm4, %v1119_v40  ;;  %v7940_v40 = vpack.c.bf16 %v104_v51, %v104_v51  ;;  %v1041_v51 = vrot.slane %v1040_v30, 4 }
 0x14c   :  { %1327 = vst.msk [vmem:[#allocation2 + $0x6c] sm:$0xf] %vm1299_vm4, %v1117_v26  ;;  %v1030_v26 = vor.u32 %v1029_v27, %v1025_v62  ;;  %v1051_v62 = vrot.slane %v1050_v50, 4 }
 0x14d   :  { %12530 = vst [vmem:[#allocation226_spill] sm:$0xff] %v7936_v63  ;;  %v7956_v55 = vshll.u32 %v7940_v40, 16  ;;  %v7959_v27 = vshrl.u32 %v7940_v40, 16  ;;  %v1046_v37 = vsel %vm6479_vm2, %v1041_v51, %v1045_v16  ;;  %v1139_v63 = vpop.permute.xlu2 %1138  ;;  %v6110_v51 = vrot.slane %v6442_v7, 9 }
 0x14e   :  { %267 = vst.msk [vmem:[#allocation2 + $0x134] sm:$0xf] %vm189_vm3, %v7918_v53  ;;  %v1031_v17 = vrot.slane %v1030_v26, 4  ;;  %1214 = vrot.lane.b32.xlu1 %v1046_v37, %s6380_s19  ;;  %v12537_v37 = vld [vmem:[#allocation6_spill] sm:$0xff] }
 0x14f   :  { %12531 = vst [vmem:[#allocation227_spill] sm:$0xff] %v7940_v40  ;;  %v1055_v30 = vrot.slane %v7956_v55, 5  ;;  %v1059_v44 = vrot.slane %v7959_v27, 4 }
 0x150   :  { %265 = vst.msk [vmem:[#allocation2 + $0x12c] sm:$0xf] %vm189_vm3, %v7870_v46  ;;  %v1123_v0 = vpop.permute.xlu0 %1122  ;;  %v1036_v26 = vsel %vm6479_vm2, %v1031_v17, %v1035_v11  ;;  %1210 = vrot.lane.b32.xlu2 %v1026_v52, %s6380_s19  ;;  %v1469_v52 = vrot.slane %v1467_v49, 4  ;;  %vm3077_vm3 = vcmask 1045508  }
 0x151   :  { %1335 = vst.msk [vmem:[#allocation2 + $0x8c] sm:$0xf] %vm1299_vm4, %v1133_v35  ;;  %v1125_v35 = vpop.permute.xlu1 %1124  ;;  %1212 = vrot.lane.b32.xlu0 %v1036_v26, %s6380_s19 }
 0x152   :  { %12532 = vst [vmem:[#allocation228_spill] sm:$0xff] %v7951_v10 }
 0x153   :  { %12533 = vst [vmem:[#allocation229_spill] sm:$0xff] %v7956_v55 }
 0x154   :  { %12534 = vst [vmem:[#allocation230_spill] sm:$0xff] %v7959_v27 }
 0x155   :  { %1331 = vst.msk [vmem:[#allocation2 + $0x7c] sm:$0xf] %vm1299_vm4, %v1125_v35  ;;  %v1464_v35 = vrot.slane %v6444_v8, 5  ;;  %v1470_v8 = vrot.slane %v6431_v3, 5  ;;  %v1145_v17 = vpop.permute.xlu2 %1144  ;;  %v12556_v3 = vld [vmem:[#allocation91_spill] sm:$0xff] }
 0x156   :  { %1330 = vst.msk [vmem:[#allocation2 + $0x78] sm:$0xf] %vm1299_vm4, %v1123_v0  ;;  %v1060_v0 = vor.u32 %v1059_v44, %v1055_v30  ;;  %v1473_v44 = vrot.slane %v12537_v37, 5 }
 0x157   :  { %1338 = vst.msk [vmem:[#allocation2 + $0x98] sm:$0xf] %vm1299_vm4, %v1139_v63  ;;  %v1465_v7 = vsel %vm7979_vm7, %v6110_v51, %v1464_v35  ;;  %v1472_v13 = vrot.slane %v1470_v8, 4  ;;  %v1466_v51 = vrot.slane %v1464_v35, 4 }
 0x158   :  { %v1129_v63 = vpop.permute.xlu0 %1128  ;;  %v1061_v16 = vrot.slane %v1060_v0, 4  ;;  %1341 = vst.msk [vmem:[#allocation2 + $0xa4] sm:$0xf] %vm1299_vm4, %v1145_v17  ;;  %1698 = vrot.lane.b32.xlu1 %v1465_v7, %s6381_s17  ;;  %v1482_v17 = vrot.slane %v6476_v28, 5  ;;  %v12540_v28 = vld [vmem:[#allocation24_spill] sm:$0xff] }
 0x159   :  { %v1131_v10 = vpop.permute.xlu1 %1130  ;;  %1333 = vst.msk [vmem:[#allocation2 + $0x84] sm:$0xf] %vm1299_vm4, %v1129_v63  ;;  %v8001_v0 = vsel %vm7979_vm7, %v1472_v13, %v1473_v44  ;;  %v8006_v63 = vsel %vm7979_vm7, %v1469_v52, %v1470_v8  ;;  %v1468_v35 = vsel %vm7979_vm7, %v1466_v51, %v1467_v49  ;;  %v1488_v49 = vrot.slane %v6528_v58, 5 }
 0x15a   :  { %1334 = vst.msk [vmem:[#allocation2 + $0x88] sm:$0xf] %vm1299_vm4, %v1131_v10  ;;  %v1056_v10 = vsel %vm6479_vm2, %v1051_v62, %v1055_v30  ;;  %1218 = vrot.lane.b32.xlu0 %v1061_v16, %s6380_s19  ;;  %v12538_v62 = vld [vmem:[#allocation15_spill] sm:$0xff]  ;;  %v1481_v16 = vrot.slane %v1479_v29, 4  ;;  %vm3076_vm2 = vcmask 1041408  }
 0x15b   :  { %1216 = vrot.lane.b32.xlu2 %v1056_v10, %s6380_s19  ;;  %v1476_v7 = vrot.slane %v12538_v62, 5  ;;  %v12544_v62 = vld [vmem:[#allocation53_spill] sm:$0xff]  ;;  %269 = vst.msk [vmem:[#allocation2 + $0x138] sm:$0x7] %vm268_vm8, %v7940_v40  ;;  %s6382_s19 = smov 12   ;;  %vm3882_vm8 = vcmask 224448  }
 0x15c   :  { %v8022_v52 = vsel %vm7979_vm7, %v1481_v16, %v1482_v17  ;;  %v1491_v16 = vrot.slane %v6526_v57, 5 }
 0x15d   :  { %v1151_v30 = vpop.permute.xlu2 %1150  ;;  %v1478_v13 = vrot.slane %v1476_v7, 4 }
 0x15e   :  { %1344 = vst.msk [vmem:[#allocation2 + $0xb0] sm:$0xf] %vm1299_vm4, %v1151_v30  ;;  %v1485_v30 = vrot.slane %v6512_v48, 5 }
 0x15f   :  { %v8027_v51 = vsel %vm7979_vm7, %v1478_v13, %v1479_v29 }
 0x160   :  { %v1135_v50 = vpop.permute.xlu0 %1134  ;;  %1704 = vrot.lane.b32.xlu1 %v8001_v0, %s6381_s17  ;;  %v1487_v29 = vrot.slane %v1485_v30, 4 }
 0x161   :  { %v1137_v26 = vpop.permute.xlu1 %1136  ;;  %1336 = vst.msk [vmem:[#allocation2 + $0x90] sm:$0xf] %vm1299_vm4, %v1135_v50 }
 0x162   :  { %1337 = vst.msk [vmem:[#allocation2 + $0x94] sm:$0xf] %vm1299_vm4, %v1137_v26  ;;  %1702 = vrot.lane.b32.xlu0 %v8006_v63, %s6381_s17  ;;  %v1475_v26 = vrot.slane %v1473_v44, 4  ;;  %v8051_v57 = vsel %vm7979_vm7, %v1487_v29, %v1488_v49 }
 0x163   :  { %1700 = vrot.lane.b32.xlu2 %v1468_v35, %s6381_s17  ;;  %v1490_v35 = vrot.slane %v1488_v49, 4 }
 0x164   :  { %v8035_v44 = vsel %vm7979_vm7, %v1475_v26, %v1476_v7  ;;  %v12539_v26 = vld [vmem:[#allocation28_spill] sm:$0xff] }
 0x165   :  { %v1157_v50 = vpop.permute.xlu2 %1156  ;;  %v8046_v7 = vsel %vm7979_vm7, %v1490_v35, %v1491_v16 }
 0x166   :  { %1347 = vst.msk [vmem:[#allocation2 + $0xbc] sm:$0xf] %vm1299_vm4, %v1157_v50  ;;  %v1497_v50 = vrot.slane %v12539_v26, 5 }
 0x168   :  { %v1141_v8 = vpop.permute.xlu0 %1140  ;;  %1710 = vrot.lane.b32.xlu1 %v8022_v52, %s6381_s17  ;;  %v1499_v35 = vrot.slane %v1497_v50, 4 }
 0x169   :  { %v1143_v10 = vpop.permute.xlu1 %1142  ;;  %1339 = vst.msk [vmem:[#allocation2 + $0x9c] sm:$0xf] %vm1299_vm4, %v1141_v8  ;;  %v1484_v8 = vrot.slane %v1482_v17, 4 }
 0x16a   :  { %1340 = vst.msk [vmem:[#allocation2 + $0xa0] sm:$0xf] %vm1299_vm4, %v1143_v10  ;;  %1708 = vrot.lane.b32.xlu0 %v8027_v51, %s6381_s17 }
 0x16b   :  { %1706 = vrot.lane.b32.xlu2 %v8035_v44, %s6381_s17  ;;  %v8059_v17 = vsel %vm7979_vm7, %v1484_v8, %v1485_v30  ;;  %v1506_v8 = vrot.slane %v6630_v41, 5 }
 0x16d   :  { %v1163_v58 = vpop.permute.xlu2 %1162 }
 0x16e   :  { %1350 = vst.msk [vmem:[#allocation2 + $0xc8] sm:$0xf] %vm1299_vm4, %v1163_v58  ;;  %v1493_v58 = vrot.slane %v1491_v16, 4 }
 0x170   :  { %v1147_v13 = vpop.permute.xlu0 %1146  ;;  %1716 = vrot.lane.b32.xlu1 %v8046_v7, %s6381_s17 }
 0x171   :  { %v1149_v10 = vpop.permute.xlu1 %1148  ;;  %1342 = vst.msk [vmem:[#allocation2 + $0xa8] sm:$0xf] %vm1299_vm4, %v1147_v13  ;;  %v12541_v13 = vld [vmem:[#allocation27_spill] sm:$0xff] }
 0x172   :  { %1343 = vst.msk [vmem:[#allocation2 + $0xac] sm:$0xf] %vm1299_vm4, %v1149_v10  ;;  %v1494_v10 = vrot.slane %v12540_v28, 5  ;;  %1714 = vrot.lane.b32.xlu0 %v8051_v57, %s6381_s17  ;;  %v1500_v26 = vrot.slane %v12541_v13, 5 }
 0x173   :  { %1712 = vrot.lane.b32.xlu2 %v8059_v17, %s6381_s17 }
 0x174   :  { %v1496_v49 = vrot.slane %v1494_v10, 4  ;;  %v8070_v30 = vsel %vm7979_vm7, %v1499_v35, %v1500_v26  ;;  %v8083_v16 = vsel %vm7979_vm7, %v1493_v58, %v1494_v10  ;;  %v1508_v35 = vrot.slane %v1506_v8, 4 }
 0x175   :  { %v1169_v28 = vpop.permute.xlu2 %1168  ;;  %v1515_v58 = vrot.slane %v6678_v43, 5 }
 0x176   :  { %v8075_v13 = vsel %vm7979_vm7, %v1496_v49, %v1497_v50  ;;  %1353 = vst.msk [vmem:[#allocation2 + $0xd4] sm:$0xf] %vm1299_vm4, %v1169_v28  ;;  %v1502_v28 = vrot.slane %v1500_v26, 4 }
 0x178   :  { %v1153_v29 = vpop.permute.xlu0 %1152  ;;  %1722 = vrot.lane.b32.xlu1 %v8070_v30, %s6381_s17 }
 0x179   :  { %v1155_v48 = vpop.permute.xlu1 %1154  ;;  %1345 = vst.msk [vmem:[#allocation2 + $0xb4] sm:$0xf] %vm1299_vm4, %v1153_v29  ;;  %v1509_v29 = vrot.slane %v6628_v32, 5 }
 0x17a   :  { %1346 = vst.msk [vmem:[#allocation2 + $0xb8] sm:$0xf] %vm1299_vm4, %v1155_v48  ;;  %v1503_v48 = vrot.slane %v6614_v14, 5  ;;  %1720 = vrot.lane.b32.xlu0 %v8075_v13, %s6381_s17 }
 0x17b   :  { %1718 = vrot.lane.b32.xlu2 %v8083_v16, %s6381_s17  ;;  %v8094_v10 = vsel %vm7979_vm7, %v1508_v35, %v1509_v29  ;;  %v1517_v35 = vrot.slane %v1515_v58, 4 }
 0x17c   :  { %v1505_v50 = vrot.slane %v1503_v48, 4  ;;  %v8107_v26 = vsel %vm7979_vm7, %v1502_v28, %v1503_v48  ;;  %v12543_v28 = vld [vmem:[#allocation56_spill] sm:$0xff] }
 0x17d   :  { %v1175_v14 = vpop.permute.xlu2 %1174 }
 0x17e   :  { %v8099_v32 = vsel %vm7979_vm7, %v1505_v50, %v1506_v8  ;;  %1356 = vst.msk [vmem:[#allocation2 + $0xe0] sm:$0xf] %vm1299_vm4, %v1175_v14  ;;  %v1511_v14 = vrot.slane %v1509_v29, 4 }
 0x180   :  { %v1159_v49 = vpop.permute.xlu0 %1158  ;;  %1728 = vrot.lane.b32.xlu1 %v8094_v10, %s6381_s17 }
 0x181   :  { %v1161_v41 = vpop.permute.xlu1 %1160  ;;  %1348 = vst.msk [vmem:[#allocation2 + $0xc0] sm:$0xf] %vm1299_vm4, %v1159_v49  ;;  %v12542_v49 = vld [vmem:[#allocation45_spill] sm:$0xff] }
 0x182   :  { %1349 = vst.msk [vmem:[#allocation2 + $0xc4] sm:$0xf] %vm1299_vm4, %v1161_v41  ;;  %v1512_v41 = vrot.slane %v6669_v36, 5  ;;  %1726 = vrot.lane.b32.xlu0 %v8099_v32, %s6381_s17  ;;  %v1518_v43 = vrot.slane %v12542_v49, 5  ;;  %v1524_v36 = vrot.slane %v12543_v28, 5 }
 0x183   :  { %1724 = vrot.lane.b32.xlu2 %v8107_v26, %s6381_s17 }
 0x184   :  { %v1514_v8 = vrot.slane %v1512_v41, 4  ;;  %v8118_v48 = vsel %vm7979_vm7, %v1517_v35, %v1518_v43  ;;  %v8131_v29 = vsel %vm7979_vm7, %v1511_v14, %v1512_v41  ;;  %v1526_v35 = vrot.slane %v1524_v36, 4 }
 0x185   :  { %v1181_v37 = vpop.permute.xlu2 %1180  ;;  %v1533_v14 = vrot.slane %v6777_v23, 5 }
 0x186   :  { %v8123_v49 = vsel %vm7979_vm7, %v1514_v8, %v1515_v58  ;;  %1359 = vst.msk [vmem:[#allocation2 + $0xec] sm:$0xf] %vm1299_vm4, %v1181_v37  ;;  %v1520_v37 = vrot.slane %v1518_v43, 4 }
 0x188   :  { %v1165_v50 = vpop.permute.xlu0 %1164  ;;  %1734 = vrot.lane.b32.xlu1 %v8118_v48, %s6381_s17 }
 0x189   :  { %v1167_v33 = vpop.permute.xlu1 %1166  ;;  %1351 = vst.msk [vmem:[#allocation2 + $0xcc] sm:$0xf] %vm1299_vm4, %v1165_v50  ;;  %v1527_v50 = vrot.slane %v6725_v42, 5 }
 0x18a   :  { %1352 = vst.msk [vmem:[#allocation2 + $0xd0] sm:$0xf] %vm1299_vm4, %v1167_v33  ;;  %v1521_v33 = vrot.slane %v12544_v62, 5  ;;  %1732 = vrot.lane.b32.xlu0 %v8123_v49, %s6381_s17 }
 0x18b   :  { %1730 = vrot.lane.b32.xlu2 %v8131_v29, %s6381_s17  ;;  %v8142_v41 = vsel %vm7979_vm7, %v1526_v35, %v1527_v50  ;;  %v1535_v35 = vrot.slane %v1533_v14, 4 }
 0x18c   :  { %v1523_v58 = vrot.slane %v1521_v33, 4  ;;  %v8155_v43 = vsel %vm7979_vm7, %v1520_v37, %v1521_v33  ;;  %v12546_v37 = vld [vmem:[#allocation74_spill] sm:$0xff] }
 0x18d   :  { %v1187_v62 = vpop.permute.xlu2 %1186 }
 0x18e   :  { %v8147_v42 = vsel %vm7979_vm7, %v1523_v58, %v1524_v36  ;;  %1362 = vst.msk [vmem:[#allocation2 + $0xf8] sm:$0xf] %vm1299_vm4, %v1187_v62  ;;  %v1529_v62 = vrot.slane %v1527_v50, 4 }
 0x190   :  { %v1171_v8 = vpop.permute.xlu0 %1170  ;;  %1740 = vrot.lane.b32.xlu1 %v8142_v41, %s6381_s17 }
 0x191   :  { %v1173_v28 = vpop.permute.xlu1 %1172  ;;  %1354 = vst.msk [vmem:[#allocation2 + $0xd8] sm:$0xf] %vm1299_vm4, %v1171_v8  ;;  %v12545_v8 = vld [vmem:[#allocation64_spill] sm:$0xff] }
 0x192   :  { %1355 = vst.msk [vmem:[#allocation2 + $0xdc] sm:$0xf] %vm1299_vm4, %v1173_v28  ;;  %v1530_v28 = vrot.slane %v6765_v45, 5  ;;  %1738 = vrot.lane.b32.xlu0 %v8147_v42, %s6381_s17  ;;  %v1536_v23 = vrot.slane %v12545_v8, 5  ;;  %v1542_v45 = vrot.slane %v12546_v37, 5 }
 0x193   :  { %1736 = vrot.lane.b32.xlu2 %v8155_v43, %s6381_s17 }
 0x194   :  { %v1532_v36 = vrot.slane %v1530_v28, 4  ;;  %v8166_v33 = vsel %vm7979_vm7, %v1535_v35, %v1536_v23  ;;  %v8179_v50 = vsel %vm7979_vm7, %v1529_v62, %v1530_v28  ;;  %v1544_v35 = vrot.slane %v1542_v45, 4 }
 0x195   :  { %v1193_v27 = vpop.permute.xlu2 %1192  ;;  %v1551_v62 = vrot.slane %v6873_v1, 5 }
 0x196   :  { %v8171_v8 = vsel %vm7979_vm7, %v1532_v36, %v1533_v14  ;;  %1365 = vst.msk [vmem:[#allocation2 + $0x104] sm:$0xf] %vm1299_vm4, %v1193_v27  ;;  %v1538_v27 = vrot.slane %v1536_v23, 4 }
 0x198   :  { %v1177_v58 = vpop.permute.xlu0 %1176  ;;  %1746 = vrot.lane.b32.xlu1 %v8166_v33, %s6381_s17 }
 0x199   :  { %v1179_v55 = vpop.permute.xlu1 %1178  ;;  %1357 = vst.msk [vmem:[#allocation2 + $0xe4] sm:$0xf] %vm1299_vm4, %v1177_v58  ;;  %v12548_v58 = vld [vmem:[#allocation73_spill] sm:$0xff] }
 0x19a   :  { %1358 = vst.msk [vmem:[#allocation2 + $0xe8] sm:$0xf] %vm1299_vm4, %v1179_v55  ;;  %v1539_v55 = vrot.slane %v12547_v60, 5  ;;  %1744 = vrot.lane.b32.xlu0 %v8171_v8, %s6381_s17  ;;  %v1545_v37 = vrot.slane %v12548_v58, 5 }
 0x19b   :  { %1742 = vrot.lane.b32.xlu2 %v8179_v50, %s6381_s17 }
 0x19c   :  { %v1541_v14 = vrot.slane %v1539_v55, 4  ;;  %v8190_v28 = vsel %vm7979_vm7, %v1544_v35, %v1545_v37  ;;  %v8203_v23 = vsel %vm7979_vm7, %v1538_v27, %v1539_v55  ;;  %v1553_v35 = vrot.slane %v1551_v62, 4  ;;  %v12554_v27 = vld [vmem:[#allocation92_spill] sm:$0xff] }
 0x19d   :  { %12549 = vst [vmem:[#allocation231_spill] sm:$0xff] %v8190_v28  ;;  %v1199_v60 = vpop.permute.xlu2 %1198 }
 0x19e   :  { %v8195_v58 = vsel %vm7979_vm7, %v1541_v14, %v1542_v45  ;;  %1368 = vst.msk [vmem:[#allocation2 + $0x110] sm:$0xf] %vm1299_vm4, %v1199_v60  ;;  %v1547_v60 = vrot.slane %v1545_v37, 4 }
 0x19f   :  { %12550 = vst [vmem:[#allocation232_spill] sm:$0xff] %v8195_v58 }
 0x1a0   :  { %v1183_v36 = vpop.permute.xlu0 %1182  ;;  %1752 = vrot.lane.b32.xlu1 %v8190_v28, %s6381_s17 }
 0x1a1   :  { %v1185_v24 = vpop.permute.xlu1 %1184  ;;  %1360 = vst.msk [vmem:[#allocation2 + $0xf0] sm:$0xf] %vm1299_vm4, %v1183_v36  ;;  %v12552_v36 = vld [vmem:[#allocation82_spill] sm:$0xff] }
 0x1a2   :  { %1361 = vst.msk [vmem:[#allocation2 + $0xf4] sm:$0xf] %vm1299_vm4, %v1185_v24  ;;  %v1548_v24 = vrot.slane %v12551_v31, 5  ;;  %1750 = vrot.lane.b32.xlu0 %v8195_v58, %s6381_s17  ;;  %v1554_v1 = vrot.slane %v12552_v36, 5  ;;  %v1560_v31 = vrot.slane %v12554_v27, 5 }
 0x1a3   :  { %1748 = vrot.lane.b32.xlu2 %v8203_v23, %s6381_s17 }
 0x1a4   :  { %v1550_v45 = vrot.slane %v1548_v24, 4  ;;  %v8214_v55 = vsel %vm7979_vm7, %v1553_v35, %v1554_v1  ;;  %v8227_v37 = vsel %vm7979_vm7, %v1547_v60, %v1548_v24  ;;  %v1562_v35 = vrot.slane %v1560_v31, 4  ;;  %v12558_v60 = vld [vmem:[#allocation101_spill] sm:$0xff] }
 0x1a5   :  { %12553 = vst [vmem:[#allocation233_spill] sm:$0xff] %v8214_v55  ;;  %v1205_v2 = vpop.permute.xlu2 %1204 }
 0x1a6   :  { %v8219_v36 = vsel %vm7979_vm7, %v1550_v45, %v1551_v62  ;;  %1371 = vst.msk [vmem:[#allocation2 + $0x11c] sm:$0xf] %vm1299_vm4, %v1205_v2  ;;  %v1556_v2 = vrot.slane %v1554_v1, 4 }
 0x1a7   :  { %12555 = vst [vmem:[#allocation234_spill] sm:$0xff] %v8219_v36 }
 0x1a8   :  { %v1189_v14 = vpop.permute.xlu0 %1188  ;;  %1758 = vrot.lane.b32.xlu1 %v8214_v55, %s6381_s17 }
 0x1a9   :  { %v1191_v19 = vpop.permute.xlu1 %1190  ;;  %1363 = vst.msk [vmem:[#allocation2 + $0xfc] sm:$0xf] %vm1299_vm4, %v1189_v14  ;;  %v12557_v14 = vld [vmem:[#allocation89_spill] sm:$0xff] }
 0x1aa   :  { %1364 = vst.msk [vmem:[#allocation2 + $0x100] sm:$0xf] %vm1299_vm4, %v1191_v19  ;;  %v1557_v19 = vrot.slane %v12556_v3, 5  ;;  %1756 = vrot.lane.b32.xlu0 %v8219_v36, %s6381_s17  ;;  %v1563_v27 = vrot.slane %v12557_v14, 5  ;;  %v1569_v3 = vrot.slane %v12558_v60, 5  ;;  %v12560_v14 = vld [vmem:[#allocation98_spill] sm:$0xff] }
 0x1ab   :  { %1754 = vrot.lane.b32.xlu2 %v8227_v37, %s6381_s17  ;;  %v1566_v55 = vrot.slane %v12560_v14, 5 }
 0x1ac   :  { %v1559_v62 = vrot.slane %v1557_v19, 4  ;;  %v8238_v24 = vsel %vm7979_vm7, %v1562_v35, %v1563_v27  ;;  %v8252_v1 = vsel %vm7979_vm7, %v1556_v2, %v1557_v19  ;;  %v1571_v35 = vrot.slane %v1569_v3, 4 }
 0x1ad   :  { %v1211_v36 = vpop.permute.xlu2 %1210  ;;  %v1578_v2 = vrot.slane %v7017_v4, 5 }
 0x1ae   :  { %1374 = vst.msk [vmem:[#allocation2 + $0x128] sm:$0xf] %vm1299_vm4, %v1211_v36  ;;  %v1565_v36 = vrot.slane %v1563_v27, 4 }
 0x1b0   :  { %v1195_v45 = vpop.permute.xlu0 %1194  ;;  %1764 = vrot.lane.b32.xlu1 %v8238_v24, %s6381_s17  ;;  %v8276_v27 = vsel %vm7979_vm7, %v1565_v36, %v1566_v55  ;;  %v12564_v36 = vld [vmem:[#allocation118_spill] sm:$0xff] }
 0x1b1   :  { %v1197_v58 = vpop.permute.xlu1 %1196  ;;  %1366 = vst.msk [vmem:[#allocation2 + $0x108] sm:$0xf] %vm1299_vm4, %v1195_v45  ;;  %v12561_v45 = vld [vmem:[#allocation100_spill] sm:$0xff] }
 0x1b2   :  { %1367 = vst.msk [vmem:[#allocation2 + $0x10c] sm:$0xf] %vm1299_vm4, %v1197_v58  ;;  %v8244_v58 = vsel %vm7979_vm7, %v1559_v62, %v1560_v31  ;;  %v1572_v60 = vrot.slane %v12561_v45, 5  ;;  %v1568_v31 = vrot.slane %v1566_v55, 4 }
 0x1b3   :  { %12559 = vst [vmem:[#allocation235_spill] sm:$0xff] %v8244_v58  ;;  %1762 = vrot.lane.b32.xlu0 %v8244_v58, %s6381_s17  ;;  %1760 = vrot.lane.b32.xlu2 %v8252_v1, %s6381_s17 }
 0x1b4   :  { %v8263_v19 = vsel %vm7979_vm7, %v1571_v35, %v1572_v60  ;;  %v8268_v45 = vsel %vm7979_vm7, %v1568_v31, %v1569_v3  ;;  %v1580_v35 = vrot.slane %v1578_v2, 4 }
 0x1b5   :  { %12562 = vst [vmem:[#allocation236_spill] sm:$0xff] %v8263_v19  ;;  %v1217_v14 = vpop.permute.xlu2 %1216 }
 0x1b6   :  { %12563 = vst [vmem:[#allocation237_spill] sm:$0xff] %v8268_v45 }
 0x1b7   :  { %1377 = vst.msk [vmem:[#allocation2 + $0x134] sm:$0xf] %vm1299_vm4, %v1217_v14  ;;  %v1574_v14 = vrot.slane %v1572_v60, 4 }
 0x1b8   :  { %v1201_v62 = vpop.permute.xlu0 %1200  ;;  %1770 = vrot.lane.b32.xlu1 %v8263_v19, %s6381_s17 }
 0x1b9   :  { %v1203_v28 = vpop.permute.xlu1 %1202  ;;  %1369 = vst.msk [vmem:[#allocation2 + $0x114] sm:$0xf] %vm1299_vm4, %v1201_v62  ;;  %v1581_v62 = vrot.slane %v7013_v56, 5 }
 0x1ba   :  { %1370 = vst.msk [vmem:[#allocation2 + $0x118] sm:$0xf] %vm1299_vm4, %v1203_v28  ;;  %v1575_v28 = vrot.slane %v7005_v38, 5  ;;  %v1587_v38 = vrot.slane %v12564_v36, 5 }
 0x1bb   :  { %1768 = vrot.lane.b32.xlu0 %v8268_v45, %s6381_s17  ;;  %1766 = vrot.lane.b32.xlu2 %v8276_v27, %s6381_s17  ;;  %v8287_v55 = vsel %vm7979_vm7, %v1580_v35, %v1581_v62 }
 0x1bc   :  { %v1577_v3 = vrot.slane %v1575_v28, 4  ;;  %v8300_v60 = vsel %vm7979_vm7, %v1574_v14, %v1575_v28  ;;  %v1589_v35 = vrot.slane %v1587_v38, 4  ;;  %v1596_v14 = vrot.slane %v7150_v20, 5 }
 0x1bd   :  { %v1701_v45 = vpop.permute.xlu2 %1700 }
 0x1be   :  { %v8292_v56 = vsel %vm7979_vm7, %v1577_v3, %v1578_v2  ;;  %1937 = vst.msk [vmem:[#allocation2 + $0x4] sm:$0xf] %vm1935_vm9, %v1701_v45  ;;  %v1583_v45 = vrot.slane %v1581_v62, 4 }
 0x1bf   :  { %12565 = vst [vmem:[#allocation238_spill] sm:$0xff] %v8292_v56 }
 0x1c0   :  { %v1207_v31 = vpop.permute.xlu0 %1206  ;;  %1776 = vrot.lane.b32.xlu1 %v8287_v55, %s6381_s17 }
 0x1c1   :  { %v1209_v4 = vpop.permute.xlu1 %1208  ;;  %1372 = vst.msk [vmem:[#allocation2 + $0x120] sm:$0xf] %vm1299_vm4, %v1207_v31  ;;  %v12567_v31 = vld [vmem:[#allocation116_spill] sm:$0xff] }
 0x1c2   :  { %1373 = vst.msk [vmem:[#allocation2 + $0x124] sm:$0xf] %vm1299_vm4, %v1209_v4  ;;  %v12566_v4 = vld [vmem:[#allocation117_spill] sm:$0xff]  ;;  %v1590_v36 = vrot.slane %v12567_v31, 5 }
 0x1c3   :  { %v1584_v19 = vrot.slane %v12566_v4, 5  ;;  %1774 = vrot.lane.b32.xlu0 %v8292_v56, %s6381_s17  ;;  %1772 = vrot.lane.b32.xlu2 %v8300_v60, %s6381_s17  ;;  %v12570_v56 = vld [vmem:[#allocation125_spill] sm:$0xff] }
 0x1c4   :  { %v8311_v28 = vsel %vm7979_vm7, %v1589_v35, %v1590_v36  ;;  %v1598_v35 = vrot.slane %v1596_v14, 4 }
 0x1c5   :  { %v1586_v2 = vrot.slane %v1584_v19, 4  ;;  %12568 = vst [vmem:[#allocation239_spill] sm:$0xff] %v8311_v28  ;;  %v1707_v4 = vpop.permute.xlu2 %1706  ;;  %v8324_v62 = vsel %vm7979_vm7, %v1583_v45, %v1584_v19  ;;  %v1605_v45 = vrot.slane %v7219_v12, 5 }
 0x1c6   :  { %1940 = vst.msk [vmem:[#allocation2 + $0x10] sm:$0xf] %vm1935_vm9, %v1707_v4  ;;  %v1592_v4 = vrot.slane %v1590_v36, 4 }
 0x1c7   :  { %v8316_v31 = vsel %vm7979_vm7, %v1586_v2, %v1587_v38  ;;  %v1607_v36 = vrot.slane %v1605_v45, 4 }
 0x1c8   :  { %v1213_v3 = vpop.permute.xlu0 %1212  ;;  %12569 = vst [vmem:[#allocation240_spill] sm:$0xff] %v8316_v31  ;;  %1782 = vrot.lane.b32.xlu1 %v8311_v28, %s6381_s17 }
 0x1c9   :  { %v1215_v58 = vpop.permute.xlu1 %1214  ;;  %1375 = vst.msk [vmem:[#allocation2 + $0x12c] sm:$0xf] %vm1299_vm4, %v1213_v3  ;;  %v1599_v3 = vrot.slane %v7144_v18, 5 }
 0x1ca   :  { %1376 = vst.msk [vmem:[#allocation2 + $0x130] sm:$0xf] %vm1299_vm4, %v1215_v58  ;;  %v1593_v58 = vrot.slane %v12570_v56, 5  ;;  %vm9351_vm4 = vmor %vm3076_vm2, %vm3077_vm3  ;;  %vm3961_vm3 = vcmask 223424  }
 0x1cb   :  { %1780 = vrot.lane.b32.xlu0 %v8316_v31, %s6381_s17  ;;  %1778 = vrot.lane.b32.xlu2 %v8324_v62, %s6381_s17  ;;  %v8334_v19 = vsel %vm7979_vm7, %v1598_v35, %v1599_v3  ;;  %v12573_v31 = vld [vmem:[#allocation135_spill] sm:$0xff]  ;;  %v12574_v35 = vld [vmem:[#allocation134_spill] sm:$0xff] }
 0x1cc   :  { %v1595_v2 = vrot.slane %v1593_v58, 4  ;;  %12571 = vst [vmem:[#allocation241_spill] sm:$0xff] %v8334_v19  ;;  %v1602_v28 = vrot.slane %v12573_v31, 5 }
 0x1cd   :  { %v1713_v56 = vpop.permute.xlu2 %1712 }
 0x1ce   :  { %v8339_v18 = vsel %vm7979_vm7, %v1595_v2, %v1596_v14  ;;  %1943 = vst.msk [vmem:[#allocation2 + $0x1c] sm:$0xf] %vm1935_vm9, %v1713_v56  ;;  %v1604_v14 = vrot.slane %v1602_v28, 4  ;;  %v1601_v56 = vrot.slane %v1599_v3, 4 }
 0x1cf   :  { %12572 = vst [vmem:[#allocation242_spill] sm:$0xff] %v8339_v18 }
 0x1d0   :  { %v1219_v20 = vpop.permute.xlu0 %1218  ;;  %1788 = vrot.lane.b32.xlu1 %v8334_v19, %s6381_s17  ;;  %v8371_v3 = vsel %vm7979_vm7, %v1601_v56, %v1602_v28  ;;  %v1623_v56 = vrot.slane %v7374_v25, 5 }
 0x1d1   :  { %v1699_v38 = vpop.permute.xlu1 %1698  ;;  %1379 = vst.msk [vmem:[#allocation2 + $0x138] sm:$0x7] %vm1378_vm10, %v1219_v20  ;;  %v8347_v20 = vsel %vm7979_vm7, %v1592_v4, %v1593_v58  ;;  %v1614_v4 = vrot.slane %v7295_v34, 5  ;;  %vm3964_vm10 = vsmask.f32 5392 }
 0x1d2   :  { %1936 = vst.msk [vmem:[#allocation2] sm:$0xf] %vm1935_vm9, %v1699_v38  ;;  %v1608_v38 = vrot.slane %v12574_v35, 5  ;;  %v8363_v35 = vsel %vm7979_vm7, %v1604_v14, %v1605_v45 }
 0x1d3   :  { %1786 = vrot.lane.b32.xlu0 %v8339_v18, %s6381_s17  ;;  %1784 = vrot.lane.b32.xlu2 %v8347_v20, %s6381_s17  ;;  %12576 = vst [vmem:[#allocation244_spill] sm:$0xff] %v8363_v35  ;;  %v12577_v18 = vld [vmem:[#allocation143_spill] sm:$0xff] }
 0x1d4   :  { %v8358_v58 = vsel %vm7979_vm7, %v1607_v36, %v1608_v38  ;;  %v1616_v36 = vrot.slane %v1614_v4, 4 }
 0x1d5   :  { %12575 = vst [vmem:[#allocation243_spill] sm:$0xff] %v8358_v58  ;;  %v1719_v31 = vpop.permute.xlu2 %1718 }
 0x1d6   :  { %1946 = vst.msk [vmem:[#allocation2 + $0x28] sm:$0xf] %vm1935_vm9, %v1719_v31  ;;  %v1610_v31 = vrot.slane %v1608_v38, 4 }
 0x1d8   :  { %v1703_v2 = vpop.permute.xlu0 %1702  ;;  %1794 = vrot.lane.b32.xlu1 %v8358_v58, %s6381_s17 }
 0x1d9   :  { %v1705_v12 = vpop.permute.xlu1 %1704  ;;  %1938 = vst.msk [vmem:[#allocation2 + $0x8] sm:$0xf] %vm1935_vm9, %v1703_v2  ;;  %v12578_v2 = vld [vmem:[#allocation144_spill] sm:$0xff] }
 0x1da   :  { %1939 = vst.msk [vmem:[#allocation2 + $0xc] sm:$0xf] %vm1935_vm9, %v1705_v12  ;;  %v1611_v12 = vrot.slane %v12577_v18, 5  ;;  %v1617_v34 = vrot.slane %v12578_v2, 5 }
 0x1db   :  { %1792 = vrot.lane.b32.xlu0 %v8363_v35, %s6381_s17  ;;  %1790 = vrot.lane.b32.xlu2 %v8371_v3, %s6381_s17  ;;  %v12580_v35 = vld [vmem:[#allocation152_spill] sm:$0xff] }
 0x1dc   :  { %v1613_v45 = vrot.slane %v1611_v12, 4  ;;  %v8382_v28 = vsel %vm7979_vm7, %v1616_v36, %v1617_v34  ;;  %v8395_v38 = vsel %vm7979_vm7, %v1610_v31, %v1611_v12  ;;  %v1625_v36 = vrot.slane %v1623_v56, 4 }
 0x1dd   :  { %v1725_v18 = vpop.permute.xlu2 %1724  ;;  %v1632_v31 = vrot.slane %v7448_v15, 5 }
 0x1de   :  { %v8387_v2 = vsel %vm7979_vm7, %v1613_v45, %v1614_v4  ;;  %1949 = vst.msk [vmem:[#allocation2 + $0x34] sm:$0xf] %vm1935_vm9, %v1725_v18  ;;  %v1619_v18 = vrot.slane %v1617_v34, 4 }
 0x1df   :  { %12579 = vst [vmem:[#allocation245_spill] sm:$0xff] %v8387_v2 }
 0x1e0   :  { %v1709_v14 = vpop.permute.xlu0 %1708  ;;  %1800 = vrot.lane.b32.xlu1 %v8382_v28, %s6381_s17 }
 0x1e1   :  { %v1711_v19 = vpop.permute.xlu1 %1710  ;;  %1941 = vst.msk [vmem:[#allocation2 + $0x14] sm:$0xf] %vm1935_vm9, %v1709_v14  ;;  %v12581_v14 = vld [vmem:[#allocation153_spill] sm:$0xff] }
 0x1e2   :  { %1942 = vst.msk [vmem:[#allocation2 + $0x18] sm:$0xf] %vm1935_vm9, %v1711_v19  ;;  %v1620_v19 = vrot.slane %v12580_v35, 5  ;;  %v1626_v25 = vrot.slane %v12581_v14, 5 }
 0x1e3   :  { %1798 = vrot.lane.b32.xlu0 %v8387_v2, %s6381_s17  ;;  %1796 = vrot.lane.b32.xlu2 %v8395_v38, %s6381_s17  ;;  %v12584_v2 = vld [vmem:[#allocation161_spill] sm:$0xff] }
 0x1e4   :  { %v1622_v4 = vrot.slane %v1620_v19, 4  ;;  %v8406_v12 = vsel %vm7979_vm7, %v1625_v36, %v1626_v25  ;;  %v8419_v34 = vsel %vm7979_vm7, %v1619_v18, %v1620_v19  ;;  %v1634_v36 = vrot.slane %v1632_v31, 4 }
 0x1e5   :  { %12582 = vst [vmem:[#allocation246_spill] sm:$0xff] %v8406_v12  ;;  %v1731_v35 = vpop.permute.xlu2 %1730  ;;  %v1641_v18 = vrot.slane %v7520_v39, 5 }
 0x1e6   :  { %v8411_v14 = vsel %vm7979_vm7, %v1622_v4, %v1623_v56  ;;  %1952 = vst.msk [vmem:[#allocation2 + $0x40] sm:$0xf] %vm1935_vm9, %v1731_v35  ;;  %v1628_v35 = vrot.slane %v1626_v25, 4 }
 0x1e7   :  { %12583 = vst [vmem:[#allocation247_spill] sm:$0xff] %v8411_v14 }
 0x1e8   :  { %v1715_v45 = vpop.permute.xlu0 %1714  ;;  %1806 = vrot.lane.b32.xlu1 %v8406_v12, %s6381_s17 }
 0x1e9   :  { %v1717_v58 = vpop.permute.xlu1 %1716  ;;  %1944 = vst.msk [vmem:[#allocation2 + $0x20] sm:$0xf] %vm1935_vm9, %v1715_v45  ;;  %v1635_v45 = vrot.slane %v7442_v22, 5 }
 0x1ea   :  { %1945 = vst.msk [vmem:[#allocation2 + $0x24] sm:$0xf] %vm1935_vm9, %v1717_v58  ;;  %v1629_v58 = vrot.slane %v12584_v2, 5 }
 0x1eb   :  { %1804 = vrot.lane.b32.xlu0 %v8411_v14, %s6381_s17  ;;  %1802 = vrot.lane.b32.xlu2 %v8419_v34, %s6381_s17  ;;  %v8430_v19 = vsel %vm7979_vm7, %v1634_v36, %v1635_v45  ;;  %v1643_v36 = vrot.slane %v1641_v18, 4 }
 0x1ec   :  { %v1631_v56 = vrot.slane %v1629_v58, 4  ;;  %12585 = vst [vmem:[#allocation248_spill] sm:$0xff] %v8430_v19  ;;  %v8443_v25 = vsel %vm7979_vm7, %v1628_v35, %v1629_v58  ;;  %v12588_v35 = vld [vmem:[#allocation182_spill] sm:$0xff] }
 0x1ed   :  { %v1737_v2 = vpop.permute.xlu2 %1736 }
 0x1ee   :  { %v8435_v22 = vsel %vm7979_vm7, %v1631_v56, %v1632_v31  ;;  %1955 = vst.msk [vmem:[#allocation2 + $0x4c] sm:$0xf] %vm1935_vm9, %v1737_v2  ;;  %v1637_v2 = vrot.slane %v1635_v45, 4 }
 0x1ef   :  { %12586 = vst [vmem:[#allocation249_spill] sm:$0xff] %v8435_v22 }
 0x1f0   :  { %v1721_v4 = vpop.permute.xlu0 %1720  ;;  %1812 = vrot.lane.b32.xlu1 %v8430_v19, %s6381_s17  ;;  %v12590_v19 = vld [vmem:[#allocation179_spill] sm:$0xff] }
 0x1f1   :  { %v1723_v15 = vpop.permute.xlu1 %1722  ;;  %1947 = vst.msk [vmem:[#allocation2 + $0x2c] sm:$0xf] %vm1935_vm9, %v1721_v4  ;;  %v12587_v4 = vld [vmem:[#allocation172_spill] sm:$0xff] }
 0x1f2   :  { %1948 = vst.msk [vmem:[#allocation2 + $0x30] sm:$0xf] %vm1935_vm9, %v1723_v15  ;;  %v1638_v15 = vrot.slane %v7493_v5, 5  ;;  %v1644_v39 = vrot.slane %v12587_v4, 5  ;;  %v1650_v5 = vrot.slane %v12588_v35, 5 }
 0x1f3   :  { %1810 = vrot.lane.b32.xlu0 %v8435_v22, %s6381_s17  ;;  %1808 = vrot.lane.b32.xlu2 %v8443_v25, %s6381_s17 }
 0x1f4   :  { %v1640_v31 = vrot.slane %v1638_v15, 4  ;;  %v8454_v58 = vsel %vm7979_vm7, %v1643_v36, %v1644_v39  ;;  %v8467_v45 = vsel %vm7979_vm7, %v1637_v2, %v1638_v15  ;;  %v1652_v36 = vrot.slane %v1650_v5, 4 }
 0x1f5   :  { %v1743_v22 = vpop.permute.xlu2 %1742  ;;  %v1659_v2 = vrot.slane %v7662_v9, 5 }
 0x1f6   :  { %v8459_v4 = vsel %vm7979_vm7, %v1640_v31, %v1641_v18  ;;  %1958 = vst.msk [vmem:[#allocation2 + $0x58] sm:$0xf] %vm1935_vm9, %v1743_v22  ;;  %v1646_v22 = vrot.slane %v1644_v39, 4 }
 0x1f7   :  { %12589 = vst [vmem:[#allocation250_spill] sm:$0xff] %v8459_v4 }
 0x1f8   :  { %v1727_v56 = vpop.permute.xlu0 %1726  ;;  %1818 = vrot.lane.b32.xlu1 %v8454_v58, %s6381_s17 }
 0x1f9   :  { %v1729_v14 = vpop.permute.xlu1 %1728  ;;  %1950 = vst.msk [vmem:[#allocation2 + $0x38] sm:$0xf] %vm1935_vm9, %v1727_v56  ;;  %v12591_v56 = vld [vmem:[#allocation181_spill] sm:$0xff] }
 0x1fa   :  { %1951 = vst.msk [vmem:[#allocation2 + $0x3c] sm:$0xf] %vm1935_vm9, %v1729_v14  ;;  %v1647_v14 = vrot.slane %v12590_v19, 5  ;;  %v1653_v35 = vrot.slane %v12591_v56, 5 }
 0x1fb   :  { %1816 = vrot.lane.b32.xlu0 %v8459_v4, %s6381_s17  ;;  %1814 = vrot.lane.b32.xlu2 %v8467_v45, %s6381_s17  ;;  %v12594_v4 = vld [vmem:[#allocation188_spill] sm:$0xff] }
 0x1fc   :  { %v1649_v18 = vrot.slane %v1647_v14, 4  ;;  %v8478_v15 = vsel %vm7979_vm7, %v1652_v36, %v1653_v35  ;;  %v8491_v39 = vsel %vm7979_vm7, %v1646_v22, %v1647_v14  ;;  %v1661_v36 = vrot.slane %v1659_v2, 4 }
 0x1fd   :  { %12592 = vst [vmem:[#allocation251_spill] sm:$0xff] %v8478_v15  ;;  %v1749_v19 = vpop.permute.xlu2 %1748  ;;  %v1668_v22 = vrot.slane %v7732_v54, 5 }
 0x1fe   :  { %v8483_v56 = vsel %vm7979_vm7, %v1649_v18, %v1650_v5  ;;  %1961 = vst.msk [vmem:[#allocation2 + $0x64] sm:$0xf] %vm1935_vm9, %v1749_v19  ;;  %v1655_v19 = vrot.slane %v1653_v35, 4 }
 0x1ff   :  { %12593 = vst [vmem:[#allocation252_spill] sm:$0xff] %v8483_v56 }
 0x200   :  { %v1733_v31 = vpop.permute.xlu0 %1732  ;;  %1824 = vrot.lane.b32.xlu1 %v8478_v15, %s6381_s17 }
 0x201   :  { %v1735_v12 = vpop.permute.xlu1 %1734  ;;  %1953 = vst.msk [vmem:[#allocation2 + $0x44] sm:$0xf] %vm1935_vm9, %v1733_v31  ;;  %v1662_v31 = vrot.slane %v7656_v21, 5 }
 0x202   :  { %1954 = vst.msk [vmem:[#allocation2 + $0x48] sm:$0xf] %vm1935_vm9, %v1735_v12  ;;  %v1656_v12 = vrot.slane %v12594_v4, 5 }
 0x203   :  { %1822 = vrot.lane.b32.xlu0 %v8483_v56, %s6381_s17  ;;  %1820 = vrot.lane.b32.xlu2 %v8491_v39, %s6381_s17  ;;  %v8502_v14 = vsel %vm7979_vm7, %v1661_v36, %v1662_v31  ;;  %v12596_v56 = vld [vmem:[#allocation197_spill] sm:$0xff]  ;;  %v1670_v36 = vrot.slane %v1668_v22, 4 }
 0x204   :  { %v1658_v5 = vrot.slane %v1656_v12, 4  ;;  %v8515_v35 = vsel %vm7979_vm7, %v1655_v19, %v1656_v12  ;;  %v1677_v19 = vrot.slane %v7801_v47, 5 }
 0x205   :  { %v1755_v4 = vpop.permute.xlu2 %1754 }
 0x206   :  { %v8507_v21 = vsel %vm7979_vm7, %v1658_v5, %v1659_v2  ;;  %1964 = vst.msk [vmem:[#allocation2 + $0x70] sm:$0xf] %vm1935_vm9, %v1755_v4  ;;  %v1664_v4 = vrot.slane %v1662_v31, 4 }
 0x207   :  { %12595 = vst [vmem:[#allocation253_spill] sm:$0xff] %v8507_v21 }
 0x208   :  { %v1739_v18 = vpop.permute.xlu0 %1738  ;;  %1830 = vrot.lane.b32.xlu1 %v8502_v14, %s6381_s17 }
 0x209   :  { %v1741_v9 = vpop.permute.xlu1 %1740  ;;  %1956 = vst.msk [vmem:[#allocation2 + $0x50] sm:$0xf] %vm1935_vm9, %v1739_v18  ;;  %v12597_v18 = vld [vmem:[#allocation199_spill] sm:$0xff] }
 0x20a   :  { %1957 = vst.msk [vmem:[#allocation2 + $0x54] sm:$0xf] %vm1935_vm9, %v1741_v9  ;;  %v1665_v9 = vrot.slane %v12596_v56, 5  ;;  %v1671_v54 = vrot.slane %v12597_v18, 5 }
 0x20b   :  { %1828 = vrot.lane.b32.xlu0 %v8507_v21, %s6381_s17  ;;  %1826 = vrot.lane.b32.xlu2 %v8515_v35, %s6381_s17 }
 0x20c   :  { %v1667_v2 = vrot.slane %v1665_v9, 4  ;;  %v8526_v12 = vsel %vm7979_vm7, %v1670_v36, %v1671_v54  ;;  %v8539_v31 = vsel %vm7979_vm7, %v1664_v4, %v1665_v9  ;;  %v1679_v36 = vrot.slane %v1677_v19, 4 }
 0x20d   :  { %v1761_v56 = vpop.permute.xlu2 %1760  ;;  %v1686_v4 = vrot.slane %v7870_v46, 5 }
 0x20e   :  { %v8531_v18 = vsel %vm7979_vm7, %v1667_v2, %v1668_v22  ;;  %1967 = vst.msk [vmem:[#allocation2 + $0x7c] sm:$0xf] %vm1935_vm9, %v1761_v56  ;;  %v1673_v56 = vrot.slane %v1671_v54, 4 }
 0x210   :  { %v1745_v5 = vpop.permute.xlu0 %1744  ;;  %1836 = vrot.lane.b32.xlu1 %v8526_v12, %s6381_s17 }
 0x211   :  { %v1747_v15 = vpop.permute.xlu1 %1746  ;;  %1959 = vst.msk [vmem:[#allocation2 + $0x5c] sm:$0xf] %vm1935_vm9, %v1745_v5  ;;  %v12598_v5 = vld [vmem:[#allocation208_spill] sm:$0xff] }
 0x212   :  { %1960 = vst.msk [vmem:[#allocation2 + $0x60] sm:$0xf] %vm1935_vm9, %v1747_v15  ;;  %v1674_v15 = vrot.slane %v7775_v61, 5  ;;  %v1680_v47 = vrot.slane %v12598_v5, 5 }
 0x213   :  { %1834 = vrot.lane.b32.xlu0 %v8531_v18, %s6381_s17  ;;  %1832 = vrot.lane.b32.xlu2 %v8539_v31, %s6381_s17 }
 0x214   :  { %v1676_v22 = vrot.slane %v1674_v15, 4  ;;  %v8550_v9 = vsel %vm7979_vm7, %v1679_v36, %v1680_v47  ;;  %v8563_v54 = vsel %vm7979_vm7, %v1673_v56, %v1674_v15  ;;  %v1688_v36 = vrot.slane %v1686_v4, 4 }
 0x215   :  { %v1767_v61 = vpop.permute.xlu2 %1766 }
 0x216   :  { %v8555_v5 = vsel %vm7979_vm7, %v1676_v22, %v1677_v19  ;;  %1970 = vst.msk [vmem:[#allocation2 + $0x88] sm:$0xf] %vm1935_vm9, %v1767_v61  ;;  %v1682_v61 = vrot.slane %v1680_v47, 4 }
 0x218   :  { %v1751_v2 = vpop.permute.xlu0 %1750  ;;  %1842 = vrot.lane.b32.xlu1 %v8550_v9, %s6381_s17 }
 0x219   :  { %v1753_v21 = vpop.permute.xlu1 %1752  ;;  %1962 = vst.msk [vmem:[#allocation2 + $0x68] sm:$0xf] %vm1935_vm9, %v1751_v2  ;;  %v1689_v2 = vrot.slane %v7864_v6, 5  ;;  %v1692_v6 = vrot.slane %v7918_v53, 5 }
 0x21a   :  { %1963 = vst.msk [vmem:[#allocation2 + $0x6c] sm:$0xf] %vm1935_vm9, %v1753_v21  ;;  %v1683_v21 = vrot.slane %v7854_v59, 5 }
 0x21b   :  { %1840 = vrot.lane.b32.xlu0 %v8555_v5, %s6381_s17  ;;  %1838 = vrot.lane.b32.xlu2 %v8563_v54, %s6381_s17  ;;  %v8574_v15 = vsel %vm7979_vm7, %v1688_v36, %v1689_v2 }
 0x21c   :  { %v1685_v19 = vrot.slane %v1683_v21, 4  ;;  %v8587_v47 = vsel %vm7979_vm7, %v1682_v61, %v1683_v21 }
 0x21d   :  { %v1773_v56 = vpop.permute.xlu2 %1772 }
 0x21e   :  { %v8578_v59 = vsel %vm7979_vm7, %v1685_v19, %v1686_v4  ;;  %1973 = vst.msk [vmem:[#allocation2 + $0x94] sm:$0xf] %vm1935_vm9, %v1773_v56  ;;  %v1691_v56 = vrot.slane %v1689_v2, 4 }
 0x220   :  { %v1757_v22 = vpop.permute.xlu0 %1756  ;;  %1848 = vrot.lane.b32.xlu1 %v8574_v15, %s6381_s17  ;;  %v8606_v61 = vsel %vm7979_vm7, %v1691_v56, %v1692_v6  ;;  %v12600_v56 = vld [vmem:[#allocation232_spill] sm:$0xff] }
 0x221   :  { %v1759_v46 = vpop.permute.xlu1 %1758  ;;  %1965 = vst.msk [vmem:[#allocation2 + $0x74] sm:$0xf] %vm1935_vm9, %v1757_v22  ;;  %v1694_v22 = vrot.slane %v1692_v6, 4 }
 0x222   :  { %1966 = vst.msk [vmem:[#allocation2 + $0x78] sm:$0xf] %vm1935_vm9, %v1759_v46  ;;  %v1695_v46 = vrot.slane %v7940_v40, 5 }
 0x223   :  { %1846 = vrot.lane.b32.xlu0 %v8578_v59, %s6381_s17  ;;  %1844 = vrot.lane.b32.xlu2 %v8587_v47, %s6381_s17 }
 0x224   :  { %v8595_v19 = vrot.slane %v1695_v46, 4  ;;  %v8599_v21 = vsel %vm7979_vm7, %v1694_v22, %v1695_v46 }
 0x225   :  { %v1779_v40 = vpop.permute.xlu2 %1778 }
 0x226   :  { %1976 = vst.msk [vmem:[#allocation2 + $0xa0] sm:$0xf] %vm1935_vm9, %v1779_v40 }
 0x228   :  { %v1763_v4 = vpop.permute.xlu0 %1762  ;;  %1854 = vrot.lane.b32.xlu1 %v8595_v19, %s6381_s17 }
 0x229   :  { %v1765_v36 = vpop.permute.xlu1 %1764  ;;  %1968 = vst.msk [vmem:[#allocation2 + $0x80] sm:$0xf] %vm1935_vm9, %v1763_v4 }
 0x22a   :  { %1969 = vst.msk [vmem:[#allocation2 + $0x84] sm:$0xf] %vm1935_vm9, %v1765_v36 }
 0x22b   :  { %1852 = vrot.lane.b32.xlu0 %v8599_v21, %s6381_s17  ;;  %1850 = vrot.lane.b32.xlu2 %v8606_v61, %s6381_s17 }
 0x22d   :  { %v1785_v40 = vpop.permute.xlu2 %1784 }
 0x22e   :  { %1979 = vst.msk [vmem:[#allocation2 + $0xac] sm:$0xf] %vm1935_vm9, %v1785_v40  ;;  %v12602_v40 = vld [vmem:[#allocation234_spill] sm:$0xff] }
 0x230   :  { %v1769_v2 = vpop.permute.xlu0 %1768  ;;  %2030 = vrot.lane.b32.xlu1 %v8035_v44, %s6382_s19 }
 0x231   :  { %v1771_v36 = vpop.permute.xlu1 %1770  ;;  %1971 = vst.msk [vmem:[#allocation2 + $0x8c] sm:$0xf] %vm1935_vm9, %v1769_v2 }
 0x232   :  { %1972 = vst.msk [vmem:[#allocation2 + $0x90] sm:$0xf] %vm1935_vm9, %v1771_v36 }
 0x233   :  { %2028 = vrot.lane.b32.xlu0 %v8001_v0, %s6382_s19  ;;  %2026 = vrot.lane.b32.xlu2 %v8006_v63, %s6382_s19 }
 0x235   :  { %v1791_v22 = vpop.permute.xlu2 %1790 }
 0x236   :  { %1982 = vst.msk [vmem:[#allocation2 + $0xb8] sm:$0xf] %vm1935_vm9, %v1791_v22  ;;  %v12603_v22 = vld [vmem:[#allocation235_spill] sm:$0xff] }
 0x238   :  { %v1775_v46 = vpop.permute.xlu0 %1774  ;;  %2036 = vrot.lane.b32.xlu1 %v8059_v17, %s6382_s19 }
 0x239   :  { %v1777_v6 = vpop.permute.xlu1 %1776  ;;  %1974 = vst.msk [vmem:[#allocation2 + $0x98] sm:$0xf] %vm1935_vm9, %v1775_v46 }
 0x23a   :  { %1975 = vst.msk [vmem:[#allocation2 + $0x9c] sm:$0xf] %vm1935_vm9, %v1777_v6 }
 0x23b   :  { %2034 = vrot.lane.b32.xlu0 %v8022_v52, %s6382_s19  ;;  %2032 = vrot.lane.b32.xlu2 %v8027_v51, %s6382_s19 }
 0x23d   :  { %v1797_v63 = vpop.permute.xlu2 %1796 }
 0x23e   :  { %1985 = vst.msk [vmem:[#allocation2 + $0xc4] sm:$0xf] %vm1935_vm9, %v1797_v63  ;;  %v12605_v63 = vld [vmem:[#allocation237_spill] sm:$0xff] }
 0x240   :  { %v1781_v0 = vpop.permute.xlu0 %1780  ;;  %2042 = vrot.lane.b32.xlu1 %v8083_v16, %s6382_s19 }
 0x241   :  { %v1783_v44 = vpop.permute.xlu1 %1782  ;;  %1977 = vst.msk [vmem:[#allocation2 + $0xa4] sm:$0xf] %vm1935_vm9, %v1781_v0 }
 0x242   :  { %1978 = vst.msk [vmem:[#allocation2 + $0xa8] sm:$0xf] %vm1935_vm9, %v1783_v44 }
 0x243   :  { %2040 = vrot.lane.b32.xlu0 %v8046_v7, %s6382_s19  ;;  %2038 = vrot.lane.b32.xlu2 %v8051_v57, %s6382_s19 }
 0x245   :  { %v1803_v51 = vpop.permute.xlu2 %1802 }
 0x246   :  { %1988 = vst.msk [vmem:[#allocation2 + $0xd0] sm:$0xf] %vm1935_vm9, %v1803_v51  ;;  %v12606_v51 = vld [vmem:[#allocation238_spill] sm:$0xff] }
 0x248   :  { %v1787_v52 = vpop.permute.xlu0 %1786  ;;  %2048 = vrot.lane.b32.xlu1 %v8107_v26, %s6382_s19 }
 0x249   :  { %v1789_v17 = vpop.permute.xlu1 %1788  ;;  %1980 = vst.msk [vmem:[#allocation2 + $0xb0] sm:$0xf] %vm1935_vm9, %v1787_v52 }
 0x24a   :  { %1981 = vst.msk [vmem:[#allocation2 + $0xb4] sm:$0xf] %vm1935_vm9, %v1789_v17 }
 0x24b   :  { %2046 = vrot.lane.b32.xlu0 %v8070_v30, %s6382_s19  ;;  %2044 = vrot.lane.b32.xlu2 %v8075_v13, %s6382_s19 }
 0x24d   :  { %v1809_v57 = vpop.permute.xlu2 %1808 }
 0x24e   :  { %1991 = vst.msk [vmem:[#allocation2 + $0xdc] sm:$0xf] %vm1935_vm9, %v1809_v57  ;;  %v12608_v57 = vld [vmem:[#allocation240_spill] sm:$0xff] }
 0x250   :  { %v1793_v7 = vpop.permute.xlu0 %1792  ;;  %2054 = vrot.lane.b32.xlu1 %v8131_v29, %s6382_s19 }
 0x251   :  { %v1795_v16 = vpop.permute.xlu1 %1794  ;;  %1983 = vst.msk [vmem:[#allocation2 + $0xbc] sm:$0xf] %vm1935_vm9, %v1793_v7 }
 0x252   :  { %1984 = vst.msk [vmem:[#allocation2 + $0xc0] sm:$0xf] %vm1935_vm9, %v1795_v16 }
 0x253   :  { %2052 = vrot.lane.b32.xlu0 %v8094_v10, %s6382_s19  ;;  %2050 = vrot.lane.b32.xlu2 %v8099_v32, %s6382_s19 }
 0x255   :  { %v1815_v13 = vpop.permute.xlu2 %1814 }
 0x256   :  { %1994 = vst.msk [vmem:[#allocation2 + $0xe8] sm:$0xf] %vm1935_vm9, %v1815_v13 }
 0x258   :  { %v1799_v30 = vpop.permute.xlu0 %1798  ;;  %2060 = vrot.lane.b32.xlu1 %v8155_v43, %s6382_s19 }
 0x259   :  { %v1801_v26 = vpop.permute.xlu1 %1800  ;;  %1986 = vst.msk [vmem:[#allocation2 + $0xc8] sm:$0xf] %vm1935_vm9, %v1799_v30 }
 0x25a   :  { %1987 = vst.msk [vmem:[#allocation2 + $0xcc] sm:$0xf] %vm1935_vm9, %v1801_v26 }
 0x25b   :  { %2058 = vrot.lane.b32.xlu0 %v8118_v48, %s6382_s19  ;;  %2056 = vrot.lane.b32.xlu2 %v8123_v49, %s6382_s19 }
 0x25d   :  { %v1821_v32 = vpop.permute.xlu2 %1820 }
 0x25e   :  { %1997 = vst.msk [vmem:[#allocation2 + $0xf4] sm:$0xf] %vm1935_vm9, %v1821_v32 }
 0x260   :  { %v1805_v10 = vpop.permute.xlu0 %1804  ;;  %2066 = vrot.lane.b32.xlu1 %v8179_v50, %s6382_s19 }
 0x261   :  { %v1807_v29 = vpop.permute.xlu1 %1806  ;;  %1989 = vst.msk [vmem:[#allocation2 + $0xd4] sm:$0xf] %vm1935_vm9, %v1805_v10 }
 0x262   :  { %1990 = vst.msk [vmem:[#allocation2 + $0xd8] sm:$0xf] %vm1935_vm9, %v1807_v29  ;;  %v12610_v29 = vld [vmem:[#allocation242_spill] sm:$0xff] }
 0x263   :  { %2064 = vrot.lane.b32.xlu0 %v8142_v41, %s6382_s19  ;;  %2062 = vrot.lane.b32.xlu2 %v8147_v42, %s6382_s19 }
 0x265   :  { %v1827_v49 = vpop.permute.xlu2 %1826 }
 0x266   :  { %2000 = vst.msk [vmem:[#allocation2 + $0x100] sm:$0xf] %vm1935_vm9, %v1827_v49 }
 0x268   :  { %v1811_v48 = vpop.permute.xlu0 %1810  ;;  %2072 = vrot.lane.b32.xlu1 %v8203_v23, %s6382_s19  ;;  %v12599_v23 = vld [vmem:[#allocation231_spill] sm:$0xff] }
 0x269   :  { %v1813_v43 = vpop.permute.xlu1 %1812  ;;  %1992 = vst.msk [vmem:[#allocation2 + $0xe0] sm:$0xf] %vm1935_vm9, %v1811_v48  ;;  %v12612_v48 = vld [vmem:[#allocation244_spill] sm:$0xff] }
 0x26a   :  { %1993 = vst.msk [vmem:[#allocation2 + $0xe4] sm:$0xf] %vm1935_vm9, %v1813_v43 }
 0x26b   :  { %2070 = vrot.lane.b32.xlu0 %v8166_v33, %s6382_s19  ;;  %2068 = vrot.lane.b32.xlu2 %v8171_v8, %s6382_s19 }
 0x26d   :  { %v1833_v42 = vpop.permute.xlu2 %1832 }
 0x26e   :  { %2003 = vst.msk [vmem:[#allocation2 + $0x10c] sm:$0xf] %vm1935_vm9, %v1833_v42 }
 0x270   :  { %v1817_v41 = vpop.permute.xlu0 %1816  ;;  %2078 = vrot.lane.b32.xlu1 %v8227_v37, %s6382_s19  ;;  %v12601_v37 = vld [vmem:[#allocation233_spill] sm:$0xff] }
 0x271   :  { %v1819_v50 = vpop.permute.xlu1 %1818  ;;  %1995 = vst.msk [vmem:[#allocation2 + $0xec] sm:$0xf] %vm1935_vm9, %v1817_v41  ;;  %v12613_v41 = vld [vmem:[#allocation245_spill] sm:$0xff] }
 0x272   :  { %1996 = vst.msk [vmem:[#allocation2 + $0xf0] sm:$0xf] %vm1935_vm9, %v1819_v50 }
 0x273   :  { %2076 = vrot.lane.b32.xlu0 %v12599_v23, %s6382_s19  ;;  %2074 = vrot.lane.b32.xlu2 %v12600_v56, %s6382_s19 }
 0x275   :  { %v1839_v8 = vpop.permute.xlu2 %1838 }
 0x276   :  { %2006 = vst.msk [vmem:[#allocation2 + $0x118] sm:$0xf] %vm1935_vm9, %v1839_v8 }
 0x278   :  { %v1823_v33 = vpop.permute.xlu0 %1822  ;;  %2084 = vrot.lane.b32.xlu1 %v8252_v1, %s6382_s19 }
 0x279   :  { %v1825_v4 = vpop.permute.xlu1 %1824  ;;  %1998 = vst.msk [vmem:[#allocation2 + $0xf8] sm:$0xf] %vm1935_vm9, %v1823_v33 }
 0x27a   :  { %1999 = vst.msk [vmem:[#allocation2 + $0xfc] sm:$0xf] %vm1935_vm9, %v1825_v4  ;;  %v12615_v4 = vld [vmem:[#allocation247_spill] sm:$0xff] }
 0x27b   :  { %2082 = vrot.lane.b32.xlu0 %v12601_v37, %s6382_s19  ;;  %2080 = vrot.lane.b32.xlu2 %v12602_v40, %s6382_s19  ;;  %v12617_v37 = vld [vmem:[#allocation249_spill] sm:$0xff]  ;;  %v12618_v40 = vld [vmem:[#allocation250_spill] sm:$0xff] }
 0x27d   :  { %v1845_v6 = vpop.permute.xlu2 %1844 }
 0x27e   :  { %2009 = vst.msk [vmem:[#allocation2 + $0x124] sm:$0xf] %vm1935_vm9, %v1845_v6 }
 0x280   :  { %v1829_v2 = vpop.permute.xlu0 %1828  ;;  %2090 = vrot.lane.b32.xlu1 %v8276_v27, %s6382_s19  ;;  %v12604_v27 = vld [vmem:[#allocation236_spill] sm:$0xff] }
 0x281   :  { %v1831_v36 = vpop.permute.xlu1 %1830  ;;  %2001 = vst.msk [vmem:[#allocation2 + $0x104] sm:$0xf] %vm1935_vm9, %v1829_v2 }
 0x282   :  { %2002 = vst.msk [vmem:[#allocation2 + $0x108] sm:$0xf] %vm1935_vm9, %v1831_v36 }
 0x283   :  { %2088 = vrot.lane.b32.xlu0 %v8238_v24, %s6382_s19  ;;  %2086 = vrot.lane.b32.xlu2 %v12603_v22, %s6382_s19 }
 0x285   :  { %v1851_v44 = vpop.permute.xlu2 %1850 }
 0x286   :  { %2012 = vst.msk [vmem:[#allocation2 + $0x130] sm:$0xf] %vm1935_vm9, %v1851_v44 }
 0x288   :  { %v1835_v46 = vpop.permute.xlu0 %1834  ;;  %2096 = vrot.lane.b32.xlu1 %v8300_v60, %s6382_s19 }
 0x289   :  { %v1837_v1 = vpop.permute.xlu1 %1836  ;;  %2004 = vst.msk [vmem:[#allocation2 + $0x110] sm:$0xf] %vm1935_vm9, %v1835_v46  ;;  %v12620_v46 = vld [vmem:[#allocation252_spill] sm:$0xff] }
 0x28a   :  { %2005 = vst.msk [vmem:[#allocation2 + $0x114] sm:$0xf] %vm1935_vm9, %v1837_v1 }
 0x28b   :  { %2094 = vrot.lane.b32.xlu0 %v12604_v27, %s6382_s19  ;;  %2092 = vrot.lane.b32.xlu2 %v12605_v63, %s6382_s19  ;;  %v12621_v27 = vld [vmem:[#allocation253_spill] sm:$0xff]  ;;  %v105_v63 = vld [vmem:[%s11733_s0 + $0x278] sm:$0xff] }
 0x28d   :  { %v2027_v17 = vpop.permute.xlu2 %2026 }
 0x28e   :  { %2264 = vst.msk [vmem:[#allocation2] sm:$0xf] %vm2263_vm11, %v2027_v17 }
 0x290   :  { %v1841_v24 = vpop.permute.xlu0 %1840  ;;  %2102 = vrot.lane.b32.xlu1 %v8324_v62, %s6382_s19  ;;  %v12607_v62 = vld [vmem:[#allocation239_spill] sm:$0xff] }
 0x291   :  { %v1843_v0 = vpop.permute.xlu1 %1842  ;;  %2007 = vst.msk [vmem:[#allocation2 + $0x11c] sm:$0xf] %vm1935_vm9, %v1841_v24 }
 0x292   :  { %2008 = vst.msk [vmem:[#allocation2 + $0x120] sm:$0xf] %vm1935_vm9, %v1843_v0 }
 0x293   :  { %2100 = vrot.lane.b32.xlu0 %v8287_v55, %s6382_s19  ;;  %2098 = vrot.lane.b32.xlu2 %v12606_v51, %s6382_s19 }
 0x295   :  { %v2033_v16 = vpop.permute.xlu2 %2032 }
 0x296   :  { %2267 = vst.msk [vmem:[#allocation2 + $0xc] sm:$0xf] %vm2263_vm11, %v2033_v16 }
 0x298   :  { %v1847_v52 = vpop.permute.xlu0 %1846  ;;  %2108 = vrot.lane.b32.xlu1 %v8347_v20, %s6382_s19  ;;  %v12609_v20 = vld [vmem:[#allocation241_spill] sm:$0xff] }
 0x299   :  { %v1849_v60 = vpop.permute.xlu1 %1848  ;;  %2010 = vst.msk [vmem:[#allocation2 + $0x128] sm:$0xf] %vm1935_vm9, %v1847_v52  ;;  %v12624_v52 = vld [vmem:[#allocation5_spill] sm:$0xff] }
 0x29a   :  { %2011 = vst.msk [vmem:[#allocation2 + $0x12c] sm:$0xf] %vm1935_vm9, %v1849_v60  ;;  %v12625_v51 = vshll.u32 %v12624_v52, 16 }
 0x29b   :  { %2106 = vrot.lane.b32.xlu0 %v12607_v62, %s6382_s19  ;;  %2104 = vrot.lane.b32.xlu2 %v12608_v57, %s6382_s19 }
 0x29c   :  { %v2353_v16 = vrot.slane %v12625_v51, 6 }
 0x29d   :  { %v2039_v26 = vpop.permute.xlu2 %2038 }
 0x29e   :  { %2270 = vst.msk [vmem:[#allocation2 + $0x18] sm:$0xf] %vm2263_vm11, %v2039_v26  ;;  %v12627_v26 = vld [vmem:[#allocation4_spill] sm:$0xff] }
 0x2a0   :  { %v1853_v7 = vpop.permute.xlu0 %1852  ;;  %2114 = vrot.lane.b32.xlu1 %v8371_v3, %s6382_s19  ;;  %v12611_v3 = vld [vmem:[#allocation243_spill] sm:$0xff] }
 0x2a1   :  { %v1855_v55 = vpop.permute.xlu1 %1854  ;;  %2013 = vst.msk [vmem:[#allocation2 + $0x134] sm:$0xf] %vm1935_vm9, %v1853_v7  ;;  %vm3963_vm9 = vsmask.f32 1280 }
 0x2a2   :  { %2015 = vst.msk [vmem:[#allocation2 + $0x138] sm:$0x7] %vm2014_vm12, %v1855_v55  ;;  %v12626_v55 = vshrl.u32 %v12624_v52, 16  ;;  %vm10122_vm12 = vmor %vm3963_vm9, %vm3964_vm10 }
 0x2a3   :  { %2112 = vrot.lane.b32.xlu0 %v12609_v20, %s6382_s19  ;;  %2110 = vrot.lane.b32.xlu2 %v12610_v29, %s6382_s19  ;;  %v12628_v20 = vshrl.u32 %v12627_v26, 16 }
 0x2a4   :  { %v2352_v7 = vrot.slane %v12626_v55, 5  ;;  %v12645_v55 = vld [vmem:[#allocation21_spill] sm:$0xff] }
 0x2a5   :  { %v2045_v10 = vpop.permute.xlu2 %2044 }
 0x2a6   :  { %2273 = vst.msk [vmem:[#allocation2 + $0x24] sm:$0xf] %vm2263_vm11, %v2045_v10  ;;  %v2354_v10 = vor.u32 %v2353_v16, %v2352_v7  ;;  %v2388_v7 = vrot.slane %v12645_v55, 6 }
 0x2a8   :  { %v2029_v13 = vpop.permute.xlu0 %2028  ;;  %2120 = vrot.lane.b32.xlu1 %v8395_v38, %s6382_s19 }
 0x2a9   :  { %v2031_v30 = vpop.permute.xlu1 %2030  ;;  %2265 = vst.msk [vmem:[#allocation2 + $0x4] sm:$0xf] %vm2263_vm11, %v2029_v13  ;;  %v12629_v13 = vshll.u32 %v12627_v26, 16 }
 0x2aa   :  { %2266 = vst.msk [vmem:[#allocation2 + $0x8] sm:$0xf] %vm2263_vm11, %v2031_v30  ;;  %v2348_v30 = vrot.slane %v12628_v20, 5 }
 0x2ab   :  { %2118 = vrot.lane.b32.xlu0 %v12611_v3, %s6382_s19  ;;  %2116 = vrot.lane.b32.xlu2 %v12612_v48, %s6382_s19  ;;  %v2349_v29 = vrot.slane %v12629_v13, 6  ;;  %v12630_v3 = vld [vmem:[#allocation16_spill] sm:$0xff] }
 0x2ad   :  { %v2051_v49 = vpop.permute.xlu2 %2050 }
 0x2ae   :  { %2276 = vst.msk [vmem:[#allocation2 + $0x30] sm:$0xf] %vm2263_vm11, %v2051_v49 }
 0x2b0   :  { %v2035_v43 = vpop.permute.xlu0 %2034  ;;  %2126 = vrot.lane.b32.xlu1 %v8419_v34, %s6382_s19  ;;  %v12614_v34 = vld [vmem:[#allocation246_spill] sm:$0xff] }
 0x2b1   :  { %v2037_v32 = vpop.permute.xlu1 %2036  ;;  %2268 = vst.msk [vmem:[#allocation2 + $0x10] sm:$0xf] %vm2263_vm11, %v2035_v43  ;;  %v12631_v43 = vld [vmem:[#allocation7_spill] sm:$0xff] }
 0x2b2   :  { %2269 = vst.msk [vmem:[#allocation2 + $0x14] sm:$0xf] %vm2263_vm11, %v2037_v32  ;;  %v2357_v32 = vrot.slane %v12630_v3, 5  ;;  %v2358_v48 = vrot.slane %v12631_v43, 6 }
 0x2b3   :  { %2124 = vrot.lane.b32.xlu0 %v8382_v28, %s6382_s19  ;;  %2122 = vrot.lane.b32.xlu2 %v12613_v41, %s6382_s19 }
 0x2b4   :  { %v2359_v41 = vor.u32 %v2358_v48, %v2357_v32  ;;  %v12647_v32 = vld [vmem:[#allocation32_spill] sm:$0xff] }
 0x2b5   :  { %v2057_v42 = vpop.permute.xlu2 %2056  ;;  %v2398_v48 = vrot.slane %v12647_v32, 6 }
 0x2b6   :  { %2279 = vst.msk [vmem:[#allocation2 + $0x3c] sm:$0xf] %vm2263_vm11, %v2057_v42  ;;  %v12632_v42 = vld [vmem:[#allocation14_spill] sm:$0xff] }
 0x2b8   :  { %v2041_v50 = vpop.permute.xlu0 %2040  ;;  %2132 = vrot.lane.b32.xlu1 %v8443_v25, %s6382_s19  ;;  %v12616_v25 = vld [vmem:[#allocation248_spill] sm:$0xff] }
 0x2b9   :  { %v2043_v38 = vpop.permute.xlu1 %2042  ;;  %2271 = vst.msk [vmem:[#allocation2 + $0x1c] sm:$0xf] %vm2263_vm11, %v2041_v50  ;;  %v2350_v50 = vor.u32 %v2349_v29, %v2348_v30 }
 0x2ba   :  { %2272 = vst.msk [vmem:[#allocation2 + $0x20] sm:$0xf] %vm2263_vm11, %v2043_v38 }
 0x2bb   :  { %2130 = vrot.lane.b32.xlu0 %v12614_v34, %s6382_s19  ;;  %2128 = vrot.lane.b32.xlu2 %v12615_v4, %s6382_s19  ;;  %v2367_v34 = vrot.slane %v12632_v42, 5  ;;  %v2351_v11 = vrot.slane %v2350_v50, 4  ;;  %v12648_v50 = vld [vmem:[#allocation39_spill] sm:$0xff] }
 0x2bd   :  { %v2063_v33 = vpop.permute.xlu2 %2062 }
 0x2be   :  { %2282 = vst.msk [vmem:[#allocation2 + $0x48] sm:$0xf] %vm2263_vm11, %v2063_v33  ;;  %v12787_v33 = vld [vmem:[#allocation13_spill] sm:$0xff] }
 0x2c0   :  { %v2047_v28 = vpop.permute.xlu0 %2046  ;;  %2138 = vrot.lane.b32.xlu1 %v8467_v45, %s6382_s19 }
 0x2c1   :  { %v2049_v23 = vpop.permute.xlu1 %2048  ;;  %2274 = vst.msk [vmem:[#allocation2 + $0x28] sm:$0xf] %vm2263_vm11, %v2047_v28 }
 0x2c2   :  { %2275 = vst.msk [vmem:[#allocation2 + $0x2c] sm:$0xf] %vm2263_vm11, %v2049_v23  ;;  %v12633_v23 = vld [vmem:[#allocation12_spill] sm:$0xff] }
 0x2c3   :  { %2136 = vrot.lane.b32.xlu0 %v12616_v25, %s6382_s19  ;;  %2134 = vrot.lane.b32.xlu2 %v12617_v37, %s6382_s19  ;;  %v2368_v28 = vrot.slane %v12633_v23, 6  ;;  %v12834_v23 = vld [vmem:[#allocation134_spill] sm:$0xff] }
 0x2c4   :  { %v3219_v42 = vrot.slane %v12834_v23, 6 }
 0x2c5   :  { %v2069_v36 = vpop.permute.xlu2 %2068 }
 0x2c6   :  { %2285 = vst.msk [vmem:[#allocation2 + $0x54] sm:$0xf] %vm2263_vm11, %v2069_v36 }
 0x2c8   :  { %v2053_v8 = vpop.permute.xlu0 %2052  ;;  %2144 = vrot.lane.b32.xlu1 %v8491_v39, %s6382_s19  ;;  %v12619_v39 = vld [vmem:[#allocation251_spill] sm:$0xff] }
 0x2c9   :  { %v2055_v56 = vpop.permute.xlu1 %2054  ;;  %2277 = vst.msk [vmem:[#allocation2 + $0x34] sm:$0xf] %vm2263_vm11, %v2053_v8 }
 0x2ca   :  { %2278 = vst.msk [vmem:[#allocation2 + $0x38] sm:$0xf] %vm2263_vm11, %v2055_v56  ;;  %v12637_v56 = vld [vmem:[#allocation19_spill] sm:$0xff] }
 0x2cb   :  { %2142 = vrot.lane.b32.xlu0 %v8454_v58, %s6382_s19  ;;  %2140 = vrot.lane.b32.xlu2 %v12618_v40, %s6382_s19  ;;  %v2363_v8 = vrot.slane %v12637_v56, 6 }
 0x2cd   :  { %v2075_v6 = vpop.permute.xlu2 %2074 }
 0x2ce   :  { %2288 = vst.msk [vmem:[#allocation2 + $0x60] sm:$0xf] %vm2263_vm11, %v2075_v6  ;;  %v12639_v6 = vld [vmem:[#allocation10_spill] sm:$0xff] }
 0x2d0   :  { %v2059_v2 = vpop.permute.xlu0 %2058  ;;  %2150 = vrot.lane.b32.xlu1 %v8515_v35, %s6382_s19 }
 0x2d1   :  { %v2061_v45 = vpop.permute.xlu1 %2060  ;;  %2280 = vst.msk [vmem:[#allocation2 + $0x40] sm:$0xf] %vm2263_vm11, %v2059_v2  ;;  %v12638_v2 = vld [vmem:[#allocation11_spill] sm:$0xff] }
 0x2d2   :  { %2281 = vst.msk [vmem:[#allocation2 + $0x44] sm:$0xf] %vm2263_vm11, %v2061_v45  ;;  %v2369_v45 = vor.u32 %v2368_v28, %v2367_v34  ;;  %v2372_v40 = vrot.slane %v12638_v2, 5 }
 0x2d3   :  { %2148 = vrot.lane.b32.xlu0 %v12619_v39, %s6382_s19  ;;  %2146 = vrot.lane.b32.xlu2 %v12620_v46, %s6382_s19  ;;  %v2373_v39 = vrot.slane %v12639_v6, 6 }
 0x2d5   :  { %v2081_v22 = vpop.permute.xlu2 %2080 }
 0x2d6   :  { %2291 = vst.msk [vmem:[#allocation2 + $0x6c] sm:$0xf] %vm2263_vm11, %v2081_v22 }
 0x2d8   :  { %v2065_v58 = vpop.permute.xlu0 %2064  ;;  %2156 = vrot.lane.b32.xlu1 %v8539_v31, %s6382_s19 }
 0x2d9   :  { %v2067_v1 = vpop.permute.xlu1 %2066  ;;  %2283 = vst.msk [vmem:[#allocation2 + $0x4c] sm:$0xf] %vm2263_vm11, %v2065_v58  ;;  %v2355_v58 = vsel %vm8870_vm15, %v2351_v11, %v2354_v10 }
 0x2da   :  { %2284 = vst.msk [vmem:[#allocation2 + $0x50] sm:$0xf] %vm2263_vm11, %v2067_v1 }
 0x2db   :  { %2154 = vrot.lane.b32.xlu0 %v8502_v14, %s6382_s19  ;;  %2152 = vrot.lane.b32.xlu2 %v12621_v27, %s6382_s19 }
 0x2dd   :  { %v2087_v0 = vpop.permute.xlu2 %2086 }
 0x2de   :  { %2294 = vst.msk [vmem:[#allocation2 + $0x78] sm:$0xf] %vm2263_vm11, %v2087_v0  ;;  %v12641_v0 = vld [vmem:[#allocation23_spill] sm:$0xff] }
 0x2e0   :  { %v2071_v44 = vpop.permute.xlu0 %2070  ;;  %2162 = vrot.lane.b32.xlu1 %v8563_v54, %s6382_s19 }
 0x2e1   :  { %v2073_v35 = vpop.permute.xlu1 %2072  ;;  %2286 = vst.msk [vmem:[#allocation2 + $0x58] sm:$0xf] %vm2263_vm11, %v2071_v44  ;;  %v12640_v44 = vld [vmem:[#allocation25_spill] sm:$0xff] }
 0x2e2   :  { %2287 = vst.msk [vmem:[#allocation2 + $0x5c] sm:$0xf] %vm2263_vm11, %v2073_v35  ;;  %v2374_v35 = vor.u32 %v2373_v39, %v2372_v40  ;;  %v2382_v27 = vrot.slane %v12640_v44, 5  ;;  %v12812_v44 = vld [vmem:[#allocation82_spill] sm:$0xff] }
 0x2e3   :  { %2160 = vrot.lane.b32.xlu0 %v8526_v12, %s6382_s19  ;;  %2158 = vrot.lane.b32.xlu2 %v8531_v18, %s6382_s19  ;;  %v8828_v12 = vpack.c.bf16 %v105_v63, %v105_v63  ;;  %v106_v18 = vld [vmem:[%s11733_s0 + $0x280] sm:$0xff]  ;;  %v12642_v63 = vld [vmem:[#allocation34_spill] sm:$0xff] }
 0x2e4   :  { %v8837_v60 = vpack.c.bf16 %v106_v18, %v106_v18  ;;  %v12643_v18 = vld [vmem:[#allocation20_spill] sm:$0xff] }
 0x2e5   :  { %v2093_v24 = vpop.permute.xlu2 %2092  ;;  %12622 = vst [vmem:[#allocation231_spill] sm:$0xff] %v8828_v12 }
 0x2e6   :  { %2297 = vst.msk [vmem:[#allocation2 + $0x84] sm:$0xf] %vm2263_vm11, %v2093_v24 }
 0x2e7   :  { %12623 = vst [vmem:[#allocation232_spill] sm:$0xff] %v8837_v60 }
 0x2e8   :  { %v2077_v14 = vpop.permute.xlu0 %2076  ;;  %2168 = vrot.lane.b32.xlu1 %v8587_v47, %s6382_s19  ;;  %v2020_v47 = vrot.slane %v8828_v12, 5 }
 0x2e9   :  { %v2079_v31 = vpop.permute.xlu1 %2078  ;;  %2289 = vst.msk [vmem:[#allocation2 + $0x64] sm:$0xf] %vm2263_vm11, %v2077_v14 }
 0x2ea   :  { %2290 = vst.msk [vmem:[#allocation2 + $0x68] sm:$0xf] %vm2263_vm11, %v2079_v31  ;;  %v2022_v62 = vrot.slane %v2020_v47, 4  ;;  %v2021_v38 = vsel %vm7979_vm7, %v8595_v19, %v2020_v47  ;;  %v12636_v19 = vld [vmem:[#allocation26_spill] sm:$0xff]  ;;  %v2383_v31 = vrot.slane %v12641_v0, 6 }
 0x2eb   :  { %2166 = vrot.lane.b32.xlu0 %v8550_v9, %s6382_s19  ;;  %2164 = vrot.lane.b32.xlu2 %v8555_v5, %s6382_s19  ;;  %v2023_v5 = vrot.slane %v8837_v60, 5  ;;  %v2362_v25 = vrot.slane %v12636_v19, 5 }
 0x2ec   :  { %v2384_v16 = vor.u32 %v2383_v31, %v2382_v27  ;;  %v12653_v27 = vld [vmem:[#allocation42_spill] sm:$0xff] }
 0x2ed   :  { %v2099_v9 = vpop.permute.xlu2 %2098  ;;  %v2364_v46 = vor.u32 %v2363_v8, %v2362_v25  ;;  %v2025_v22 = vrot.slane %v2023_v5, 4  ;;  %v12650_v8 = vld [vmem:[#allocation31_spill] sm:$0xff]  ;;  %v2413_v31 = vrot.slane %v12653_v27, 6 }
 0x2ee   :  { %2300 = vst.msk [vmem:[#allocation2 + $0x90] sm:$0xf] %vm2263_vm11, %v2099_v9  ;;  %v2361_v9 = vrot.slane %v2359_v41, 4  ;;  %v2386_v29 = vrot.slane %v2384_v16, 4 }
 0x2ef   :  { %v2366_v24 = vrot.slane %v2364_v46, 4 }
 0x2f0   :  { %v2083_v17 = vpop.permute.xlu0 %2082  ;;  %2174 = vrot.lane.b32.xlu1 %v8606_v61, %s6382_s19  ;;  %v2365_v13 = vsel %vm8870_vm15, %v2361_v9, %v2364_v46 }
 0x2f1   :  { %v2085_v54 = vpop.permute.xlu1 %2084  ;;  %2292 = vst.msk [vmem:[#allocation2 + $0x70] sm:$0xf] %vm2263_vm11, %v2083_v17  ;;  %v2378_v17 = vrot.slane %v12643_v18, 6  ;;  %v2370_v20 = vsel %vm8870_vm15, %v2366_v24, %v2369_v45  ;;  %v12821_v18 = vld [vmem:[#allocation109_spill] sm:$0xff] }
 0x2f2   :  { %2293 = vst.msk [vmem:[#allocation2 + $0x74] sm:$0xf] %vm2263_vm11, %v2085_v54  ;;  %v2377_v54 = vrot.slane %v12642_v63, 5 }
 0x2f3   :  { %2172 = vrot.lane.b32.xlu0 %v8574_v15, %s6382_s19  ;;  %2170 = vrot.lane.b32.xlu2 %v8578_v59, %s6382_s19  ;;  %v2024_v15 = vsel %vm7979_vm7, %v2022_v62, %v2023_v5  ;;  %v2356_v59 = vrot.slane %v2354_v10, 4  ;;  %v12644_v62 = vld [vmem:[#allocation22_spill] sm:$0xff]  ;;  %vm3073_vm7 = vcmask 157824  }
 0x2f4   :  { %v2387_v5 = vrot.slane %v12644_v62, 5  ;;  %v2379_v30 = vor.u32 %v2378_v17, %v2377_v54  ;;  %v12654_v54 = vld [vmem:[#allocation47_spill] sm:$0xff]  ;;  %v12809_v62 = vld [vmem:[#allocation73_spill] sm:$0xff] }
 0x2f5   :  { %v2105_v49 = vpop.permute.xlu2 %2104  ;;  %v2360_v36 = vsel %vm8870_vm15, %v2356_v59, %v2359_v41  ;;  %v2392_v59 = vrot.slane %v12648_v50, 5  ;;  %v12649_v41 = vld [vmem:[#allocation29_spill] sm:$0xff]  ;;  %v2407_v17 = vrot.slane %v12654_v54, 5  ;;  %v12762_v54 = vld [vmem:[#allocation207_spill] sm:$0xff] }
 0x2f6   :  { %2303 = vst.msk [vmem:[#allocation2 + $0x9c] sm:$0xf] %vm2263_vm11, %v2105_v49  ;;  %v2393_v34 = vrot.slane %v12649_v41, 6 }
 0x2f8   :  { %v2089_v61 = vpop.permute.xlu0 %2088  ;;  %2180 = vrot.lane.b32.xlu1 %v2024_v15, %s6382_s19  ;;  %v12646_v15 = vld [vmem:[#allocation33_spill] sm:$0xff] }
 0x2f9   :  { %v2091_v57 = vpop.permute.xlu1 %2090  ;;  %2295 = vst.msk [vmem:[#allocation2 + $0x7c] sm:$0xf] %vm2263_vm11, %v2089_v61  ;;  %v2389_v61 = vor.u32 %v2388_v7, %v2387_v5  ;;  %v2397_v10 = vrot.slane %v12646_v15, 5  ;;  %v12800_v15 = vld [vmem:[#allocation45_spill] sm:$0xff] }
 0x2fa   :  { %2296 = vst.msk [vmem:[#allocation2 + $0x80] sm:$0xf] %vm2263_vm11, %v2091_v57 }
 0x2fb   :  { %2178 = vrot.lane.b32.xlu0 %v2021_v38, %s6382_s19  ;;  %2176 = vrot.lane.b32.xlu2 %v8599_v21, %s6382_s19  ;;  %v2371_v21 = vrot.slane %v2369_v45, 4  ;;  %v2381_v38 = vrot.slane %v2379_v30, 4  ;;  %v2390_v11 = vsel %vm8870_vm15, %v2386_v29, %v2389_v61  ;;  %v2399_v25 = vor.u32 %v2398_v48, %v2397_v10 }
 0x2fd   :  { %v2111_v1 = vpop.permute.xlu2 %2110  ;;  %v2375_v51 = vsel %vm8870_vm15, %v2371_v21, %v2374_v35  ;;  %v2385_v39 = vsel %vm8870_vm15, %v2381_v38, %v2384_v16  ;;  %v2401_v46 = vrot.slane %v2399_v25, 4  ;;  %v12652_v21 = vld [vmem:[#allocation43_spill] sm:$0xff]  ;;  %v2391_v16 = vrot.slane %v2389_v61, 4 }
 0x2fe   :  { %2306 = vst.msk [vmem:[#allocation2 + $0xa8] sm:$0xf] %vm2263_vm11, %v2111_v1  ;;  %v2394_v1 = vor.u32 %v2393_v34, %v2392_v59  ;;  %v12658_v59 = vld [vmem:[#allocation52_spill] sm:$0xff] }
 0x2ff   :  { %v2427_v34 = vrot.slane %v12658_v59, 5 }
 0x300   :  { %v2095_v37 = vpop.permute.xlu0 %2094  ;;  %2759 = vrot.lane.b32.xlu1 %v2360_v36, %s6383_s23  ;;  %v12651_v36 = vld [vmem:[#allocation30_spill] sm:$0xff]  ;;  %v2396_v24 = vrot.slane %v2394_v1, 4  ;;  %v2395_v61 = vsel %vm8870_vm15, %v2391_v16, %v2394_v1 }
 0x301   :  { %v2097_v4 = vpop.permute.xlu1 %2096  ;;  %2298 = vst.msk [vmem:[#allocation2 + $0x88] sm:$0xf] %vm2263_vm11, %v2095_v37  ;;  %v2402_v37 = vrot.slane %v12650_v8, 5  ;;  %v2403_v45 = vrot.slane %v12651_v36, 6 }
 0x302   :  { %2299 = vst.msk [vmem:[#allocation2 + $0x8c] sm:$0xf] %vm2263_vm11, %v2097_v4  ;;  %v2376_v4 = vrot.slane %v2374_v35, 4  ;;  %v2412_v35 = vrot.slane %v12652_v21, 5  ;;  %v2400_v10 = vsel %vm8870_vm15, %v2396_v24, %v2399_v25  ;;  %v12663_v24 = vld [vmem:[#allocation49_spill] sm:$0xff] }
 0x303   :  { %2757 = vrot.lane.b32.xlu0 %v2355_v58, %s6383_s23  ;;  %2182 = vrot.lane.b32.xlu2 %v2025_v22, %s6382_s19  ;;  %v2404_v22 = vor.u32 %v2403_v45, %v2402_v37  ;;  %v12660_v45 = vld [vmem:[#allocation54_spill] sm:$0xff] }
 0x304   :  { %v2380_v58 = vsel %vm8870_vm15, %v2376_v4, %v2379_v30  ;;  %v2414_v7 = vor.u32 %v2413_v31, %v2412_v35  ;;  %v12657_v30 = vld [vmem:[#allocation40_spill] sm:$0xff]  ;;  %v2422_v25 = vrot.slane %v12660_v45, 5  ;;  %v12662_v31 = vld [vmem:[#allocation50_spill] sm:$0xff] }
 0x305   :  { %v2117_v57 = vpop.permute.xlu2 %2116  ;;  %v2405_v5 = vsel %vm8870_vm15, %v2401_v46, %v2404_v22  ;;  %v2406_v1 = vrot.slane %v2404_v22, 4 }
 0x306   :  { %2309 = vst.msk [vmem:[#allocation2 + $0xb4] sm:$0xf] %vm2263_vm11, %v2117_v57  ;;  %v12656_v57 = vld [vmem:[#allocation41_spill] sm:$0xff] }
 0x308   :  { %v2101_v47 = vpop.permute.xlu0 %2100  ;;  %2765 = vrot.lane.b32.xlu1 %v2375_v51, %s6383_s23 }
 0x309   :  { %v2103_v14 = vpop.permute.xlu1 %2102  ;;  %2301 = vst.msk [vmem:[#allocation2 + $0x94] sm:$0xf] %vm2263_vm11, %v2101_v47  ;;  %v12655_v47 = vld [vmem:[#allocation38_spill] sm:$0xff] }
 0x30a   :  { %2302 = vst.msk [vmem:[#allocation2 + $0x98] sm:$0xf] %vm2263_vm11, %v2103_v14  ;;  %v2408_v9 = vrot.slane %v12655_v47, 6 }
 0x30b   :  { %2763 = vrot.lane.b32.xlu0 %v2370_v20, %s6383_s23  ;;  %2761 = vrot.lane.b32.xlu2 %v2365_v13, %s6383_s23  ;;  %v2417_v20 = vrot.slane %v12656_v57, 5  ;;  %v2418_v13 = vrot.slane %v12657_v30, 6  ;;  %v12750_v57 = vld [vmem:[#allocation189_spill] sm:$0xff] }
 0x30c   :  { %v2409_v48 = vor.u32 %v2408_v9, %v2407_v17  ;;  %v2433_v17 = vrot.slane %v12663_v24, 6 }
 0x30d   :  { %v2123_v40 = vpop.permute.xlu2 %2122  ;;  %v2419_v38 = vor.u32 %v2418_v13, %v2417_v20  ;;  %v12664_v13 = vld [vmem:[#allocation61_spill] sm:$0xff] }
 0x30e   :  { %2312 = vst.msk [vmem:[#allocation2 + $0xc0] sm:$0xf] %vm2263_vm11, %v2123_v40  ;;  %v2411_v37 = vrot.slane %v2409_v48, 4  ;;  %v12661_v40 = vld [vmem:[#allocation48_spill] sm:$0xff]  ;;  %v2410_v22 = vsel %vm8870_vm15, %v2406_v1, %v2409_v48  ;;  %v12668_v1 = vld [vmem:[#allocation59_spill] sm:$0xff] }
 0x30f   :  { %v2421_v48 = vrot.slane %v2419_v38, 4 }
 0x310   :  { %v2107_v28 = vpop.permute.xlu0 %2106  ;;  %2771 = vrot.lane.b32.xlu1 %v2390_v11, %s6383_s23 }
 0x311   :  { %v2109_v49 = vpop.permute.xlu1 %2108  ;;  %2304 = vst.msk [vmem:[#allocation2 + $0xa0] sm:$0xf] %vm2263_vm11, %v2107_v28  ;;  %v12659_v28 = vld [vmem:[#allocation51_spill] sm:$0xff] }
 0x312   :  { %2305 = vst.msk [vmem:[#allocation2 + $0xa4] sm:$0xf] %vm2263_vm11, %v2109_v49  ;;  %v2416_v49 = vrot.slane %v2414_v7, 4  ;;  %v2428_v4 = vrot.slane %v12659_v28, 6 }
 0x313   :  { %2769 = vrot.lane.b32.xlu0 %v2385_v39, %s6383_s23  ;;  %2767 = vrot.lane.b32.xlu2 %v2380_v58, %s6383_s23  ;;  %v2423_v39 = vrot.slane %v12661_v40, 6 }
 0x314   :  { %v2420_v46 = vsel %vm8870_vm15, %v2416_v49, %v2419_v38  ;;  %v2429_v35 = vor.u32 %v2428_v4, %v2427_v34  ;;  %v12666_v4 = vld [vmem:[#allocation63_spill] sm:$0xff] }
 0x315   :  { %v2129_v29 = vpop.permute.xlu2 %2128  ;;  %v2424_v16 = vor.u32 %v2423_v39, %v2422_v25 }
 0x316   :  { %2315 = vst.msk [vmem:[#allocation2 + $0xcc] sm:$0xf] %vm2263_vm11, %v2129_v29  ;;  %v2442_v29 = vrot.slane %v12664_v13, 5  ;;  %v12672_v13 = vld [vmem:[#allocation72_spill] sm:$0xff] }
 0x317   :  { %v2426_v34 = vrot.slane %v2424_v16, 4  ;;  %v2425_v38 = vsel %vm8870_vm15, %v2421_v48, %v2424_v16 }
 0x318   :  { %v2113_v51 = vpop.permute.xlu0 %2112  ;;  %2777 = vrot.lane.b32.xlu1 %v2405_v5, %s6383_s23  ;;  %v2431_v5 = vrot.slane %v2429_v35, 4 }
 0x319   :  { %v2115_v14 = vpop.permute.xlu1 %2114  ;;  %2307 = vst.msk [vmem:[#allocation2 + $0xac] sm:$0xf] %vm2263_vm11, %v2113_v51  ;;  %v2415_v51 = vsel %vm8870_vm15, %v2411_v37, %v2414_v7  ;;  %v2437_v7 = vrot.slane %v12666_v4, 5 }
 0x31a   :  { %2308 = vst.msk [vmem:[#allocation2 + $0xb0] sm:$0xf] %vm2263_vm11, %v2115_v14  ;;  %v2432_v14 = vrot.slane %v12662_v31, 5  ;;  %v12690_v31 = vld [vmem:[#allocation99_spill] sm:$0xff] }
 0x31b   :  { %2775 = vrot.lane.b32.xlu0 %v2400_v10, %s6383_s23  ;;  %2773 = vrot.lane.b32.xlu2 %v2395_v61, %s6383_s23  ;;  %v12665_v10 = vld [vmem:[#allocation60_spill] sm:$0xff] }
 0x31c   :  { %v2434_v20 = vor.u32 %v2433_v17, %v2432_v14  ;;  %v2443_v61 = vrot.slane %v12665_v10, 6  ;;  %v12669_v14 = vld [vmem:[#allocation58_spill] sm:$0xff] }
 0x31d   :  { %v2135_v9 = vpop.permute.xlu2 %2134  ;;  %v2448_v17 = vrot.slane %v12669_v14, 6 }
 0x31e   :  { %2318 = vst.msk [vmem:[#allocation2 + $0xd8] sm:$0xf] %vm2263_vm11, %v2135_v9  ;;  %v2435_v39 = vsel %vm8870_vm15, %v2431_v5, %v2434_v20  ;;  %v2436_v16 = vrot.slane %v2434_v20, 4 }
 0x320   :  { %v2119_v58 = vpop.permute.xlu0 %2118  ;;  %2783 = vrot.lane.b32.xlu1 %v2420_v46, %s6383_s23  ;;  %v2447_v46 = vrot.slane %v12668_v1, 5 }
 0x321   :  { %v2121_v11 = vpop.permute.xlu1 %2120  ;;  %2310 = vst.msk [vmem:[#allocation2 + $0xb8] sm:$0xf] %vm2263_vm11, %v2119_v58  ;;  %v2444_v58 = vor.u32 %v2443_v61, %v2442_v29  ;;  %v12670_v29 = vld [vmem:[#allocation70_spill] sm:$0xff] }
 0x322   :  { %2311 = vst.msk [vmem:[#allocation2 + $0xbc] sm:$0xf] %vm2263_vm11, %v2121_v11  ;;  %v12667_v11 = vld [vmem:[#allocation57_spill] sm:$0xff]  ;;  %v2449_v5 = vor.u32 %v2448_v17, %v2447_v46  ;;  %v2457_v61 = vrot.slane %v12670_v29, 5  ;;  %v12674_v46 = vld [vmem:[#allocation68_spill] sm:$0xff] }
 0x323   :  { %2781 = vrot.lane.b32.xlu0 %v2415_v51, %s6383_s23  ;;  %v2438_v37 = vrot.slane %v12667_v11, 6  ;;  %2779 = vrot.lane.b32.xlu2 %v2410_v22, %s6383_s23  ;;  %v2430_v51 = vsel %vm8870_vm15, %v2426_v34, %v2429_v35  ;;  %v2446_v22 = vrot.slane %v2444_v58, 4  ;;  %v2452_v35 = vrot.slane %v12672_v13, 5  ;;  %v12673_v34 = vld [vmem:[#allocation66_spill] sm:$0xff]  ;;  %v12678_v13 = vld [vmem:[#allocation81_spill] sm:$0xff] }
 0x324   :  { %v2462_v17 = vrot.slane %v12674_v46, 5 }
 0x325   :  { %v2141_v9 = vpop.permute.xlu2 %2140  ;;  %v2439_v10 = vor.u32 %v2438_v37, %v2437_v7  ;;  %v2453_v7 = vrot.slane %v12673_v34, 6  ;;  %v2450_v48 = vsel %vm8870_vm15, %v2446_v22, %v2449_v5  ;;  %v12676_v22 = vld [vmem:[#allocation79_spill] sm:$0xff] }
 0x326   :  { %2321 = vst.msk [vmem:[#allocation2 + $0xe4] sm:$0xf] %vm2263_vm11, %v2141_v9  ;;  %v12675_v9 = vld [vmem:[#allocation67_spill] sm:$0xff] }
 0x327   :  { %v2441_v1 = vrot.slane %v2439_v10, 4  ;;  %v2454_v34 = vor.u32 %v2453_v7, %v2452_v35  ;;  %v2440_v20 = vsel %vm8870_vm15, %v2436_v16, %v2439_v10  ;;  %v2451_v10 = vrot.slane %v2449_v5, 4  ;;  %v12680_v16 = vld [vmem:[#allocation77_spill] sm:$0xff] }
 0x328   :  { %v2125_v25 = vpop.permute.xlu0 %2124  ;;  %2789 = vrot.lane.b32.xlu1 %v2435_v39, %s6383_s23 }
 0x329   :  { %v2127_v49 = vpop.permute.xlu1 %2126  ;;  %2313 = vst.msk [vmem:[#allocation2 + $0xc4] sm:$0xf] %vm2263_vm11, %v2125_v25  ;;  %v2445_v29 = vsel %vm8870_vm15, %v2441_v1, %v2444_v58  ;;  %v2456_v46 = vrot.slane %v2454_v34, 4  ;;  %v2467_v58 = vrot.slane %v12678_v13, 5  ;;  %v12679_v1 = vld [vmem:[#allocation75_spill] sm:$0xff]  ;;  %v2455_v5 = vsel %vm8870_vm15, %v2451_v10, %v2454_v34  ;;  %v12684_v13 = vld [vmem:[#allocation90_spill] sm:$0xff] }
 0x32a   :  { %2314 = vst.msk [vmem:[#allocation2 + $0xc8] sm:$0xf] %vm2263_vm11, %v2127_v49  ;;  %v12671_v49 = vld [vmem:[#allocation69_spill] sm:$0xff]  ;;  %v2468_v35 = vrot.slane %v12679_v1, 6  ;;  %v12686_v10 = vld [vmem:[#allocation86_spill] sm:$0xff] }
 0x32b   :  { %2787 = vrot.lane.b32.xlu0 %v2430_v51, %s6383_s23  ;;  %v2458_v25 = vrot.slane %v12671_v49, 6  ;;  %2785 = vrot.lane.b32.xlu2 %v2425_v38, %s6383_s23  ;;  %v2463_v51 = vrot.slane %v12675_v9, 6 }
 0x32c   :  { %v2469_v1 = vor.u32 %v2468_v35, %v2467_v58 }
 0x32d   :  { %v2459_v39 = vor.u32 %v2458_v25, %v2457_v61  ;;  %v2147_v49 = vpop.permute.xlu2 %2146  ;;  %v2464_v38 = vor.u32 %v2463_v51, %v2462_v17  ;;  %v2472_v61 = vrot.slane %v12676_v22, 5  ;;  %v12677_v25 = vld [vmem:[#allocation78_spill] sm:$0xff]  ;;  %v12681_v17 = vld [vmem:[#allocation76_spill] sm:$0xff] }
 0x32e   :  { %2324 = vst.msk [vmem:[#allocation2 + $0xf0] sm:$0xf] %vm2263_vm11, %v2147_v49  ;;  %v2478_v51 = vrot.slane %v12681_v17, 6 }
 0x32f   :  { %v2460_v22 = vsel %vm8870_vm15, %v2456_v46, %v2459_v39  ;;  %v12685_v46 = vld [vmem:[#allocation84_spill] sm:$0xff]  ;;  %v2466_v34 = vrot.slane %v2464_v38, 4 }
 0x330   :  { %v2131_v37 = vpop.permute.xlu0 %2130  ;;  %2795 = vrot.lane.b32.xlu1 %v2450_v48, %s6383_s23  ;;  %v2477_v48 = vrot.slane %v12680_v16, 5  ;;  %v2471_v16 = vrot.slane %v2469_v1, 4  ;;  %v2483_v58 = vrot.slane %v12685_v46, 6 }
 0x331   :  { %v2133_v14 = vpop.permute.xlu1 %2132  ;;  %2316 = vst.msk [vmem:[#allocation2 + $0xd0] sm:$0xf] %vm2263_vm11, %v2131_v37  ;;  %v2473_v37 = vrot.slane %v12677_v25, 6 }
 0x332   :  { %2317 = vst.msk [vmem:[#allocation2 + $0xd4] sm:$0xf] %vm2263_vm11, %v2133_v14  ;;  %v2461_v14 = vrot.slane %v2459_v39, 4  ;;  %v2482_v39 = vrot.slane %v12684_v13, 5 }
 0x333   :  { %2793 = vrot.lane.b32.xlu0 %v2445_v29, %s6383_s23  ;;  %2791 = vrot.lane.b32.xlu2 %v2440_v20, %s6383_s23  ;;  %v2474_v7 = vor.u32 %v2473_v37, %v2472_v61  ;;  %v2479_v20 = vor.u32 %v2478_v51, %v2477_v48  ;;  %v12683_v37 = vld [vmem:[#allocation87_spill] sm:$0xff]  ;;  %v12687_v48 = vld [vmem:[#allocation85_spill] sm:$0xff] }
 0x334   :  { %v2465_v29 = vsel %vm8870_vm15, %v2461_v14, %v2464_v38  ;;  %v12682_v14 = vld [vmem:[#allocation88_spill] sm:$0xff]  ;;  %v2493_v51 = vrot.slane %v12687_v48, 6  ;;  %v2484_v13 = vor.u32 %v2483_v58, %v2482_v39  ;;  %v2470_v38 = vsel %vm8870_vm15, %v2466_v34, %v2469_v1  ;;  %v12692_v34 = vld [vmem:[#allocation94_spill] sm:$0xff] }
 0x335   :  { %v2153_v25 = vpop.permute.xlu2 %2152  ;;  %v2487_v61 = vrot.slane %v12682_v14, 5  ;;  %v2475_v46 = vsel %vm8870_vm15, %v2471_v16, %v2474_v7  ;;  %v12691_v16 = vld [vmem:[#allocation95_spill] sm:$0xff]  ;;  %v2481_v1 = vrot.slane %v2479_v20, 4 }
 0x336   :  { %2327 = vst.msk [vmem:[#allocation2 + $0xfc] sm:$0xf] %vm2263_vm11, %v2153_v25  ;;  %v2486_v24 = vrot.slane %v2484_v13, 4  ;;  %v2498_v39 = vrot.slane %v12691_v16, 6 }
 0x338   :  { %v2137_v49 = vpop.permute.xlu0 %2136  ;;  %2801 = vrot.lane.b32.xlu1 %v2465_v29, %s6383_s23  ;;  %v2492_v29 = vrot.slane %v12686_v10, 5  ;;  %v12756_v10 = vld [vmem:[#allocation198_spill] sm:$0xff] }
 0x339   :  { %v2139_v9 = vpop.permute.xlu1 %2138  ;;  %2319 = vst.msk [vmem:[#allocation2 + $0xdc] sm:$0xf] %vm2263_vm11, %v2137_v49  ;;  %v2488_v49 = vrot.slane %v12683_v37, 6 }
 0x33a   :  { %2320 = vst.msk [vmem:[#allocation2 + $0xe0] sm:$0xf] %vm2263_vm11, %v2139_v9  ;;  %v2476_v9 = vrot.slane %v2474_v7, 4  ;;  %v2497_v7 = vrot.slane %v12690_v31, 5 }
 0x33b   :  { %2799 = vrot.lane.b32.xlu0 %v2460_v22, %s6383_s23  ;;  %2797 = vrot.lane.b32.xlu2 %v2455_v5, %s6383_s23  ;;  %v2489_v35 = vor.u32 %v2488_v49, %v2487_v61  ;;  %v2494_v5 = vor.u32 %v2493_v51, %v2492_v29  ;;  %v12689_v49 = vld [vmem:[#allocation96_spill] sm:$0xff]  ;;  %v12693_v29 = vld [vmem:[#allocation93_spill] sm:$0xff] }
 0x33c   :  { %v2480_v22 = vsel %vm8870_vm15, %v2476_v9, %v2479_v20  ;;  %v12688_v9 = vld [vmem:[#allocation97_spill] sm:$0xff]  ;;  %v2508_v51 = vrot.slane %v12693_v29, 6  ;;  %v2499_v40 = vor.u32 %v2498_v39, %v2497_v7 }
 0x33d   :  { %v2159_v11 = vpop.permute.xlu2 %2158  ;;  %v2502_v61 = vrot.slane %v12688_v9, 5  ;;  %v2490_v59 = vsel %vm8870_vm15, %v2486_v24, %v2489_v35 }
 0x33e   :  { %2330 = vst.msk [vmem:[#allocation2 + $0x108] sm:$0xf] %vm2263_vm11, %v2159_v11  ;;  %v2501_v29 = vrot.slane %v2499_v40, 4 }
 0x340   :  { %v2143_v25 = vpop.permute.xlu0 %2142  ;;  %2807 = vrot.lane.b32.xlu1 %v2480_v22, %s6383_s23  ;;  %v2507_v22 = vrot.slane %v12692_v34, 5  ;;  %v12696_v34 = vld [vmem:[#allocation108_spill] sm:$0xff] }
 0x341   :  { %v2145_v17 = vpop.permute.xlu1 %2144  ;;  %2322 = vst.msk [vmem:[#allocation2 + $0xe8] sm:$0xf] %vm2263_vm11, %v2143_v25  ;;  %v2503_v25 = vrot.slane %v12689_v49, 6  ;;  %v2512_v24 = vrot.slane %v12696_v34, 5  ;;  %v12702_v34 = vld [vmem:[#allocation122_spill] sm:$0xff] }
 0x342   :  { %2323 = vst.msk [vmem:[#allocation2 + $0xec] sm:$0xf] %vm2263_vm11, %v2145_v17  ;;  %v2491_v17 = vrot.slane %v2489_v35, 4  ;;  %v12697_v35 = vld [vmem:[#allocation102_spill] sm:$0xff] }
 0x343   :  { %2805 = vrot.lane.b32.xlu0 %v2475_v46, %s6383_s23  ;;  %2803 = vrot.lane.b32.xlu2 %v2470_v38, %s6383_s23  ;;  %v2504_v58 = vor.u32 %v2503_v25, %v2502_v61  ;;  %v2509_v38 = vor.u32 %v2508_v51, %v2507_v22  ;;  %v12695_v25 = vld [vmem:[#allocation105_spill] sm:$0xff]  ;;  %v2513_v7 = vrot.slane %v12697_v35, 6  ;;  %v12699_v22 = vld [vmem:[#allocation103_spill] sm:$0xff] }
 0x344   :  { %v2495_v46 = vsel %vm8870_vm15, %v2491_v17, %v2494_v5  ;;  %v12694_v17 = vld [vmem:[#allocation106_spill] sm:$0xff]  ;;  %v2523_v51 = vrot.slane %v12699_v22, 6 }
 0x345   :  { %v2165_v28 = vpop.permute.xlu2 %2164  ;;  %v2506_v20 = vrot.slane %v2504_v58, 4  ;;  %v2517_v61 = vrot.slane %v12694_v17, 5  ;;  %v2505_v17 = vsel %vm8870_vm15, %v2501_v29, %v2504_v58  ;;  %v2514_v35 = vor.u32 %v2513_v7, %v2512_v24  ;;  %v12703_v29 = vld [vmem:[#allocation111_spill] sm:$0xff] }
 0x346   :  { %2333 = vst.msk [vmem:[#allocation2 + $0x114] sm:$0xf] %vm2263_vm11, %v2165_v28  ;;  %v2527_v58 = vrot.slane %v12702_v34, 5  ;;  %v2528_v24 = vrot.slane %v12703_v29, 6  ;;  %v12708_v34 = vld [vmem:[#allocation131_spill] sm:$0xff] }
 0x348   :  { %v2149_v11 = vpop.permute.xlu0 %2148  ;;  %2813 = vrot.lane.b32.xlu1 %v2495_v46, %s6383_s23  ;;  %v2529_v29 = vor.u32 %v2528_v24, %v2527_v58  ;;  %v12710_v24 = vld [vmem:[#allocation120_spill] sm:$0xff] }
 0x349   :  { %v2151_v4 = vpop.permute.xlu1 %2150  ;;  %2325 = vst.msk [vmem:[#allocation2 + $0xf4] sm:$0xf] %vm2263_vm11, %v2149_v11  ;;  %v2518_v11 = vrot.slane %v12695_v25, 6 }
 0x34a   :  { %2326 = vst.msk [vmem:[#allocation2 + $0xf8] sm:$0xf] %vm2263_vm11, %v2151_v4  ;;  %v2485_v4 = vsel %vm8870_vm15, %v2481_v1, %v2484_v13  ;;  %v2510_v13 = vsel %vm8870_vm15, %v2506_v20, %v2509_v38  ;;  %v12698_v1 = vld [vmem:[#allocation104_spill] sm:$0xff]  ;;  %v12700_v20 = vld [vmem:[#allocation115_spill] sm:$0xff] }
 0x34b   :  { %2811 = vrot.lane.b32.xlu0 %v2490_v59, %s6383_s23  ;;  %2809 = vrot.lane.b32.xlu2 %v2485_v4, %s6383_s23  ;;  %v2496_v59 = vrot.slane %v2494_v5, 4  ;;  %v2519_v39 = vor.u32 %v2518_v11, %v2517_v61  ;;  %v2522_v46 = vrot.slane %v12698_v1, 5  ;;  %v2532_v61 = vrot.slane %v12700_v20, 5  ;;  %v12701_v11 = vld [vmem:[#allocation114_spill] sm:$0xff] }
 0x34c   :  { %v2516_v1 = vrot.slane %v2514_v35, 4 }
 0x34d   :  { %v2171_v25 = vpop.permute.xlu2 %2170  ;;  %v2521_v5 = vrot.slane %v2519_v39, 4  ;;  %v2524_v4 = vor.u32 %v2523_v51, %v2522_v46  ;;  %v12705_v46 = vld [vmem:[#allocation112_spill] sm:$0xff] }
 0x34e   :  { %2336 = vst.msk [vmem:[#allocation2 + $0x120] sm:$0xf] %vm2263_vm11, %v2171_v25  ;;  %v2538_v51 = vrot.slane %v12705_v46, 6  ;;  %v2520_v20 = vsel %vm8870_vm15, %v2516_v1, %v2519_v39  ;;  %v2542_v39 = vrot.slane %v12708_v34, 5  ;;  %v12709_v1 = vld [vmem:[#allocation121_spill] sm:$0xff]  ;;  %v12714_v34 = vld [vmem:[#allocation140_spill] sm:$0xff] }
 0x34f   :  { %v2543_v58 = vrot.slane %v12709_v1, 6  ;;  %v2557_v49 = vrot.slane %v12714_v34, 5 }
 0x350   :  { %v2155_v28 = vpop.permute.xlu0 %2154  ;;  %2819 = vrot.lane.b32.xlu1 %v2510_v13, %s6383_s23 }
 0x351   :  { %v2157_v45 = vpop.permute.xlu1 %2156  ;;  %2328 = vst.msk [vmem:[#allocation2 + $0x100] sm:$0xf] %vm2263_vm11, %v2155_v28  ;;  %v2533_v28 = vrot.slane %v12701_v11, 6 }
 0x352   :  { %2329 = vst.msk [vmem:[#allocation2 + $0x104] sm:$0xf] %vm2263_vm11, %v2157_v45  ;;  %v2500_v45 = vsel %vm8870_vm15, %v2496_v59, %v2499_v40  ;;  %v2511_v40 = vrot.slane %v2509_v38, 4  ;;  %v12704_v59 = vld [vmem:[#allocation113_spill] sm:$0xff] }
 0x353   :  { %2817 = vrot.lane.b32.xlu0 %v2505_v17, %s6383_s23  ;;  %2815 = vrot.lane.b32.xlu2 %v2500_v45, %s6383_s23  ;;  %v2525_v17 = vsel %vm8870_vm15, %v2521_v5, %v2524_v4  ;;  %v2534_v7 = vor.u32 %v2533_v28, %v2532_v61  ;;  %v2537_v13 = vrot.slane %v12704_v59, 5  ;;  %v12707_v5 = vld [vmem:[#allocation123_spill] sm:$0xff]  ;;  %v2531_v59 = vrot.slane %v2529_v29, 4 }
 0x354   :  { %v2515_v38 = vsel %vm8870_vm15, %v2511_v40, %v2514_v35  ;;  %v2548_v61 = vrot.slane %v12707_v5, 6  ;;  %v2552_v40 = vrot.slane %v12710_v24, 5 }
 0x355   :  { %v2177_v11 = vpop.permute.xlu2 %2176  ;;  %v2536_v28 = vrot.slane %v2534_v7, 4 }
 0x356   :  { %2339 = vst.msk [vmem:[#allocation2 + $0x12c] sm:$0xf] %vm2263_vm11, %v2177_v11 }
 0x358   :  { %v2161_v25 = vpop.permute.xlu0 %2160  ;;  %2825 = vrot.lane.b32.xlu1 %v2525_v17, %s6383_s23 }
 0x359   :  { %v2163_v22 = vpop.permute.xlu1 %2162  ;;  %2331 = vst.msk [vmem:[#allocation2 + $0x10c] sm:$0xf] %vm2263_vm11, %v2161_v25  ;;  %v2539_v25 = vor.u32 %v2538_v51, %v2537_v13  ;;  %v2526_v13 = vrot.slane %v2524_v4, 4 }
 0x35a   :  { %2332 = vst.msk [vmem:[#allocation2 + $0x110] sm:$0xf] %vm2263_vm11, %v2163_v22  ;;  %v12706_v22 = vld [vmem:[#allocation124_spill] sm:$0xff] }
 0x35b   :  { %v2547_v45 = vrot.slane %v12706_v22, 5  ;;  %2823 = vrot.lane.b32.xlu0 %v2520_v20, %s6383_s23  ;;  %2821 = vrot.lane.b32.xlu2 %v2515_v38, %s6383_s23  ;;  %v12711_v20 = vld [vmem:[#allocation119_spill] sm:$0xff]  ;;  %v2540_v51 = vsel %vm8870_vm15, %v2536_v28, %v2539_v25  ;;  %v2535_v22 = vsel %vm8870_vm15, %v2531_v59, %v2534_v7  ;;  %v12715_v7 = vld [vmem:[#allocation128_spill] sm:$0xff] }
 0x35c   :  { %v2553_v17 = vrot.slane %v12711_v20, 6  ;;  %v2558_v59 = vrot.slane %v12715_v7, 6  ;;  %v12720_v7 = vld [vmem:[#allocation146_spill] sm:$0xff] }
 0x35d   :  { %v2549_v35 = vor.u32 %v2548_v61, %v2547_v45  ;;  %v2183_v5 = vpop.permute.xlu2 %2182  ;;  %v2530_v45 = vsel %vm8870_vm15, %v2526_v13, %v2529_v29  ;;  %v12712_v61 = vld [vmem:[#allocation133_spill] sm:$0xff] }
 0x35e   :  { %2343 = vst.msk [vmem:[#allocation2 + $0x138] sm:$0x7] %vm2342_vm0, %v2183_v5  ;;  %v2554_v1 = vor.u32 %v2553_v17, %v2552_v40  ;;  %v2562_v4 = vrot.slane %v12712_v61, 5  ;;  %v12717_v17 = vld [vmem:[#allocation129_spill] sm:$0xff]  ;;  %vm4613_vm0 = vcmask 257248  }
 0x35f   :  { %v2551_v38 = vrot.slane %v2549_v35, 4  ;;  %v2568_v13 = vrot.slane %v12717_v17, 6 }
 0x360   :  { %v2167_v11 = vpop.permute.xlu0 %2166  ;;  %2831 = vrot.lane.b32.xlu1 %v2540_v51, %s6383_s23 }
 0x361   :  { %v2169_v46 = vpop.permute.xlu1 %2168  ;;  %2334 = vst.msk [vmem:[#allocation2 + $0x118] sm:$0xf] %vm2263_vm11, %v2167_v11  ;;  %v12713_v11 = vld [vmem:[#allocation132_spill] sm:$0xff]  ;;  %v2555_v29 = vsel %vm8870_vm15, %v2551_v38, %v2554_v1  ;;  %v12718_v38 = vld [vmem:[#allocation142_spill] sm:$0xff] }
 0x362   :  { %2335 = vst.msk [vmem:[#allocation2 + $0x11c] sm:$0xf] %vm2263_vm11, %v2169_v46  ;;  %v2544_v46 = vor.u32 %v2543_v58, %v2542_v39  ;;  %v2563_v20 = vrot.slane %v12713_v11, 6  ;;  %v12716_v58 = vld [vmem:[#allocation130_spill] sm:$0xff] }
 0x363   :  { %2829 = vrot.lane.b32.xlu0 %v2535_v22, %s6383_s23  ;;  %2827 = vrot.lane.b32.xlu2 %v2530_v45, %s6383_s23  ;;  %v2541_v22 = vrot.slane %v2539_v25, 4  ;;  %v2567_v40 = vrot.slane %v12716_v58, 5 }
 0x364   :  { %v2546_v24 = vrot.slane %v2544_v46, 4  ;;  %v2564_v39 = vor.u32 %v2563_v20, %v2562_v4  ;;  %v2577_v4 = vrot.slane %v12718_v38, 5 }
 0x365   :  { %v2762_v51 = vpop.permute.xlu2 %2761  ;;  %v2545_v45 = vsel %vm8870_vm15, %v2541_v22, %v2544_v46  ;;  %v2569_v20 = vor.u32 %v2568_v13, %v2567_v40  ;;  %v2556_v46 = vrot.slane %v2554_v1, 4  ;;  %v12722_v22 = vld [vmem:[#allocation138_spill] sm:$0xff]  ;;  %v12723_v13 = vld [vmem:[#allocation137_spill] sm:$0xff] }
 0x366   :  { %v2550_v11 = vsel %vm8870_vm15, %v2546_v24, %v2549_v35  ;;  %2997 = vst.msk [vmem:[#allocation2 + $0x8] sm:$0xf] %vm2994_vm1, %v2762_v51  ;;  %v2566_v25 = vrot.slane %v2564_v39, 4  ;;  %v2572_v35 = vrot.slane %v12720_v7, 5  ;;  %v2582_v40 = vrot.slane %v12722_v22, 5 }
 0x367   :  { %v2583_v51 = vrot.slane %v12723_v13, 6 }
 0x368   :  { %v2173_v5 = vpop.permute.xlu0 %2172  ;;  %2837 = vrot.lane.b32.xlu1 %v2555_v29, %s6383_s23 }
 0x369   :  { %v2175_v28 = vpop.permute.xlu1 %2174  ;;  %2337 = vst.msk [vmem:[#allocation2 + $0x124] sm:$0xf] %vm2263_vm11, %v2173_v5  ;;  %v12719_v5 = vld [vmem:[#allocation141_spill] sm:$0xff] }
 0x36a   :  { %2338 = vst.msk [vmem:[#allocation2 + $0x128] sm:$0xf] %vm2263_vm11, %v2175_v28  ;;  %v2559_v28 = vor.u32 %v2558_v59, %v2557_v49  ;;  %v2578_v17 = vrot.slane %v12719_v5, 6  ;;  %v12721_v49 = vld [vmem:[#allocation139_spill] sm:$0xff]  ;;  %v12726_v5 = vld [vmem:[#allocation154_spill] sm:$0xff] }
 0x36b   :  { %2835 = vrot.lane.b32.xlu0 %v2550_v11, %s6383_s23  ;;  %v2573_v24 = vrot.slane %v12721_v49, 6  ;;  %2833 = vrot.lane.b32.xlu2 %v2545_v45, %s6383_s23  ;;  %v2570_v11 = vsel %vm8870_vm15, %v2566_v25, %v2569_v20  ;;  %v12724_v45 = vld [vmem:[#allocation151_spill] sm:$0xff] }
 0x36c   :  { %v2561_v61 = vrot.slane %v2559_v28, 4  ;;  %v2579_v29 = vor.u32 %v2578_v17, %v2577_v4  ;;  %v2560_v1 = vsel %vm8870_vm15, %v2556_v46, %v2559_v28  ;;  %v2584_v17 = vor.u32 %v2583_v51, %v2582_v40  ;;  %v12725_v4 = vld [vmem:[#allocation150_spill] sm:$0xff]  ;;  %v12728_v46 = vld [vmem:[#allocation149_spill] sm:$0xff]  ;;  %v12729_v40 = vld [vmem:[#allocation148_spill] sm:$0xff] }
 0x36d   :  { %v2768_v34 = vpop.permute.xlu2 %2767  ;;  %v2574_v7 = vor.u32 %v2573_v24, %v2572_v35  ;;  %v2592_v25 = vrot.slane %v12724_v45, 5  ;;  %v2571_v28 = vrot.slane %v2569_v20, 4  ;;  %v2598_v51 = vrot.slane %v12729_v40, 6 }
 0x36e   :  { %v2565_v49 = vsel %vm8870_vm15, %v2561_v61, %v2564_v39  ;;  %3000 = vst.msk [vmem:[#allocation2 + $0x14] sm:$0xf] %vm2994_vm1, %v2768_v34  ;;  %v2587_v61 = vrot.slane %v12726_v5, 5  ;;  %v12727_v39 = vld [vmem:[#allocation147_spill] sm:$0xff]  ;;  %v12732_v5 = vld [vmem:[#allocation162_spill] sm:$0xff] }
 0x36f   :  { %v2576_v22 = vrot.slane %v2574_v7, 4  ;;  %v2588_v35 = vrot.slane %v12727_v39, 6  ;;  %v2575_v20 = vsel %vm8870_vm15, %v2571_v28, %v2574_v7  ;;  %v2586_v7 = vrot.slane %v2584_v17, 4  ;;  %v12734_v28 = vld [vmem:[#allocation158_spill] sm:$0xff] }
 0x370   :  { %v2179_v59 = vpop.permute.xlu0 %2178  ;;  %2843 = vrot.lane.b32.xlu1 %v2570_v11, %s6383_s23  ;;  %v2597_v11 = vrot.slane %v12728_v46, 5 }
 0x371   :  { %v2181_v58 = vpop.permute.xlu1 %2180  ;;  %2340 = vst.msk [vmem:[#allocation2 + $0x130] sm:$0xf] %vm2263_vm11, %v2179_v59  ;;  %v2593_v59 = vrot.slane %v12725_v4, 6  ;;  %v2580_v45 = vsel %vm8870_vm15, %v2576_v22, %v2579_v29  ;;  %v2589_v39 = vor.u32 %v2588_v35, %v2587_v61  ;;  %v12733_v22 = vld [vmem:[#allocation156_spill] sm:$0xff] }
 0x372   :  { %2341 = vst.msk [vmem:[#allocation2 + $0x134] sm:$0xf] %vm2263_vm11, %v2181_v58  ;;  %v2581_v58 = vrot.slane %v2579_v29, 4  ;;  %v2602_v29 = vrot.slane %v12732_v5, 5  ;;  %v2603_v61 = vrot.slane %v12733_v22, 6  ;;  %v12738_v5 = vld [vmem:[#allocation171_spill] sm:$0xff] }
 0x373   :  { %2841 = vrot.lane.b32.xlu0 %v2565_v49, %s6383_s23  ;;  %2839 = vrot.lane.b32.xlu2 %v2560_v1, %s6383_s23  ;;  %v2594_v24 = vor.u32 %v2593_v59, %v2592_v25  ;;  %v2599_v1 = vor.u32 %v2598_v51, %v2597_v11  ;;  %v12731_v59 = vld [vmem:[#allocation159_spill] sm:$0xff]  ;;  %v2591_v46 = vrot.slane %v2589_v39, 4  ;;  %v12735_v11 = vld [vmem:[#allocation157_spill] sm:$0xff]  ;;  %vm3633_vm11 = vcmask 190624  }
 0x374   :  { %v2585_v49 = vsel %vm8870_vm15, %v2581_v58, %v2584_v17  ;;  %v12730_v58 = vld [vmem:[#allocation160_spill] sm:$0xff]  ;;  %v2613_v51 = vrot.slane %v12735_v11, 6  ;;  %v2604_v22 = vor.u32 %v2603_v61, %v2602_v29  ;;  %v2590_v17 = vsel %vm8870_vm15, %v2586_v7, %v2589_v39  ;;  %v12740_v7 = vld [vmem:[#allocation167_spill] sm:$0xff] }
 0x375   :  { %v2774_v4 = vpop.permute.xlu2 %2773  ;;  %v2607_v25 = vrot.slane %v12730_v58, 5  ;;  %v2595_v58 = vsel %vm8870_vm15, %v2591_v46, %v2594_v24  ;;  %v12739_v46 = vld [vmem:[#allocation165_spill] sm:$0xff]  ;;  %v2601_v39 = vrot.slane %v2599_v1, 4 }
 0x376   :  { %3003 = vst.msk [vmem:[#allocation2 + $0x20] sm:$0xf] %vm2994_vm1, %v2774_v4  ;;  %v2618_v29 = vrot.slane %v12739_v46, 6 }
 0x378   :  { %v2758_v34 = vpop.permute.xlu0 %2757  ;;  %2849 = vrot.lane.b32.xlu1 %v2585_v49, %s6383_s23  ;;  %v2612_v49 = vrot.slane %v12734_v28, 5  ;;  %v2606_v28 = vrot.slane %v2604_v22, 4 }
 0x379   :  { %v2760_v13 = vpop.permute.xlu1 %2759  ;;  %2995 = vst.msk [vmem:[#allocation2] sm:$0xf] %vm2994_vm1, %v2758_v34  ;;  %v2608_v34 = vrot.slane %v12731_v59, 6 }
 0x37a   :  { %2996 = vst.msk [vmem:[#allocation2 + $0x4] sm:$0xf] %vm2994_vm1, %v2760_v13  ;;  %v2596_v13 = vrot.slane %v2594_v24, 4  ;;  %v2617_v24 = vrot.slane %v12738_v5, 5  ;;  %v12744_v5 = vld [vmem:[#allocation180_spill] sm:$0xff] }
 0x37b   :  { %2847 = vrot.lane.b32.xlu0 %v2580_v45, %s6383_s23  ;;  %2845 = vrot.lane.b32.xlu2 %v2575_v20, %s6383_s23  ;;  %v2609_v35 = vor.u32 %v2608_v34, %v2607_v25  ;;  %v2614_v20 = vor.u32 %v2613_v51, %v2612_v49  ;;  %v12737_v34 = vld [vmem:[#allocation168_spill] sm:$0xff]  ;;  %v12741_v49 = vld [vmem:[#allocation166_spill] sm:$0xff] }
 0x37c   :  { %v2600_v45 = vsel %vm8870_vm15, %v2596_v13, %v2599_v1  ;;  %v12736_v13 = vld [vmem:[#allocation169_spill] sm:$0xff]  ;;  %v2628_v51 = vrot.slane %v12741_v49, 6  ;;  %v2619_v46 = vor.u32 %v2618_v29, %v2617_v24  ;;  %v2605_v1 = vsel %vm8870_vm15, %v2601_v39, %v2604_v22  ;;  %v12746_v39 = vld [vmem:[#allocation176_spill] sm:$0xff] }
 0x37d   :  { %v2780_v59 = vpop.permute.xlu2 %2779  ;;  %v2622_v25 = vrot.slane %v12736_v13, 5  ;;  %v2610_v13 = vsel %vm8870_vm15, %v2606_v28, %v2609_v35  ;;  %v12745_v28 = vld [vmem:[#allocation174_spill] sm:$0xff]  ;;  %v2616_v22 = vrot.slane %v2614_v20, 4 }
 0x37e   :  { %3006 = vst.msk [vmem:[#allocation2 + $0x2c] sm:$0xf] %vm2994_vm1, %v2780_v59  ;;  %v2633_v24 = vrot.slane %v12745_v28, 6 }
 0x380   :  { %v2764_v4 = vpop.permute.xlu0 %2763  ;;  %2855 = vrot.lane.b32.xlu1 %v2600_v45, %s6383_s23  ;;  %v2627_v45 = vrot.slane %v12740_v7, 5  ;;  %v2621_v7 = vrot.slane %v2619_v46, 4 }
 0x381   :  { %v2766_v40 = vpop.permute.xlu1 %2765  ;;  %2998 = vst.msk [vmem:[#allocation2 + $0xc] sm:$0xf] %vm2994_vm1, %v2764_v4  ;;  %v2623_v4 = vrot.slane %v12737_v34, 6 }
 0x382   :  { %2999 = vst.msk [vmem:[#allocation2 + $0x10] sm:$0xf] %vm2994_vm1, %v2766_v40  ;;  %v2611_v40 = vrot.slane %v2609_v35, 4  ;;  %v2632_v35 = vrot.slane %v12744_v5, 5 }
 0x383   :  { %2853 = vrot.lane.b32.xlu0 %v2595_v58, %s6383_s23  ;;  %2851 = vrot.lane.b32.xlu2 %v2590_v17, %s6383_s23  ;;  %v2624_v61 = vor.u32 %v2623_v4, %v2622_v25  ;;  %v2629_v17 = vor.u32 %v2628_v51, %v2627_v45  ;;  %v12743_v4 = vld [vmem:[#allocation177_spill] sm:$0xff]  ;;  %v12747_v45 = vld [vmem:[#allocation175_spill] sm:$0xff] }
 0x384   :  { %v2615_v58 = vsel %vm8870_vm15, %v2611_v40, %v2614_v20  ;;  %v12742_v40 = vld [vmem:[#allocation178_spill] sm:$0xff]  ;;  %v2643_v51 = vrot.slane %v12747_v45, 6  ;;  %v2634_v5 = vor.u32 %v2633_v24, %v2632_v35  ;;  %v2620_v20 = vsel %vm8870_vm15, %v2616_v22, %v2619_v46  ;;  %v12752_v22 = vld [vmem:[#allocation185_spill] sm:$0xff]  ;;  %v12818_v45 = vld [vmem:[#allocation100_spill] sm:$0xff] }
 0x385   :  { %v2786_v34 = vpop.permute.xlu2 %2785  ;;  %v2637_v25 = vrot.slane %v12742_v40, 5  ;;  %v2625_v28 = vsel %vm8870_vm15, %v2621_v7, %v2624_v61  ;;  %v12751_v7 = vld [vmem:[#allocation183_spill] sm:$0xff]  ;;  %v2631_v46 = vrot.slane %v2629_v17, 4 }
 0x386   :  { %3009 = vst.msk [vmem:[#allocation2 + $0x38] sm:$0xf] %vm2994_vm1, %v2786_v34  ;;  %v2636_v30 = vrot.slane %v2634_v5, 4  ;;  %v2648_v35 = vrot.slane %v12751_v7, 6 }
 0x388   :  { %v2770_v59 = vpop.permute.xlu0 %2769  ;;  %2861 = vrot.lane.b32.xlu1 %v2615_v58, %s6383_s23  ;;  %v2642_v58 = vrot.slane %v12746_v39, 5 }
 0x389   :  { %v2772_v11 = vpop.permute.xlu1 %2771  ;;  %3001 = vst.msk [vmem:[#allocation2 + $0x18] sm:$0xf] %vm2994_vm1, %v2770_v59  ;;  %v2638_v59 = vrot.slane %v12743_v4, 6  ;;  %v12815_v4 = vld [vmem:[#allocation89_spill] sm:$0xff] }
 0x38a   :  { %3002 = vst.msk [vmem:[#allocation2 + $0x1c] sm:$0xf] %vm2994_vm1, %v2772_v11  ;;  %v2626_v11 = vrot.slane %v2624_v61, 4  ;;  %v2647_v61 = vrot.slane %v12750_v57, 5 }
 0x38b   :  { %2859 = vrot.lane.b32.xlu0 %v2610_v13, %s6383_s23  ;;  %2857 = vrot.lane.b32.xlu2 %v2605_v1, %s6383_s23  ;;  %v2639_v29 = vor.u32 %v2638_v59, %v2637_v25  ;;  %v2644_v1 = vor.u32 %v2643_v51, %v2642_v58  ;;  %v12749_v59 = vld [vmem:[#allocation186_spill] sm:$0xff]  ;;  %v12753_v58 = vld [vmem:[#allocation184_spill] sm:$0xff] }
 0x38c   :  { %v2630_v13 = vsel %vm8870_vm15, %v2626_v11, %v2629_v17  ;;  %v12748_v11 = vld [vmem:[#allocation187_spill] sm:$0xff]  ;;  %v2658_v51 = vrot.slane %v12753_v58, 6  ;;  %v2649_v16 = vor.u32 %v2648_v35, %v2647_v61 }
 0x38d   :  { %v2792_v38 = vpop.permute.xlu2 %2791  ;;  %v2652_v25 = vrot.slane %v12748_v11, 5  ;;  %v2640_v21 = vsel %vm8870_vm15, %v2636_v30, %v2639_v29  ;;  %v2662_v30 = vrot.slane %v12756_v10, 5  ;;  %v12797_v10 = vld [vmem:[#allocation36_spill] sm:$0xff]  ;;  %v12803_v58 = vld [vmem:[#allocation55_spill] sm:$0xff] }
 0x38e   :  { %3012 = vst.msk [vmem:[#allocation2 + $0x44] sm:$0xf] %vm2994_vm1, %v2792_v38  ;;  %v2651_v48 = vrot.slane %v2649_v16, 4  ;;  %v12806_v11 = vld [vmem:[#allocation64_spill] sm:$0xff] }
 0x390   :  { %v2776_v34 = vpop.permute.xlu0 %2775  ;;  %2867 = vrot.lane.b32.xlu1 %v2630_v13, %s6383_s23  ;;  %v2657_v13 = vrot.slane %v12752_v22, 5 }
 0x391   :  { %v2778_v49 = vpop.permute.xlu1 %2777  ;;  %3004 = vst.msk [vmem:[#allocation2 + $0x24] sm:$0xf] %vm2994_vm1, %v2776_v34  ;;  %v2653_v34 = vrot.slane %v12749_v59, 6 }
 0x392   :  { %3005 = vst.msk [vmem:[#allocation2 + $0x28] sm:$0xf] %vm2994_vm1, %v2778_v49  ;;  %v2641_v49 = vrot.slane %v2639_v29, 4  ;;  %v12757_v29 = vld [vmem:[#allocation192_spill] sm:$0xff] }
 0x393   :  { %2865 = vrot.lane.b32.xlu0 %v2625_v28, %s6383_s23  ;;  %2863 = vrot.lane.b32.xlu2 %v2620_v20, %s6383_s23  ;;  %v2654_v24 = vor.u32 %v2653_v34, %v2652_v25  ;;  %v2659_v20 = vor.u32 %v2658_v51, %v2657_v13  ;;  %v12755_v34 = vld [vmem:[#allocation195_spill] sm:$0xff]  ;;  %v2663_v61 = vrot.slane %v12757_v29, 6  ;;  %v12759_v13 = vld [vmem:[#allocation193_spill] sm:$0xff] }
 0x394   :  { %v2645_v28 = vsel %vm8870_vm15, %v2641_v49, %v2644_v1  ;;  %v12754_v49 = vld [vmem:[#allocation196_spill] sm:$0xff]  ;;  %v2673_v51 = vrot.slane %v12759_v13, 6 }
 0x395   :  { %v2798_v27 = vpop.permute.xlu2 %2797  ;;  %v2656_v17 = vrot.slane %v2654_v24, 4  ;;  %v2667_v25 = vrot.slane %v12754_v49, 5  ;;  %v2655_v14 = vsel %vm8870_vm15, %v2651_v48, %v2654_v24  ;;  %v2664_v47 = vor.u32 %v2663_v61, %v2662_v30  ;;  %v12763_v24 = vld [vmem:[#allocation201_spill] sm:$0xff]  ;;  %v12794_v49 = vld [vmem:[#allocation27_spill] sm:$0xff] }
 0x396   :  { %3015 = vst.msk [vmem:[#allocation2 + $0x50] sm:$0xf] %vm2994_vm1, %v2798_v27  ;;  %v2677_v48 = vrot.slane %v12762_v54, 5  ;;  %v2678_v30 = vrot.slane %v12763_v24, 6  ;;  %v12768_v54 = vld [vmem:[#allocation216_spill] sm:$0xff] }
 0x398   :  { %v2782_v38 = vpop.permute.xlu0 %2781  ;;  %2873 = vrot.lane.b32.xlu1 %v2645_v28, %s6383_s23  ;;  %v2679_v24 = vor.u32 %v2678_v30, %v2677_v48 }
 0x399   :  { %v2784_v9 = vpop.permute.xlu1 %2783  ;;  %3007 = vst.msk [vmem:[#allocation2 + $0x30] sm:$0xf] %vm2994_vm1, %v2782_v38  ;;  %v2668_v38 = vrot.slane %v12755_v34, 6 }
 0x39a   :  { %3008 = vst.msk [vmem:[#allocation2 + $0x34] sm:$0xf] %vm2994_vm1, %v2784_v9  ;;  %v2635_v9 = vsel %vm8870_vm15, %v2631_v46, %v2634_v5  ;;  %v2660_v5 = vsel %vm8870_vm15, %v2656_v17, %v2659_v20  ;;  %v12758_v46 = vld [vmem:[#allocation194_spill] sm:$0xff]  ;;  %v12760_v17 = vld [vmem:[#allocation205_spill] sm:$0xff] }
 0x39b   :  { %2871 = vrot.lane.b32.xlu0 %v2640_v21, %s6383_s23  ;;  %2869 = vrot.lane.b32.xlu2 %v2635_v9, %s6383_s23  ;;  %v2646_v21 = vrot.slane %v2644_v1, 4  ;;  %v2669_v35 = vor.u32 %v2668_v38, %v2667_v25  ;;  %v2672_v28 = vrot.slane %v12758_v46, 5  ;;  %v2682_v25 = vrot.slane %v12760_v17, 5  ;;  %v12761_v38 = vld [vmem:[#allocation204_spill] sm:$0xff] }
 0x39c   :  { %v2666_v46 = vrot.slane %v2664_v47, 4 }
 0x39d   :  { %v2804_v37 = vpop.permute.xlu2 %2803  ;;  %v2671_v1 = vrot.slane %v2669_v35, 4  ;;  %v2674_v9 = vor.u32 %v2673_v51, %v2672_v28  ;;  %v12765_v28 = vld [vmem:[#allocation202_spill] sm:$0xff] }
 0x39e   :  { %3018 = vst.msk [vmem:[#allocation2 + $0x5c] sm:$0xf] %vm2994_vm1, %v2804_v37  ;;  %v2688_v51 = vrot.slane %v12765_v28, 6  ;;  %v2670_v17 = vsel %vm8870_vm15, %v2666_v46, %v2669_v35  ;;  %v2692_v35 = vrot.slane %v12768_v54, 5  ;;  %v12769_v46 = vld [vmem:[#allocation210_spill] sm:$0xff]  ;;  %v12774_v54 = vld [vmem:[#allocation224_spill] sm:$0xff] }
 0x39f   :  { %v2693_v48 = vrot.slane %v12769_v46, 6 }
 0x3a0   :  { %v2788_v27 = vpop.permute.xlu0 %2787  ;;  %2879 = vrot.lane.b32.xlu1 %v2660_v5, %s6383_s23 }
 0x3a1   :  { %v2790_v31 = vpop.permute.xlu1 %2789  ;;  %3010 = vst.msk [vmem:[#allocation2 + $0x3c] sm:$0xf] %vm2994_vm1, %v2788_v27  ;;  %v2683_v27 = vrot.slane %v12761_v38, 6  ;;  %v2694_v46 = vor.u32 %v2693_v48, %v2692_v35  ;;  %v12776_v48 = vld [vmem:[#allocation221_spill] sm:$0xff] }
 0x3a2   :  { %3011 = vst.msk [vmem:[#allocation2 + $0x40] sm:$0xf] %vm2994_vm1, %v2790_v31  ;;  %v2650_v31 = vsel %vm8870_vm15, %v2646_v21, %v2649_v16  ;;  %v2675_v16 = vsel %vm8870_vm15, %v2671_v1, %v2674_v9  ;;  %v12764_v21 = vld [vmem:[#allocation203_spill] sm:$0xff]  ;;  %v12766_v1 = vld [vmem:[#allocation214_spill] sm:$0xff] }
 0x3a3   :  { %2877 = vrot.lane.b32.xlu0 %v2655_v14, %s6383_s23  ;;  %2875 = vrot.lane.b32.xlu2 %v2650_v31, %s6383_s23  ;;  %v2661_v14 = vrot.slane %v2659_v20, 4  ;;  %v2684_v61 = vor.u32 %v2683_v27, %v2682_v25  ;;  %v2687_v5 = vrot.slane %v12764_v21, 5  ;;  %v2697_v25 = vrot.slane %v12766_v1, 5  ;;  %v12767_v27 = vld [vmem:[#allocation213_spill] sm:$0xff] }
 0x3a4   :  { %v2681_v21 = vrot.slane %v2679_v24, 4 }
 0x3a5   :  { %v2810_v38 = vpop.permute.xlu2 %2809  ;;  %v2665_v20 = vsel %vm8870_vm15, %v2661_v14, %v2664_v47  ;;  %v2689_v31 = vor.u32 %v2688_v51, %v2687_v5  ;;  %v2676_v47 = vrot.slane %v2674_v9, 4  ;;  %v12770_v14 = vld [vmem:[#allocation212_spill] sm:$0xff]  ;;  %v12771_v5 = vld [vmem:[#allocation211_spill] sm:$0xff] }
 0x3a6   :  { %3021 = vst.msk [vmem:[#allocation2 + $0x68] sm:$0xf] %vm2994_vm1, %v2810_v38  ;;  %v2703_v51 = vrot.slane %v12771_v5, 6  ;;  %v2685_v1 = vsel %vm8870_vm15, %v2681_v21, %v2684_v61  ;;  %v12775_v21 = vld [vmem:[#allocation219_spill] sm:$0xff] }
 0x3a7   :  { %v2680_v9 = vsel %vm8870_vm15, %v2676_v47, %v2679_v24  ;;  %v2708_v35 = vrot.slane %v12775_v21, 6  ;;  %v2717_v47 = vrot.slane %v12776_v48, 5 }
 0x3a8   :  { %v2794_v37 = vpop.permute.xlu0 %2793  ;;  %2885 = vrot.lane.b32.xlu1 %v2675_v16, %s6383_s23  ;;  %v2702_v16 = vrot.slane %v12770_v14, 5  ;;  %v2696_v14 = vrot.slane %v2694_v46, 4 }
 0x3a9   :  { %v2796_v13 = vpop.permute.xlu1 %2795  ;;  %3013 = vst.msk [vmem:[#allocation2 + $0x48] sm:$0xf] %vm2994_vm1, %v2794_v37  ;;  %v2698_v37 = vrot.slane %v12767_v27, 6 }
 0x3aa   :  { %3014 = vst.msk [vmem:[#allocation2 + $0x4c] sm:$0xf] %vm2994_vm1, %v2796_v13  ;;  %v2686_v13 = vrot.slane %v2684_v61, 4  ;;  %v2707_v61 = vrot.slane %v12774_v54, 5 }
 0x3ab   :  { %2883 = vrot.lane.b32.xlu0 %v2670_v17, %s6383_s23  ;;  %2881 = vrot.lane.b32.xlu2 %v2665_v20, %s6383_s23  ;;  %v2699_v30 = vor.u32 %v2698_v37, %v2697_v25 }
 0x3ac   :  { %v2690_v17 = vsel %vm8870_vm15, %v2686_v13, %v2689_v31  ;;  %v12773_v13 = vld [vmem:[#allocation222_spill] sm:$0xff]  ;;  %v2709_v21 = vor.u32 %v2708_v35, %v2707_v61  ;;  %v12780_v35 = vld [vmem:[#allocation228_spill] sm:$0xff] }
 0x3ad   :  { %v2816_v27 = vpop.permute.xlu2 %2815  ;;  %v2713_v25 = vrot.slane %v12773_v13, 6  ;;  %v2701_v37 = vrot.slane %v2699_v30, 4  ;;  %v2691_v13 = vrot.slane %v2689_v31, 4  ;;  %v12778_v31 = vld [vmem:[#allocation230_spill] sm:$0xff] }
 0x3ae   :  { %3024 = vst.msk [vmem:[#allocation2 + $0x74] sm:$0xf] %vm2994_vm1, %v2816_v27  ;;  %v2711_v61 = vrot.slane %v2709_v21, 4 }
 0x3b0   :  { %v2800_v38 = vpop.permute.xlu0 %2799  ;;  %2891 = vrot.lane.b32.xlu1 %v2690_v17, %s6383_s23  ;;  %v12777_v17 = vld [vmem:[#allocation220_spill] sm:$0xff] }
 0x3b1   :  { %v2802_v28 = vpop.permute.xlu1 %2801  ;;  %3016 = vst.msk [vmem:[#allocation2 + $0x54] sm:$0xf] %vm2994_vm1, %v2800_v38  ;;  %v2704_v38 = vor.u32 %v2703_v51, %v2702_v16 }
 0x3b2   :  { %3017 = vst.msk [vmem:[#allocation2 + $0x58] sm:$0xf] %vm2994_vm1, %v2802_v28  ;;  %v12772_v28 = vld [vmem:[#allocation223_spill] sm:$0xff] }
 0x3b3   :  { %v2712_v20 = vrot.slane %v12772_v28, 5  ;;  %2889 = vrot.lane.b32.xlu0 %v2685_v1, %s6383_s23  ;;  %2887 = vrot.lane.b32.xlu2 %v2680_v9, %s6383_s23  ;;  %v2718_v1 = vrot.slane %v12777_v17, 6  ;;  %v2705_v16 = vsel %vm8870_vm15, %v2701_v37, %v2704_v38  ;;  %v2700_v28 = vsel %vm8870_vm15, %v2696_v14, %v2699_v30 }
 0x3b4   :  { %v12233_v17 = vshrl.u32 %v8828_v12, 16  ;;  %v12232_v30 = vshll.u32 %v8828_v12, 16 }
 0x3b5   :  { %v2714_v24 = vor.u32 %v2713_v25, %v2712_v20  ;;  %v2822_v51 = vpop.permute.xlu2 %2821  ;;  %v2719_v9 = vor.u32 %v2718_v1, %v2717_v47  ;;  %v2695_v20 = vsel %vm8870_vm15, %v2691_v13, %v2694_v46  ;;  %v2727_v25 = vrot.slane %v12778_v31, 5 }
 0x3b6   :  { %3027 = vst.msk [vmem:[#allocation2 + $0x80] sm:$0xf] %vm2994_vm1, %v2822_v51  ;;  %v2722_v51 = vrot.slane %v12780_v35, 5  ;;  %v2706_v46 = vrot.slane %v2704_v38, 4  ;;  %v2735_v1 = vrot.slane %v12233_v17, 5  ;;  %v12230_v38 = vshll.u32 %v8837_v60, 16 }
 0x3b7   :  { %v12791_v35 = vld [vmem:[#allocation17_spill] sm:$0xff] }
 0x3b8   :  { %v2806_v27 = vpop.permute.xlu0 %2805  ;;  %2897 = vrot.lane.b32.xlu1 %v2705_v16, %s6383_s23  ;;  %v12781_v16 = vld [vmem:[#allocation226_spill] sm:$0xff]  ;;  %v3102_v54 = vrot.slane %v12791_v35, 6 }
 0x3b9   :  { %v2808_v5 = vpop.permute.xlu1 %2807  ;;  %3019 = vst.msk [vmem:[#allocation2 + $0x60] sm:$0xf] %vm2994_vm1, %v2806_v27  ;;  %v12779_v27 = vld [vmem:[#allocation229_spill] sm:$0xff]  ;;  %v2723_v48 = vrot.slane %v12781_v16, 6 }
 0x3ba   :  { %3020 = vst.msk [vmem:[#allocation2 + $0x64] sm:$0xf] %vm2994_vm1, %v2808_v5  ;;  %v2716_v5 = vrot.slane %v2714_v24, 4  ;;  %v2728_v37 = vrot.slane %v12779_v27, 6  ;;  %v2738_v27 = vrot.slane %v12232_v30, 6 }
 0x3bb   :  { %2895 = vrot.lane.b32.xlu0 %v2700_v28, %s6383_s23  ;;  %2893 = vrot.lane.b32.xlu2 %v2695_v20, %s6383_s23  ;;  %v2724_v16 = vor.u32 %v2723_v48, %v2722_v51  ;;  %v12231_v20 = vshrl.u32 %v8837_v60, 16 }
 0x3bc   :  { %v2720_v28 = vsel %vm8870_vm15, %v2716_v5, %v2719_v9  ;;  %v2729_v13 = vor.u32 %v2728_v37, %v2727_v25  ;;  %v107_v5 = vld [vmem:[%s11733_s0 + $0x288] sm:$0xff]  ;;  %v2710_v25 = vsel %vm8870_vm15, %v2706_v46, %v2709_v21  ;;  %v2721_v21 = vrot.slane %v2719_v9, 4 }
 0x3bd   :  { %v2828_v31 = vpop.permute.xlu2 %2827  ;;  %v2745_v51 = vrot.slane %v12231_v20, 5  ;;  %v6111_v9 = vrot.slane %v12627_v26, 10 }
 0x3be   :  { %3030 = vst.msk [vmem:[#allocation2 + $0x8c] sm:$0xf] %vm2994_vm1, %v2828_v31  ;;  %v2731_v37 = vrot.slane %v2729_v13, 4  ;;  %v9329_v31 = vpack.c.bf16 %v107_v5, %v107_v5 }
 0x3c0   :  { %v2812_v47 = vpop.permute.xlu0 %2811  ;;  %2903 = vrot.lane.b32.xlu1 %v2720_v28, %s6383_s23  ;;  %v12229_v5 = vshll.u32 %v9329_v31, 16 }
 0x3c1   :  { %v2814_v14 = vpop.permute.xlu1 %2813  ;;  %3022 = vst.msk [vmem:[#allocation2 + $0x6c] sm:$0xf] %vm2994_vm1, %v2812_v47  ;;  %v2748_v47 = vrot.slane %v12230_v38, 6 }
 0x3c2   :  { %3023 = vst.msk [vmem:[#allocation2 + $0x70] sm:$0xf] %vm2994_vm1, %v2814_v14  ;;  %v2715_v14 = vsel %vm8870_vm15, %v2711_v61, %v2714_v24  ;;  %v2739_v24 = vor.u32 %v2738_v27, %v2735_v1  ;;  %v2726_v61 = vrot.slane %v2724_v16, 4 }
 0x3c3   :  { %2901 = vrot.lane.b32.xlu0 %v2715_v14, %s6383_s23  ;;  %2899 = vrot.lane.b32.xlu2 %v2710_v25, %s6383_s23  ;;  %v2749_v14 = vor.u32 %v2748_v47, %v2745_v51  ;;  %v2725_v25 = vsel %vm8870_vm15, %v2721_v21, %v2724_v16  ;;  %v2755_v51 = vrot.slane %v12229_v5, 6  ;;  %v12784_v16 = vld [vmem:[#allocation15_spill] sm:$0xff] }
 0x3c4   :  { %v2740_v27 = vsel %vm8870_vm15, %v2731_v37, %v2739_v24  ;;  %v2730_v1 = vsel %vm8870_vm15, %v2726_v61, %v2729_v13  ;;  %v3081_v37 = vrot.slane %v12624_v52, 6  ;;  %v2741_v26 = vrot.slane %v2739_v24, 4 }
 0x3c5   :  { %v2834_v46 = vpop.permute.xlu2 %2833  ;;  %v2751_v61 = vrot.slane %v2749_v14, 4 }
 0x3c6   :  { %3033 = vst.msk [vmem:[#allocation2 + $0x98] sm:$0xf] %vm2994_vm1, %v2834_v46  ;;  %v3082_v52 = vsel %vm9351_vm4, %v6111_v9, %v3081_v37  ;;  %v12785_v46 = vld [vmem:[#allocation6_spill] sm:$0xff]  ;;  %v12786_v9 = vld [vmem:[#allocation9_spill] sm:$0xff] }
 0x3c8   :  { %v2818_v28 = vpop.permute.xlu0 %2817  ;;  %2909 = vrot.lane.b32.xlu1 %v2740_v27, %s6383_s23  ;;  %v2756_v27 = vsel %vm8870_vm15, %v2751_v61, %v2755_v51  ;;  %v3083_v51 = vrot.slane %v3081_v37, 4 }
 0x3c9   :  { %v2820_v48 = vpop.permute.xlu1 %2819  ;;  %3025 = vst.msk [vmem:[#allocation2 + $0x78] sm:$0xf] %vm2994_vm1, %v2818_v28  ;;  %v3087_v28 = vrot.slane %v12784_v16, 6  ;;  %v12829_v16 = vld [vmem:[#allocation126_spill] sm:$0xff] }
 0x3ca   :  { %3026 = vst.msk [vmem:[#allocation2 + $0x7c] sm:$0xf] %vm2994_vm1, %v2820_v48 }
 0x3cb   :  { %2907 = vrot.lane.b32.xlu0 %v2730_v1, %s6383_s23  ;;  %2905 = vrot.lane.b32.xlu2 %v2725_v25, %s6383_s23  ;;  %v3084_v1 = vrot.slane %v12785_v46, 6  ;;  %v2750_v25 = vsel %vm8870_vm15, %v2741_v26, %v2749_v14  ;;  %v3089_v24 = vrot.slane %v3087_v28, 4  ;;  %v3096_v14 = vrot.slane %v12787_v33, 6  ;;  %vm10141_vm15 = vmor %vm4694_vm13, %vm4695_vm14 }
 0x3cd   :  { %v2840_v21 = vpop.permute.xlu2 %2839  ;;  %v3086_v5 = vrot.slane %v3084_v1, 4  ;;  %v3085_v37 = vsel %vm9351_vm4, %v3083_v51, %v3084_v1  ;;  %v12790_v1 = vld [vmem:[#allocation24_spill] sm:$0xff] }
 0x3ce   :  { %3036 = vst.msk [vmem:[#allocation2 + $0xa4] sm:$0xf] %vm2994_vm1, %v2840_v21  ;;  %v3105_v51 = vrot.slane %v12790_v1, 6 }
 0x3cf   :  { %v9382_v21 = vsel %vm9351_vm4, %v3086_v5, %v3087_v28 }
 0x3d0   :  { %v2824_v47 = vpop.permute.xlu0 %2823  ;;  %3317 = vrot.lane.b32.xlu1 %v3082_v52, %s6384_s26 }
 0x3d1   :  { %v2826_v48 = vpop.permute.xlu1 %2825  ;;  %3028 = vst.msk [vmem:[#allocation2 + $0x84] sm:$0xf] %vm2994_vm1, %v2824_v47 }
 0x3d2   :  { %3029 = vst.msk [vmem:[#allocation2 + $0x88] sm:$0xf] %vm2994_vm1, %v2826_v48  ;;  %v3090_v48 = vrot.slane %v12786_v9, 6 }
 0x3d3   :  { %2913 = vrot.lane.b32.xlu0 %v2756_v27, %s6383_s23  ;;  %2911 = vrot.lane.b32.xlu2 %v2750_v25, %s6383_s23  ;;  %v12788_v27 = vld [vmem:[#allocation8_spill] sm:$0xff]  ;;  %v3098_v25 = vrot.slane %v3096_v14, 4 }
 0x3d4   :  { %v9377_v52 = vsel %vm9351_vm4, %v3089_v24, %v3090_v48  ;;  %v3093_v38 = vrot.slane %v12788_v27, 6  ;;  %v12789_v24 = vld [vmem:[#allocation18_spill] sm:$0xff]  ;;  %v3092_v28 = vrot.slane %v3090_v48, 4 }
 0x3d5   :  { %v2846_v26 = vpop.permute.xlu2 %2845 }
 0x3d6   :  { %3039 = vst.msk [vmem:[#allocation2 + $0xb0] sm:$0xf] %vm2994_vm1, %v2846_v26  ;;  %v3095_v20 = vrot.slane %v3093_v38, 4  ;;  %v9411_v48 = vsel %vm9351_vm4, %v3092_v28, %v3093_v38  ;;  %v12793_v28 = vld [vmem:[#allocation35_spill] sm:$0xff] }
 0x3d7   :  { %v3114_v36 = vrot.slane %v12793_v28, 6 }
 0x3d8   :  { %v2830_v61 = vpop.permute.xlu0 %2829  ;;  %3323 = vrot.lane.b32.xlu1 %v9377_v52, %s6384_s26  ;;  %v9403_v17 = vsel %vm9351_vm4, %v3095_v20, %v3096_v14  ;;  %v3104_v20 = vrot.slane %v3102_v54, 4 }
 0x3d9   :  { %v2832_v47 = vpop.permute.xlu1 %2831  ;;  %3031 = vst.msk [vmem:[#allocation2 + $0x90] sm:$0xf] %vm2994_vm1, %v2830_v61 }
 0x3da   :  { %3032 = vst.msk [vmem:[#allocation2 + $0x94] sm:$0xf] %vm2994_vm1, %v2832_v47  ;;  %v3099_v47 = vrot.slane %v12789_v24, 6  ;;  %v9427_v34 = vsel %vm9351_vm4, %v3104_v20, %v3105_v51 }
 0x3db   :  { %3321 = vrot.lane.b32.xlu0 %v9382_v21, %s6384_s26  ;;  %3319 = vrot.lane.b32.xlu2 %v3085_v37, %s6384_s26  ;;  %v3107_v37 = vrot.slane %v3105_v51, 4 }
 0x3dc   :  { %v9398_v26 = vsel %vm9351_vm4, %v3098_v25, %v3099_v47  ;;  %v12792_v25 = vld [vmem:[#allocation28_spill] sm:$0xff] }
 0x3dd   :  { %v2852_v30 = vpop.permute.xlu2 %2851 }
 0x3de   :  { %3042 = vst.msk [vmem:[#allocation2 + $0xbc] sm:$0xf] %vm2994_vm1, %v2852_v30  ;;  %v3101_v30 = vrot.slane %v3099_v47, 4 }
 0x3e0   :  { %v2836_v5 = vpop.permute.xlu0 %2835  ;;  %3329 = vrot.lane.b32.xlu1 %v9398_v26, %s6384_s26  ;;  %v9435_v47 = vsel %vm9351_vm4, %v3101_v30, %v3102_v54  ;;  %v12796_v30 = vld [vmem:[#allocation44_spill] sm:$0xff] }
 0x3e1   :  { %v2838_v61 = vpop.permute.xlu1 %2837  ;;  %3034 = vst.msk [vmem:[#allocation2 + $0x9c] sm:$0xf] %vm2994_vm1, %v2836_v5 }
 0x3e2   :  { %3035 = vst.msk [vmem:[#allocation2 + $0xa0] sm:$0xf] %vm2994_vm1, %v2838_v61  ;;  %v3108_v61 = vrot.slane %v12792_v25, 6 }
 0x3e3   :  { %3327 = vrot.lane.b32.xlu0 %v9403_v17, %s6384_s26  ;;  %3325 = vrot.lane.b32.xlu2 %v9411_v48, %s6384_s26 }
 0x3e4   :  { %v9422_v38 = vsel %vm9351_vm4, %v3107_v37, %v3108_v61  ;;  %v3116_v37 = vrot.slane %v3114_v36, 4 }
 0x3e5   :  { %v2858_v8 = vpop.permute.xlu2 %2857 }
 0x3e6   :  { %3045 = vst.msk [vmem:[#allocation2 + $0xc8] sm:$0xf] %vm2994_vm1, %v2858_v8  ;;  %v3110_v8 = vrot.slane %v3108_v61, 4 }
 0x3e8   :  { %v2842_v14 = vpop.permute.xlu0 %2841  ;;  %3335 = vrot.lane.b32.xlu1 %v9422_v38, %s6384_s26 }
 0x3e9   :  { %v2844_v5 = vpop.permute.xlu1 %2843  ;;  %3037 = vst.msk [vmem:[#allocation2 + $0xa8] sm:$0xf] %vm2994_vm1, %v2842_v14  ;;  %v12795_v14 = vld [vmem:[#allocation37_spill] sm:$0xff] }
 0x3ea   :  { %3038 = vst.msk [vmem:[#allocation2 + $0xac] sm:$0xf] %vm2994_vm1, %v2844_v5  ;;  %v3111_v5 = vrot.slane %v12794_v49, 6  ;;  %v3117_v28 = vrot.slane %v12795_v14, 6  ;;  %v3123_v49 = vrot.slane %v12796_v30, 6 }
 0x3eb   :  { %3333 = vrot.lane.b32.xlu0 %v9427_v34, %s6384_s26  ;;  %3331 = vrot.lane.b32.xlu2 %v9435_v47, %s6384_s26 }
 0x3ec   :  { %v3113_v51 = vrot.slane %v3111_v5, 4  ;;  %v9446_v54 = vsel %vm9351_vm4, %v3116_v37, %v3117_v28  ;;  %v9459_v61 = vsel %vm9351_vm4, %v3110_v8, %v3111_v5  ;;  %v3125_v37 = vrot.slane %v3123_v49, 4  ;;  %v12799_v8 = vld [vmem:[#allocation53_spill] sm:$0xff] }
 0x3ed   :  { %v2864_v29 = vpop.permute.xlu2 %2863 }
 0x3ee   :  { %v9451_v14 = vsel %vm9351_vm4, %v3113_v51, %v3114_v36  ;;  %3048 = vst.msk [vmem:[#allocation2 + $0xd4] sm:$0xf] %vm2994_vm1, %v2864_v29  ;;  %v3119_v29 = vrot.slane %v3117_v28, 4 }
 0x3f0   :  { %v2848_v20 = vpop.permute.xlu0 %2847  ;;  %3341 = vrot.lane.b32.xlu1 %v9446_v54, %s6384_s26 }
 0x3f1   :  { %v2850_v25 = vpop.permute.xlu1 %2849  ;;  %3040 = vst.msk [vmem:[#allocation2 + $0xb4] sm:$0xf] %vm2994_vm1, %v2848_v20  ;;  %v12798_v20 = vld [vmem:[#allocation46_spill] sm:$0xff] }
 0x3f2   :  { %3041 = vst.msk [vmem:[#allocation2 + $0xb8] sm:$0xf] %vm2994_vm1, %v2850_v25  ;;  %v3120_v25 = vrot.slane %v12797_v10, 6  ;;  %v3126_v30 = vrot.slane %v12798_v20, 6  ;;  %v3132_v10 = vrot.slane %v12799_v8, 6 }
 0x3f3   :  { %3339 = vrot.lane.b32.xlu0 %v9451_v14, %s6384_s26  ;;  %3337 = vrot.lane.b32.xlu2 %v9459_v61, %s6384_s26 }
 0x3f4   :  { %v3122_v36 = vrot.slane %v3120_v25, 4  ;;  %v9470_v5 = vsel %vm9351_vm4, %v3125_v37, %v3126_v30  ;;  %v9483_v28 = vsel %vm9351_vm4, %v3119_v29, %v3120_v25  ;;  %v3134_v37 = vrot.slane %v3132_v10, 4  ;;  %v12802_v29 = vld [vmem:[#allocation62_spill] sm:$0xff] }
 0x3f5   :  { %v2870_v32 = vpop.permute.xlu2 %2869 }
 0x3f6   :  { %v9475_v20 = vsel %vm9351_vm4, %v3122_v36, %v3123_v49  ;;  %3051 = vst.msk [vmem:[#allocation2 + $0xe0] sm:$0xf] %vm2994_vm1, %v2870_v32  ;;  %v3128_v32 = vrot.slane %v3126_v30, 4 }
 0x3f8   :  { %v2854_v51 = vpop.permute.xlu0 %2853  ;;  %3347 = vrot.lane.b32.xlu1 %v9470_v5, %s6384_s26 }
 0x3f9   :  { %v2856_v1 = vpop.permute.xlu1 %2855  ;;  %3043 = vst.msk [vmem:[#allocation2 + $0xc0] sm:$0xf] %vm2994_vm1, %v2854_v51  ;;  %v12801_v51 = vld [vmem:[#allocation56_spill] sm:$0xff] }
 0x3fa   :  { %3044 = vst.msk [vmem:[#allocation2 + $0xc4] sm:$0xf] %vm2994_vm1, %v2856_v1  ;;  %v3129_v1 = vrot.slane %v12800_v15, 6  ;;  %v3135_v8 = vrot.slane %v12801_v51, 6  ;;  %v3141_v15 = vrot.slane %v12802_v29, 6 }
 0x3fb   :  { %3345 = vrot.lane.b32.xlu0 %v9475_v20, %s6384_s26  ;;  %3343 = vrot.lane.b32.xlu2 %v9483_v28, %s6384_s26 }
 0x3fc   :  { %v3131_v49 = vrot.slane %v3129_v1, 4  ;;  %v9494_v25 = vsel %vm9351_vm4, %v3134_v37, %v3135_v8  ;;  %v9507_v30 = vsel %vm9351_vm4, %v3128_v32, %v3129_v1  ;;  %v3143_v37 = vrot.slane %v3141_v15, 4  ;;  %v12805_v32 = vld [vmem:[#allocation71_spill] sm:$0xff] }
 0x3fd   :  { %v2876_v50 = vpop.permute.xlu2 %2875 }
 0x3fe   :  { %v9499_v51 = vsel %vm9351_vm4, %v3131_v49, %v3132_v10  ;;  %3054 = vst.msk [vmem:[#allocation2 + $0xec] sm:$0xf] %vm2994_vm1, %v2876_v50  ;;  %v3137_v50 = vrot.slane %v3135_v8, 4 }
 0x400   :  { %v2860_v36 = vpop.permute.xlu0 %2859  ;;  %3353 = vrot.lane.b32.xlu1 %v9494_v25, %s6384_s26 }
 0x401   :  { %v2862_v41 = vpop.permute.xlu1 %2861  ;;  %3046 = vst.msk [vmem:[#allocation2 + $0xcc] sm:$0xf] %vm2994_vm1, %v2860_v36  ;;  %v12804_v36 = vld [vmem:[#allocation65_spill] sm:$0xff] }
 0x402   :  { %3047 = vst.msk [vmem:[#allocation2 + $0xd0] sm:$0xf] %vm2994_vm1, %v2862_v41  ;;  %v3138_v41 = vrot.slane %v12803_v58, 6  ;;  %v3144_v29 = vrot.slane %v12804_v36, 6  ;;  %v3150_v58 = vrot.slane %v12805_v32, 6 }
 0x403   :  { %3351 = vrot.lane.b32.xlu0 %v9499_v51, %s6384_s26  ;;  %3349 = vrot.lane.b32.xlu2 %v9507_v30, %s6384_s26 }
 0x404   :  { %v3140_v10 = vrot.slane %v3138_v41, 4  ;;  %v9518_v1 = vsel %vm9351_vm4, %v3143_v37, %v3144_v29  ;;  %v9531_v8 = vsel %vm9351_vm4, %v3137_v50, %v3138_v41  ;;  %v3152_v37 = vrot.slane %v3150_v58, 4  ;;  %v12808_v50 = vld [vmem:[#allocation80_spill] sm:$0xff] }
 0x405   :  { %v2882_v59 = vpop.permute.xlu2 %2881 }
 0x406   :  { %v9523_v36 = vsel %vm9351_vm4, %v3140_v10, %v3141_v15  ;;  %3057 = vst.msk [vmem:[#allocation2 + $0xf8] sm:$0xf] %vm2994_vm1, %v2882_v59  ;;  %v3146_v59 = vrot.slane %v3144_v29, 4 }
 0x408   :  { %v2866_v49 = vpop.permute.xlu0 %2865  ;;  %3359 = vrot.lane.b32.xlu1 %v9518_v1, %s6384_s26 }
 0x409   :  { %v2868_v22 = vpop.permute.xlu1 %2867  ;;  %3049 = vst.msk [vmem:[#allocation2 + $0xd8] sm:$0xf] %vm2994_vm1, %v2866_v49  ;;  %v12807_v49 = vld [vmem:[#allocation74_spill] sm:$0xff] }
 0x40a   :  { %3050 = vst.msk [vmem:[#allocation2 + $0xdc] sm:$0xf] %vm2994_vm1, %v2868_v22  ;;  %v3147_v22 = vrot.slane %v12806_v11, 6  ;;  %v3153_v32 = vrot.slane %v12807_v49, 6  ;;  %v3159_v11 = vrot.slane %v12808_v50, 6 }
 0x40b   :  { %3357 = vrot.lane.b32.xlu0 %v9523_v36, %s6384_s26  ;;  %3355 = vrot.lane.b32.xlu2 %v9531_v8, %s6384_s26 }
 0x40c   :  { %v3149_v15 = vrot.slane %v3147_v22, 4  ;;  %v9542_v41 = vsel %vm9351_vm4, %v3152_v37, %v3153_v32  ;;  %v9555_v29 = vsel %vm9351_vm4, %v3146_v59, %v3147_v22  ;;  %v3161_v37 = vrot.slane %v3159_v11, 4  ;;  %v12811_v59 = vld [vmem:[#allocation91_spill] sm:$0xff] }
 0x40d   :  { %v2888_v55 = vpop.permute.xlu2 %2887 }
 0x40e   :  { %v9547_v49 = vsel %vm9351_vm4, %v3149_v15, %v3150_v58  ;;  %3060 = vst.msk [vmem:[#allocation2 + $0x104] sm:$0xf] %vm2994_vm1, %v2888_v55  ;;  %v3155_v55 = vrot.slane %v3153_v32, 4 }
 0x410   :  { %v2872_v10 = vpop.permute.xlu0 %2871  ;;  %3365 = vrot.lane.b32.xlu1 %v9542_v41, %s6384_s26 }
 0x411   :  { %v2874_v35 = vpop.permute.xlu1 %2873  ;;  %3052 = vst.msk [vmem:[#allocation2 + $0xe4] sm:$0xf] %vm2994_vm1, %v2872_v10  ;;  %v12810_v10 = vld [vmem:[#allocation83_spill] sm:$0xff] }
 0x412   :  { %3053 = vst.msk [vmem:[#allocation2 + $0xe8] sm:$0xf] %vm2994_vm1, %v2874_v35  ;;  %v3156_v35 = vrot.slane %v12809_v62, 6  ;;  %v3162_v50 = vrot.slane %v12810_v10, 6  ;;  %v3168_v62 = vrot.slane %v12811_v59, 6 }
 0x413   :  { %3363 = vrot.lane.b32.xlu0 %v9547_v49, %s6384_s26  ;;  %3361 = vrot.lane.b32.xlu2 %v9555_v29, %s6384_s26 }
 0x414   :  { %v3158_v58 = vrot.slane %v3156_v35, 4  ;;  %v9566_v22 = vsel %vm9351_vm4, %v3161_v37, %v3162_v50  ;;  %v9579_v32 = vsel %vm9351_vm4, %v3155_v55, %v3156_v35  ;;  %v3170_v37 = vrot.slane %v3168_v62, 4  ;;  %v12814_v55 = vld [vmem:[#allocation98_spill] sm:$0xff] }
 0x415   :  { %v2894_v0 = vpop.permute.xlu2 %2893 }
 0x416   :  { %v9571_v10 = vsel %vm9351_vm4, %v3158_v58, %v3159_v11  ;;  %3063 = vst.msk [vmem:[#allocation2 + $0x110] sm:$0xf] %vm2994_vm1, %v2894_v0  ;;  %v3164_v0 = vrot.slane %v3162_v50, 4 }
 0x418   :  { %v2878_v15 = vpop.permute.xlu0 %2877  ;;  %3371 = vrot.lane.b32.xlu1 %v9566_v22, %s6384_s26 }
 0x419   :  { %v2880_v24 = vpop.permute.xlu1 %2879  ;;  %3055 = vst.msk [vmem:[#allocation2 + $0xf0] sm:$0xf] %vm2994_vm1, %v2878_v15  ;;  %v12813_v15 = vld [vmem:[#allocation92_spill] sm:$0xff] }
 0x41a   :  { %3056 = vst.msk [vmem:[#allocation2 + $0xf4] sm:$0xf] %vm2994_vm1, %v2880_v24  ;;  %v3165_v24 = vrot.slane %v12812_v44, 6  ;;  %v3171_v59 = vrot.slane %v12813_v15, 6  ;;  %v3177_v44 = vrot.slane %v12814_v55, 6 }
 0x41b   :  { %3369 = vrot.lane.b32.xlu0 %v9571_v10, %s6384_s26  ;;  %3367 = vrot.lane.b32.xlu2 %v9579_v32, %s6384_s26 }
 0x41c   :  { %v3167_v11 = vrot.slane %v3165_v24, 4  ;;  %v9590_v35 = vsel %vm9351_vm4, %v3170_v37, %v3171_v59  ;;  %v9603_v50 = vsel %vm9351_vm4, %v3164_v0, %v3165_v24  ;;  %v3179_v37 = vrot.slane %v3177_v44, 4  ;;  %v12817_v0 = vld [vmem:[#allocation107_spill] sm:$0xff] }
 0x41d   :  { %v2900_v57 = vpop.permute.xlu2 %2899 }
 0x41e   :  { %v9595_v15 = vsel %vm9351_vm4, %v3167_v11, %v3168_v62  ;;  %3066 = vst.msk [vmem:[#allocation2 + $0x11c] sm:$0xf] %vm2994_vm1, %v2900_v57  ;;  %v3173_v57 = vrot.slane %v3171_v59, 4 }
 0x420   :  { %v2884_v58 = vpop.permute.xlu0 %2883  ;;  %3377 = vrot.lane.b32.xlu1 %v9590_v35, %s6384_s26 }
 0x421   :  { %v2886_v7 = vpop.permute.xlu1 %2885  ;;  %3058 = vst.msk [vmem:[#allocation2 + $0xfc] sm:$0xf] %vm2994_vm1, %v2884_v58  ;;  %v12816_v58 = vld [vmem:[#allocation101_spill] sm:$0xff] }
 0x422   :  { %3059 = vst.msk [vmem:[#allocation2 + $0x100] sm:$0xf] %vm2994_vm1, %v2886_v7  ;;  %v3174_v7 = vrot.slane %v12815_v4, 6  ;;  %v3180_v55 = vrot.slane %v12816_v58, 6  ;;  %v3186_v4 = vrot.slane %v12817_v0, 6 }
 0x423   :  { %3375 = vrot.lane.b32.xlu0 %v9595_v15, %s6384_s26  ;;  %3373 = vrot.lane.b32.xlu2 %v9603_v50, %s6384_s26 }
 0x424   :  { %v3176_v62 = vrot.slane %v3174_v7, 4  ;;  %v9614_v24 = vsel %vm9351_vm4, %v3179_v37, %v3180_v55  ;;  %v9627_v59 = vsel %vm9351_vm4, %v3173_v57, %v3174_v7  ;;  %v3188_v37 = vrot.slane %v3186_v4, 4  ;;  %v12820_v57 = vld [vmem:[#allocation117_spill] sm:$0xff] }
 0x425   :  { %v2906_v33 = vpop.permute.xlu2 %2905 }
 0x426   :  { %v9619_v58 = vsel %vm9351_vm4, %v3176_v62, %v3177_v44  ;;  %3069 = vst.msk [vmem:[#allocation2 + $0x128] sm:$0xf] %vm2994_vm1, %v2906_v33  ;;  %v3182_v33 = vrot.slane %v3180_v55, 4 }
 0x428   :  { %v2890_v11 = vpop.permute.xlu0 %2889  ;;  %3383 = vrot.lane.b32.xlu1 %v9614_v24, %s6384_s26 }
 0x429   :  { %v2892_v40 = vpop.permute.xlu1 %2891  ;;  %3061 = vst.msk [vmem:[#allocation2 + $0x108] sm:$0xf] %vm2994_vm1, %v2890_v11  ;;  %v12819_v11 = vld [vmem:[#allocation110_spill] sm:$0xff] }
 0x42a   :  { %3062 = vst.msk [vmem:[#allocation2 + $0x10c] sm:$0xf] %vm2994_vm1, %v2892_v40  ;;  %v3183_v40 = vrot.slane %v12818_v45, 6  ;;  %v3189_v0 = vrot.slane %v12819_v11, 6  ;;  %v3195_v45 = vrot.slane %v12820_v57, 6 }
 0x42b   :  { %3381 = vrot.lane.b32.xlu0 %v9619_v58, %s6384_s26  ;;  %3379 = vrot.lane.b32.xlu2 %v9627_v59, %s6384_s26 }
 0x42c   :  { %v3185_v44 = vrot.slane %v3183_v40, 4  ;;  %v9638_v7 = vsel %vm9351_vm4, %v3188_v37, %v3189_v0  ;;  %v9651_v55 = vsel %vm9351_vm4, %v3182_v33, %v3183_v40  ;;  %v3197_v37 = vrot.slane %v3195_v45, 4  ;;  %v12823_v33 = vld [vmem:[#allocation125_spill] sm:$0xff] }
 0x42d   :  { %v2912_v27 = vpop.permute.xlu2 %2911 }
 0x42e   :  { %v9643_v11 = vsel %vm9351_vm4, %v3185_v44, %v3186_v4  ;;  %3072 = vst.msk [vmem:[#allocation2 + $0x134] sm:$0xf] %vm2994_vm1, %v2912_v27  ;;  %v3191_v27 = vrot.slane %v3189_v0, 4 }
 0x430   :  { %v2896_v62 = vpop.permute.xlu0 %2895  ;;  %3389 = vrot.lane.b32.xlu1 %v9638_v7, %s6384_s26 }
 0x431   :  { %v2898_v39 = vpop.permute.xlu1 %2897  ;;  %3064 = vst.msk [vmem:[#allocation2 + $0x114] sm:$0xf] %vm2994_vm1, %v2896_v62  ;;  %v12822_v62 = vld [vmem:[#allocation118_spill] sm:$0xff] }
 0x432   :  { %3065 = vst.msk [vmem:[#allocation2 + $0x118] sm:$0xf] %vm2994_vm1, %v2898_v39  ;;  %v3192_v39 = vrot.slane %v12821_v18, 6  ;;  %v3198_v57 = vrot.slane %v12822_v62, 6  ;;  %v3204_v18 = vrot.slane %v12823_v33, 6 }
 0x433   :  { %3387 = vrot.lane.b32.xlu0 %v9643_v11, %s6384_s26  ;;  %3385 = vrot.lane.b32.xlu2 %v9651_v55, %s6384_s26 }
 0x434   :  { %v3194_v4 = vrot.slane %v3192_v39, 4  ;;  %v9662_v40 = vsel %vm9351_vm4, %v3197_v37, %v3198_v57  ;;  %v9675_v0 = vsel %vm9351_vm4, %v3191_v27, %v3192_v39  ;;  %v3206_v37 = vrot.slane %v3204_v18, 4  ;;  %v12827_v27 = vld [vmem:[#allocation135_spill] sm:$0xff] }
 0x435   :  { %v3320_v46 = vpop.permute.xlu2 %3319 }
 0x436   :  { %v9667_v62 = vsel %vm9351_vm4, %v3194_v4, %v3195_v45  ;;  %3556 = vst.msk [vmem:[#allocation2 + $0x4] sm:$0xf] %vm3554_vm6, %v3320_v46  ;;  %v3200_v46 = vrot.slane %v3198_v57, 4 }
 0x438   :  { %v2902_v44 = vpop.permute.xlu0 %2901  ;;  %3395 = vrot.lane.b32.xlu1 %v9662_v40, %s6384_s26 }
 0x439   :  { %v2904_v63 = vpop.permute.xlu1 %2903  ;;  %3067 = vst.msk [vmem:[#allocation2 + $0x120] sm:$0xf] %vm2994_vm1, %v2902_v44  ;;  %v12825_v44 = vld [vmem:[#allocation127_spill] sm:$0xff] }
 0x43a   :  { %3068 = vst.msk [vmem:[#allocation2 + $0x124] sm:$0xf] %vm2994_vm1, %v2904_v63  ;;  %v12824_v63 = vld [vmem:[#allocation116_spill] sm:$0xff]  ;;  %v3207_v33 = vrot.slane %v12825_v44, 6 }
 0x43b   :  { %v3201_v9 = vrot.slane %v12824_v63, 6  ;;  %3393 = vrot.lane.b32.xlu0 %v9667_v62, %s6384_s26  ;;  %3391 = vrot.lane.b32.xlu2 %v9675_v0, %s6384_s26  ;;  %v3213_v63 = vrot.slane %v12827_v27, 6 }
 0x43c   :  { %v9686_v39 = vsel %vm9351_vm4, %v3206_v37, %v3207_v33 }
 0x43d   :  { %v3203_v45 = vrot.slane %v3201_v9, 4  ;;  %12826 = vst [vmem:[#allocation233_spill] sm:$0xff] %v9686_v39  ;;  %v3326_v2 = vpop.permute.xlu2 %3325  ;;  %v9699_v57 = vsel %vm9351_vm4, %v3200_v46, %v3201_v9  ;;  %v3215_v37 = vrot.slane %v3213_v63, 4  ;;  %v12832_v46 = vld [vmem:[#allocation143_spill] sm:$0xff] }
 0x43e   :  { %3559 = vst.msk [vmem:[#allocation2 + $0x10] sm:$0xf] %vm3554_vm6, %v3326_v2  ;;  %v3209_v2 = vrot.slane %v3207_v33, 4 }
 0x43f   :  { %v9691_v44 = vsel %vm9351_vm4, %v3203_v45, %v3204_v18 }
 0x440   :  { %v2908_v4 = vpop.permute.xlu0 %2907  ;;  %12828 = vst [vmem:[#allocation234_spill] sm:$0xff] %v9691_v44  ;;  %3401 = vrot.lane.b32.xlu1 %v9686_v39, %s6384_s26 }
 0x441   :  { %v2910_v6 = vpop.permute.xlu1 %2909  ;;  %3070 = vst.msk [vmem:[#allocation2 + $0x12c] sm:$0xf] %vm2994_vm1, %v2908_v4  ;;  %v12830_v4 = vld [vmem:[#allocation136_spill] sm:$0xff] }
 0x442   :  { %3071 = vst.msk [vmem:[#allocation2 + $0x130] sm:$0xf] %vm2994_vm1, %v2910_v6  ;;  %v3210_v6 = vrot.slane %v12829_v16, 6  ;;  %v3216_v27 = vrot.slane %v12830_v4, 6  ;;  %vm5172_vm1 = vcmask 290048  }
 0x443   :  { %3399 = vrot.lane.b32.xlu0 %v9691_v44, %s6384_s26  ;;  %3397 = vrot.lane.b32.xlu2 %v9699_v57, %s6384_s26  ;;  %v3222_v44 = vrot.slane %v12832_v46, 6 }
 0x444   :  { %v3212_v45 = vrot.slane %v3210_v6, 4  ;;  %v9709_v9 = vsel %vm9351_vm4, %v3215_v37, %v3216_v27  ;;  %v12836_v37 = vld [vmem:[#allocation145_spill] sm:$0xff] }
 0x445   :  { %12831 = vst [vmem:[#allocation235_spill] sm:$0xff] %v9709_v9  ;;  %v3332_v39 = vpop.permute.xlu2 %3331  ;;  %v3224_v33 = vrot.slane %v3222_v44, 4 }
 0x446   :  { %v9714_v4 = vsel %vm9351_vm4, %v3212_v45, %v3213_v63  ;;  %3562 = vst.msk [vmem:[#allocation2 + $0x1c] sm:$0xf] %vm3554_vm6, %v3332_v39  ;;  %v3221_v63 = vrot.slane %v3219_v42, 4  ;;  %v3218_v39 = vrot.slane %v3216_v27, 4 }
 0x447   :  { %12833 = vst [vmem:[#allocation236_spill] sm:$0xff] %v9714_v4 }
 0x448   :  { %v2914_v16 = vpop.permute.xlu0 %2913  ;;  %3407 = vrot.lane.b32.xlu1 %v9709_v9, %s6384_s26  ;;  %v9746_v27 = vsel %vm9351_vm4, %v3218_v39, %v3219_v42  ;;  %v12844_v39 = vld [vmem:[#allocation161_spill] sm:$0xff] }
 0x449   :  { %v3318_v18 = vpop.permute.xlu1 %3317  ;;  %3074 = vst.msk [vmem:[#allocation2 + $0x138] sm:$0x7] %vm3073_vm7, %v2914_v16  ;;  %v9722_v16 = vsel %vm9351_vm4, %v3209_v2, %v3210_v6  ;;  %v12838_v2 = vld [vmem:[#allocation152_spill] sm:$0xff]  ;;  %vm6095_vm7 = vcmask 254976  }
 0x44a   :  { %3555 = vst.msk [vmem:[#allocation2] sm:$0xf] %vm3554_vm6, %v3318_v18  ;;  %v3225_v18 = vrot.slane %v12836_v37, 6  ;;  %v3231_v23 = vrot.slane %v12838_v2, 6  ;;  %v9738_v37 = vsel %vm9351_vm4, %v3221_v63, %v3222_v44 }
 0x44b   :  { %12835 = vst [vmem:[#allocation237_spill] sm:$0xff] %v9722_v16  ;;  %3405 = vrot.lane.b32.xlu0 %v9714_v4, %s6384_s26  ;;  %3403 = vrot.lane.b32.xlu2 %v9722_v16, %s6384_s26  ;;  %v12840_v4 = vld [vmem:[#allocation144_spill] sm:$0xff] }
 0x44c   :  { %v9733_v6 = vsel %vm9351_vm4, %v3224_v33, %v3225_v18  ;;  %12839 = vst [vmem:[#allocation239_spill] sm:$0xff] %v9738_v37  ;;  %v3233_v33 = vrot.slane %v3231_v23, 4 }
 0x44d   :  { %12837 = vst [vmem:[#allocation238_spill] sm:$0xff] %v9733_v6  ;;  %v3338_v9 = vpop.permute.xlu2 %3337 }
 0x44e   :  { %3565 = vst.msk [vmem:[#allocation2 + $0x28] sm:$0xf] %vm3554_vm6, %v3338_v9  ;;  %v3227_v9 = vrot.slane %v3225_v18, 4 }
 0x44f   :  { %12841 = vst [vmem:[#allocation240_spill] sm:$0xff] %v9746_v27 }
 0x450   :  { %v3322_v45 = vpop.permute.xlu0 %3321  ;;  %3413 = vrot.lane.b32.xlu1 %v9733_v6, %s6384_s26 }
 0x451   :  { %v3324_v46 = vpop.permute.xlu1 %3323  ;;  %3557 = vst.msk [vmem:[#allocation2 + $0x8] sm:$0xf] %vm3554_vm6, %v3322_v45  ;;  %v12842_v45 = vld [vmem:[#allocation155_spill] sm:$0xff] }
 0x452   :  { %3558 = vst.msk [vmem:[#allocation2 + $0xc] sm:$0xf] %vm3554_vm6, %v3324_v46  ;;  %v3228_v46 = vrot.slane %v12840_v4, 6  ;;  %v3234_v2 = vrot.slane %v12842_v45, 6  ;;  %v3240_v4 = vrot.slane %v12844_v39, 6 }
 0x453   :  { %3411 = vrot.lane.b32.xlu0 %v9738_v37, %s6384_s26  ;;  %3409 = vrot.lane.b32.xlu2 %v9746_v27, %s6384_s26  ;;  %v12846_v37 = vld [vmem:[#allocation153_spill] sm:$0xff] }
 0x454   :  { %v3230_v44 = vrot.slane %v3228_v46, 4  ;;  %v9757_v42 = vsel %vm9351_vm4, %v3233_v33, %v3234_v2  ;;  %v9770_v18 = vsel %vm9351_vm4, %v3227_v9, %v3228_v46  ;;  %v3242_v33 = vrot.slane %v3240_v4, 4  ;;  %v12850_v9 = vld [vmem:[#allocation170_spill] sm:$0xff] }
 0x455   :  { %12843 = vst [vmem:[#allocation241_spill] sm:$0xff] %v9757_v42  ;;  %v3344_v6 = vpop.permute.xlu2 %3343 }
 0x456   :  { %v9762_v45 = vsel %vm9351_vm4, %v3230_v44, %v3231_v23  ;;  %3568 = vst.msk [vmem:[#allocation2 + $0x34] sm:$0xf] %vm3554_vm6, %v3344_v6  ;;  %v3236_v6 = vrot.slane %v3234_v2, 4 }
 0x457   :  { %12845 = vst [vmem:[#allocation242_spill] sm:$0xff] %v9762_v45 }
 0x458   :  { %v3328_v63 = vpop.permute.xlu0 %3327  ;;  %3419 = vrot.lane.b32.xlu1 %v9757_v42, %s6384_s26  ;;  %12847 = vst [vmem:[#allocation243_spill] sm:$0xff] %v9770_v18 }
 0x459   :  { %v3330_v16 = vpop.permute.xlu1 %3329  ;;  %3560 = vst.msk [vmem:[#allocation2 + $0x14] sm:$0xf] %vm3554_vm6, %v3328_v63  ;;  %v12848_v63 = vld [vmem:[#allocation164_spill] sm:$0xff] }
 0x45a   :  { %3561 = vst.msk [vmem:[#allocation2 + $0x18] sm:$0xf] %vm3554_vm6, %v3330_v16  ;;  %v3237_v16 = vrot.slane %v12846_v37, 6  ;;  %v3243_v39 = vrot.slane %v12848_v63, 6  ;;  %v3249_v37 = vrot.slane %v12850_v9, 6 }
 0x45b   :  { %3417 = vrot.lane.b32.xlu0 %v9762_v45, %s6384_s26  ;;  %3415 = vrot.lane.b32.xlu2 %v9770_v18, %s6384_s26  ;;  %v12852_v45 = vld [vmem:[#allocation163_spill] sm:$0xff] }
 0x45c   :  { %v3239_v23 = vrot.slane %v3237_v16, 4  ;;  %v9781_v46 = vsel %vm9351_vm4, %v3242_v33, %v3243_v39  ;;  %v9794_v2 = vsel %vm9351_vm4, %v3236_v6, %v3237_v16  ;;  %v3251_v33 = vrot.slane %v3249_v37, 4  ;;  %v12856_v6 = vld [vmem:[#allocation179_spill] sm:$0xff] }
 0x45d   :  { %12849 = vst [vmem:[#allocation244_spill] sm:$0xff] %v9781_v46  ;;  %v3350_v42 = vpop.permute.xlu2 %3349 }
 0x45e   :  { %v9786_v63 = vsel %vm9351_vm4, %v3239_v23, %v3240_v4  ;;  %3571 = vst.msk [vmem:[#allocation2 + $0x40] sm:$0xf] %vm3554_vm6, %v3350_v42  ;;  %v3245_v42 = vrot.slane %v3243_v39, 4 }
 0x45f   :  { %12851 = vst [vmem:[#allocation245_spill] sm:$0xff] %v9786_v63 }
 0x460   :  { %v3334_v44 = vpop.permute.xlu0 %3333  ;;  %3425 = vrot.lane.b32.xlu1 %v9781_v46, %s6384_s26  ;;  %12853 = vst [vmem:[#allocation246_spill] sm:$0xff] %v9794_v2 }
 0x461   :  { %v3336_v27 = vpop.permute.xlu1 %3335  ;;  %3563 = vst.msk [vmem:[#allocation2 + $0x20] sm:$0xf] %vm3554_vm6, %v3334_v44  ;;  %v12854_v44 = vld [vmem:[#allocation173_spill] sm:$0xff] }
 0x462   :  { %3564 = vst.msk [vmem:[#allocation2 + $0x24] sm:$0xf] %vm3554_vm6, %v3336_v27  ;;  %v3246_v27 = vrot.slane %v12852_v45, 6  ;;  %v3252_v9 = vrot.slane %v12854_v44, 6  ;;  %v3258_v45 = vrot.slane %v12856_v6, 6  ;;  %v12858_v44 = vld [vmem:[#allocation172_spill] sm:$0xff] }
 0x463   :  { %3423 = vrot.lane.b32.xlu0 %v9786_v63, %s6384_s26  ;;  %3421 = vrot.lane.b32.xlu2 %v9794_v2, %s6384_s26 }
 0x464   :  { %v3248_v4 = vrot.slane %v3246_v27, 4  ;;  %v9805_v16 = vsel %vm9351_vm4, %v3251_v33, %v3252_v9  ;;  %v9818_v39 = vsel %vm9351_vm4, %v3245_v42, %v3246_v27  ;;  %v3260_v33 = vrot.slane %v3258_v45, 4  ;;  %v12862_v42 = vld [vmem:[#allocation188_spill] sm:$0xff] }
 0x465   :  { %12855 = vst [vmem:[#allocation247_spill] sm:$0xff] %v9805_v16  ;;  %v3356_v46 = vpop.permute.xlu2 %3355 }
 0x466   :  { %v9810_v63 = vsel %vm9351_vm4, %v3248_v4, %v3249_v37  ;;  %3574 = vst.msk [vmem:[#allocation2 + $0x4c] sm:$0xf] %vm3554_vm6, %v3356_v46  ;;  %v3254_v46 = vrot.slane %v3252_v9, 4 }
 0x467   :  { %12857 = vst [vmem:[#allocation248_spill] sm:$0xff] %v9810_v63 }
 0x468   :  { %v3340_v23 = vpop.permute.xlu0 %3339  ;;  %3431 = vrot.lane.b32.xlu1 %v9805_v16, %s6384_s26  ;;  %12859 = vst [vmem:[#allocation249_spill] sm:$0xff] %v9818_v39 }
 0x469   :  { %v3342_v18 = vpop.permute.xlu1 %3341  ;;  %3566 = vst.msk [vmem:[#allocation2 + $0x2c] sm:$0xf] %vm3554_vm6, %v3340_v23  ;;  %v12860_v23 = vld [vmem:[#allocation182_spill] sm:$0xff] }
 0x46a   :  { %3567 = vst.msk [vmem:[#allocation2 + $0x30] sm:$0xf] %vm3554_vm6, %v3342_v18  ;;  %v3255_v18 = vrot.slane %v12858_v44, 6  ;;  %v3261_v2 = vrot.slane %v12860_v23, 6  ;;  %v12864_v44 = vld [vmem:[#allocation181_spill] sm:$0xff] }
 0x46b   :  { %3429 = vrot.lane.b32.xlu0 %v9810_v63, %s6384_s26  ;;  %3427 = vrot.lane.b32.xlu2 %v9818_v39, %s6384_s26  ;;  %v3267_v63 = vrot.slane %v12862_v42, 6 }
 0x46c   :  { %v3257_v37 = vrot.slane %v3255_v18, 4  ;;  %v9829_v27 = vsel %vm9351_vm4, %v3260_v33, %v3261_v2  ;;  %v9842_v9 = vsel %vm9351_vm4, %v3254_v46, %v3255_v18  ;;  %v12868_v46 = vld [vmem:[#allocation197_spill] sm:$0xff] }
 0x46d   :  { %12861 = vst [vmem:[#allocation250_spill] sm:$0xff] %v9829_v27  ;;  %v3362_v16 = vpop.permute.xlu2 %3361  ;;  %v3269_v33 = vrot.slane %v3267_v63, 4 }
 0x46e   :  { %v9834_v23 = vsel %vm9351_vm4, %v3257_v37, %v3258_v45  ;;  %3577 = vst.msk [vmem:[#allocation2 + $0x58] sm:$0xf] %vm3554_vm6, %v3362_v16  ;;  %v3263_v16 = vrot.slane %v3261_v2, 4 }
 0x46f   :  { %12863 = vst [vmem:[#allocation251_spill] sm:$0xff] %v9834_v23 }
 0x470   :  { %v3346_v4 = vpop.permute.xlu0 %3345  ;;  %3437 = vrot.lane.b32.xlu1 %v9829_v27, %s6384_s26  ;;  %12865 = vst [vmem:[#allocation252_spill] sm:$0xff] %v9842_v9  ;;  %v3276_v27 = vrot.slane %v12868_v46, 6 }
 0x471   :  { %v3348_v6 = vpop.permute.xlu1 %3347  ;;  %3569 = vst.msk [vmem:[#allocation2 + $0x38] sm:$0xf] %vm3554_vm6, %v3346_v4  ;;  %v12866_v4 = vld [vmem:[#allocation191_spill] sm:$0xff] }
 0x472   :  { %3570 = vst.msk [vmem:[#allocation2 + $0x3c] sm:$0xf] %vm3554_vm6, %v3348_v6  ;;  %v3264_v6 = vrot.slane %v12864_v44, 6  ;;  %v3270_v39 = vrot.slane %v12866_v4, 6 }
 0x473   :  { %3435 = vrot.lane.b32.xlu0 %v9834_v23, %s6384_s26  ;;  %3433 = vrot.lane.b32.xlu2 %v9842_v9, %s6384_s26  ;;  %v12870_v23 = vld [vmem:[#allocation190_spill] sm:$0xff] }
 0x474   :  { %v3266_v45 = vrot.slane %v3264_v6, 4  ;;  %v9853_v18 = vsel %vm9351_vm4, %v3269_v33, %v3270_v39  ;;  %v9866_v2 = vsel %vm9351_vm4, %v3263_v16, %v3264_v6  ;;  %v3278_v33 = vrot.slane %v3276_v27, 4  ;;  %v12874_v16 = vld [vmem:[#allocation206_spill] sm:$0xff] }
 0x475   :  { %12867 = vst [vmem:[#allocation253_spill] sm:$0xff] %v9853_v18  ;;  %v3368_v44 = vpop.permute.xlu2 %3367 }
 0x476   :  { %v9858_v4 = vsel %vm9351_vm4, %v3266_v45, %v3267_v63  ;;  %3580 = vst.msk [vmem:[#allocation2 + $0x64] sm:$0xf] %vm3554_vm6, %v3368_v44  ;;  %v3272_v44 = vrot.slane %v3270_v39, 4 }
 0x477   :  { %12869 = vst [vmem:[#allocation5_spill] sm:$0xff] %v9858_v4 }
 0x478   :  { %v3352_v37 = vpop.permute.xlu0 %3351  ;;  %3443 = vrot.lane.b32.xlu1 %v9853_v18, %s6384_s26  ;;  %12871 = vst [vmem:[#allocation4_spill] sm:$0xff] %v9866_v2  ;;  %v12876_v18 = vld [vmem:[#allocation199_spill] sm:$0xff] }
 0x479   :  { %v3354_v42 = vpop.permute.xlu1 %3353  ;;  %3572 = vst.msk [vmem:[#allocation2 + $0x44] sm:$0xf] %vm3554_vm6, %v3352_v37  ;;  %v12872_v37 = vld [vmem:[#allocation200_spill] sm:$0xff] }
 0x47a   :  { %3573 = vst.msk [vmem:[#allocation2 + $0x48] sm:$0xf] %vm3554_vm6, %v3354_v42  ;;  %v3273_v42 = vrot.slane %v12870_v23, 6  ;;  %v3279_v46 = vrot.slane %v12872_v37, 6  ;;  %v3285_v23 = vrot.slane %v12874_v16, 6 }
 0x47b   :  { %3441 = vrot.lane.b32.xlu0 %v9858_v4, %s6384_s26  ;;  %3439 = vrot.lane.b32.xlu2 %v9866_v2, %s6384_s26 }
 0x47c   :  { %v3275_v63 = vrot.slane %v3273_v42, 4  ;;  %v9877_v6 = vsel %vm9351_vm4, %v3278_v33, %v3279_v46  ;;  %v9890_v39 = vsel %vm9351_vm4, %v3272_v44, %v3273_v42  ;;  %v3287_v33 = vrot.slane %v3285_v23, 4  ;;  %v12880_v44 = vld [vmem:[#allocation215_spill] sm:$0xff] }
 0x47d   :  { %12873 = vst [vmem:[#allocation16_spill] sm:$0xff] %v9877_v6  ;;  %v3374_v4 = vpop.permute.xlu2 %3373 }
 0x47e   :  { %v9882_v37 = vsel %vm9351_vm4, %v3275_v63, %v3276_v27  ;;  %3583 = vst.msk [vmem:[#allocation2 + $0x70] sm:$0xf] %vm3554_vm6, %v3374_v4  ;;  %v3281_v4 = vrot.slane %v3279_v46, 4 }
 0x47f   :  { %12875 = vst [vmem:[#allocation7_spill] sm:$0xff] %v9882_v37 }
 0x480   :  { %v3358_v45 = vpop.permute.xlu0 %3357  ;;  %3449 = vrot.lane.b32.xlu1 %v9877_v6, %s6384_s26  ;;  %12877 = vst [vmem:[#allocation26_spill] sm:$0xff] %v9890_v39 }
 0x481   :  { %v3360_v9 = vpop.permute.xlu1 %3359  ;;  %3575 = vst.msk [vmem:[#allocation2 + $0x50] sm:$0xf] %vm3554_vm6, %v3358_v45  ;;  %v12878_v45 = vld [vmem:[#allocation209_spill] sm:$0xff] }
 0x482   :  { %3576 = vst.msk [vmem:[#allocation2 + $0x54] sm:$0xf] %vm3554_vm6, %v3360_v9  ;;  %v3282_v9 = vrot.slane %v12876_v18, 6  ;;  %v3288_v16 = vrot.slane %v12878_v45, 6  ;;  %v3294_v18 = vrot.slane %v12880_v44, 6 }
 0x483   :  { %3447 = vrot.lane.b32.xlu0 %v9882_v37, %s6384_s26  ;;  %3445 = vrot.lane.b32.xlu2 %v9890_v39, %s6384_s26  ;;  %v12882_v37 = vld [vmem:[#allocation208_spill] sm:$0xff] }
 0x484   :  { %v3284_v27 = vrot.slane %v3282_v9, 4  ;;  %v9901_v42 = vsel %vm9351_vm4, %v3287_v33, %v3288_v16  ;;  %v9914_v46 = vsel %vm9351_vm4, %v3281_v4, %v3282_v9  ;;  %v3296_v33 = vrot.slane %v3294_v18, 4 }
 0x485   :  { %12879 = vst [vmem:[#allocation19_spill] sm:$0xff] %v9901_v42  ;;  %v3380_v6 = vpop.permute.xlu2 %3379  ;;  %v3303_v4 = vrot.slane %v7918_v53, 6 }
 0x486   :  { %v9906_v45 = vsel %vm9351_vm4, %v3284_v27, %v3285_v23  ;;  %3586 = vst.msk [vmem:[#allocation2 + $0x7c] sm:$0xf] %vm3554_vm6, %v3380_v6  ;;  %v3290_v6 = vrot.slane %v3288_v16, 4 }
 0x487   :  { %12881 = vst [vmem:[#allocation254_spill] sm:$0xff] %v9906_v45 }
 0x488   :  { %v3364_v63 = vpop.permute.xlu0 %3363  ;;  %3455 = vrot.lane.b32.xlu1 %v9901_v42, %s6384_s26 }
 0x489   :  { %v3366_v2 = vpop.permute.xlu1 %3365  ;;  %3578 = vst.msk [vmem:[#allocation2 + $0x5c] sm:$0xf] %vm3554_vm6, %v3364_v63  ;;  %v12883_v63 = vld [vmem:[#allocation218_spill] sm:$0xff] }
 0x48a   :  { %3579 = vst.msk [vmem:[#allocation2 + $0x60] sm:$0xf] %vm3554_vm6, %v3366_v2  ;;  %v3291_v2 = vrot.slane %v12882_v37, 6  ;;  %v3297_v44 = vrot.slane %v12883_v63, 6 }
 0x48b   :  { %3453 = vrot.lane.b32.xlu0 %v9906_v45, %s6384_s26  ;;  %3451 = vrot.lane.b32.xlu2 %v9914_v46, %s6384_s26  ;;  %v12885_v45 = vld [vmem:[#allocation217_spill] sm:$0xff] }
 0x48c   :  { %v3293_v23 = vrot.slane %v3291_v2, 4  ;;  %v9925_v9 = vsel %vm9351_vm4, %v3296_v33, %v3297_v44  ;;  %v9938_v16 = vsel %vm9351_vm4, %v3290_v6, %v3291_v2  ;;  %v3305_v33 = vrot.slane %v3303_v4, 4 }
 0x48d   :  { %12884 = vst [vmem:[#allocation255_spill] sm:$0xff] %v9925_v9  ;;  %v3386_v37 = vpop.permute.xlu2 %3385  ;;  %v3312_v6 = vrot.slane %v8837_v60, 6 }
 0x48e   :  { %v9930_v63 = vsel %vm9351_vm4, %v3293_v23, %v3294_v18  ;;  %3589 = vst.msk [vmem:[#allocation2 + $0x88] sm:$0xf] %vm3554_vm6, %v3386_v37  ;;  %v3299_v37 = vrot.slane %v3297_v44, 4 }
 0x490   :  { %v3370_v27 = vpop.permute.xlu0 %3369  ;;  %3461 = vrot.lane.b32.xlu1 %v9925_v9, %s6384_s26 }
 0x491   :  { %v3372_v39 = vpop.permute.xlu1 %3371  ;;  %3581 = vst.msk [vmem:[#allocation2 + $0x68] sm:$0xf] %vm3554_vm6, %v3370_v27  ;;  %v12886_v27 = vld [vmem:[#allocation227_spill] sm:$0xff] }
 0x492   :  { %3582 = vst.msk [vmem:[#allocation2 + $0x6c] sm:$0xf] %vm3554_vm6, %v3372_v39  ;;  %v3300_v39 = vrot.slane %v12885_v45, 6  ;;  %v3306_v53 = vrot.slane %v12886_v27, 6 }
 0x493   :  { %3459 = vrot.lane.b32.xlu0 %v9930_v63, %s6384_s26  ;;  %3457 = vrot.lane.b32.xlu2 %v9938_v16, %s6384_s26 }
 0x494   :  { %v3302_v18 = vrot.slane %v3300_v39, 4  ;;  %v9949_v2 = vsel %vm9351_vm4, %v3305_v33, %v3306_v53  ;;  %v9962_v44 = vsel %vm9351_vm4, %v3299_v37, %v3300_v39  ;;  %v3314_v33 = vrot.slane %v3312_v6, 4 }
 0x495   :  { %v3392_v9 = vpop.permute.xlu2 %3391 }
 0x496   :  { %v9954_v27 = vsel %vm9351_vm4, %v3302_v18, %v3303_v4  ;;  %3592 = vst.msk [vmem:[#allocation2 + $0x94] sm:$0xf] %vm3554_vm6, %v3392_v9  ;;  %v3308_v9 = vrot.slane %v3306_v53, 4 }
 0x498   :  { %v3376_v23 = vpop.permute.xlu0 %3375  ;;  %3467 = vrot.lane.b32.xlu1 %v9949_v2, %s6384_s26 }
 0x499   :  { %v3378_v42 = vpop.permute.xlu1 %3377  ;;  %3584 = vst.msk [vmem:[#allocation2 + $0x74] sm:$0xf] %vm3554_vm6, %v3376_v23  ;;  %v3315_v23 = vrot.slane %v9329_v31, 6 }
 0x49a   :  { %3585 = vst.msk [vmem:[#allocation2 + $0x78] sm:$0xf] %vm3554_vm6, %v3378_v42  ;;  %v3309_v42 = vrot.slane %v8828_v12, 6 }
 0x49b   :  { %3465 = vrot.lane.b32.xlu0 %v9954_v27, %s6384_s26  ;;  %3463 = vrot.lane.b32.xlu2 %v9962_v44, %s6384_s26  ;;  %v9975_v39 = vsel %vm9351_vm4, %v3314_v33, %v3315_v23 }
 0x49c   :  { %v3311_v4 = vrot.slane %v3309_v42, 4 }
 0x49d   :  { %v3398_v37 = vpop.permute.xlu2 %3397 }
 0x49e   :  { %v9979_v12 = vsel %vm9351_vm4, %v3311_v4, %v3312_v6  ;;  %3595 = vst.msk [vmem:[#allocation2 + $0xa0] sm:$0xf] %vm3554_vm6, %v3398_v37  ;;  %v3966_v37 = vrot.slane %v12630_v3, 6  ;;  %v12889_v3 = vld [vmem:[#allocation237_spill] sm:$0xff] }
 0x4a0   :  { %v3382_v18 = vpop.permute.xlu0 %3381  ;;  %3473 = vrot.lane.b32.xlu1 %v9975_v39, %s6384_s26 }
 0x4a1   :  { %v3384_v60 = vpop.permute.xlu1 %3383  ;;  %3587 = vst.msk [vmem:[#allocation2 + $0x80] sm:$0xf] %vm3554_vm6, %v3382_v18 }
 0x4a2   :  { %3588 = vst.msk [vmem:[#allocation2 + $0x84] sm:$0xf] %vm3554_vm6, %v3384_v60  ;;  %v9986_v60 = vsel %vm9351_vm4, %v3308_v9, %v3309_v42 }
 0x4a3   :  { %3471 = vrot.lane.b32.xlu0 %v9979_v12, %s6384_s26  ;;  %3469 = vrot.lane.b32.xlu2 %v9986_v60, %s6384_s26 }
 0x4a5   :  { %v3404_v6 = vpop.permute.xlu2 %3403 }
 0x4a6   :  { %3598 = vst.msk [vmem:[#allocation2 + $0xac] sm:$0xf] %vm3554_vm6, %v3404_v6  ;;  %v12888_v6 = vld [vmem:[#allocation12_spill] sm:$0xff] }
 0x4a8   :  { %v3388_v33 = vpop.permute.xlu0 %3387  ;;  %3649 = vrot.lane.b32.xlu1 %v9411_v48, %s6385_s27 }
 0x4a9   :  { %v3390_v53 = vpop.permute.xlu1 %3389  ;;  %3590 = vst.msk [vmem:[#allocation2 + $0x8c] sm:$0xf] %vm3554_vm6, %v3388_v33  ;;  %v12887_v33 = vld [vmem:[#allocation14_spill] sm:$0xff] }
 0x4aa   :  { %3591 = vst.msk [vmem:[#allocation2 + $0x90] sm:$0xf] %vm3554_vm6, %v3390_v53 }
 0x4ab   :  { %3647 = vrot.lane.b32.xlu0 %v9377_v52, %s6385_s27  ;;  %3645 = vrot.lane.b32.xlu2 %v9382_v21, %s6385_s27 }
 0x4ad   :  { %v3410_v18 = vpop.permute.xlu2 %3409 }
 0x4ae   :  { %3601 = vst.msk [vmem:[#allocation2 + $0xb8] sm:$0xf] %vm3554_vm6, %v3410_v18 }
 0x4b0   :  { %v3394_v4 = vpop.permute.xlu0 %3393  ;;  %3655 = vrot.lane.b32.xlu1 %v9435_v47, %s6385_s27 }
 0x4b1   :  { %v3396_v42 = vpop.permute.xlu1 %3395  ;;  %3593 = vst.msk [vmem:[#allocation2 + $0x98] sm:$0xf] %vm3554_vm6, %v3394_v4 }
 0x4b2   :  { %3594 = vst.msk [vmem:[#allocation2 + $0x9c] sm:$0xf] %vm3554_vm6, %v3396_v42 }
 0x4b3   :  { %3653 = vrot.lane.b32.xlu0 %v9398_v26, %s6385_s27  ;;  %3651 = vrot.lane.b32.xlu2 %v9403_v17, %s6385_s27 }
 0x4b5   :  { %v3416_v21 = vpop.permute.xlu2 %3415 }
 0x4b6   :  { %3604 = vst.msk [vmem:[#allocation2 + $0xc4] sm:$0xf] %vm3554_vm6, %v3416_v21 }
 0x4b8   :  { %v3400_v52 = vpop.permute.xlu0 %3399  ;;  %3661 = vrot.lane.b32.xlu1 %v9459_v61, %s6385_s27 }
 0x4b9   :  { %v3402_v48 = vpop.permute.xlu1 %3401  ;;  %3596 = vst.msk [vmem:[#allocation2 + $0xa4] sm:$0xf] %vm3554_vm6, %v3400_v52 }
 0x4ba   :  { %3597 = vst.msk [vmem:[#allocation2 + $0xa8] sm:$0xf] %vm3554_vm6, %v3402_v48 }
 0x4bb   :  { %3659 = vrot.lane.b32.xlu0 %v9422_v38, %s6385_s27  ;;  %3657 = vrot.lane.b32.xlu2 %v9427_v34, %s6385_s27 }
 0x4bd   :  { %v3422_v17 = vpop.permute.xlu2 %3421 }
 0x4be   :  { %3607 = vst.msk [vmem:[#allocation2 + $0xd0] sm:$0xf] %vm3554_vm6, %v3422_v17 }
 0x4c0   :  { %v3406_v26 = vpop.permute.xlu0 %3405  ;;  %3667 = vrot.lane.b32.xlu1 %v9483_v28, %s6385_s27 }
 0x4c1   :  { %v3408_v47 = vpop.permute.xlu1 %3407  ;;  %3599 = vst.msk [vmem:[#allocation2 + $0xb0] sm:$0xf] %vm3554_vm6, %v3406_v26 }
 0x4c2   :  { %3600 = vst.msk [vmem:[#allocation2 + $0xb4] sm:$0xf] %vm3554_vm6, %v3408_v47  ;;  %v12893_v47 = vld [vmem:[#allocation234_spill] sm:$0xff] }
 0x4c3   :  { %3665 = vrot.lane.b32.xlu0 %v9446_v54, %s6385_s27  ;;  %3663 = vrot.lane.b32.xlu2 %v9451_v14, %s6385_s27 }
 0x4c5   :  { %v3428_v34 = vpop.permute.xlu2 %3427 }
 0x4c6   :  { %3610 = vst.msk [vmem:[#allocation2 + $0xdc] sm:$0xf] %vm3554_vm6, %v3428_v34 }
 0x4c8   :  { %v3412_v38 = vpop.permute.xlu0 %3411  ;;  %3673 = vrot.lane.b32.xlu1 %v9507_v30, %s6385_s27 }
 0x4c9   :  { %v3414_v61 = vpop.permute.xlu1 %3413  ;;  %3602 = vst.msk [vmem:[#allocation2 + $0xbc] sm:$0xf] %vm3554_vm6, %v3412_v38  ;;  %v12894_v38 = vld [vmem:[#allocation15_spill] sm:$0xff] }
 0x4ca   :  { %3603 = vst.msk [vmem:[#allocation2 + $0xc0] sm:$0xf] %vm3554_vm6, %v3414_v61  ;;  %v4699_v34 = vrot.slane %v12894_v38, 7  ;;  %v12912_v38 = vld [vmem:[#allocation189_spill] sm:$0xff] }
 0x4cb   :  { %3671 = vrot.lane.b32.xlu0 %v9470_v5, %s6385_s27  ;;  %3669 = vrot.lane.b32.xlu2 %v9475_v20, %s6385_s27 }
 0x4cd   :  { %v3434_v14 = vpop.permute.xlu2 %3433 }
 0x4ce   :  { %3613 = vst.msk [vmem:[#allocation2 + $0xe8] sm:$0xf] %vm3554_vm6, %v3434_v14  ;;  %v12896_v14 = vld [vmem:[#allocation10_spill] sm:$0xff] }
 0x4d0   :  { %v3418_v54 = vpop.permute.xlu0 %3417  ;;  %3679 = vrot.lane.b32.xlu1 %v9531_v8, %s6385_s27 }
 0x4d1   :  { %v3420_v28 = vpop.permute.xlu1 %3419  ;;  %3605 = vst.msk [vmem:[#allocation2 + $0xc8] sm:$0xf] %vm3554_vm6, %v3418_v54 }
 0x4d2   :  { %3606 = vst.msk [vmem:[#allocation2 + $0xcc] sm:$0xf] %vm3554_vm6, %v3420_v28  ;;  %v12895_v28 = vld [vmem:[#allocation11_spill] sm:$0xff] }
 0x4d3   :  { %3677 = vrot.lane.b32.xlu0 %v9494_v25, %s6385_s27  ;;  %3675 = vrot.lane.b32.xlu2 %v9499_v51, %s6385_s27  ;;  %v3980_v54 = vrot.slane %v12895_v28, 6  ;;  %v12913_v28 = vld [vmem:[#allocation183_spill] sm:$0xff] }
 0x4d5   :  { %v3440_v20 = vpop.permute.xlu2 %3439 }
 0x4d6   :  { %3616 = vst.msk [vmem:[#allocation2 + $0xf4] sm:$0xf] %vm3554_vm6, %v3440_v20  ;;  %v4701_v20 = vrot.slane %v4699_v34, 4 }
 0x4d8   :  { %v3424_v5 = vpop.permute.xlu0 %3423  ;;  %3685 = vrot.lane.b32.xlu1 %v9555_v29, %s6385_s27 }
 0x4d9   :  { %v3426_v30 = vpop.permute.xlu1 %3425  ;;  %3608 = vst.msk [vmem:[#allocation2 + $0xd4] sm:$0xf] %vm3554_vm6, %v3424_v5 }
 0x4da   :  { %3609 = vst.msk [vmem:[#allocation2 + $0xd8] sm:$0xf] %vm3554_vm6, %v3426_v30  ;;  %v3981_v30 = vrot.slane %v12896_v14, 7 }
 0x4db   :  { %3683 = vrot.lane.b32.xlu0 %v9518_v1, %s6385_s27  ;;  %3681 = vrot.lane.b32.xlu2 %v9523_v36, %s6385_s27 }
 0x4dd   :  { %v3446_v51 = vpop.permute.xlu2 %3445 }
 0x4de   :  { %3619 = vst.msk [vmem:[#allocation2 + $0x100] sm:$0xf] %vm3554_vm6, %v3446_v51 }
 0x4e0   :  { %v3430_v25 = vpop.permute.xlu0 %3429  ;;  %3691 = vrot.lane.b32.xlu1 %v9579_v32, %s6385_s27 }
 0x4e1   :  { %v3432_v8 = vpop.permute.xlu1 %3431  ;;  %3611 = vst.msk [vmem:[#allocation2 + $0xe0] sm:$0xf] %vm3554_vm6, %v3430_v25 }
 0x4e2   :  { %3612 = vst.msk [vmem:[#allocation2 + $0xe4] sm:$0xf] %vm3554_vm6, %v3432_v8  ;;  %v12897_v8 = vld [vmem:[#allocation9_spill] sm:$0xff] }
 0x4e3   :  { %3689 = vrot.lane.b32.xlu0 %v9542_v41, %s6385_s27  ;;  %3687 = vrot.lane.b32.xlu2 %v9547_v49, %s6385_s27  ;;  %v4702_v25 = vrot.slane %v12897_v8, 7 }
 0x4e5   :  { %v3452_v36 = vpop.permute.xlu2 %3451 }
 0x4e6   :  { %3622 = vst.msk [vmem:[#allocation2 + $0x10c] sm:$0xf] %vm3554_vm6, %v3452_v36  ;;  %v12901_v36 = vld [vmem:[#allocation6_spill] sm:$0xff] }
 0x4e8   :  { %v3436_v1 = vpop.permute.xlu0 %3435  ;;  %3697 = vrot.lane.b32.xlu1 %v9603_v50, %s6385_s27 }
 0x4e9   :  { %v3438_v29 = vpop.permute.xlu1 %3437  ;;  %3614 = vst.msk [vmem:[#allocation2 + $0xec] sm:$0xf] %vm3554_vm6, %v3436_v1  ;;  %v12900_v1 = vld [vmem:[#allocation236_spill] sm:$0xff] }
 0x4ea   :  { %3615 = vst.msk [vmem:[#allocation2 + $0xf0] sm:$0xf] %vm3554_vm6, %v3438_v29 }
 0x4eb   :  { %3695 = vrot.lane.b32.xlu0 %v9566_v22, %s6385_s27  ;;  %3693 = vrot.lane.b32.xlu2 %v9571_v10, %s6385_s27 }
 0x4ed   :  { %v3458_v49 = vpop.permute.xlu2 %3457 }
 0x4ee   :  { %3625 = vst.msk [vmem:[#allocation2 + $0x118] sm:$0xf] %vm3554_vm6, %v3458_v49  ;;  %v12902_v49 = vld [vmem:[#allocation34_spill] sm:$0xff] }
 0x4f0   :  { %v3442_v41 = vpop.permute.xlu0 %3441  ;;  %3703 = vrot.lane.b32.xlu1 %v9627_v59, %s6385_s27 }
 0x4f1   :  { %v3444_v32 = vpop.permute.xlu1 %3443  ;;  %3617 = vst.msk [vmem:[#allocation2 + $0xf8] sm:$0xf] %vm3554_vm6, %v3442_v41  ;;  %v3982_v41 = vor.u32 %v3981_v30, %v3980_v54  ;;  %v4256_v54 = vrot.slane %v12913_v28, 7 }
 0x4f2   :  { %3618 = vst.msk [vmem:[#allocation2 + $0xfc] sm:$0xf] %vm3554_vm6, %v3444_v32  ;;  %v6112_v32 = vrot.slane %v12901_v36, 11 }
 0x4f3   :  { %3701 = vrot.lane.b32.xlu0 %v9590_v35, %s6385_s27  ;;  %3699 = vrot.lane.b32.xlu2 %v9595_v15, %s6385_s27 }
 0x4f5   :  { %v3464_v10 = vpop.permute.xlu2 %3463 }
 0x4f6   :  { %3628 = vst.msk [vmem:[#allocation2 + $0x124] sm:$0xf] %vm3554_vm6, %v3464_v10 }
 0x4f8   :  { %v3448_v22 = vpop.permute.xlu0 %3447  ;;  %3709 = vrot.lane.b32.xlu1 %v9651_v55, %s6385_s27 }
 0x4f9   :  { %v3450_v50 = vpop.permute.xlu1 %3449  ;;  %3620 = vst.msk [vmem:[#allocation2 + $0x104] sm:$0xf] %vm3554_vm6, %v3448_v22  ;;  %v12903_v22 = vld [vmem:[#allocation20_spill] sm:$0xff] }
 0x4fa   :  { %3621 = vst.msk [vmem:[#allocation2 + $0x108] sm:$0xf] %vm3554_vm6, %v3450_v50  ;;  %v3985_v50 = vrot.slane %v12902_v49, 6  ;;  %v3986_v10 = vrot.slane %v12903_v22, 7  ;;  %v12915_v49 = vld [vmem:[#allocation25_spill] sm:$0xff]  ;;  %v12916_v22 = vld [vmem:[#allocation23_spill] sm:$0xff] }
 0x4fb   :  { %3707 = vrot.lane.b32.xlu0 %v9614_v24, %s6385_s27  ;;  %3705 = vrot.lane.b32.xlu2 %v9619_v58, %s6385_s27 }
 0x4fd   :  { %v3470_v15 = vpop.permute.xlu2 %3469 }
 0x4fe   :  { %3631 = vst.msk [vmem:[#allocation2 + $0x130] sm:$0xf] %vm3554_vm6, %v3470_v15  ;;  %v12904_v15 = vld [vmem:[#allocation235_spill] sm:$0xff] }
 0x500   :  { %v3454_v35 = vpop.permute.xlu0 %3453  ;;  %3715 = vrot.lane.b32.xlu1 %v9675_v0, %s6385_s27  ;;  %v3971_v0 = vrot.slane %v12637_v56, 7 }
 0x501   :  { %v3456_v59 = vpop.permute.xlu1 %3455  ;;  %3623 = vst.msk [vmem:[#allocation2 + $0x110] sm:$0xf] %vm3554_vm6, %v3454_v35  ;;  %v4703_v35 = vsel %vm10141_vm15, %v4701_v20, %v4702_v25  ;;  %v12914_v20 = vld [vmem:[#allocation252_spill] sm:$0xff] }
 0x502   :  { %3624 = vst.msk [vmem:[#allocation2 + $0x114] sm:$0xf] %vm3554_vm6, %v3456_v59 }
 0x503   :  { %3713 = vrot.lane.b32.xlu0 %v9638_v7, %s6385_s27  ;;  %3711 = vrot.lane.b32.xlu2 %v9643_v11, %s6385_s27  ;;  %v3970_v7 = vrot.slane %v12636_v19, 6  ;;  %v3967_v11 = vrot.slane %v12631_v43, 7  ;;  %v3976_v19 = vrot.slane %v12888_v6, 7  ;;  %v12890_v43 = vld [vmem:[#allocation233_spill] sm:$0xff] }
 0x505   :  { %v3646_v58 = vpop.permute.xlu2 %3645  ;;  %v3968_v56 = vor.u32 %v3967_v11, %v3966_v37 }
 0x506   :  { %3883 = vst.msk [vmem:[#allocation2] sm:$0xf] %vm3882_vm8, %v3646_v58  ;;  %v10159_v58 = vor.u32 %v3986_v10, %v3985_v50  ;;  %v3990_v50 = vrot.slane %v12915_v49, 6  ;;  %v3991_v10 = vrot.slane %v12916_v22, 7 }
 0x507   :  { %v3969_v52 = vrot.slane %v3968_v56, 4 }
 0x508   :  { %v3460_v24 = vpop.permute.xlu0 %3459  ;;  %3721 = vrot.lane.b32.xlu1 %v9699_v57, %s6385_s27  ;;  %v3972_v57 = vor.u32 %v3971_v0, %v3970_v7 }
 0x509   :  { %v3462_v55 = vpop.permute.xlu1 %3461  ;;  %3626 = vst.msk [vmem:[#allocation2 + $0x11c] sm:$0xf] %vm3554_vm6, %v3460_v24  ;;  %v3984_v24 = vrot.slane %v3982_v41, 4 }
 0x50a   :  { %3627 = vst.msk [vmem:[#allocation2 + $0x120] sm:$0xf] %vm3554_vm6, %v3462_v55  ;;  %v3973_v61 = vsel %vm10122_vm12, %v3969_v52, %v3972_v57  ;;  %v4700_v55 = vsel %vm10141_vm15, %v6112_v32, %v4699_v34  ;;  %v12910_v52 = vld [vmem:[#allocation177_spill] sm:$0xff]  ;;  %v4255_v34 = vrot.slane %v12912_v38, 6 }
 0x50b   :  { %3719 = vrot.lane.b32.xlu0 %v9662_v40, %s6385_s27  ;;  %3717 = vrot.lane.b32.xlu2 %v9667_v62, %s6385_s27  ;;  %v3975_v40 = vrot.slane %v12887_v33, 6  ;;  %v3974_v62 = vrot.slane %v3972_v57, 4  ;;  %v3988_v37 = vsel %vm10122_vm12, %v3984_v24, %v10159_v58  ;;  %v12905_v57 = vld [vmem:[#allocation8_spill] sm:$0xff]  ;;  %v12918_v24 = vld [vmem:[#allocation173_spill] sm:$0xff] }
 0x50c   :  { %v4705_v33 = vrot.slane %v12905_v57, 7 }
 0x50d   :  { %v3652_v42 = vpop.permute.xlu2 %3651  ;;  %v3977_v4 = vor.u32 %v3976_v19, %v3975_v40  ;;  %v12906_v40 = vld [vmem:[#allocation176_spill] sm:$0xff]  ;;  %v12907_v19 = vld [vmem:[#allocation175_spill] sm:$0xff] }
 0x50e   :  { %3886 = vst.msk [vmem:[#allocation2 + $0xc] sm:$0xf] %vm3882_vm8, %v3652_v42  ;;  %v4250_v6 = vrot.slane %v12906_v40, 6  ;;  %v4251_v42 = vrot.slane %v12907_v19, 7  ;;  %v12920_v40 = vld [vmem:[#allocation251_spill] sm:$0xff] }
 0x50f   :  { %v3978_v26 = vsel %vm10122_vm12, %v3974_v62, %v3977_v4  ;;  %v3979_v0 = vrot.slane %v3977_v4, 4  ;;  %v12909_v4 = vld [vmem:[#allocation178_spill] sm:$0xff] }
 0x510   :  { %v3466_v53 = vpop.permute.xlu0 %3465  ;;  %3727 = vrot.lane.b32.xlu1 %v12889_v3, %s6385_s27  ;;  %v4707_v3 = vrot.slane %v4705_v33, 4 }
 0x511   :  { %v3468_v9 = vpop.permute.xlu1 %3467  ;;  %3629 = vst.msk [vmem:[#allocation2 + $0x128] sm:$0xf] %vm3554_vm6, %v3466_v53  ;;  %v3983_v53 = vsel %vm10122_vm12, %v3979_v0, %v3982_v41  ;;  %v3989_v0 = vrot.slane %v10159_v58, 4  ;;  %v12921_v58 = vld [vmem:[#allocation18_spill] sm:$0xff] }
 0x512   :  { %3630 = vst.msk [vmem:[#allocation2 + $0x12c] sm:$0xf] %vm3554_vm6, %v3468_v9 }
 0x513   :  { %3725 = vrot.lane.b32.xlu0 %v12890_v43, %s6385_s27  ;;  %3723 = vrot.lane.b32.xlu2 %v12893_v47, %s6385_s27  ;;  %v12908_v43 = vld [vmem:[#allocation13_spill] sm:$0xff] }
 0x514   :  { %v4708_v62 = vrot.slane %v12908_v43, 7 }
 0x515   :  { %v3658_v17 = vpop.permute.xlu2 %3657 }
 0x516   :  { %3889 = vst.msk [vmem:[#allocation2 + $0x18] sm:$0xf] %vm3882_vm8, %v3658_v17  ;;  %v4704_v17 = vrot.slane %v4702_v25, 4  ;;  %v4709_v30 = vsel %vm10141_vm15, %v4707_v3, %v4708_v62  ;;  %v4710_v38 = vrot.slane %v4708_v62, 4 }
 0x518   :  { %v3472_v21 = vpop.permute.xlu0 %3471  ;;  %4378 = vrot.lane.b32.xlu1 %v3978_v26, %s6386_s28  ;;  %v12911_v26 = vld [vmem:[#allocation240_spill] sm:$0xff]  ;;  %v4706_v8 = vsel %vm10141_vm15, %v4704_v17, %v4705_v33 }
 0x519   :  { %v3474_v18 = vpop.permute.xlu1 %3473  ;;  %3632 = vst.msk [vmem:[#allocation2 + $0x134] sm:$0xf] %vm3554_vm6, %v3472_v21  ;;  %v4246_v21 = vrot.slane %v12910_v52, 7  ;;  %v12923_v52 = vld [vmem:[#allocation21_spill] sm:$0xff]  ;;  %vm5251_vm6 = vcmask 289024  }
 0x51a   :  { %3634 = vst.msk [vmem:[#allocation2 + $0x138] sm:$0x7] %vm3633_vm11, %v3474_v18  ;;  %v4245_v18 = vrot.slane %v12909_v4, 6  ;;  %v12922_v4 = vld [vmem:[#allocation22_spill] sm:$0xff] }
 0x51b   :  { %4376 = vrot.lane.b32.xlu0 %v3973_v61, %s6386_s28  ;;  %3729 = vrot.lane.b32.xlu2 %v12900_v1, %s6385_s27  ;;  %v4252_v61 = vor.u32 %v4251_v42, %v4250_v6  ;;  %v4711_v42 = vrot.slane %v12921_v58, 7  ;;  %v12933_v58 = vld [vmem:[#allocation29_spill] sm:$0xff] }
 0x51d   :  { %v3664_v59 = vpop.permute.xlu2 %3663  ;;  %v4254_v25 = vrot.slane %v4252_v61, 4  ;;  %v4712_v62 = vsel %vm10141_vm15, %v4710_v38, %v4711_v42 }
 0x51e   :  { %3892 = vst.msk [vmem:[#allocation2 + $0x24] sm:$0xf] %vm3882_vm8, %v3664_v59 }
 0x520   :  { %v3648_v51 = vpop.permute.xlu0 %3647  ;;  %3731 = vrot.lane.b32.xlu1 %v12904_v15, %s6385_s27  ;;  %v12917_v15 = vld [vmem:[#allocation172_spill] sm:$0xff] }
 0x521   :  { %v3650_v5 = vpop.permute.xlu1 %3649  ;;  %3884 = vst.msk [vmem:[#allocation2 + $0x4] sm:$0xf] %vm3882_vm8, %v3648_v51  ;;  %v10194_v51 = vor.u32 %v4256_v54, %v4255_v34 }
 0x522   :  { %3885 = vst.msk [vmem:[#allocation2 + $0x8] sm:$0xf] %vm3882_vm8, %v3650_v5  ;;  %v10186_v5 = vor.u32 %v4246_v21, %v4245_v18  ;;  %v3995_v18 = vrot.slane %v12922_v4, 6  ;;  %v3996_v21 = vrot.slane %v12923_v52, 7 }
 0x523   :  { %4937 = vrot.lane.b32.xlu0 %v4703_v35, %s6387_s29  ;;  %4935 = vrot.lane.b32.xlu2 %v4700_v55, %s6387_s29  ;;  %v4258_v41 = vsel %vm10122_vm12, %v4254_v25, %v10194_v51  ;;  %v4867_v55 = vrot.slane %v12917_v15, 7 }
 0x524   :  { %v4249_v36 = vrot.slane %v10186_v5, 4  ;;  %v10236_v54 = vor.u32 %v3996_v21, %v3995_v18 }
 0x525   :  { %v3670_v11 = vpop.permute.xlu2 %3669 }
 0x526   :  { %3895 = vst.msk [vmem:[#allocation2 + $0x30] sm:$0xf] %vm3882_vm8, %v3670_v11  ;;  %v4253_v35 = vsel %vm10122_vm12, %v4249_v36, %v4252_v61  ;;  %v4869_v11 = vrot.slane %v4867_v55, 4 }
 0x528   :  { %v3654_v9 = vpop.permute.xlu0 %3653  ;;  %4382 = vrot.lane.b32.xlu1 %v3988_v37, %s6386_s28 }
 0x529   :  { %v3656_v7 = vpop.permute.xlu1 %3655  ;;  %3887 = vst.msk [vmem:[#allocation2 + $0x10] sm:$0xf] %vm3882_vm8, %v3654_v9  ;;  %v3992_v9 = vor.u32 %v3991_v10, %v3990_v50  ;;  %v12927_v10 = vld [vmem:[#allocation182_spill] sm:$0xff] }
 0x52a   :  { %3888 = vst.msk [vmem:[#allocation2 + $0x14] sm:$0xf] %vm3882_vm8, %v3656_v7  ;;  %v12268_v7 = vrot.slane %v12918_v24, 7 }
 0x52b   :  { %4380 = vrot.lane.b32.xlu0 %v3983_v53, %s6386_s28  ;;  %3733 = vrot.lane.b32.xlu2 %v12911_v26, %s6385_s27  ;;  %v12919_v53 = vld [vmem:[#allocation179_spill] sm:$0xff]  ;;  %v3993_v19 = vsel %vm10122_vm12, %v3989_v0, %v3992_v9  ;;  %v12924_v26 = vld [vmem:[#allocation17_spill] sm:$0xff]  ;;  %v3994_v28 = vrot.slane %v3992_v9, 4  ;;  %v12930_v9 = vld [vmem:[#allocation4_spill] sm:$0xff] }
 0x52c   :  { %v4870_v57 = vrot.slane %v12919_v53, 7  ;;  %v4866_v6 = vrot.slane %v12268_v7, 4  ;;  %v4714_v17 = vrot.slane %v12924_v26, 7 }
 0x52d   :  { %v3676_v14 = vpop.permute.xlu2 %3675  ;;  %v3998_v36 = vsel %vm10122_vm12, %v3994_v28, %v10236_v54 }
 0x52e   :  { %3898 = vst.msk [vmem:[#allocation2 + $0x3c] sm:$0xf] %vm3882_vm8, %v3676_v14  ;;  %v4871_v3 = vsel %vm10141_vm15, %v4869_v11, %v4870_v57  ;;  %v4868_v43 = vsel %vm10141_vm15, %v4866_v6, %v4867_v55  ;;  %v12929_v55 = vld [vmem:[#allocation184_spill] sm:$0xff]  ;;  %v12931_v11 = vld [vmem:[#allocation181_spill] sm:$0xff]  ;;  %v12932_v6 = vld [vmem:[#allocation39_spill] sm:$0xff]  ;;  %v4716_v28 = vrot.slane %v4714_v17, 4 }
 0x52f   :  { %v4266_v0 = vrot.slane %v12929_v55, 7  ;;  %v4876_v53 = vrot.slane %v12931_v11, 7  ;;  %v12942_v11 = vld [vmem:[#allocation195_spill] sm:$0xff] }
 0x530   :  { %v3660_v47 = vpop.permute.xlu0 %3659  ;;  %3757 = vrot.lane.b32.xlu1 %v12914_v20, %s6385_s27 }
 0x531   :  { %v3662_v56 = vpop.permute.xlu1 %3661  ;;  %3890 = vst.msk [vmem:[#allocation2 + $0x1c] sm:$0xf] %vm3882_vm8, %v3660_v47  ;;  %v4713_v47 = vrot.slane %v4711_v42, 4  ;;  %v4001_v42 = vrot.slane %v12933_v58, 7  ;;  %v4878_v58 = vrot.slane %v4876_v53, 4 }
 0x532   :  { %3891 = vst.msk [vmem:[#allocation2 + $0x20] sm:$0xf] %vm3882_vm8, %v3662_v56 }
 0x533   :  { %4941 = vrot.lane.b32.xlu0 %v4709_v30, %s6387_s29  ;;  %4939 = vrot.lane.b32.xlu2 %v4706_v8, %s6387_s29  ;;  %v4715_v14 = vsel %vm10141_vm15, %v4713_v47, %v4714_v17  ;;  %v12925_v30 = vld [vmem:[#allocation187_spill] sm:$0xff]  ;;  %v12926_v8 = vld [vmem:[#allocation186_spill] sm:$0xff]  ;;  %v12935_v47 = vld [vmem:[#allocation33_spill] sm:$0xff] }
 0x534   :  { %v4260_v20 = vrot.slane %v12925_v30, 6  ;;  %v4261_v25 = vrot.slane %v12926_v8, 7  ;;  %v4005_v26 = vrot.slane %v12935_v47, 6 }
 0x535   :  { %v3682_v59 = vpop.permute.xlu2 %3681 }
 0x536   :  { %3901 = vst.msk [vmem:[#allocation2 + $0x48] sm:$0xf] %vm3882_vm8, %v3682_v59  ;;  %v4873_v59 = vrot.slane %v12927_v10, 7 }
 0x538   :  { %v3666_v32 = vpop.permute.xlu0 %3665  ;;  %4490 = vrot.lane.b32.xlu1 %v4258_v41, %s6386_s28  ;;  %v4262_v41 = vor.u32 %v4261_v25, %v4260_v20 }
 0x539   :  { %v3668_v1 = vpop.permute.xlu1 %3667  ;;  %3893 = vst.msk [vmem:[#allocation2 + $0x28] sm:$0xf] %vm3882_vm8, %v3666_v32  ;;  %v4259_v32 = vrot.slane %v10194_v51, 4  ;;  %v12928_v51 = vld [vmem:[#allocation185_spill] sm:$0xff] }
 0x53a   :  { %3894 = vst.msk [vmem:[#allocation2 + $0x2c] sm:$0xf] %vm3882_vm8, %v3668_v1  ;;  %v4265_v15 = vrot.slane %v12928_v51, 6  ;;  %v12940_v51 = vld [vmem:[#allocation28_spill] sm:$0xff] }
 0x53b   :  { %4488 = vrot.lane.b32.xlu0 %v4253_v35, %s6386_s28  ;;  %3759 = vrot.lane.b32.xlu2 %v12920_v40, %s6385_s27  ;;  %v4263_v22 = vsel %vm10122_vm12, %v4259_v32, %v4262_v41  ;;  %v4872_v40 = vrot.slane %v4870_v57, 4 }
 0x53c   :  { %v10270_v4 = vor.u32 %v4266_v0, %v4265_v15  ;;  %v4720_v15 = vrot.slane %v12940_v51, 7 }
 0x53d   :  { %v3688_v56 = vpop.permute.xlu2 %3687  ;;  %v4874_v57 = vsel %vm10141_vm15, %v4872_v40, %v4873_v59  ;;  %v12943_v40 = vld [vmem:[#allocation253_spill] sm:$0xff] }
 0x53e   :  { %3904 = vst.msk [vmem:[#allocation2 + $0x54] sm:$0xf] %vm3882_vm8, %v3688_v56 }
 0x540   :  { %v3672_v33 = vpop.permute.xlu0 %3671  ;;  %4384 = vrot.lane.b32.xlu1 %v3993_v19, %s6386_s28  ;;  %v4000_v19 = vrot.slane %v12932_v6, 6 }
 0x541   :  { %v3674_v37 = vpop.permute.xlu1 %3673  ;;  %3896 = vst.msk [vmem:[#allocation2 + $0x34] sm:$0xf] %vm3882_vm8, %v3672_v33 }
 0x542   :  { %3897 = vst.msk [vmem:[#allocation2 + $0x38] sm:$0xf] %vm3882_vm8, %v3674_v37  ;;  %v4875_v37 = vrot.slane %v4873_v59, 4  ;;  %v4002_v21 = vor.u32 %v4001_v42, %v4000_v19  ;;  %v12944_v19 = vld [vmem:[#allocation5_spill] sm:$0xff]  ;;  %v12945_v42 = vld [vmem:[#allocation188_spill] sm:$0xff] }
 0x543   :  { %5049 = vrot.lane.b32.xlu0 %v4871_v3, %s6387_s29  ;;  %5047 = vrot.lane.b32.xlu2 %v4868_v43, %s6387_s29  ;;  %v12934_v3 = vld [vmem:[#allocation250_spill] sm:$0xff]  ;;  %v4264_v43 = vrot.slane %v4262_v41, 4 }
 0x544   :  { %v4877_v18 = vsel %vm10141_vm15, %v4875_v37, %v4876_v53  ;;  %v4004_v8 = vrot.slane %v4002_v21, 4 }
 0x545   :  { %v3694_v1 = vpop.permute.xlu2 %3693 }
 0x546   :  { %3907 = vst.msk [vmem:[#allocation2 + $0x60] sm:$0xf] %vm3882_vm8, %v3694_v1 }
 0x548   :  { %v3678_v34 = vpop.permute.xlu0 %3677  ;;  %4945 = vrot.lane.b32.xlu1 %v4715_v14, %s6387_s29  ;;  %v12937_v14 = vld [vmem:[#allocation24_spill] sm:$0xff] }
 0x549   :  { %v3680_v61 = vpop.permute.xlu1 %3679  ;;  %3899 = vst.msk [vmem:[#allocation2 + $0x40] sm:$0xf] %vm3882_vm8, %v3678_v34  ;;  %v4268_v34 = vsel %vm10122_vm12, %v4264_v43, %v10270_v4  ;;  %v4717_v30 = vrot.slane %v12937_v14, 7  ;;  %v12949_v14 = vld [vmem:[#allocation38_spill] sm:$0xff] }
 0x54a   :  { %3900 = vst.msk [vmem:[#allocation2 + $0x44] sm:$0xf] %vm3882_vm8, %v3680_v61  ;;  %v12936_v61 = vld [vmem:[#allocation32_spill] sm:$0xff] }
 0x54b   :  { %4943 = vrot.lane.b32.xlu0 %v4712_v62, %s6387_s29  ;;  %4386 = vrot.lane.b32.xlu2 %v3998_v36, %s6386_s28  ;;  %v4006_v38 = vrot.slane %v12936_v61, 7  ;;  %v3999_v62 = vrot.slane %v10236_v54, 4  ;;  %v4718_v36 = vsel %vm10141_vm15, %v4716_v28, %v4717_v30  ;;  %v4269_v61 = vrot.slane %v10270_v4, 4 }
 0x54d   :  { %v3700_v35 = vpop.permute.xlu2 %3699  ;;  %v10285_v25 = vor.u32 %v4006_v38, %v4005_v26  ;;  %v4003_v41 = vsel %vm10122_vm12, %v3999_v62, %v4002_v21 }
 0x54e   :  { %3910 = vst.msk [vmem:[#allocation2 + $0x6c] sm:$0xf] %vm3882_vm8, %v3700_v35  ;;  %v4719_v35 = vrot.slane %v4717_v30, 4  ;;  %v4016_v30 = vrot.slane %v12949_v14, 7 }
 0x54f   :  { %v4008_v17 = vsel %vm10122_vm12, %v4004_v8, %v10285_v25 }
 0x550   :  { %v3684_v50 = vpop.permute.xlu0 %3683  ;;  %4492 = vrot.lane.b32.xlu1 %v4263_v22, %s6386_s28  ;;  %v12939_v22 = vld [vmem:[#allocation192_spill] sm:$0xff]  ;;  %v4721_v6 = vsel %vm10141_vm15, %v4719_v35, %v4720_v15 }
 0x551   :  { %v3686_v49 = vpop.permute.xlu1 %3685  ;;  %3902 = vst.msk [vmem:[#allocation2 + $0x4c] sm:$0xf] %vm3882_vm8, %v3684_v50  ;;  %v12938_v50 = vld [vmem:[#allocation198_spill] sm:$0xff]  ;;  %v4271_v10 = vrot.slane %v12939_v22, 7 }
 0x552   :  { %3903 = vst.msk [vmem:[#allocation2 + $0x50] sm:$0xf] %vm3882_vm8, %v3686_v49  ;;  %v4270_v54 = vrot.slane %v12938_v50, 6 }
 0x553   :  { %3763 = vrot.lane.b32.xlu0 %v12930_v9, %s6385_s27  ;;  %3761 = vrot.lane.b32.xlu2 %v12934_v3, %s6385_s27  ;;  %v12941_v9 = vld [vmem:[#allocation196_spill] sm:$0xff]  ;;  %v12946_v3 = vld [vmem:[#allocation31_spill] sm:$0xff] }
 0x554   :  { %v4272_v0 = vor.u32 %v4271_v10, %v4270_v54  ;;  %v4275_v37 = vrot.slane %v12941_v9, 6  ;;  %v4010_v43 = vrot.slane %v12946_v3, 6  ;;  %v12950_v54 = vld [vmem:[#allocation191_spill] sm:$0xff] }
 0x555   :  { %v3706_v52 = vpop.permute.xlu2 %3705  ;;  %v4882_v22 = vrot.slane %v12950_v54, 7 }
 0x556   :  { %3913 = vst.msk [vmem:[#allocation2 + $0x78] sm:$0xf] %vm3882_vm8, %v3706_v52  ;;  %v4274_v21 = vrot.slane %v4272_v0, 4  ;;  %v4273_v4 = vsel %vm10122_vm12, %v4269_v61, %v4272_v0  ;;  %v12956_v61 = vld [vmem:[#allocation201_spill] sm:$0xff] }
 0x558   :  { %v3690_v56 = vpop.permute.xlu0 %3689  ;;  %5053 = vrot.lane.b32.xlu1 %v4877_v18, %s6387_s29  ;;  %v12947_v18 = vld [vmem:[#allocation30_spill] sm:$0xff] }
 0x559   :  { %v3692_v33 = vpop.permute.xlu1 %3691  ;;  %3905 = vst.msk [vmem:[#allocation2 + $0x58] sm:$0xf] %vm3882_vm8, %v3690_v56  ;;  %v4879_v56 = vrot.slane %v12945_v42, 7  ;;  %v4011_v52 = vrot.slane %v12947_v18, 7  ;;  %v6357_v18 = vld [vmem:[%s11734_s1] sm:$0xff] }
 0x55a   :  { %3906 = vst.msk [vmem:[#allocation2 + $0x5c] sm:$0xf] %vm3882_vm8, %v3692_v33  ;;  %v4276_v33 = vrot.slane %v12942_v11, 7 }
 0x55b   :  { %5051 = vrot.lane.b32.xlu0 %v4874_v57, %s6387_s29  ;;  %4494 = vrot.lane.b32.xlu2 %v4268_v34, %s6386_s28  ;;  %v4880_v53 = vsel %vm10141_vm15, %v4878_v58, %v4879_v56  ;;  %v4012_v38 = vor.u32 %v4011_v52, %v4010_v43  ;;  %v12948_v34 = vld [vmem:[#allocation47_spill] sm:$0xff]  ;;  %v4881_v50 = vrot.slane %v4879_v56, 4  ;;  %v4722_v52 = vrot.slane %v4720_v15, 4 }
 0x55c   :  { %v10321_v47 = vor.u32 %v4276_v33, %v4275_v37  ;;  %v4015_v28 = vrot.slane %v12948_v34, 6  ;;  %v6358_v37 = vld [vmem:[%s11734_s1 + $0x8] sm:$0xff]  ;;  %v12952_v33 = vld [vmem:[#allocation194_spill] sm:$0xff]  ;;  %v12954_v56 = vld [vmem:[#allocation35_spill] sm:$0xff] }
 0x55d   :  { %v3712_v32 = vpop.permute.xlu2 %3711  ;;  %v4883_v11 = vsel %vm10141_vm15, %v4881_v50, %v4882_v22  ;;  %v4726_v3 = vrot.slane %v12954_v56, 7 }
 0x55e   :  { %3916 = vst.msk [vmem:[#allocation2 + $0x84] sm:$0xf] %vm3882_vm8, %v3712_v32  ;;  %v4278_v8 = vsel %vm10122_vm12, %v4274_v21, %v10321_v47  ;;  %v10339_v62 = vor.u32 %v4016_v30, %v4015_v28  ;;  %v12955_v21 = vld [vmem:[#allocation207_spill] sm:$0xff]  ;;  %v12957_v28 = vld [vmem:[#allocation26_spill] sm:$0xff]  ;;  %v12958_v30 = vld [vmem:[#allocation88_spill] sm:$0xff] }
 0x560   :  { %v3696_v1 = vpop.permute.xlu0 %3695  ;;  %4947 = vrot.lane.b32.xlu1 %v4718_v36, %s6387_s29  ;;  %v5336_v36 = vld [vmem:[%s11734_s1 + $0x10] sm:$0x3] }
 0x561   :  { %v3698_v20 = vpop.permute.xlu1 %3697  ;;  %3908 = vst.msk [vmem:[#allocation2 + $0x64] sm:$0xf] %vm3882_vm8, %v3696_v1  ;;  %v4014_v1 = vrot.slane %v4012_v38, 4 }
 0x562   :  { %3909 = vst.msk [vmem:[#allocation2 + $0x68] sm:$0xf] %vm3882_vm8, %v3698_v20 }
 0x563   :  { %4390 = vrot.lane.b32.xlu0 %v4008_v17, %s6386_s28  ;;  %4388 = vrot.lane.b32.xlu2 %v4003_v41, %s6386_s28  ;;  %v4009_v17 = vrot.slane %v10285_v25, 4  ;;  %v5548_v41 = vunpack.c.l.b16 %v5336_v36  ;;  %v4279_v36 = vrot.slane %v10321_v47, 4 }
 0x565   :  { %v3718_v55 = vpop.permute.xlu2 %3717  ;;  %v5551_v10 = vpack.c.b16 %v5548_v41, %v5548_v41  ;;  %v4013_v25 = vsel %vm10122_vm12, %v4009_v17, %v4012_v38 }
 0x566   :  { %3919 = vst.msk [vmem:[#allocation2 + $0x90] sm:$0xf] %vm3882_vm8, %v3718_v55  ;;  %v12951_v55 = vld [vmem:[#allocation27_spill] sm:$0xff] }
 0x567   :  { %v4723_v0 = vrot.slane %v12951_v55, 7  ;;  %v5677_v9 = vsel %vm3076_vm2, %v5551_v10, 0  ;;  %v12961_v10 = vld [vmem:[#allocation85_spill] sm:$0xff]  ;;  %vm5554_vm2 = vcmask 293888  }
 0x568   :  { %v3702_v59 = vpop.permute.xlu0 %3701  ;;  %3767 = vrot.lane.b32.xlu1 %v12943_v40, %s6385_s27  ;;  %5684 = vmatpush.bf16.msra.mxu0 %v5677_v9  ;;  %v4280_v40 = vrot.slane %v12952_v33, 6  ;;  %v12963_v33 = vld [vmem:[#allocation197_spill] sm:$0xff] }
 0x569   :  { %v3704_v49 = vpop.permute.xlu1 %3703  ;;  %3911 = vst.msk [vmem:[#allocation2 + $0x70] sm:$0xf] %vm3882_vm8, %v3702_v59  ;;  %v4018_v59 = vsel %vm10122_vm12, %v4014_v1, %v10339_v62  ;;  %6361 = vmatpush.bf16.msra.mxu3 %v5677_v9  ;;  %6359 = vmatpush.bf16.msra.mxu1 %v5677_v9  ;;  %v4725_v42 = vrot.slane %v4723_v0, 4  ;;  %v4724_v51 = vsel %vm10141_vm15, %v4722_v52, %v4723_v0 }
 0x56a   :  { %3912 = vst.msk [vmem:[#allocation2 + $0x74] sm:$0xf] %vm3882_vm8, %v3704_v49  ;;  %6360 = vmatpush.bf16.msra.mxu2 %v5677_v9 }
 0x56b   :  { %3765 = vrot.lane.b32.xlu0 %v12944_v19, %s6385_s27  ;;  %4949 = vrot.lane.b32.xlu2 %v4721_v6, %s6387_s29  ;;  %v12953_v6 = vld [vmem:[#allocation193_spill] sm:$0xff]  ;;  %v4727_v34 = vsel %vm10141_vm15, %v4725_v42, %v4726_v3 }
 0x56c   :  { %v4281_v19 = vrot.slane %v12953_v6, 7  ;;  %5685 = vmatpush.bf16.msra.mxu0 %v6358_v37 }
 0x56d   :  { %v3724_v20 = vpop.permute.xlu2 %3723  ;;  %6364 = vmatpush.bf16.msra.mxu3 %v6358_v37  ;;  %6362 = vmatpush.bf16.msra.mxu1 %v6358_v37 }
 0x56e   :  { %3922 = vst.msk [vmem:[#allocation2 + $0x9c] sm:$0xf] %vm3882_vm8, %v3724_v20  ;;  %6363 = vmatpush.bf16.msra.mxu2 %v6358_v37  ;;  %v4095_v20 = vrot.slane %v12958_v30, 6 }
 0x570   :  { %v3708_v26 = vpop.permute.xlu0 %3707  ;;  %5055 = vrot.lane.b32.xlu1 %v4880_v53, %s6387_s29  ;;  %v4286_v53 = vrot.slane %v12956_v61, 7  ;;  %5686 = vmatpush.bf16.msra.mxu0 %v6357_v18 }
 0x571   :  { %v3710_v57 = vpop.permute.xlu1 %3709  ;;  %3914 = vst.msk [vmem:[#allocation2 + $0x7c] sm:$0xf] %vm3882_vm8, %v3708_v26  ;;  %v4285_v26 = vrot.slane %v12955_v21, 6  ;;  %6367 = vmatpush.bf16.msra.mxu3 %v6357_v18  ;;  %6365 = vmatpush.bf16.msra.mxu1 %v6357_v18  ;;  %v12966_v21 = vld [vmem:[#allocation83_spill] sm:$0xff] }
 0x572   :  { %3915 = vst.msk [vmem:[#allocation2 + $0x80] sm:$0xf] %vm3882_vm8, %v3710_v57  ;;  %v4282_v57 = vor.u32 %v4281_v19, %v4280_v40  ;;  %6366 = vmatpush.bf16.msra.mxu2 %v6357_v18  ;;  %v4888_v40 = vrot.slane %v12963_v33, 7  ;;  %v12964_v19 = vld [vmem:[#allocation7_spill] sm:$0xff] }
 0x573   :  { %4498 = vrot.lane.b32.xlu0 %v4278_v8, %s6386_s28  ;;  %4496 = vrot.lane.b32.xlu2 %v4273_v4, %s6386_s28  ;;  %v10388_v14 = vor.u32 %v4286_v53, %v4285_v26  ;;  %v12959_v8 = vld [vmem:[#allocation87_spill] sm:$0xff]  ;;  %v4774_v26 = vrot.slane %v12966_v21, 7 }
 0x574   :  { %v4284_v15 = vrot.slane %v4282_v57, 4  ;;  %v4096_v4 = vrot.slane %v12959_v8, 7  ;;  %v4283_v47 = vsel %vm10122_vm12, %v4279_v36, %v4282_v57  ;;  %v12968_v53 = vld [vmem:[#allocation95_spill] sm:$0xff] }
 0x575   :  { %v3730_v35 = vpop.permute.xlu2 %3729  ;;  %v4776_v30 = vrot.slane %v4774_v26, 4  ;;  %v4289_v33 = vrot.slane %v10388_v14, 4 }
 0x576   :  { %3925 = vst.msk [vmem:[#allocation2 + $0xa8] sm:$0xf] %vm3882_vm8, %v3730_v35  ;;  %v4288_v17 = vsel %vm10122_vm12, %v4284_v15, %v10388_v14  ;;  %v10399_v41 = vor.u32 %v4096_v4, %v4095_v20  ;;  %v12970_v20 = vld [vmem:[#allocation43_spill] sm:$0xff]  ;;  %v12971_v4 = vld [vmem:[#allocation42_spill] sm:$0xff] }
 0x577   :  { %v4020_v8 = vrot.slane %v12970_v20, 6 }
 0x578   :  { %v3714_v49 = vpop.permute.xlu0 %3713  ;;  %4394 = vrot.lane.b32.xlu1 %v4018_v59, %s6386_s28  ;;  %v4101_v59 = vrot.slane %v12961_v10, 7  ;;  %v4099_v0 = vrot.slane %v10399_v41, 4 }
 0x579   :  { %v3716_v32 = vpop.permute.xlu1 %3715  ;;  %3917 = vst.msk [vmem:[#allocation2 + $0x88] sm:$0xf] %vm3882_vm8, %v3714_v49  ;;  %v12960_v49 = vld [vmem:[#allocation86_spill] sm:$0xff] }
 0x57a   :  { %3918 = vst.msk [vmem:[#allocation2 + $0x8c] sm:$0xf] %vm3882_vm8, %v3716_v32  ;;  %v4100_v50 = vrot.slane %v12960_v49, 6 }
 0x57b   :  { %4392 = vrot.lane.b32.xlu0 %v4013_v25, %s6386_s28  ;;  %5057 = vrot.lane.b32.xlu2 %v4883_v11, %s6387_s29  ;;  %v12962_v25 = vld [vmem:[#allocation190_spill] sm:$0xff] }
 0x57c   :  { %v4885_v55 = vrot.slane %v12962_v25, 7  ;;  %v4102_v9 = vor.u32 %v4101_v59, %v4100_v50  ;;  %v12973_v25 = vld [vmem:[#allocation40_spill] sm:$0xff] }
 0x57d   :  { %v4936_v38 = vpop.permute.xlu2 %4935 }
 0x57e   :  { %v4887_v11 = vrot.slane %v4885_v55, 4  ;;  %v4103_v42 = vsel %vm10122_vm12, %v4099_v0, %v4102_v9 }
 0x580   :  { %v3720_v43 = vpop.permute.xlu0 %3719  ;;  %3769 = vrot.lane.b32.xlu1 %v12957_v28, %s6385_s27  ;;  %v4889_v57 = vsel %vm10141_vm15, %v4887_v11, %v4888_v40  ;;  %v12969_v28 = vld [vmem:[#allocation91_spill] sm:$0xff] }
 0x581   :  { %v3722_v58 = vpop.permute.xlu1 %3721  ;;  %3920 = vst.msk [vmem:[#allocation2 + $0x94] sm:$0xf] %vm3882_vm8, %v3720_v43  ;;  %v12965_v43 = vld [vmem:[#allocation82_spill] sm:$0xff] }
 0x582   :  { %3921 = vst.msk [vmem:[#allocation2 + $0x98] sm:$0xf] %vm3882_vm8, %v3722_v58  ;;  %v4884_v58 = vrot.slane %v4882_v22, 4  ;;  %v4777_v18 = vrot.slane %v12965_v43, 7  ;;  %v12967_v22 = vld [vmem:[#allocation99_spill] sm:$0xff] }
 0x583   :  { %4953 = vrot.lane.b32.xlu0 %v4727_v34, %s6387_s29  ;;  %4951 = vrot.lane.b32.xlu2 %v4724_v51, %s6387_s29  ;;  %v4105_v61 = vrot.slane %v12967_v22, 6  ;;  %v4780_v51 = vrot.slane %v12969_v28, 7  ;;  %v12975_v22 = vld [vmem:[#allocation205_spill] sm:$0xff] }
 0x584   :  { %v4886_v54 = vsel %vm10141_vm15, %v4884_v58, %v4885_v55  ;;  %v4779_v34 = vrot.slane %v4777_v18, 4  ;;  %v4778_v10 = vsel %vm10141_vm15, %v4776_v30, %v4777_v18  ;;  %v4026_v55 = vrot.slane %v12973_v25, 7 }
 0x585   :  { %v3734_v35 = vpop.permute.xlu2 %3733  ;;  %v4019_v18 = vrot.slane %v10339_v62, 4 }
 0x586   :  { %3927 = vst.msk [vmem:[#allocation2 + $0xb0] sm:$0xf] %vm3882_vm8, %v3734_v35  ;;  %v4781_v49 = vsel %vm10141_vm15, %v4779_v34, %v4780_v51  ;;  %v12972_v35 = vld [vmem:[#allocation41_spill] sm:$0xff] }
 0x588   :  { %v3726_v32 = vpop.permute.xlu0 %3725  ;;  %4502 = vrot.lane.b32.xlu1 %v4288_v17, %s6386_s28 }
 0x589   :  { %v3728_v1 = vpop.permute.xlu1 %3727  ;;  %3923 = vst.msk [vmem:[#allocation2 + $0xa0] sm:$0xf] %vm3882_vm8, %v3726_v32  ;;  %v4104_v32 = vrot.slane %v4102_v9, 4  ;;  %v4728_v9 = vrot.slane %v4726_v3, 4 }
 0x58a   :  { %3924 = vst.msk [vmem:[#allocation2 + $0xa4] sm:$0xf] %vm3882_vm8, %v3728_v1  ;;  %v4021_v1 = vrot.slane %v12971_v4, 7  ;;  %v12978_v4 = vld [vmem:[#allocation203_spill] sm:$0xff] }
 0x58b   :  { %4500 = vrot.lane.b32.xlu0 %v4283_v47, %s6386_s28  ;;  %3771 = vrot.lane.b32.xlu2 %v12964_v19, %s6385_s27  ;;  %v4025_v47 = vrot.slane %v12972_v35, 6 }
 0x58c   :  { %v4022_v59 = vor.u32 %v4021_v1, %v4020_v8  ;;  %v4295_v1 = vrot.slane %v12978_v4, 6 }
 0x58d   :  { %v4940_v52 = vpop.permute.xlu2 %4939  ;;  %v10459_v58 = vor.u32 %v4026_v55, %v4025_v47  ;;  %v12982_v47 = vld [vmem:[#allocation97_spill] sm:$0xff]  ;;  %v12983_v55 = vld [vmem:[#allocation96_spill] sm:$0xff] }
 0x58e   :  { %v4024_v19 = vrot.slane %v4022_v59, 4  ;;  %v4110_v25 = vrot.slane %v12982_v47, 6 }
 0x590   :  { %v4377_v6 = vpop.permute.xlu0 %4376  ;;  %4428 = vrot.lane.b32.xlu1 %v4103_v42, %s6386_s28 }
 0x591   :  { %v4379_v37 = vpop.permute.xlu1 %4378  ;;  %4614 = vst.msk [vmem:[#allocation2] sm:$0xf] %vm4613_vm0, %v4377_v6 }
 0x592   :  { %4615 = vst.msk [vmem:[#allocation2 + $0x4] sm:$0xf] %vm4613_vm0, %v4379_v37  ;;  %v12974_v37 = vld [vmem:[#allocation37_spill] sm:$0xff] }
 0x593   :  { %5173 = vst.msk [vmem:[#allocation2] sm:$0xf] %vm5172_vm1, %v4936_v38  ;;  %v4106_v38 = vrot.slane %v12968_v53, 7  ;;  %5061 = vrot.lane.b32.xlu0 %v4889_v57, %s6387_s29  ;;  %5059 = vrot.lane.b32.xlu2 %v4886_v54, %s6387_s29  ;;  %v4729_v11 = vrot.slane %v12974_v37, 7  ;;  %v4028_v57 = vsel %vm10122_vm12, %v4024_v19, %v10459_v58  ;;  %v4023_v54 = vsel %vm10122_vm12, %v4019_v18, %v4022_v59  ;;  %v12981_v59 = vld [vmem:[#allocation200_spill] sm:$0xff]  ;;  %v12985_v18 = vld [vmem:[#allocation93_spill] sm:$0xff] }
 0x594   :  { %v4891_v35 = vrot.slane %v12981_v59, 7  ;;  %v4029_v59 = vrot.slane %v10459_v58, 4 }
 0x595   :  { %v10440_v17 = vor.u32 %v4106_v38, %v4105_v61  ;;  %v3760_v50 = vpop.permute.xlu2 %3759  ;;  %v4730_v56 = vsel %vm10141_vm15, %v4728_v9, %v4729_v11  ;;  %v12976_v61 = vld [vmem:[#allocation204_spill] sm:$0xff]  ;;  %v4731_v34 = vrot.slane %v4729_v11, 4 }
 0x596   :  { %3940 = vst.msk [vmem:[#allocation2 + $0xe4] sm:$0xf] %vm3882_vm8, %v3760_v50  ;;  %v4291_v53 = vrot.slane %v12976_v61, 7  ;;  %v12980_v50 = vld [vmem:[#allocation16_spill] sm:$0xff] }
 0x597   :  { %v4108_v0 = vsel %vm10122_vm12, %v4104_v32, %v10440_v17 }
 0x598   :  { %v4938_v36 = vpop.permute.xlu0 %4937  ;;  %4989 = vrot.lane.b32.xlu1 %v4781_v49, %s6387_s29 }
 0x599   :  { %v3732_v15 = vpop.permute.xlu1 %3731  ;;  %5174 = vst.msk [vmem:[#allocation2 + $0x4] sm:$0xf] %vm5172_vm1, %v4938_v36  ;;  %v12979_v36 = vld [vmem:[#allocation202_spill] sm:$0xff] }
 0x59a   :  { %3926 = vst.msk [vmem:[#allocation2 + $0xac] sm:$0xf] %vm3882_vm8, %v3732_v15  ;;  %v12977_v15 = vld [vmem:[#allocation36_spill] sm:$0xff]  ;;  %v4296_v32 = vrot.slane %v12979_v36, 7 }
 0x59b   :  { %4987 = vrot.lane.b32.xlu0 %v4778_v10, %s6387_s29  ;;  %4430 = vrot.lane.b32.xlu2 %v4108_v0, %s6386_s28  ;;  %v4732_v30 = vrot.slane %v12977_v15, 7  ;;  %v4890_v10 = vrot.slane %v4888_v40, 4  ;;  %v4111_v0 = vrot.slane %v12983_v55, 7  ;;  %v12990_v55 = vld [vmem:[#allocation89_spill] sm:$0xff] }
 0x59d   :  { %v5048_v3 = vpop.permute.xlu2 %5047  ;;  %v4733_v49 = vsel %vm10141_vm15, %v4731_v34, %v4732_v30  ;;  %v4892_v40 = vsel %vm10141_vm15, %v4890_v10, %v4891_v35  ;;  %v4112_v19 = vor.u32 %v4111_v0, %v4110_v25  ;;  %v4786_v0 = vrot.slane %v12990_v55, 7 }
 0x5a0   :  { %v4381_v42 = vpop.permute.xlu0 %4380  ;;  %v6318_v43 = vld [vmem:[#allocation2] sm:$0xff]  ;;  %4955 = vrot.lane.b32.xlu1 %v4730_v56, %s6387_s29  ;;  %v4116_v56 = vrot.slane %v12985_v18, 7 }
 0x5a1   :  { %v4383_v6 = vpop.permute.xlu1 %4382  ;;  %4616 = vst.msk [vmem:[#allocation2 + $0x8] sm:$0xf] %vm4613_vm0, %v4381_v42  ;;  %6277 = vmatmul.msk.bf16.vlgmr.msra.gmra.mxu0 %vm5554_vm2, %v6318_v43  ;;  %v12984_v42 = vld [vmem:[#allocation94_spill] sm:$0xff] }
 0x5a2   :  { %4617 = vst.msk [vmem:[#allocation2 + $0xc] sm:$0xf] %vm4613_vm0, %v4383_v6  ;;  %v4115_v43 = vrot.slane %v12984_v42, 6 }
 0x5a3   :  { %5175 = vst.msk [vmem:[#allocation2 + $0x8] sm:$0xf] %vm5172_vm1, %v4940_v52  ;;  %4398 = vrot.lane.b32.xlu0 %v4028_v57, %s6386_s28  ;;  %v4290_v52 = vrot.slane %v12975_v22, 6  ;;  %4396 = vrot.lane.b32.xlu2 %v4023_v54, %s6386_s28 }
 0x5a5   :  { %v4387_v20 = vpop.permute.xlu2 %4386  ;;  %v4292_v8 = vor.u32 %v4291_v53, %v4290_v52  ;;  %v4109_v52 = vrot.slane %v10440_v17, 4  ;;  %v4893_v53 = vrot.slane %v4891_v35, 4 }
 0x5a6   :  { %4619 = vst.msk [vmem:[#allocation2 + $0x14] sm:$0xf] %vm4613_vm0, %v4387_v20 }
 0x5a7   :  { %v4294_v37 = vrot.slane %v4292_v8, 4  ;;  %v4293_v14 = vsel %vm10122_vm12, %v4289_v33, %v4292_v8  ;;  %v12987_v8 = vld [vmem:[#allocation54_spill] sm:$0xff]  ;;  %v4113_v17 = vsel %vm10122_vm12, %v4109_v52, %v4112_v19 }
 0x5a8   :  { %v4942_v38 = vpop.permute.xlu0 %4941  ;;  %3775 = vrot.lane.b32.xlu1 %v9914_v46, %s6385_s27  ;;  %v10498_v46 = vor.u32 %v4296_v32, %v4295_v1  ;;  %v4030_v4 = vrot.slane %v12987_v8, 6  ;;  %v12988_v1 = vld [vmem:[#allocation48_spill] sm:$0xff]  ;;  %v12996_v8 = vld [vmem:[#allocation210_spill] sm:$0xff] }
 0x5a9   :  { %v3758_v62 = vpop.permute.xlu1 %3757  ;;  %5176 = vst.msk [vmem:[#allocation2 + $0xc] sm:$0xf] %vm5172_vm1, %v4942_v38  ;;  %v12986_v38 = vld [vmem:[#allocation199_spill] sm:$0xff]  ;;  %v4031_v36 = vrot.slane %v12988_v1, 7 }
 0x5aa   :  { %3939 = vst.msk [vmem:[#allocation2 + $0xe0] sm:$0xf] %vm3882_vm8, %v3758_v62  ;;  %v4298_v54 = vsel %vm10122_vm12, %v4294_v37, %v10498_v46  ;;  %v10518_v62 = vor.u32 %v4116_v56, %v4115_v43  ;;  %v4894_v34 = vrot.slane %v12986_v38, 7  ;;  %v12993_v43 = vld [vmem:[#allocation51_spill] sm:$0xff] }
 0x5ab   :  { %3773 = vrot.lane.b32.xlu0 %v12980_v50, %s6385_s27  ;;  %4957 = vrot.lane.b32.xlu2 %v4733_v49, %s6387_s29  ;;  %v12989_v49 = vld [vmem:[#allocation92_spill] sm:$0xff]  ;;  %v4032_v35 = vor.u32 %v4031_v36, %v4030_v4  ;;  %v4036_v18 = vrot.slane %v12993_v43, 7  ;;  %v4301_v4 = vrot.slane %v12996_v8, 7  ;;  %v13003_v43 = vld [vmem:[#allocation102_spill] sm:$0xff]  ;;  %v13006_v8 = vld [vmem:[#allocation105_spill] sm:$0xff] }
 0x5ac   :  { %v4783_v50 = vrot.slane %v12989_v49, 7  ;;  %v4895_v10 = vsel %vm10141_vm15, %v4893_v53, %v4894_v34  ;;  %v4119_v55 = vrot.slane %v10518_v62, 4 }
 0x5ad   :  { %v3762_v57 = vpop.permute.xlu2 %3761  ;;  %v4033_v58 = vsel %vm10122_vm12, %v4029_v59, %v4032_v35 }
 0x5ae   :  { %3941 = vst.msk [vmem:[#allocation2 + $0xe8] sm:$0xf] %vm3882_vm8, %v3762_v57  ;;  %v4785_v25 = vrot.slane %v4783_v50, 4  ;;  %v12994_v57 = vld [vmem:[#allocation46_spill] sm:$0xff] }
 0x5b0   :  { %v4489_v11 = vpop.permute.xlu0 %4488  ;;  %v6319_v6 = vld [vmem:[#allocation2 + $0x8] sm:$0xff]  ;;  %5063 = vrot.lane.b32.xlu1 %v4892_v40, %s6387_s29 }
 0x5b1   :  { %v4491_v9 = vpop.permute.xlu1 %4490  ;;  %4670 = vst.msk [vmem:[#allocation2 + $0xe0] sm:$0xf] %vm4613_vm0, %v4489_v11  ;;  %6278 = vmatmul.msk.bf16.gmra.mxu0 %vm5554_vm2, %v6319_v6  ;;  %v4782_v11 = vrot.slane %v4780_v51, 4  ;;  %v12991_v6 = vld [vmem:[#allocation44_spill] sm:$0xff] }
 0x5b2   :  { %4671 = vst.msk [vmem:[#allocation2 + $0xe4] sm:$0xf] %vm4613_vm0, %v4491_v9  ;;  %v4735_v33 = vrot.slane %v12991_v6, 7  ;;  %v12992_v51 = vld [vmem:[#allocation52_spill] sm:$0xff] }
 0x5b3   :  { %5229 = vst.msk [vmem:[#allocation2 + $0xe0] sm:$0xf] %vm5172_vm1, %v5048_v3  ;;  %4506 = vrot.lane.b32.xlu0 %v4298_v54, %s6386_s28  ;;  %v4114_v3 = vrot.slane %v4112_v19, 4  ;;  %4504 = vrot.lane.b32.xlu2 %v4293_v14, %s6386_s28  ;;  %v4787_v19 = vsel %vm10141_vm15, %v4785_v25, %v4786_v0  ;;  %v4784_v28 = vsel %vm10141_vm15, %v4782_v11, %v4783_v50  ;;  %v4035_v42 = vrot.slane %v12992_v51, 6  ;;  %v13002_v51 = vld [vmem:[#allocation108_spill] sm:$0xff] }
 0x5b4   :  { %v4737_v56 = vrot.slane %v4735_v33, 4  ;;  %v4738_v54 = vrot.slane %v12994_v57, 7 }
 0x5b5   :  { %v4118_v20 = vsel %vm10122_vm12, %v4114_v3, %v10518_v62  ;;  %v4495_v32 = vpop.permute.xlu2 %4494  ;;  %v4734_v3 = vrot.slane %v4732_v30, 4  ;;  %v10567_v53 = vor.u32 %v4036_v18, %v4035_v42  ;;  %v12995_v30 = vld [vmem:[#allocation216_spill] sm:$0xff]  ;;  %v4120_v42 = vrot.slane %v13002_v51, 6 }
 0x5b6   :  { %v4739_v15 = vsel %vm10141_vm15, %v4737_v56, %v4738_v54  ;;  %v4121_v18 = vrot.slane %v13003_v43, 7 }
 0x5b7   :  { %v4736_v36 = vsel %vm10141_vm15, %v4734_v3, %v4735_v33  ;;  %v13001_v33 = vld [vmem:[#allocation209_spill] sm:$0xff]  ;;  %v13004_v3 = vld [vmem:[#allocation254_spill] sm:$0xff] }
 0x5b8   :  { %v5050_v61 = vpop.permute.xlu0 %5049  ;;  %4434 = vrot.lane.b32.xlu1 %v4118_v20, %s6386_s28  ;;  %v4300_v20 = vrot.slane %v12995_v30, 6  ;;  %v13005_v30 = vld [vmem:[#allocation106_spill] sm:$0xff] }
 0x5b9   :  { %v4385_v22 = vpop.permute.xlu1 %4384  ;;  %5230 = vst.msk [vmem:[#allocation2 + $0xe4] sm:$0xf] %vm5172_vm1, %v5050_v61  ;;  %v4034_v61 = vrot.slane %v4032_v35, 4  ;;  %v12997_v35 = vld [vmem:[#allocation206_spill] sm:$0xff] }
 0x5ba   :  { %4618 = vst.msk [vmem:[#allocation2 + $0x10] sm:$0xf] %vm4613_vm0, %v4385_v22  ;;  %v4302_v49 = vor.u32 %v4301_v4, %v4300_v20  ;;  %v4125_v20 = vrot.slane %v13005_v30, 6  ;;  %v4126_v4 = vrot.slane %v13006_v8, 7  ;;  %v13013_v30 = vld [vmem:[#allocation45_spill] sm:$0xff] }
 0x5bb   :  { %4432 = vrot.lane.b32.xlu0 %v4113_v17, %s6386_s28  ;;  %5065 = vrot.lane.b32.xlu2 %v4895_v10, %s6387_s29  ;;  %v4299_v17 = vrot.slane %v10498_v46, 4  ;;  %v12999_v46 = vld [vmem:[#allocation213_spill] sm:$0xff] }
 0x5bc   :  { %v4306_v11 = vrot.slane %v12999_v46, 7 }
 0x5bd   :  { %v4389_v40 = vpop.permute.xlu2 %4388  ;;  %v4303_v59 = vsel %vm10122_vm12, %v4299_v17, %v4302_v49 }
 0x5be   :  { %4620 = vst.msk [vmem:[#allocation2 + $0x18] sm:$0xf] %vm4613_vm0, %v4389_v40  ;;  %v4900_v40 = vrot.slane %v13001_v33, 7 }
 0x5c0   :  { %v4944_v9 = vpop.permute.xlu0 %4943  ;;  %v6346_v37 = vld [vmem:[#allocation2 + $0xe0] sm:$0xff]  ;;  %4400 = vrot.lane.b32.xlu1 %v4033_v58, %s6386_s28  ;;  %v13000_v58 = vld [vmem:[#allocation19_spill] sm:$0xff] }
 0x5c1   :  { %v4946_v47 = vpop.permute.xlu1 %4945  ;;  %5177 = vst.msk [vmem:[#allocation2 + $0x10] sm:$0xf] %vm5172_vm1, %v4944_v9  ;;  %6305 = vmatmul.msk.bf16.vlgmr.msra.gmra.mxu3 %vm5554_vm2, %v6346_v37  ;;  %v12998_v9 = vld [vmem:[#allocation214_spill] sm:$0xff] }
 0x5c2   :  { %5178 = vst.msk [vmem:[#allocation2 + $0x14] sm:$0xf] %vm5172_vm1, %v4946_v47  ;;  %v4897_v47 = vrot.slane %v12997_v35, 7  ;;  %v4305_v37 = vrot.slane %v12998_v9, 6  ;;  %v10627_v9 = vor.u32 %v4126_v4, %v4125_v20  ;;  %v4741_v20 = vrot.slane %v13013_v30, 7 }
 0x5c3   :  { %4993 = vrot.lane.b32.xlu0 %v4787_v19, %s6387_s29  ;;  %4991 = vrot.lane.b32.xlu2 %v4784_v28, %s6387_s29  ;;  %v4896_v28 = vrot.slane %v4894_v34, 4 }
 0x5c4   :  { %v4899_v6 = vrot.slane %v4897_v47, 4 }
 0x5c5   :  { %v4950_v1 = vpop.permute.xlu2 %4949 }
 0x5c6   :  { %v4901_v38 = vsel %vm10141_vm15, %v4899_v6, %v4900_v40 }
 0x5c8   :  { %v3764_v22 = vpop.permute.xlu0 %3763  ;;  %4961 = vrot.lane.b32.xlu1 %v4739_v15, %s6387_s29  ;;  %v4122_v15 = vor.u32 %v4121_v18, %v4120_v42 }
 0x5c9   :  { %v4493_v14 = vpop.permute.xlu1 %4492  ;;  %v6320_v52 = vld [vmem:[#allocation2 + $0x10] sm:$0xff]  ;;  %3942 = vst.msk [vmem:[#allocation2 + $0xec] sm:$0xf] %vm3882_vm8, %v3764_v22  ;;  %v4304_v22 = vrot.slane %v4302_v49, 4 }
 0x5ca   :  { %4672 = vst.msk [vmem:[#allocation2 + $0xe8] sm:$0xf] %vm4613_vm0, %v4493_v14  ;;  %6279 = vmatmul.msk.bf16.gmra.mxu0 %vm5554_vm2, %v6320_v52  ;;  %v10605_v52 = vor.u32 %v4306_v11, %v4305_v37  ;;  %v13008_v49 = vld [vmem:[#allocation50_spill] sm:$0xff]  ;;  %v4123_v62 = vsel %vm10122_vm12, %v4119_v55, %v4122_v15  ;;  %v13018_v55 = vld [vmem:[#allocation219_spill] sm:$0xff] }
 0x5cb   :  { %4673 = vst.msk [vmem:[#allocation2 + $0xec] sm:$0xf] %vm4613_vm0, %v4495_v32  ;;  %v4038_v32 = vsel %vm10122_vm12, %v4034_v61, %v10567_v53  ;;  %4959 = vrot.lane.b32.xlu0 %v4736_v36, %s6387_s29  ;;  %v4898_v61 = vsel %vm10141_vm15, %v4896_v28, %v4897_v47  ;;  %v4788_v36 = vrot.slane %v4786_v0, 4  ;;  %v4124_v47 = vrot.slane %v4122_v15, 4 }
 0x5cc   :  { %4402 = vrot.lane.b32.xlu2 %v4038_v32, %s6386_s28  ;;  %v13007_v32 = vld [vmem:[#allocation98_spill] sm:$0xff] }
 0x5cd   :  { %v4497_v25 = vpop.permute.xlu2 %4496  ;;  %v4789_v17 = vrot.slane %v13007_v32, 7  ;;  %v4128_v42 = vsel %vm10122_vm12, %v4124_v47, %v10627_v9 }
 0x5cf   :  { %v4790_v0 = vsel %vm10141_vm15, %v4788_v36, %v4789_v17 }
 0x5d0   :  { %v5052_v10 = vpop.permute.xlu0 %5051  ;;  %4508 = vrot.lane.b32.xlu1 %v4303_v59, %s6386_s28 }
 0x5d1   :  { %v5054_v50 = vpop.permute.xlu1 %5053  ;;  %5231 = vst.msk [vmem:[#allocation2 + $0xe8] sm:$0xf] %vm5172_vm1, %v5052_v10  ;;  %v13009_v10 = vld [vmem:[#allocation49_spill] sm:$0xff] }
 0x5d2   :  { %5232 = vst.msk [vmem:[#allocation2 + $0xec] sm:$0xf] %vm5172_vm1, %v5054_v50  ;;  %v4040_v50 = vrot.slane %v13008_v49, 6  ;;  %v4041_v59 = vrot.slane %v13009_v10, 7  ;;  %v13016_v49 = vld [vmem:[#allocation53_spill] sm:$0xff] }
 0x5d3   :  { %3779 = vrot.lane.b32.xlu0 %v13000_v58, %s6385_s27  ;;  %v13010_v58 = vld [vmem:[#allocation63_spill] sm:$0xff] }
 0x5d4   :  { %3777 = vrot.lane.b32.xlu2 %v13004_v3, %s6385_s27  ;;  %v4042_v11 = vor.u32 %v4041_v59, %v4040_v50  ;;  %v4045_v6 = vrot.slane %v13010_v58, 6  ;;  %v4791_v3 = vrot.slane %v4789_v17, 4  ;;  %v4743_v17 = vrot.slane %v4741_v20, 4 }
 0x5d5   :  { %v5058_v34 = vpop.permute.xlu2 %5057  ;;  %v4744_v50 = vrot.slane %v13016_v49, 7 }
 0x5d7   :  { %v4745_v58 = vsel %vm10141_vm15, %v4743_v17, %v4744_v50 }
 0x5d8   :  { %v4391_v56 = vpop.permute.xlu0 %4390  ;;  %5069 = vrot.lane.b32.xlu1 %v4901_v38, %s6387_s29 }
 0x5d9   :  { %v4948_v19 = vpop.permute.xlu1 %4947  ;;  %v6347_v14 = vld [vmem:[#allocation2 + $0xe8] sm:$0xff]  ;;  %4621 = vst.msk [vmem:[#allocation2 + $0x1c] sm:$0xf] %vm4613_vm0, %v4391_v56  ;;  %v4039_v56 = vrot.slane %v10567_v53, 4 }
 0x5da   :  { %5179 = vst.msk [vmem:[#allocation2 + $0x18] sm:$0xf] %vm5172_vm1, %v4948_v19  ;;  %6306 = vmatmul.msk.bf16.gmra.mxu3 %vm5554_vm2, %v6347_v14  ;;  %v13011_v19 = vld [vmem:[#allocation57_spill] sm:$0xff] }
 0x5db   :  { %5180 = vst.msk [vmem:[#allocation2 + $0x1c] sm:$0xf] %vm5172_vm1, %v4950_v1  ;;  %v4308_v1 = vsel %vm10122_vm12, %v4304_v22, %v10605_v52  ;;  %5067 = vrot.lane.b32.xlu0 %v4898_v61, %s6387_s29  ;;  %v4046_v28 = vrot.slane %v13011_v19, 7  ;;  %v13012_v22 = vld [vmem:[#allocation101_spill] sm:$0xff]  ;;  %v4043_v53 = vsel %vm10122_vm12, %v4039_v56, %v4042_v11 }
 0x5dc   :  { %4510 = vrot.lane.b32.xlu2 %v4308_v1, %s6386_s28  ;;  %v4792_v38 = vrot.slane %v13012_v22, 7  ;;  %v13015_v1 = vld [vmem:[#allocation211_spill] sm:$0xff] }
 0x5dd   :  { %v4952_v51 = vpop.permute.xlu2 %4951  ;;  %v10646_v43 = vor.u32 %v4046_v28, %v4045_v6  ;;  %v4311_v36 = vrot.slane %v13015_v1, 7  ;;  %v4309_v28 = vrot.slane %v10605_v52, 4  ;;  %v13021_v52 = vld [vmem:[#allocation208_spill] sm:$0xff]  ;;  %v4902_v1 = vrot.slane %v4900_v40, 4  ;;  %v13024_v40 = vld [vmem:[#allocation122_spill] sm:$0xff] }
 0x5de   :  { %v4793_v8 = vsel %vm10141_vm15, %v4791_v3, %v4792_v38  ;;  %v4903_v3 = vrot.slane %v13021_v52, 7  ;;  %v13031_v52 = vld [vmem:[#allocation142_spill] sm:$0xff] }
 0x5e0   :  { %v3766_v37 = vpop.permute.xlu0 %3765  ;;  %4995 = vrot.lane.b32.xlu1 %v4790_v0, %s6387_s29  ;;  %v4316_v0 = vrot.slane %v13018_v55, 7  ;;  %v4905_v30 = vrot.slane %v4903_v3, 4  ;;  %v4904_v33 = vsel %vm10141_vm15, %v4902_v1, %v4903_v3  ;;  %v4185_v3 = vrot.slane %v13031_v52, 6  ;;  %v13041_v52 = vld [vmem:[#allocation147_spill] sm:$0xff] }
 0x5e1   :  { %v3768_v35 = vpop.permute.xlu1 %3767  ;;  %3943 = vst.msk [vmem:[#allocation2 + $0xf0] sm:$0xf] %vm3882_vm8, %v3766_v37  ;;  %v13017_v37 = vld [vmem:[#allocation224_spill] sm:$0xff] }
 0x5e2   :  { %3944 = vst.msk [vmem:[#allocation2 + $0xf4] sm:$0xf] %vm3882_vm8, %v3768_v35  ;;  %v6321_v46 = vld [vmem:[#allocation2 + $0x18] sm:$0xff]  ;;  %v4740_v35 = vrot.slane %v4738_v54, 4 }
 0x5e3   :  { %4674 = vst.msk [vmem:[#allocation2 + $0xf0] sm:$0xf] %vm4613_vm0, %v4497_v25  ;;  %6280 = vmatmul.msk.bf16.gmra.mxu0 %vm5554_vm2, %v6321_v46  ;;  %4438 = vrot.lane.b32.xlu0 %v4128_v42, %s6386_s28  ;;  %v4044_v25 = vrot.slane %v4042_v11, 4  ;;  %v4315_v46 = vrot.slane %v13017_v37, 6  ;;  %v13019_v42 = vld [vmem:[#allocation104_spill] sm:$0xff]  ;;  %v13026_v37 = vld [vmem:[#allocation107_spill] sm:$0xff] }
 0x5e4   :  { %4436 = vrot.lane.b32.xlu2 %v4123_v62, %s6386_s28  ;;  %v4742_v57 = vsel %vm10141_vm15, %v4740_v35, %v4741_v20  ;;  %v4130_v62 = vrot.slane %v13019_v42, 6  ;;  %v13022_v20 = vld [vmem:[#allocation215_spill] sm:$0xff] }
 0x5e5   :  { %v4048_v61 = vsel %vm10122_vm12, %v4044_v25, %v10646_v43  ;;  %v3772_v15 = vpop.permute.xlu2 %3771  ;;  %v10688_v6 = vor.u32 %v4316_v0, %v4315_v46  ;;  %v13020_v25 = vld [vmem:[#allocation103_spill] sm:$0xff]  ;;  %v4798_v46 = vrot.slane %v13026_v37, 7  ;;  %v4794_v0 = vrot.slane %v4792_v38, 4 }
 0x5e6   :  { %3946 = vst.msk [vmem:[#allocation2 + $0xfc] sm:$0xf] %vm3882_vm8, %v3772_v15 }
 0x5e8   :  { %v4499_v14 = vpop.permute.xlu0 %4498  ;;  %4406 = vrot.lane.b32.xlu1 %v4048_v61, %s6386_s28  ;;  %v4129_v61 = vrot.slane %v10627_v9, 4 }
 0x5e9   :  { %v5056_v18 = vpop.permute.xlu1 %5055  ;;  %4675 = vst.msk [vmem:[#allocation2 + $0xf4] sm:$0xf] %vm4613_vm0, %v4499_v14 }
 0x5ea   :  { %5233 = vst.msk [vmem:[#allocation2 + $0xf0] sm:$0xf] %vm5172_vm1, %v5056_v18  ;;  %v4131_v18 = vrot.slane %v13020_v25, 7 }
 0x5eb   :  { %5234 = vst.msk [vmem:[#allocation2 + $0xf4] sm:$0xf] %vm5172_vm1, %v5058_v34  ;;  %4404 = vrot.lane.b32.xlu0 %v4043_v53, %s6386_s28  ;;  %v13014_v34 = vld [vmem:[#allocation212_spill] sm:$0xff] }
 0x5ec   :  { %v4310_v4 = vrot.slane %v13014_v34, 6  ;;  %4997 = vrot.lane.b32.xlu2 %v4793_v8, %s6387_s29  ;;  %v4132_v15 = vor.u32 %v4131_v18, %v4130_v62  ;;  %v4906_v8 = vrot.slane %v13022_v20, 7  ;;  %v13029_v62 = vld [vmem:[#allocation59_spill] sm:$0xff]  ;;  %v13030_v18 = vld [vmem:[#allocation58_spill] sm:$0xff] }
 0x5ed   :  { %v5060_v11 = vpop.permute.xlu2 %5059  ;;  %v4055_v25 = vrot.slane %v13029_v62, 6 }
 0x5ee   :  { %v4312_v47 = vor.u32 %v4311_v36, %v4310_v4  ;;  %v4133_v9 = vsel %vm10122_vm12, %v4129_v61, %v4132_v15  ;;  %v13023_v36 = vld [vmem:[#allocation100_spill] sm:$0xff]  ;;  %v13032_v61 = vld [vmem:[#allocation141_spill] sm:$0xff] }
 0x5f0   :  { %v4393_v10 = vpop.permute.xlu0 %4392  ;;  %3781 = vrot.lane.b32.xlu1 %v9938_v16, %s6385_s27  ;;  %v4314_v54 = vrot.slane %v4312_v47, 4  ;;  %v4313_v14 = vsel %vm10122_vm12, %v4309_v28, %v4312_v47  ;;  %v4134_v28 = vrot.slane %v4132_v15, 4  ;;  %v4186_v15 = vrot.slane %v13032_v61, 7 }
 0x5f1   :  { %v4395_v32 = vpop.permute.xlu1 %4394  ;;  %4622 = vst.msk [vmem:[#allocation2 + $0x20] sm:$0xf] %vm4613_vm0, %v4393_v10  ;;  %v4135_v10 = vrot.slane %v13024_v40, 6 }
 0x5f2   :  { %4623 = vst.msk [vmem:[#allocation2 + $0x24] sm:$0xf] %vm4613_vm0, %v4395_v32  ;;  %v6348_v59 = vld [vmem:[#allocation2 + $0xf0] sm:$0xff]  ;;  %v4318_v16 = vsel %vm10122_vm12, %v4314_v54, %v10688_v6  ;;  %v4795_v32 = vrot.slane %v13023_v36, 7  ;;  %v10761_v36 = vor.u32 %v4186_v15, %v4185_v3  ;;  %v4196_v3 = vrot.slane %v13041_v52, 7 }
 0x5f3   :  { %5181 = vst.msk [vmem:[#allocation2 + $0x20] sm:$0xf] %vm5172_vm1, %v4952_v51  ;;  %6307 = vmatmul.msk.bf16.gmra.mxu3 %vm5554_vm2, %v6348_v59  ;;  %4965 = vrot.lane.b32.xlu0 %v4745_v58, %s6387_s29  ;;  %v13025_v59 = vld [vmem:[#allocation111_spill] sm:$0xff] }
 0x5f4   :  { %4963 = vrot.lane.b32.xlu2 %v4742_v57, %s6387_s29  ;;  %v4136_v35 = vrot.slane %v13025_v59, 7  ;;  %v4797_v47 = vrot.slane %v4795_v32, 4  ;;  %v13028_v57 = vld [vmem:[#allocation60_spill] sm:$0xff]  ;;  %v13042_v15 = vld [vmem:[#allocation143_spill] sm:$0xff] }
 0x5f5   :  { %v4431_v56 = vpop.permute.xlu2 %4430  ;;  %v4051_v54 = vrot.slane %v13028_v57, 7  ;;  %v13035_v59 = vld [vmem:[#allocation56_spill] sm:$0xff]  ;;  %v13037_v57 = vld [vmem:[#allocation55_spill] sm:$0xff] }
 0x5f6   :  { %4641 = vst.msk [vmem:[#allocation2 + $0x6c] sm:$0xf] %vm4613_vm0, %v4431_v56  ;;  %v4799_v22 = vsel %vm10141_vm15, %v4797_v47, %v4798_v46  ;;  %v4056_v56 = vrot.slane %v13030_v18, 7  ;;  %v13036_v47 = vld [vmem:[#allocation239_spill] sm:$0xff] }
 0x5f8   :  { %v4954_v51 = vpop.permute.xlu0 %4953  ;;  %4514 = vrot.lane.b32.xlu1 %v4318_v16, %s6386_s28  ;;  %v4796_v16 = vsel %vm10141_vm15, %v4794_v0, %v4795_v32  ;;  %v13033_v32 = vld [vmem:[#allocation138_spill] sm:$0xff] }
 0x5f9   :  { %v3770_v19 = vpop.permute.xlu1 %3769  ;;  %5182 = vst.msk [vmem:[#allocation2 + $0x24] sm:$0xf] %vm5172_vm1, %v4954_v51  ;;  %v10737_v51 = vor.u32 %v4136_v35, %v4135_v10  ;;  %v4747_v35 = vrot.slane %v13035_v59, 7 }
 0x5fa   :  { %3945 = vst.msk [vmem:[#allocation2 + $0xf8] sm:$0xf] %vm3882_vm8, %v3770_v19 }
 0x5fb   :  { %4512 = vrot.lane.b32.xlu0 %v4313_v14, %s6386_s28  ;;  %v4138_v14 = vsel %vm10122_vm12, %v4134_v28, %v10737_v51 }
 0x5fc   :  { %3783 = vrot.lane.b32.xlu2 %v9930_v63, %s6385_s27  ;;  %v4907_v63 = vsel %vm10141_vm15, %v4905_v30, %v4906_v8 }
 0x5fd   :  { %v4397_v17 = vpop.permute.xlu2 %4396 }
 0x5fe   :  { %4624 = vst.msk [vmem:[#allocation2 + $0x28] sm:$0xf] %vm4613_vm0, %v4397_v17  ;;  %v4190_v17 = vrot.slane %v13033_v32, 6 }
 0x600   :  { %v4501_v34 = vpop.permute.xlu0 %4500  ;;  %v6322_v4 = vld [vmem:[#allocation2 + $0x20] sm:$0xff]  ;;  %4440 = vrot.lane.b32.xlu1 %v4133_v9, %s6386_s28  ;;  %v4049_v9 = vrot.slane %v10646_v43, 4 }
 0x601   :  { %v4503_v53 = vpop.permute.xlu1 %4502  ;;  %4676 = vst.msk [vmem:[#allocation2 + $0xf8] sm:$0xf] %vm4613_vm0, %v4501_v34  ;;  %6281 = vmatmul.msk.bf16.gmra.mxu0 %vm5554_vm2, %v6322_v4  ;;  %v10754_v34 = vor.u32 %v4056_v56, %v4055_v25  ;;  %v13039_v56 = vld [vmem:[#allocation136_spill] sm:$0xff] }
 0x602   :  { %4677 = vst.msk [vmem:[#allocation2 + $0xfc] sm:$0xf] %vm4613_vm0, %v4503_v53 }
 0x603   :  { %5235 = vst.msk [vmem:[#allocation2 + $0xf8] sm:$0xf] %vm5172_vm1, %v5060_v11  ;;  %5073 = vrot.lane.b32.xlu0 %v4907_v63, %s6387_s29  ;;  %v13027_v11 = vld [vmem:[#allocation61_spill] sm:$0xff] }
 0x604   :  { %v4050_v58 = vrot.slane %v13027_v11, 6  ;;  %5071 = vrot.lane.b32.xlu2 %v4904_v33, %s6387_s29  ;;  %v13034_v63 = vld [vmem:[#allocation137_spill] sm:$0xff] }
 0x605   :  { %v4958_v38 = vpop.permute.xlu2 %4957  ;;  %v4191_v33 = vrot.slane %v13034_v63, 7 }
 0x606   :  { %v4052_v42 = vor.u32 %v4051_v54, %v4050_v58  ;;  %v4749_v58 = vrot.slane %v4747_v35, 4  ;;  %v4750_v54 = vrot.slane %v13037_v57, 7 }
 0x607   :  { %v4192_v0 = vor.u32 %v4191_v33, %v4190_v17 }
 0x608   :  { %v5062_v19 = vpop.permute.xlu0 %5061  ;;  %5001 = vrot.lane.b32.xlu1 %v4799_v22, %s6387_s29  ;;  %v4054_v30 = vrot.slane %v4052_v42, 4  ;;  %v4053_v43 = vsel %vm10122_vm12, %v4049_v9, %v4052_v42  ;;  %v4746_v22 = vrot.slane %v4744_v50, 4  ;;  %v13038_v42 = vld [vmem:[#allocation134_spill] sm:$0xff]  ;;  %v4751_v18 = vsel %vm10141_vm15, %v4749_v58, %v4750_v54 }
 0x609   :  { %v4429_v55 = vpop.permute.xlu1 %4428  ;;  %5236 = vst.msk [vmem:[#allocation2 + $0xfc] sm:$0xf] %vm5172_vm1, %v5062_v19  ;;  %v4831_v62 = vrot.slane %v13038_v42, 7  ;;  %v13040_v50 = vld [vmem:[#allocation154_spill] sm:$0xff]  ;;  %v4194_v17 = vrot.slane %v4192_v0, 4 }
 0x60a   :  { %4640 = vst.msk [vmem:[#allocation2 + $0x68] sm:$0xf] %vm4613_vm0, %v4429_v55  ;;  %v4058_v10 = vsel %vm10122_vm12, %v4054_v30, %v10754_v34  ;;  %v4189_v55 = vrot.slane %v10761_v36, 4  ;;  %v4748_v49 = vsel %vm10141_vm15, %v4746_v22, %v4747_v35  ;;  %v13044_v35 = vld [vmem:[#allocation222_spill] sm:$0xff] }
 0x60b   :  { %4999 = vrot.lane.b32.xlu0 %v4796_v16, %s6387_s29  ;;  %v4833_v61 = vrot.slane %v4831_v62, 4 }
 0x60c   :  { %4442 = vrot.lane.b32.xlu2 %v4138_v14, %s6386_s28  ;;  %v4193_v16 = vsel %vm10122_vm12, %v4189_v55, %v4192_v0  ;;  %v12269_v14 = vrot.slane %v13039_v56, 7  ;;  %v4319_v0 = vrot.slane %v10688_v6, 4  ;;  %v13046_v6 = vld [vmem:[#allocation221_spill] sm:$0xff] }
 0x60d   :  { %v4505_v40 = vpop.permute.xlu2 %4504 }
 0x610   :  { %v4988_v4 = vpop.permute.xlu0 %4987  ;;  %v6349_v1 = vld [vmem:[#allocation2 + $0xf8] sm:$0xff]  ;;  %3735 = vrot.lane.b32.xlu1 %v13036_v47, %s6385_s27  ;;  %v4321_v47 = vrot.slane %v13044_v35, 7 }
 0x611   :  { %v4990_v53 = vpop.permute.xlu1 %4989  ;;  %5199 = vst.msk [vmem:[#allocation2 + $0x68] sm:$0xf] %vm5172_vm1, %v4988_v4  ;;  %6308 = vmatmul.msk.bf16.gmra.mxu3 %vm5554_vm2, %v6349_v1  ;;  %v4830_v1 = vrot.slane %v12269_v14, 4 }
 0x612   :  { %5200 = vst.msk [vmem:[#allocation2 + $0x6c] sm:$0xf] %vm5172_vm1, %v4990_v53  ;;  %v4834_v53 = vrot.slane %v13042_v15, 7 }
 0x613   :  { %4410 = vrot.lane.b32.xlu0 %v4058_v10, %s6386_s28  ;;  %v13043_v10 = vld [vmem:[#allocation223_spill] sm:$0xff]  ;;  %v4832_v55 = vsel %vm10141_vm15, %v4830_v1, %v4831_v62 }
 0x614   :  { %4408 = vrot.lane.b32.xlu2 %v4053_v43, %s6386_s28  ;;  %v4835_v33 = vsel %vm10141_vm15, %v4833_v61, %v4834_v53  ;;  %v4320_v59 = vrot.slane %v13043_v10, 6  ;;  %v4908_v61 = vrot.slane %v4906_v8, 4 }
 0x615   :  { %v5066_v25 = vpop.permute.xlu2 %5065 }
 0x618   :  { %v4399_v19 = vpop.permute.xlu0 %4398  ;;  %4464 = vrot.lane.b32.xlu1 %v4193_v16, %s6386_s28  ;;  %v13045_v16 = vld [vmem:[#allocation218_spill] sm:$0xff] }
 0x619   :  { %v4956_v11 = vpop.permute.xlu1 %4955  ;;  %v6331_v28 = vld [vmem:[#allocation2 + $0x68] sm:$0xff]  ;;  %4625 = vst.msk [vmem:[#allocation2 + $0x2c] sm:$0xf] %vm4613_vm0, %v4399_v19  ;;  %v4909_v42 = vrot.slane %v13045_v16, 7 }
 0x61a   :  { %5183 = vst.msk [vmem:[#allocation2 + $0x28] sm:$0xf] %vm5172_vm1, %v4956_v11  ;;  %6290 = vmatmul.msk.bf16.vlgmr.msra.gmra.mxu1 %vm5554_vm2, %v6331_v28  ;;  %v4322_v11 = vor.u32 %v4321_v47, %v4320_v59 }
 0x61b   :  { %5184 = vst.msk [vmem:[#allocation2 + $0x2c] sm:$0xf] %vm5172_vm1, %v4958_v38  ;;  %v4195_v38 = vrot.slane %v13040_v50, 6  ;;  %4969 = vrot.lane.b32.xlu0 %v4751_v18, %s6387_s29  ;;  %v4325_v18 = vrot.slane %v13046_v6, 6  ;;  %v4910_v35 = vsel %vm10141_vm15, %v4908_v61, %v4909_v42 }
 0x61c   :  { %4967 = vrot.lane.b32.xlu2 %v4748_v49, %s6387_s29  ;;  %v4323_v22 = vsel %vm10122_vm12, %v4319_v0, %v4322_v11  ;;  %v13047_v49 = vld [vmem:[#allocation220_spill] sm:$0xff]  ;;  %v4324_v10 = vrot.slane %v4322_v11, 4 }
 0x61d   :  { %v10805_v63 = vor.u32 %v4196_v3, %v4195_v38  ;;  %v4992_v43 = vpop.permute.xlu2 %4991  ;;  %v4326_v50 = vrot.slane %v13047_v49, 7  ;;  %v4911_v38 = vrot.slane %v4909_v42, 4  ;;  %v13052_v0 = vld [vmem:[#allocation112_spill] sm:$0xff] }
 0x61e   :  { %v10798_v4 = vpop.f32.mrf.mxu0  ;;  %v4146_v11 = vrot.slane %v13052_v0, 7 }
 0x61f   :  { %v10847_v59 = vor.u32 %v4326_v50, %v4325_v18  ;;  %v13055_v18 = vld [vmem:[#allocation66_spill] sm:$0xff] }
 0x620   :  { %v3774_v9 = vpop.permute.xlu0 %3773  ;;  %5025 = vrot.lane.b32.xlu1 %v4835_v33, %s6387_s29  ;;  %v13050_v33 = vld [vmem:[#allocation255_spill] sm:$0xff]  ;;  %v4061_v49 = vrot.slane %v13055_v18, 7  ;;  %v4752_v18 = vrot.slane %v4750_v54, 4 }
 0x621   :  { %v3776_v30 = vpop.permute.xlu1 %3775  ;;  %3947 = vst.msk [vmem:[#allocation2 + $0x100] sm:$0xf] %vm3882_vm8, %v3774_v9  ;;  %v13049_v9 = vld [vmem:[#allocation114_spill] sm:$0xff]  ;;  %v4328_v16 = vsel %vm10122_vm12, %v4324_v10, %v10847_v59 }
 0x622   :  { %3948 = vst.msk [vmem:[#allocation2 + $0x104] sm:$0xf] %vm3882_vm8, %v3776_v30  ;;  %v6323_v32 = vld [vmem:[#allocation2 + $0x28] sm:$0xff]  ;;  %v13048_v30 = vld [vmem:[#allocation115_spill] sm:$0xff] }
 0x623   :  { %4678 = vst.msk [vmem:[#allocation2 + $0x100] sm:$0xf] %vm4613_vm0, %v4505_v40  ;;  %6282 = vmatmul.msk.bf16.gmra.mxu0 %vm5554_vm2, %v6323_v32  ;;  %v4198_v40 = vsel %vm10122_vm12, %v4194_v17, %v10805_v63  ;;  %5023 = vrot.lane.b32.xlu0 %v4832_v55, %s6387_s29  ;;  %v4140_v1 = vrot.slane %v13048_v30, 6  ;;  %v4141_v32 = vrot.slane %v13049_v9, 7  ;;  %v13051_v55 = vld [vmem:[#allocation113_spill] sm:$0xff]  ;;  %v13056_v30 = vld [vmem:[#allocation70_spill] sm:$0xff] }
 0x624   :  { %4466 = vrot.lane.b32.xlu2 %v4198_v40, %s6386_s28  ;;  %v4145_v40 = vrot.slane %v13051_v55, 6  ;;  %v4139_v9 = vrot.slane %v10737_v51, 4 }
 0x625   :  { %v4142_v47 = vor.u32 %v4141_v32, %v4140_v1  ;;  %v4065_v1 = vrot.slane %v13056_v30, 6 }
 0x626   :  { %v10823_v19 = vpop.f32.mrf.mxu0  ;;  %v4403_v62 = vpop.permute.xlu2 %4402  ;;  %v10876_v61 = vor.u32 %v4146_v11, %v4145_v40  ;;  %v4059_v11 = vrot.slane %v10754_v34, 4 }
 0x627   :  { %4627 = vst.msk [vmem:[#allocation2 + $0x34] sm:$0xf] %vm4613_vm0, %v4403_v62  ;;  %v13054_v62 = vld [vmem:[#allocation72_spill] sm:$0xff]  ;;  %v4143_v55 = vsel %vm10122_vm12, %v4139_v9, %v4142_v47 }
 0x628   :  { %v4507_v28 = vpop.permute.xlu0 %4506  ;;  %4516 = vrot.lane.b32.xlu1 %v4323_v22, %s6386_s28  ;;  %v4060_v6 = vrot.slane %v13054_v62, 6 }
 0x629   :  { %v5064_v58 = vpop.permute.xlu1 %5063  ;;  %4679 = vst.msk [vmem:[#allocation2 + $0x104] sm:$0xf] %vm4613_vm0, %v4507_v28  ;;  %v13053_v28 = vld [vmem:[#allocation110_spill] sm:$0xff] }
 0x62a   :  { %5237 = vst.msk [vmem:[#allocation2 + $0x100] sm:$0xf] %vm5172_vm1, %v5064_v58  ;;  %v4800_v58 = vrot.slane %v4798_v46, 4  ;;  %v4801_v22 = vrot.slane %v13053_v28, 7 }
 0x62b   :  { %5238 = vst.msk [vmem:[#allocation2 + $0x104] sm:$0xf] %vm5172_vm1, %v5066_v25  ;;  %3787 = vrot.lane.b32.xlu0 %v9962_v44, %s6385_s27  ;;  %v4912_v25 = vrot.slane %v12885_v45, 7 }
 0x62c   :  { %3785 = vrot.lane.b32.xlu2 %v13050_v33, %s6385_s27  ;;  %v4062_v33 = vor.u32 %v4061_v49, %v4060_v6  ;;  %v13059_v49 = vld [vmem:[#allocation62_spill] sm:$0xff] }
 0x62d   :  { %v4913_v20 = vsel %vm10141_vm15, %v4911_v38, %v4912_v25 }
 0x62e   :  { %v5693_v3 = vpop.f32.mrf.mxu0  ;;  %v3778_v8 = vpop.permute.xlu2 %3777  ;;  %v4064_v51 = vrot.slane %v4062_v33, 4  ;;  %v4063_v34 = vsel %vm10122_vm12, %v4059_v11, %v4062_v33  ;;  %v13063_v33 = vld [vmem:[#allocation148_spill] sm:$0xff] }
 0x62f   :  { %3949 = vst.msk [vmem:[#allocation2 + $0x108] sm:$0xf] %vm3882_vm8, %v3778_v8 }
 0x630   :  { %v4433_v17 = vpop.permute.xlu0 %4432  ;;  %5077 = vrot.lane.b32.xlu1 %v4913_v20, %s6387_s29 }
 0x631   :  { %v4435_v52 = vpop.permute.xlu1 %4434  ;;  %4642 = vst.msk [vmem:[#allocation2 + $0x70] sm:$0xf] %vm4613_vm0, %v4433_v17 }
 0x632   :  { %4643 = vst.msk [vmem:[#allocation2 + $0x74] sm:$0xf] %vm4613_vm0, %v4435_v52  ;;  %v6350_v44 = vld [vmem:[#allocation2 + $0x100] sm:$0xff]  ;;  %v4144_v52 = vrot.slane %v4142_v47, 4 }
 0x633   :  { %5201 = vst.msk [vmem:[#allocation2 + $0x70] sm:$0xf] %vm5172_vm1, %v4992_v43  ;;  %6309 = vmatmul.msk.bf16.gmra.mxu3 %vm5554_vm2, %v6350_v44  ;;  %v10863_v43 = vld [vmem:[%s11735_s2] ss:$0 sm:$0xff]  ;;  %5075 = vrot.lane.b32.xlu0 %v4910_v35, %s6387_s29  ;;  %v13057_v44 = vld [vmem:[#allocation69_spill] sm:$0xff] }
 0x634   :  { %v5694_v42 = vadd.f32 %v10863_v43, %v5693_v3  ;;  %4518 = vrot.lane.b32.xlu2 %v4328_v16, %s6386_s28  ;;  %v4802_v3 = vsel %vm10141_vm15, %v4800_v58, %v4801_v22  ;;  %v4066_v10 = vrot.slane %v13057_v44, 7  ;;  %v4148_v8 = vsel %vm10122_vm12, %v4144_v52, %v10876_v61 }
 0x635   :  { %v4803_v16 = vrot.slane %v4801_v22, 4  ;;  %v4206_v44 = vrot.slane %v13063_v33, 7 }
 0x636   :  { %v5695_v38 = vpop.f32.mrf.mxu0  ;;  %v5889_v32 = vmax.f32 %v5694_v42, 0.0  ;;  %v4511_v20 = vpop.permute.xlu2 %4510  ;;  %v10896_v40 = vor.u32 %v4066_v10, %v4065_v1  ;;  %v13058_v42 = vld [vmem:[#allocation109_spill] sm:$0xff] }
 0x637   :  { %v5696_v46 = vadd.f32 %v10863_v43, %v5695_v38  ;;  %v4804_v62 = vrot.slane %v13058_v42, 7  ;;  %v13060_v38 = vld [vmem:[#allocation151_spill] sm:$0xff] }
 0x638   :  { %v4994_v37 = vpop.permute.xlu0 %4993  ;;  %5003 = vrot.lane.b32.xlu1 %v4802_v3, %s6387_s29  ;;  %v4068_v47 = vsel %vm10122_vm12, %v4064_v51, %v10896_v40  ;;  %v4200_v52 = vrot.slane %v13060_v38, 6 }
 0x639   :  { %v4401_v50 = vpop.permute.xlu1 %4400  ;;  %5202 = vst.msk [vmem:[#allocation2 + $0x74] sm:$0xf] %vm5172_vm1, %v4994_v37  ;;  %v5890_v17 = vmax.f32 %v5696_v46, 0.0  ;;  %v4805_v22 = vsel %vm10141_vm15, %v4803_v16, %v4804_v62  ;;  %v13061_v37 = vld [vmem:[#allocation150_spill] sm:$0xff] }
 0x63a   :  { %4626 = vst.msk [vmem:[#allocation2 + $0x30] sm:$0xf] %vm4613_vm0, %v4401_v50  ;;  %v4753_v50 = vrot.slane %v13059_v49, 7  ;;  %v4201_v46 = vrot.slane %v13061_v37, 7  ;;  %v13067_v37 = vld [vmem:[#allocation145_spill] sm:$0xff] }
 0x63b   :  { %v10890_v35 = vpack.c.bf16 %v5890_v17, %v5889_v32  ;;  %4446 = vrot.lane.b32.xlu0 %v4148_v8, %s6386_s28  ;;  %v13062_v32 = vld [vmem:[#allocation149_spill] sm:$0xff] }
 0x63c   :  { %4444 = vrot.lane.b32.xlu2 %v4143_v55, %s6386_s28  ;;  %v4754_v57 = vsel %vm10141_vm15, %v4752_v18, %v4753_v50  ;;  %v4202_v54 = vor.u32 %v4201_v46, %v4200_v52  ;;  %v4205_v17 = vrot.slane %v13062_v32, 6  ;;  %v13064_v55 = vld [vmem:[#allocation243_spill] sm:$0xff]  ;;  %v4837_v46 = vrot.slane %v13067_v37, 7 }
 0x63d   :  { %v13073_v37 = vld [vmem:[#allocation131_spill] sm:$0xff] }
 0x63e   :  { %v4437_v6 = vpop.permute.xlu2 %4436  ;;  %v4204_v51 = vrot.slane %v4202_v54, 4 }
 0x63f   :  { %4644 = vst.msk [vmem:[#allocation2 + $0x78] sm:$0xf] %vm4613_vm0, %v4437_v6  ;;  %v4755_v6 = vrot.slane %v4753_v50, 4 }
 0x640   :  { %v4960_v58 = vpop.permute.xlu0 %4959  ;;  %v6332_v28 = vld [vmem:[#allocation2 + $0x70] sm:$0xff]  ;;  %4414 = vrot.lane.b32.xlu1 %v4068_v47, %s6386_s28 }
 0x641   :  { %v4962_v0 = vpop.permute.xlu1 %4961  ;;  %5185 = vst.msk [vmem:[#allocation2 + $0x30] sm:$0xf] %vm5172_vm1, %v4960_v58  ;;  %6291 = vmatmul.msk.bf16.gmra.mxu1 %vm5554_vm2, %v6332_v28  ;;  %v4199_v58 = vrot.slane %v10805_v63, 4  ;;  %v13065_v47 = vld [vmem:[#allocation238_spill] sm:$0xff] }
 0x642   :  { %5186 = vst.msk [vmem:[#allocation2 + $0x34] sm:$0xf] %vm5172_vm1, %v4962_v0 }
 0x643   :  { %4412 = vrot.lane.b32.xlu0 %v4063_v34, %s6386_s28  ;;  %v13066_v34 = vld [vmem:[#allocation65_spill] sm:$0xff]  ;;  %v4203_v52 = vsel %vm10122_vm12, %v4199_v58, %v4202_v54  ;;  %v13070_v54 = vld [vmem:[#allocation144_spill] sm:$0xff] }
 0x644   :  { %5005 = vrot.lane.b32.xlu2 %v4805_v22, %s6387_s29  ;;  %v4756_v22 = vrot.slane %v13066_v34, 7  ;;  %v4840_v33 = vrot.slane %v13070_v54, 7  ;;  %v13072_v58 = vld [vmem:[#allocation229_spill] sm:$0xff] }
 0x646   :  { %v4998_v10 = vpop.permute.xlu2 %4997  ;;  %v4757_v50 = vsel %vm10141_vm15, %v4755_v6, %v4756_v22 }
 0x647   :  { %v5698_v30 = vpop.f32.mrf.mxu0 }
 0x648   :  { %v3780_v1 = vpop.permute.xlu0 %3779  ;;  %4971 = vrot.lane.b32.xlu1 %v4754_v57, %s6387_s29  ;;  %v5699_v8 = vadd.f32 %v10863_v43, %v5698_v30  ;;  %v13068_v30 = vld [vmem:[#allocation228_spill] sm:$0xff] }
 0x649   :  { %v4509_v3 = vpop.permute.xlu1 %4508  ;;  %v6324_v9 = vld [vmem:[#allocation2 + $0x30] sm:$0xff]  ;;  %3950 = vst.msk [vmem:[#allocation2 + $0x10c] sm:$0xf] %vm3882_vm8, %v3780_v1  ;;  %v4330_v1 = vrot.slane %v13068_v30, 6 }
 0x64a   :  { %4680 = vst.msk [vmem:[#allocation2 + $0x108] sm:$0xf] %vm4613_vm0, %v4509_v3  ;;  %6283 = vmatmul.msk.bf16.gmra.mxu0 %vm5554_vm2, %v6324_v9  ;;  %v5891_v18 = vmax.f32 %v5699_v8, 0.0  ;;  %v13069_v9 = vld [vmem:[#allocation226_spill] sm:$0xff] }
 0x64b   :  { %4681 = vst.msk [vmem:[#allocation2 + $0x10c] sm:$0xf] %vm4613_vm0, %v4511_v20  ;;  %3739 = vrot.lane.b32.xlu0 %v13064_v55, %s6385_s27  ;;  %v10934_v20 = vor.u32 %v4206_v44, %v4205_v17  ;;  %v4331_v57 = vrot.slane %v13069_v9, 7  ;;  %v4839_v17 = vrot.slane %v4837_v46, 4  ;;  %v4836_v55 = vrot.slane %v4834_v53, 4  ;;  %v13075_v9 = vld [vmem:[#allocation225_spill] sm:$0xff] }
 0x64c   :  { %3737 = vrot.lane.b32.xlu2 %v13065_v47, %s6385_s27 }
 0x64d   :  { %v4208_v38 = vsel %vm10122_vm12, %v4204_v51, %v10934_v20  ;;  %v4332_v51 = vor.u32 %v4331_v57, %v4330_v1  ;;  %v4841_v47 = vsel %vm10141_vm15, %v4839_v17, %v4840_v33  ;;  %v4838_v15 = vsel %vm10141_vm15, %v4836_v55, %v4837_v46 }
 0x64e   :  { %v4964_v63 = vpop.permute.xlu2 %4963  ;;  %v4150_v46 = vrot.slane %v13073_v37, 6  ;;  %v4915_v57 = vrot.slane %v13075_v9, 7  ;;  %v13080_v37 = vld [vmem:[#allocation118_spill] sm:$0xff]  ;;  %v13081_v9 = vld [vmem:[#allocation68_spill] sm:$0xff] }
 0x64f   :  { %v5700_v11 = vpop.f32.mrf.mxu0  ;;  %v4334_v53 = vrot.slane %v4332_v51, 4 }
 0x650   :  { %v5068_v28 = vpop.permute.xlu0 %5067  ;;  %v5701_v16 = vadd.f32 %v10863_v43, %v5700_v11  ;;  %4470 = vrot.lane.b32.xlu1 %v4208_v38, %s6386_s28 }
 0x651   :  { %v5070_v0 = vpop.permute.xlu1 %5069  ;;  %5239 = vst.msk [vmem:[#allocation2 + $0x108] sm:$0xf] %vm5172_vm1, %v5068_v28  ;;  %v4336_v28 = vrot.slane %v13072_v58, 7 }
 0x652   :  { %5240 = vst.msk [vmem:[#allocation2 + $0x10c] sm:$0xf] %vm5172_vm1, %v5070_v0  ;;  %v5892_v49 = vmax.f32 %v5701_v16, 0.0  ;;  %v13071_v0 = vld [vmem:[#allocation230_spill] sm:$0xff] }
 0x653   :  { %4468 = vrot.lane.b32.xlu0 %v4203_v52, %s6386_s28  ;;  %v4335_v11 = vrot.slane %v13071_v0, 6 }
 0x654   :  { %v10949_v3 = vpack.c.bf16 %v5892_v49, %v5891_v18  ;;  %4973 = vrot.lane.b32.xlu2 %v4757_v50, %s6387_s29  ;;  %v4329_v18 = vrot.slane %v10847_v59, 4  ;;  %v13074_v50 = vld [vmem:[#allocation121_spill] sm:$0xff] }
 0x655   :  { %v4151_v30 = vrot.slane %v13074_v50, 7 }
 0x656   :  { %v3784_v16 = vpop.permute.xlu2 %3783  ;;  %v4333_v1 = vsel %vm10122_vm12, %v4329_v18, %v4332_v51 }
 0x657   :  { %3952 = vst.msk [vmem:[#allocation2 + $0x114] sm:$0xf] %vm3882_vm8, %v3784_v16  ;;  %v13077_v16 = vld [vmem:[#allocation117_spill] sm:$0xff] }
 0x658   :  { %v4439_v44 = vpop.permute.xlu0 %4438  ;;  %3789 = vrot.lane.b32.xlu1 %v9954_v27, %s6385_s27 }
 0x659   :  { %v4996_v32 = vpop.permute.xlu1 %4995  ;;  %v6351_v8 = vld [vmem:[#allocation2 + $0x108] sm:$0xff]  ;;  %4645 = vst.msk [vmem:[#allocation2 + $0x7c] sm:$0xf] %vm4613_vm0, %v4439_v44  ;;  %v4917_v44 = vrot.slane %v4915_v57, 4 }
 0x65a   :  { %5203 = vst.msk [vmem:[#allocation2 + $0x78] sm:$0xf] %vm5172_vm1, %v4996_v32  ;;  %6310 = vmatmul.msk.bf16.gmra.mxu3 %vm5554_vm2, %v6351_v8  ;;  %v4152_v32 = vor.u32 %v4151_v30, %v4150_v46  ;;  %v13076_v8 = vld [vmem:[#allocation227_spill] sm:$0xff]  ;;  %v4810_v46 = vrot.slane %v13080_v37, 7  ;;  %v13110_v37 = vld [vmem:[#allocation76_spill] sm:$0xff] }
 0x65b   :  { %5204 = vst.msk [vmem:[#allocation2 + $0x7c] sm:$0xf] %vm5172_vm1, %v4998_v10  ;;  %5029 = vrot.lane.b32.xlu0 %v4841_v47, %s6387_s29  ;;  %v10979_v10 = vor.u32 %v4336_v28, %v4335_v11  ;;  %v4918_v55 = vrot.slane %v13076_v8, 7  ;;  %v4807_v47 = vrot.slane %v13077_v16, 7 }
 0x65c   :  { %5027 = vrot.lane.b32.xlu2 %v4838_v15, %s6387_s29 }
 0x65d   :  { %v4338_v52 = vsel %vm10122_vm12, %v4334_v53, %v10979_v10 }
 0x65e   :  { %v5072_v59 = vpop.permute.xlu2 %5071 }
 0x660   :  { %v4405_v49 = vpop.permute.xlu0 %4404  ;;  %v5703_v38 = vpop.f32.mrf.mxu0  ;;  %4522 = vrot.lane.b32.xlu1 %v4338_v52, %s6386_s28  ;;  %v4809_v52 = vrot.slane %v4807_v47, 4 }
 0x661   :  { %v4407_v6 = vpop.permute.xlu1 %4406  ;;  %4628 = vst.msk [vmem:[#allocation2 + $0x38] sm:$0xf] %vm4613_vm0, %v4405_v49  ;;  %v5704_v0 = vadd.f32 %v10863_v43, %v5703_v38  ;;  %v13079_v49 = vld [vmem:[#allocation123_spill] sm:$0xff] }
 0x662   :  { %4629 = vst.msk [vmem:[#allocation2 + $0x3c] sm:$0xf] %vm4613_vm0, %v4407_v6  ;;  %v6333_v27 = vld [vmem:[#allocation2 + $0x78] sm:$0xff]  ;;  %v4919_v6 = vsel %vm10141_vm15, %v4917_v44, %v4918_v55  ;;  %v4156_v38 = vrot.slane %v13079_v49, 7  ;;  %v4811_v42 = vsel %vm10141_vm15, %v4809_v52, %v4810_v46 }
 0x663   :  { %5187 = vst.msk [vmem:[#allocation2 + $0x38] sm:$0xf] %vm5172_vm1, %v4964_v63  ;;  %6292 = vmatmul.msk.bf16.gmra.mxu1 %vm5554_vm2, %v6333_v27  ;;  %4520 = vrot.lane.b32.xlu0 %v4333_v1, %s6386_s28  ;;  %v4149_v63 = vrot.slane %v10876_v61, 4  ;;  %v4914_v61 = vrot.slane %v4912_v25, 4  ;;  %v13078_v25 = vld [vmem:[#allocation124_spill] sm:$0xff]  ;;  %v11020_v27 = vpop.f32.mrf.mxu3  ;;  %v4806_v1 = vrot.slane %v4804_v62, 4 }
 0x664   :  { %3791 = vrot.lane.b32.xlu2 %v9949_v2, %s6385_s27  ;;  %v5893_v2 = vmax.f32 %v5704_v0, 0.0  ;;  %v4155_v18 = vrot.slane %v13078_v25, 6  ;;  %v4069_v25 = vrot.slane %v10896_v40, 4 }
 0x665   :  { %v4153_v28 = vsel %vm10122_vm12, %v4149_v63, %v4152_v32  ;;  %v4916_v45 = vsel %vm10141_vm15, %v4914_v61, %v4915_v57  ;;  %v4070_v63 = vrot.slane %v13081_v9, 6  ;;  %v13082_v57 = vld [vmem:[#allocation67_spill] sm:$0xff] }
 0x666   :  { %v4443_v15 = vpop.permute.xlu2 %4442 }
 0x667   :  { %4647 = vst.msk [vmem:[#allocation2 + $0x84] sm:$0xf] %vm4613_vm0, %v4443_v15  ;;  %v13084_v15 = vld [vmem:[#allocation75_spill] sm:$0xff] }
 0x668   :  { %v4966_v11 = vpop.permute.xlu0 %4965  ;;  %v5705_v58 = vpop.f32.mrf.mxu0  ;;  %4448 = vrot.lane.b32.xlu1 %v4153_v28, %s6386_s28  ;;  %v13083_v28 = vld [vmem:[#allocation81_spill] sm:$0xff] }
 0x669   :  { %v3782_v17 = vpop.permute.xlu1 %3781  ;;  %5188 = vst.msk [vmem:[#allocation2 + $0x3c] sm:$0xf] %vm5172_vm1, %v4966_v11  ;;  %v5706_v51 = vadd.f32 %v10863_v43, %v5705_v58  ;;  %v4154_v11 = vrot.slane %v4152_v32, 4  ;;  %v11033_v58 = vor.u32 %v4156_v38, %v4155_v18  ;;  %v4075_v16 = vrot.slane %v13083_v28, 6  ;;  %v13085_v18 = vld [vmem:[#allocation64_spill] sm:$0xff] }
 0x66a   :  { %3951 = vst.msk [vmem:[#allocation2 + $0x110] sm:$0xf] %vm3882_vm8, %v3782_v17  ;;  %v4071_v17 = vrot.slane %v13082_v57, 7  ;;  %v4076_v32 = vrot.slane %v13084_v15, 7  ;;  %v4759_v49 = vrot.slane %v13085_v18, 7  ;;  %v13090_v15 = vld [vmem:[#allocation160_spill] sm:$0xff] }
 0x66b   :  { %v5894_v53 = vmax.f32 %v5706_v51, 0.0  ;;  %5081 = vrot.lane.b32.xlu0 %v4919_v6, %s6387_s29  ;;  %v4808_v51 = vsel %vm10141_vm15, %v4806_v1, %v4807_v47  ;;  %v11053_v47 = vpop.f32.mrf.mxu3 }
 0x66c   :  { %5079 = vrot.lane.b32.xlu2 %v4916_v45, %s6387_s29  ;;  %v4072_v61 = vor.u32 %v4071_v17, %v4070_v63  ;;  %v4761_v9 = vrot.slane %v4759_v49, 4  ;;  %v13087_v63 = vld [vmem:[#allocation71_spill] sm:$0xff]  ;;  %v4758_v17 = vrot.slane %v4756_v22, 4 }
 0x66d   :  { %v11024_v50 = vpack.c.bf16 %v5894_v53, %v5893_v2  ;;  %v11051_v2 = vor.u32 %v4076_v32, %v4075_v16  ;;  %v4762_v40 = vrot.slane %v13087_v63, 7  ;;  %v4215_v32 = vrot.slane %v13090_v15, 6 }
 0x66e   :  { %v4409_v62 = vpop.permute.xlu2 %4408  ;;  %v4074_v6 = vrot.slane %v4072_v61, 4  ;;  %v4073_v1 = vsel %vm10122_vm12, %v4069_v25, %v4072_v61  ;;  %v4760_v61 = vsel %vm10141_vm15, %v4758_v17, %v4759_v49 }
 0x66f   :  { %4630 = vst.msk [vmem:[#allocation2 + $0x40] sm:$0xf] %vm4613_vm0, %v4409_v62  ;;  %v4763_v34 = vsel %vm10141_vm15, %v4761_v9, %v4762_v40  ;;  %v4209_v9 = vrot.slane %v10934_v20, 4 }
 0x670   :  { %v4513_v44 = vpop.permute.xlu0 %4512  ;;  %v6325_v0 = vld [vmem:[#allocation2 + $0x38] sm:$0xff]  ;;  %5009 = vrot.lane.b32.xlu1 %v4811_v42, %s6387_s29  ;;  %v4078_v52 = vsel %vm10122_vm12, %v4074_v6, %v11051_v2  ;;  %v4842_v6 = vrot.slane %v4840_v33, 4 }
 0x671   :  { %v4515_v30 = vpop.permute.xlu1 %4514  ;;  %4682 = vst.msk [vmem:[#allocation2 + $0x110] sm:$0xf] %vm4613_vm0, %v4513_v44  ;;  %6284 = vmatmul.msk.bf16.gmra.mxu0 %vm5554_vm2, %v6325_v0  ;;  %v13088_v44 = vld [vmem:[#allocation162_spill] sm:$0xff] }
 0x672   :  { %4683 = vst.msk [vmem:[#allocation2 + $0x114] sm:$0xf] %vm4613_vm0, %v4515_v30  ;;  %v13086_v30 = vld [vmem:[#allocation242_spill] sm:$0xff]  ;;  %v4210_v0 = vrot.slane %v13088_v44, 6 }
 0x673   :  { %5241 = vst.msk [vmem:[#allocation2 + $0x110] sm:$0xf] %vm5172_vm1, %v5072_v59  ;;  %v4158_v59 = vsel %vm10122_vm12, %v4154_v11, %v11033_v58  ;;  %5007 = vrot.lane.b32.xlu0 %v4808_v51, %s6387_s29  ;;  %v13089_v11 = vld [vmem:[#allocation156_spill] sm:$0xff]  ;;  %v11074_v62 = vpop.f32.mrf.mxu3 }
 0x674   :  { %4450 = vrot.lane.b32.xlu2 %v4158_v59, %s6386_s28  ;;  %v4211_v42 = vrot.slane %v13089_v11, 7  ;;  %v13091_v59 = vld [vmem:[#allocation159_spill] sm:$0xff] }
 0x676   :  { %v4968_v38 = vpop.permute.xlu2 %4967  ;;  %v4212_v16 = vor.u32 %v4211_v42, %v4210_v0  ;;  %v13094_v0 = vld [vmem:[#allocation231_spill] sm:$0xff] }
 0x677   :  { %5189 = vst.msk [vmem:[#allocation2 + $0x40] sm:$0xf] %vm5172_vm1, %v4968_v38  ;;  %v13095_v11 = vshrl.u32 %v13094_v0, 16 }
 0x678   :  { %v5074_v45 = vpop.permute.xlu0 %5073  ;;  %3741 = vrot.lane.b32.xlu1 %v13086_v30, %s6385_s27  ;;  %v4214_v38 = vrot.slane %v4212_v16, 4  ;;  %v4213_v20 = vsel %vm10122_vm12, %v4209_v9, %v4212_v16 }
 0x679   :  { %v4441_v53 = vpop.permute.xlu1 %4440  ;;  %5242 = vst.msk [vmem:[#allocation2 + $0x114] sm:$0xf] %vm5172_vm1, %v5074_v45  ;;  %v13092_v45 = vld [vmem:[#allocation152_spill] sm:$0xff]  ;;  %v4340_v42 = vrot.slane %v13095_v11, 6 }
 0x67a   :  { %4646 = vst.msk [vmem:[#allocation2 + $0x80] sm:$0xf] %vm4613_vm0, %v4441_v53  ;;  %v4216_v53 = vrot.slane %v13091_v59, 7  ;;  %v4843_v25 = vrot.slane %v13092_v45, 7 }
 0x67b   :  { %4418 = vrot.lane.b32.xlu0 %v4078_v52, %s6386_s28 }
 0x67c   :  { %4416 = vrot.lane.b32.xlu2 %v4073_v1, %s6386_s28  ;;  %v11093_v52 = vor.u32 %v4216_v53, %v4215_v32  ;;  %v13093_v1 = vld [vmem:[#allocation241_spill] sm:$0xff]  ;;  %v4844_v54 = vsel %vm10141_vm15, %v4842_v6, %v4843_v25  ;;  %v13098_v53 = vld [vmem:[#allocation232_spill] sm:$0xff] }
 0x67d   :  { %v13099_v6 = vshrl.u32 %v13098_v53, 16 }
 0x67e   :  { %v4467_v22 = vpop.permute.xlu2 %4466  ;;  %v4218_v17 = vsel %vm10122_vm12, %v4214_v38, %v11093_v52 }
 0x67f   :  { %v4345_v45 = vrot.slane %v13099_v6, 6 }
 0x680   :  { %v5000_v51 = vpop.permute.xlu0 %4999  ;;  %v6352_v28 = vld [vmem:[#allocation2 + $0x110] sm:$0xff]  ;;  %4977 = vrot.lane.b32.xlu1 %v4763_v34, %s6387_s29 }
 0x681   :  { %v5002_v57 = vpop.permute.xlu1 %5001  ;;  %5205 = vst.msk [vmem:[#allocation2 + $0x80] sm:$0xf] %vm5172_vm1, %v5000_v51  ;;  %6311 = vmatmul.msk.bf16.gmra.mxu3 %vm5554_vm2, %v6352_v28  ;;  %v13096_v51 = vshll.u32 %v13094_v0, 16 }
 0x682   :  { %5206 = vst.msk [vmem:[#allocation2 + $0x84] sm:$0xf] %vm5172_vm1, %v5002_v57  ;;  %v11100_v57 = vpop.f32.mrf.mxu3 }
 0x683   :  { %4975 = vrot.lane.b32.xlu0 %v4760_v61, %s6387_s29  ;;  %v4341_v28 = vrot.slane %v13096_v51, 7  ;;  %v13097_v61 = vld [vmem:[#allocation155_spill] sm:$0xff]  ;;  %v13104_v51 = vld [vmem:[#allocation128_spill] sm:$0xff] }
 0x684   :  { %3743 = vrot.lane.b32.xlu2 %v13093_v1, %s6385_s27  ;;  %v4846_v15 = vrot.slane %v13097_v61, 7  ;;  %v13101_v1 = vld [vmem:[#allocation120_spill] sm:$0xff] }
 0x685   :  { %v4342_v59 = vor.u32 %v4341_v28, %v4340_v42  ;;  %v4160_v9 = vrot.slane %v13101_v1, 6  ;;  %v4166_v28 = vrot.slane %v13104_v51, 7 }
 0x686   :  { %v3786_v33 = vpop.permute.xlu2 %3785 }
 0x687   :  { %3953 = vst.msk [vmem:[#allocation2 + $0x118] sm:$0xf] %vm3882_vm8, %v3786_v33 }
 0x688   :  { %v4411_v49 = vpop.permute.xlu0 %4410  ;;  %5031 = vrot.lane.b32.xlu1 %v4844_v54, %s6387_s29  ;;  %v13102_v54 = vld [vmem:[#allocation119_spill] sm:$0xff] }
 0x689   :  { %v3736_v18 = vpop.permute.xlu1 %3735  ;;  %v6334_v30 = vld [vmem:[#allocation2 + $0x80] sm:$0xff]  ;;  %4631 = vst.msk [vmem:[#allocation2 + $0x44] sm:$0xf] %vm4613_vm0, %v4411_v49  ;;  %v4920_v49 = vrot.slane %v4918_v55, 4  ;;  %v4161_v33 = vrot.slane %v13102_v54, 7  ;;  %v4924_v54 = vrot.slane %v13098_v53, 7 }
 0x68a   :  { %3928 = vst.msk [vmem:[#allocation2 + $0xb4] sm:$0xf] %vm3882_vm8, %v3736_v18  ;;  %6293 = vmatmul.msk.bf16.gmra.mxu1 %vm5554_vm2, %v6334_v30  ;;  %v11122_v16 = vpop.f32.mrf.mxu3  ;;  %v13100_v18 = vshll.u32 %v13098_v53, 16  ;;  %v4921_v30 = vrot.slane %v13094_v0, 7  ;;  %v13103_v0 = vld [vmem:[#allocation140_spill] sm:$0xff] }
 0x68b   :  { %4659 = vst.msk [vmem:[#allocation2 + $0xb4] sm:$0xf] %vm4613_vm0, %v4467_v22  ;;  %4474 = vrot.lane.b32.xlu0 %v4218_v17, %s6386_s28  ;;  %v4845_v22 = vrot.slane %v4843_v25, 4  ;;  %v4162_v55 = vor.u32 %v4161_v33, %v4160_v9  ;;  %v4165_v42 = vrot.slane %v13103_v0, 6  ;;  %v4079_v0 = vrot.slane %v11051_v2, 4 }
 0x68c   :  { %4472 = vrot.lane.b32.xlu2 %v4213_v20, %s6386_s28  ;;  %v4346_v38 = vrot.slane %v13100_v18, 7  ;;  %v4344_v20 = vrot.slane %v4342_v59, 4  ;;  %v4922_v8 = vsel %vm10141_vm15, %v4920_v49, %v4921_v30  ;;  %v4923_v9 = vrot.slane %v4921_v30, 4 }
 0x68d   :  { %v4847_v25 = vsel %vm10141_vm15, %v4845_v22, %v4846_v15  ;;  %v11162_v18 = vor.u32 %v4166_v28, %v4165_v42 }
 0x68e   :  { %v4519_v32 = vpop.permute.xlu2 %4518 }
 0x690   :  { %v4970_v34 = vpop.permute.xlu0 %4969  ;;  %3795 = vrot.lane.b32.xlu1 %v9979_v12, %s6385_s27  ;;  %v11141_v12 = vor.u32 %v4346_v38, %v4345_v45  ;;  %v4164_v45 = vrot.slane %v4162_v55, 4 }
 0x691   :  { %v4465_v44 = vpop.permute.xlu1 %4464  ;;  %5190 = vst.msk [vmem:[#allocation2 + $0x44] sm:$0xf] %vm5172_vm1, %v4970_v34 }
 0x692   :  { %4658 = vst.msk [vmem:[#allocation2 + $0xb0] sm:$0xf] %vm4613_vm0, %v4465_v44  ;;  %v4348_v22 = vsel %vm10122_vm12, %v4344_v20, %v11141_v12  ;;  %v11156_v6 = vpop.f32.mrf.mxu3 }
 0x693   :  { %3793 = vrot.lane.b32.xlu0 %v9986_v60, %s6385_s27  ;;  %v4339_v60 = vrot.slane %v10979_v10, 4 }
 0x694   :  { %5033 = vrot.lane.b32.xlu2 %v4847_v25, %s6387_s29  ;;  %v4159_v25 = vrot.slane %v11033_v58, 4  ;;  %v13105_v58 = vld [vmem:[#allocation79_spill] sm:$0xff] }
 0x695   :  { %v4343_v10 = vsel %vm10122_vm12, %v4339_v60, %v4342_v59  ;;  %v4168_v59 = vsel %vm10122_vm12, %v4164_v45, %v11162_v18  ;;  %v4080_v33 = vrot.slane %v13105_v58, 6  ;;  %v13107_v60 = vld [vmem:[#allocation116_spill] sm:$0xff] }
 0x696   :  { %v4445_v34 = vpop.permute.xlu2 %4444  ;;  %v4813_v30 = vrot.slane %v13107_v60, 7 }
 0x697   :  { %4648 = vst.msk [vmem:[#allocation2 + $0x88] sm:$0xf] %vm4613_vm0, %v4445_v34  ;;  %v13108_v34 = vld [vmem:[#allocation125_spill] sm:$0xff] }
 0x698   :  { %v5024_v44 = vpop.permute.xlu0 %5023  ;;  %v6326_v11 = vld [vmem:[#allocation2 + $0x40] sm:$0xff]  ;;  %5083 = vrot.lane.b32.xlu1 %v4922_v8, %s6387_s29  ;;  %v4815_v28 = vrot.slane %v4813_v30, 4 }
 0x699   :  { %v5026_v17 = vpop.permute.xlu1 %5025  ;;  %5217 = vst.msk [vmem:[#allocation2 + $0xb0] sm:$0xf] %vm5172_vm1, %v5024_v44  ;;  %6285 = vmatmul.msk.bf16.gmra.mxu0 %vm5554_vm2, %v6326_v11  ;;  %v4163_v11 = vsel %vm10122_vm12, %v4159_v25, %v4162_v55  ;;  %v4816_v55 = vrot.slane %v13108_v34, 7  ;;  %v4169_v34 = vrot.slane %v11162_v18, 4 }
 0x69a   :  { %5218 = vst.msk [vmem:[#allocation2 + $0xb4] sm:$0xf] %vm5172_vm1, %v5026_v17  ;;  %v13106_v17 = vld [vmem:[#allocation78_spill] sm:$0xff]  ;;  %v11179_v8 = vpop.f32.mrf.mxu3 }
 0x69b   :  { %4526 = vrot.lane.b32.xlu0 %v4348_v22, %s6386_s28  ;;  %v4081_v20 = vrot.slane %v13106_v17, 7  ;;  %v4817_v2 = vsel %vm10141_vm15, %v4815_v28, %v4816_v55 }
 0x69c   :  { %4524 = vrot.lane.b32.xlu2 %v4343_v10, %s6386_s28  ;;  %v4812_v10 = vrot.slane %v4810_v46, 4  ;;  %v4086_v46 = vrot.slane %v13110_v37, 7 }
 0x69d   :  { %v4082_v42 = vor.u32 %v4081_v20, %v4080_v33 }
 0x69e   :  { %v5006_v44 = vpop.permute.xlu2 %5005  ;;  %v4814_v25 = vsel %vm10141_vm15, %v4812_v10, %v4813_v30  ;;  %v13112_v30 = vld [vmem:[#allocation157_spill] sm:$0xff]  ;;  %v13115_v10 = vld [vmem:[#allocation246_spill] sm:$0xff] }
 0x69f   :  { %v4083_v45 = vsel %vm10122_vm12, %v4079_v0, %v4082_v42  ;;  %v4084_v17 = vrot.slane %v4082_v42, 4 }
 0x6a0   :  { %v3788_v49 = vpop.permute.xlu0 %3787  ;;  %4454 = vrot.lane.b32.xlu1 %v4168_v59, %s6386_s28 }
 0x6a1   :  { %v4517_v38 = vpop.permute.xlu1 %4516  ;;  %v6340_v1 = vld [vmem:[#allocation2 + $0xb0] sm:$0xff]  ;;  %3954 = vst.msk [vmem:[#allocation2 + $0x11c] sm:$0xf] %vm3882_vm8, %v3788_v49  ;;  %v13109_v49 = vld [vmem:[#allocation77_spill] sm:$0xff] }
 0x6a2   :  { %4684 = vst.msk [vmem:[#allocation2 + $0x118] sm:$0xf] %vm4613_vm0, %v4517_v38  ;;  %6299 = vmatmul.msk.bf16.vlgmr.msra.gmra.mxu2 %vm5554_vm2, %v6340_v1  ;;  %v4085_v1 = vrot.slane %v13109_v49, 6  ;;  %v13116_v49 = vld [vmem:[#allocation73_spill] sm:$0xff] }
 0x6a3   :  { %4685 = vst.msk [vmem:[#allocation2 + $0x11c] sm:$0xf] %vm4613_vm0, %v4519_v32  ;;  %v4925_v32 = vsel %vm10141_vm15, %v4923_v9, %v4924_v54  ;;  %4452 = vrot.lane.b32.xlu0 %v4163_v11, %s6386_s28  ;;  %v11206_v9 = vpop.f32.mrf.mxu3  ;;  %v13111_v11 = vld [vmem:[#allocation158_spill] sm:$0xff] }
 0x6a4   :  { %5085 = vrot.lane.b32.xlu2 %v4925_v32, %s6387_s29  ;;  %v11212_v20 = vor.u32 %v4086_v46, %v4085_v1  ;;  %v4220_v60 = vrot.slane %v13111_v11, 6  ;;  %v4221_v32 = vrot.slane %v13112_v30, 7  ;;  %v4768_v1 = vrot.slane %v13116_v49, 7  ;;  %v11230_v46 = vpop.f32.mrf.mxu0  ;;  %v11244_v30 = vpop.f32.mrf.mxu1  ;;  %v109_v49 = vld [vmem:[%s11733_s0 + $0x298] sm:$0xff] }
 0x6a6   :  { %v3738_v38 = vpop.permute.xlu2 %3737  ;;  %v4088_v42 = vsel %vm10122_vm12, %v4084_v17, %v11212_v20 }
 0x6a7   :  { %3929 = vst.msk [vmem:[#allocation2 + $0xb8] sm:$0xf] %vm3882_vm8, %v3738_v38  ;;  %v4222_v38 = vor.u32 %v4221_v32, %v4220_v60  ;;  %v13118_v32 = vld [vmem:[#allocation171_spill] sm:$0xff] }
 0x6a8   :  { %v5076_v22 = vpop.permute.xlu0 %5075  ;;  %4420 = vrot.lane.b32.xlu1 %v4083_v45, %s6386_s28  ;;  %v4219_v45 = vrot.slane %v11093_v52, 4 }
 0x6a9   :  { %v5078_v51 = vpop.permute.xlu1 %5077  ;;  %5243 = vst.msk [vmem:[#allocation2 + $0x118] sm:$0xf] %vm5172_vm1, %v5076_v22  ;;  %v13114_v22 = vld [vmem:[#allocation245_spill] sm:$0xff] }
 0x6aa   :  { %5244 = vst.msk [vmem:[#allocation2 + $0x11c] sm:$0xf] %vm5172_vm1, %v5078_v51  ;;  %v13113_v51 = vld [vmem:[#allocation74_spill] sm:$0xff]  ;;  %v4223_v52 = vsel %vm10122_vm12, %v4219_v45, %v4222_v38  ;;  %v13120_v45 = vld [vmem:[#allocation161_spill] sm:$0xff] }
 0x6ab   :  { %5013 = vrot.lane.b32.xlu0 %v4817_v2, %s6387_s29  ;;  %v4765_v28 = vrot.slane %v13113_v51, 7  ;;  %v13119_v51 = vld [vmem:[#allocation165_spill] sm:$0xff] }
 0x6ac   :  { %5011 = vrot.lane.b32.xlu2 %v4814_v25, %s6387_s29 }
 0x6ad   :  { %v4767_v25 = vrot.slane %v4765_v28, 4 }
 0x6ae   :  { %v4974_v0 = vpop.permute.xlu2 %4973 }
 0x6af   :  { %v4769_v60 = vsel %vm10141_vm15, %v4767_v25, %v4768_v1  ;;  %v4350_v25 = vshrl.u32 %v9329_v31, 16 }
 0x6b0   :  { %v4447_v58 = vpop.permute.xlu0 %4446  ;;  %3747 = vrot.lane.b32.xlu1 %v13114_v22, %s6385_s27  ;;  %v4226_v22 = vrot.slane %v13119_v51, 7  ;;  %v13121_v51 = vshll.u32 %v9329_v31, 16 }
 0x6b1   :  { %v5004_v59 = vpop.permute.xlu1 %5003  ;;  %v6353_v33 = vld [vmem:[#allocation2 + $0x118] sm:$0xff]  ;;  %4649 = vst.msk [vmem:[#allocation2 + $0x8c] sm:$0xf] %vm4613_vm0, %v4447_v58  ;;  %v4764_v58 = vrot.slane %v4762_v40, 4 }
 0x6b2   :  { %5207 = vst.msk [vmem:[#allocation2 + $0x88] sm:$0xf] %vm5172_vm1, %v5004_v59  ;;  %6312 = vmatmul.msk.bf16.gmra.mxu3 %vm5554_vm2, %v6353_v33  ;;  %v13117_v33 = vld [vmem:[#allocation153_spill] sm:$0xff] }
 0x6b3   :  { %5208 = vst.msk [vmem:[#allocation2 + $0x8c] sm:$0xf] %vm5172_vm1, %v5006_v44  ;;  %3745 = vrot.lane.b32.xlu0 %v13115_v10, %s6385_s27  ;;  %v4849_v17 = vrot.slane %v13117_v33, 7  ;;  %v4766_v40 = vsel %vm10141_vm15, %v4764_v58, %v4765_v28  ;;  %v108_v58 = vld [vmem:[%s11733_s0 + $0x290] sm:$0xff] }
 0x6b4   :  { %4422 = vrot.lane.b32.xlu2 %v4088_v42, %s6386_s28 }
 0x6b5   :  { %v4851_v10 = vrot.slane %v4849_v17, 4 }
 0x6b6   :  { %v5848_v44 = vpop.f32.mrf.mxu3  ;;  %v5028_v11 = vpop.permute.xlu2 %5027 }
 0x6b7   :  { %v5849_v63 = vadd.f32 %v10863_v43, %v5848_v44 }
 0x6b8   :  { %v4413_v37 = vpop.permute.xlu0 %4412  ;;  %4476 = vrot.lane.b32.xlu1 %v4223_v52, %s6386_s28 }
 0x6b9   :  { %v4415_v2 = vpop.permute.xlu1 %4414  ;;  %4632 = vst.msk [vmem:[#allocation2 + $0x48] sm:$0xf] %vm4613_vm0, %v4413_v37  ;;  %v5951_v52 = vmax.f32 %v5849_v63, 0.0 }
 0x6ba   :  { %4633 = vst.msk [vmem:[#allocation2 + $0x4c] sm:$0xf] %vm4613_vm0, %v4415_v2  ;;  %v6335_v59 = vld [vmem:[#allocation2 + $0x88] sm:$0xff]  ;;  %v4852_v2 = vrot.slane %v13120_v45, 7 }
 0x6bb   :  { %5192 = vst.msk [vmem:[#allocation2 + $0x4c] sm:$0xf] %vm5172_vm1, %v4974_v0  ;;  %6294 = vmatmul.msk.bf16.gmra.mxu1 %vm5554_vm2, %v6335_v59  ;;  %v4225_v0 = vrot.slane %v13118_v32, 6  ;;  %4981 = vrot.lane.b32.xlu0 %v4769_v60, %s6387_s29  ;;  %v4848_v59 = vrot.slane %v4846_v15, 4  ;;  %v4224_v60 = vrot.slane %v4222_v38, 4  ;;  %v4352_v15 = vrot.slane %v4350_v25, 6 }
 0x6bc   :  { %4979 = vrot.lane.b32.xlu2 %v4766_v40, %s6387_s29  ;;  %v4853_v61 = vsel %vm10141_vm15, %v4851_v10, %v4852_v2  ;;  %v4353_v40 = vrot.slane %v13121_v51, 7  ;;  %v11278_v38 = vpack.c.bf16 %v108_v58, %v108_v58  ;;  %v4349_v10 = vrot.slane %v11141_v12, 4 }
 0x6bd   :  { %v11264_v32 = vor.u32 %v4226_v22, %v4225_v0  ;;  %v4850_v63 = vsel %vm10141_vm15, %v4848_v59, %v4849_v17  ;;  %v11285_v22 = vpop.f32.mrf.mxu1  ;;  %v3639_v17 = vrot.slane %v3315_v23, 4 }
 0x6be   :  { %v5850_v42 = vpop.f32.mrf.mxu3  ;;  %v4354_v25 = vor.u32 %v4353_v40, %v4352_v15  ;;  %v3640_v59 = vrot.slane %v11278_v38, 6  ;;  %v4361_v12 = vshll.u32 %v11278_v38, 16 }
 0x6bf   :  { %v5851_v37 = vadd.f32 %v10863_v43, %v5850_v42  ;;  %v3792_v42 = vpop.permute.xlu2 %3791  ;;  %v4228_v0 = vsel %vm10122_vm12, %v4224_v60, %v11264_v32 }
 0x6c0   :  { %v3740_v28 = vpop.permute.xlu0 %3739  ;;  %3956 = vst.msk [vmem:[#allocation2 + $0x124] sm:$0xf] %vm3882_vm8, %v3792_v42  ;;  %5037 = vrot.lane.b32.xlu1 %v4853_v61, %s6387_s29  ;;  %v4355_v23 = vsel %vm10122_vm12, %v4349_v10, %v4354_v25  ;;  %v3641_v15 = vsel %vm9351_vm4, %v3639_v17, %v3640_v59  ;;  %v4363_v40 = vrot.slane %v4361_v12, 7  ;;  %v13122_v10 = vld [vmem:[#allocation133_spill] sm:$0xff] }
 0x6c1   :  { %v4972_v44 = vpop.permute.xlu1 %4971  ;;  %v5952_v33 = vmax.f32 %v5851_v37, 0.0  ;;  %3930 = vst.msk [vmem:[#allocation2 + $0xbc] sm:$0xf] %vm3882_vm8, %v3740_v28 }
 0x6c2   :  { %5191 = vst.msk [vmem:[#allocation2 + $0x48] sm:$0xf] %vm5172_vm1, %v4972_v44  ;;  %v11272_v44 = vpop.f32.mrf.mxu0 }
 0x6c3   :  { %v11274_v7 = vpack.c.bf16 %v5952_v33, %v5951_v52  ;;  %5035 = vrot.lane.b32.xlu0 %v4850_v63, %s6387_s29  ;;  %v4358_v52 = vshrl.u32 %v11278_v38, 16  ;;  %v4927_v33 = vrot.slane %v9329_v31, 7  ;;  %v4930_v63 = vrot.slane %v11278_v38, 7 }
 0x6c4   :  { %4478 = vrot.lane.b32.xlu2 %v4228_v0, %s6386_s28  ;;  %v4926_v0 = vrot.slane %v4924_v54, 4 }
 0x6c5   :  { %v4360_v51 = vrot.slane %v4358_v52, 6  ;;  %v11309_v42 = vpop.f32.mrf.mxu1  ;;  %v4356_v52 = vrot.slane %v4354_v25, 4 }
 0x6c7   :  { %v5080_v60 = vpop.permute.xlu2 %5079  ;;  %v11321_v12 = vor.u32 %v4363_v40, %v4360_v51  ;;  %v13126_v51 = vld [vmem:[#allocation127_spill] sm:$0xff] }
 0x6c8   :  { %v4469_v58 = vpop.permute.xlu0 %4468  ;;  %4528 = vrot.lane.b32.xlu1 %v4355_v23, %s6386_s28  ;;  %v4928_v23 = vsel %vm10141_vm15, %v4926_v0, %v4927_v33  ;;  %v4819_v40 = vrot.slane %v13126_v51, 7 }
 0x6c9   :  { %v4471_v37 = vpop.permute.xlu1 %4470  ;;  %v6327_v28 = vld [vmem:[#allocation2 + $0x48] sm:$0xff]  ;;  %4660 = vst.msk [vmem:[#allocation2 + $0xb8] sm:$0xf] %vm4613_vm0, %v4469_v58  ;;  %v4365_v25 = vsel %vm10122_vm12, %v4356_v52, %v11321_v12 }
 0x6ca   :  { %4661 = vst.msk [vmem:[#allocation2 + $0xbc] sm:$0xf] %vm4613_vm0, %v4471_v37  ;;  %6286 = vmatmul.msk.bf16.gmra.mxu0 %vm5554_vm2, %v6327_v28  ;;  %v11302_v61 = vpop.f32.mrf.mxu0  ;;  %v4170_v37 = vrot.slane %v13122_v10, 6  ;;  %v13123_v28 = vld [vmem:[#allocation132_spill] sm:$0xff] }
 0x6cb   :  { %5219 = vst.msk [vmem:[#allocation2 + $0xb8] sm:$0xf] %vm5172_vm1, %v5028_v11  ;;  %3799 = vrot.lane.b32.xlu0 %v3641_v15, %s6385_s27  ;;  %v4929_v11 = vrot.slane %v4927_v33, 4  ;;  %v4171_v58 = vrot.slane %v13123_v28, 7  ;;  %v13125_v28 = vld [vmem:[#allocation129_spill] sm:$0xff]  ;;  %v4818_v33 = vrot.slane %v4816_v55, 4 }
 0x6cc   :  { %3797 = vrot.lane.b32.xlu2 %v9975_v39, %s6385_s27  ;;  %v4176_v14 = vrot.slane %v13125_v28, 7 }
 0x6cd   :  { %v4931_v53 = vsel %vm10141_vm15, %v4929_v11, %v4930_v63  ;;  %v4172_v15 = vor.u32 %v4171_v58, %v4170_v37  ;;  %v13127_v11 = vld [vmem:[#allocation90_spill] sm:$0xff]  ;;  %v13128_v37 = vld [vmem:[#allocation84_spill] sm:$0xff]  ;;  %v4820_v55 = vsel %vm10141_vm15, %v4818_v33, %v4819_v40 }
 0x6ce   :  { %v4090_v0 = vrot.slane %v13127_v11, 6  ;;  %v4091_v58 = vrot.slane %v13128_v37, 7  ;;  %v4089_v11 = vrot.slane %v11212_v20, 4 }
 0x6cf   :  { %v4451_v54 = vpop.permute.xlu2 %4450 }
 0x6d0   :  { %v5030_v17 = vpop.permute.xlu0 %5029  ;;  %4651 = vst.msk [vmem:[#allocation2 + $0x94] sm:$0xf] %vm4613_vm0, %v4451_v54  ;;  %5089 = vrot.lane.b32.xlu1 %v4931_v53, %s6387_s29  ;;  %v4174_v54 = vrot.slane %v4172_v15, 4  ;;  %v5760_v53 = vpop.f32.mrf.mxu1 }
 0x6d1   :  { %v3790_v31 = vpop.permute.xlu1 %3789  ;;  %5220 = vst.msk [vmem:[#allocation2 + $0xbc] sm:$0xf] %vm5172_vm1, %v5030_v17 }
 0x6d2   :  { %3955 = vst.msk [vmem:[#allocation2 + $0x120] sm:$0xf] %vm3882_vm8, %v3790_v31  ;;  %v13124_v31 = vld [vmem:[#allocation130_spill] sm:$0xff]  ;;  %v11332_v39 = vpop.f32.mrf.mxu0 }
 0x6d3   :  { %v4175_v10 = vrot.slane %v13124_v31, 6  ;;  %5087 = vrot.lane.b32.xlu0 %v4928_v23, %s6387_s29 }
 0x6d4   :  { %4530 = vrot.lane.b32.xlu2 %v4365_v25, %s6386_s28 }
 0x6d5   :  { %v11344_v31 = vor.u32 %v4176_v14, %v4175_v10  ;;  %v4092_v14 = vor.u32 %v4091_v58, %v4090_v0  ;;  %v4821_v58 = vrot.slane %v4819_v40, 4 }
 0x6d7   :  { %v4417_v23 = vpop.permute.xlu2 %4416  ;;  %v4178_v10 = vsel %vm10122_vm12, %v4174_v54, %v11344_v31  ;;  %v4094_v51 = vrot.slane %v4092_v14, 4 }
 0x6d8   :  { %v4521_v28 = vpop.permute.xlu0 %4520  ;;  %v6341_v52 = vld [vmem:[#allocation2 + $0xb8] sm:$0xff]  ;;  %4634 = vst.msk [vmem:[#allocation2 + $0x50] sm:$0xf] %vm4613_vm0, %v4417_v23  ;;  %5015 = vrot.lane.b32.xlu1 %v4820_v55, %s6387_s29  ;;  %v4770_v55 = vrot.slane %v4768_v1, 4  ;;  %v5759_v1 = vadd.f32 %v10863_v43, %v11309_v42 }
 0x6d9   :  { %v4523_v17 = vpop.permute.xlu1 %4522  ;;  %4686 = vst.msk [vmem:[#allocation2 + $0x120] sm:$0xf] %vm4613_vm0, %v4521_v28  ;;  %6300 = vmatmul.msk.bf16.gmra.mxu2 %vm5554_vm2, %v6341_v52  ;;  %v4093_v52 = vsel %vm10122_vm12, %v4089_v11, %v4092_v14  ;;  %v13130_v14 = vld [vmem:[#allocation80_spill] sm:$0xff] }
 0x6da   :  { %4687 = vst.msk [vmem:[#allocation2 + $0x124] sm:$0xf] %vm4613_vm0, %v4523_v17  ;;  %v11358_v25 = vpop.f32.mrf.mxu0  ;;  %v13129_v17 = vld [vmem:[#allocation126_spill] sm:$0xff]  ;;  %v4771_v23 = vrot.slane %v13130_v14, 7 }
 0x6db   :  { %5245 = vst.msk [vmem:[#allocation2 + $0x120] sm:$0xf] %vm5172_vm1, %v5080_v60  ;;  %v4173_v60 = vsel %vm10122_vm12, %v4169_v34, %v4172_v15  ;;  %4458 = vrot.lane.b32.xlu0 %v4178_v10, %s6386_s28  ;;  %v12270_v54 = vrot.slane %v13129_v17, 7  ;;  %v4098_v15 = vsel %vm10122_vm12, %v4094_v51, %v10399_v41 }
 0x6dc   :  { %4456 = vrot.lane.b32.xlu2 %v4173_v60, %s6386_s28 }
 0x6dd   :  { %v5853_v18 = vpop.f32.mrf.mxu3  ;;  %v4823_v40 = vsel %vm10141_vm15, %v4821_v58, %v12270_v54  ;;  %v11406_v54 = vpack.c.bf16 %v109_v49, %v109_v49 }
 0x6de   :  { %v5854_v20 = vadd.f32 %v10863_v43, %v5853_v18 }
 0x6df   :  { %v3744_v28 = vpop.permute.xlu2 %3743 }
 0x6e0   :  { %v5082_v0 = vpop.permute.xlu0 %5081  ;;  %v5763_v37 = vpop.f32.mrf.mxu1  ;;  %3932 = vst.msk [vmem:[#allocation2 + $0xc4] sm:$0xf] %vm3882_vm8, %v3744_v28  ;;  %4426 = vrot.lane.b32.xlu1 %v4098_v15, %s6386_s28  ;;  %v5953_v51 = vmax.f32 %v5854_v20, 0.0  ;;  %v5761_v15 = vadd.f32 %v10863_v43, %v5760_v53  ;;  %v13131_v20 = vld [vmem:[#allocation169_spill] sm:$0xff] }
 0x6e1   :  { %v4449_v33 = vpop.permute.xlu1 %4448  ;;  %5246 = vst.msk [vmem:[#allocation2 + $0x124] sm:$0xf] %vm5172_vm1, %v5082_v0  ;;  %v5764_v18 = vadd.f32 %v10863_v43, %v5763_v37 }
 0x6e2   :  { %4650 = vst.msk [vmem:[#allocation2 + $0x90] sm:$0xf] %vm4613_vm0, %v4449_v33  ;;  %v11386_v10 = vpop.f32.mrf.mxu0 }
 0x6e3   :  { %4424 = vrot.lane.b32.xlu0 %v4093_v52, %s6386_s28  ;;  %v4772_v52 = vsel %vm10141_vm15, %v4770_v55, %v4771_v23 }
 0x6e4   :  { %5017 = vrot.lane.b32.xlu2 %v4823_v40, %s6387_s29  ;;  %v13132_v40 = vld [vmem:[#allocation168_spill] sm:$0xff] }
 0x6e5   :  { %v5855_v34 = vpop.f32.mrf.mxu3 }
 0x6e6   :  { %v5856_v41 = vadd.f32 %v10863_v43, %v5855_v34  ;;  %v4230_v34 = vrot.slane %v13131_v20, 6  ;;  %v4371_v20 = vshll.u32 %v11406_v54, 16 }
 0x6e7   :  { %v4473_v14 = vpop.permute.xlu2 %4472 }
 0x6e8   :  { %v5954_v33 = vmax.f32 %v5856_v41, 0.0  ;;  %v5008_v11 = vpop.permute.xlu0 %5007  ;;  %v5765_v0 = vpop.f32.mrf.mxu1  ;;  %v6354_v58 = vld [vmem:[#allocation2 + $0x120] sm:$0xff]  ;;  %v4231_v41 = vrot.slane %v13132_v40, 7  ;;  %4983 = vrot.lane.b32.xlu1 %v4772_v52, %s6387_s29  ;;  %v4368_v52 = vshrl.u32 %v11406_v54, 16 }
 0x6e9   :  { %v5010_v60 = vpop.permute.xlu1 %5009  ;;  %5209 = vst.msk [vmem:[#allocation2 + $0x90] sm:$0xf] %vm5172_vm1, %v5008_v11  ;;  %v5766_v37 = vadd.f32 %v10863_v43, %v5765_v0  ;;  %6313 = vmatmul.msk.bf16.gmra.mxu3 %vm5554_vm2, %v6354_v58  ;;  %v11411_v43 = vld [vmem:[%s11735_s2] ss:$0 sm:$0xff]  ;;  %v5915_v11 = vmax.f32 %v5759_v1, 0.0  ;;  %v4229_v0 = vrot.slane %v11264_v32, 4 }
 0x6ea   :  { %5210 = vst.msk [vmem:[#allocation2 + $0x94] sm:$0xf] %vm5172_vm1, %v5010_v60  ;;  %v11399_v28 = vpack.c.bf16 %v5954_v33, %v5953_v51  ;;  %v5917_v60 = vmax.f32 %v5764_v18, 0.0  ;;  %v5756_v53 = vadd.f32 %v11411_v43, %v11285_v22  ;;  %v5916_v51 = vmax.f32 %v5761_v15, 0.0  ;;  %v13133_v18 = vld [vmem:[#allocation249_spill] sm:$0xff]  ;;  %v13134_v32 = vld [vmem:[#allocation244_spill] sm:$0xff] }
 0x6eb   :  { %v5918_v42 = vmax.f32 %v5766_v37, 0.0  ;;  %v5754_v33 = vadd.f32 %v11411_v43, %v11244_v30  ;;  %3751 = vrot.lane.b32.xlu0 %v13133_v18, %s6385_s27  ;;  %v4232_v58 = vor.u32 %v4231_v41, %v4230_v34  ;;  %v3642_v22 = vrot.slane %v3640_v59, 4 }
 0x6ec   :  { %v3643_v15 = vrot.slane %v11406_v54, 6  ;;  %v5914_v30 = vmax.f32 %v5756_v53, 0.0  ;;  %3749 = vrot.lane.b32.xlu2 %v13134_v32, %s6385_s27  ;;  %v5981_v34 = vpack.c.bf16 %v5916_v51, %v5915_v11  ;;  %v4773_v41 = vrot.slane %v4771_v23, 4  ;;  %v13135_v23 = vld [vmem:[#allocation164_spill] sm:$0xff]  ;;  %v13136_v11 = vld [vmem:[#allocation167_spill] sm:$0xff] }
 0x6ed   :  { %v5982_v55 = vpack.c.bf16 %v5918_v42, %v5917_v60  ;;  %v5913_v60 = vmax.f32 %v5754_v33, 0.0  ;;  %v4233_v59 = vsel %vm10122_vm12, %v4229_v0, %v4232_v58  ;;  %v4373_v18 = vrot.slane %v4371_v20, 7 }
 0x6ee   :  { %v5723_v37 = vpop.f32.mrf.mxu0  ;;  %v3644_v53 = vsel %vm9351_vm4, %v3642_v22, %v3643_v15  ;;  %v4854_v51 = vrot.slane %v4852_v2, 4  ;;  %v4855_v33 = vrot.slane %v13135_v23, 7  ;;  %v4235_v0 = vrot.slane %v13136_v11, 6 }
 0x6ef   :  { %6038 = vmatpush.bf16.msrb.mxu2 %v5982_v55  ;;  %v5034_v42 = vpop.permute.xlu2 %5033  ;;  %v4370_v55 = vrot.slane %v4368_v52, 6  ;;  %v5724_v22 = vadd.f32 %v11411_v43, %v5723_v37  ;;  %v4366_v2 = vrot.slane %v11321_v12, 4  ;;  %v5721_v21 = vadd.f32 %v11411_v43, %v11386_v10 }
 0x6f0   :  { %v4419_v1 = vpop.permute.xlu0 %4418  ;;  %4480 = vrot.lane.b32.xlu1 %v4233_v59, %s6386_s28  ;;  %v5719_v37 = vadd.f32 %v11411_v43, %v11358_v25  ;;  %v4234_v12 = vrot.slane %v4232_v58, 4  ;;  %v5716_v25 = vadd.f32 %v11411_v43, %v11332_v39  ;;  %v4932_v39 = vrot.slane %v4930_v63, 4 }
 0x6f1   :  { %v3742_v49 = vpop.permute.xlu1 %3741  ;;  %v6336_v40 = vld [vmem:[#allocation2 + $0x90] sm:$0xff]  ;;  %4635 = vst.msk [vmem:[#allocation2 + $0x54] sm:$0xf] %vm4613_vm0, %v4419_v1  ;;  %v4374_v52 = vor.u32 %v4373_v18, %v4370_v55  ;;  %v5901_v32 = vmax.f32 %v5724_v22, 0.0  ;;  %v5900_v18 = vmax.f32 %v5721_v21, 0.0  ;;  %v5709_v38 = vadd.f32 %v11411_v43, %v11230_v46 }
 0x6f2   :  { %3931 = vst.msk [vmem:[#allocation2 + $0xc0] sm:$0xf] %vm3882_vm8, %v3742_v49  ;;  %6295 = vmatmul.msk.bf16.gmra.mxu1 %vm5554_vm2, %v6336_v40  ;;  %v5980_v49 = vpack.c.bf16 %v5914_v30, %v5913_v60  ;;  %v13137_v1 = vld [vmem:[#allocation166_spill] sm:$0xff]  ;;  %v4856_v30 = vsel %vm10141_vm15, %v4854_v51, %v4855_v33  ;;  %v13139_v60 = vld [vmem:[#allocation139_spill] sm:$0xff]  ;;  %v5714_v51 = vadd.f32 %v11411_v43, %v11302_v61  ;;  %v5899_v23 = vmax.f32 %v5719_v37, 0.0 }
 0x6f3   :  { %4662 = vst.msk [vmem:[#allocation2 + $0xc0] sm:$0xf] %vm4613_vm0, %v4473_v14  ;;  %6039 = vmatpush.bf16.msrb.mxu2 %v5981_v34  ;;  %v4775_v14 = vsel %vm10141_vm15, %v4773_v41, %v4774_v26  ;;  %v4236_v13 = vrot.slane %v13137_v1, 7  ;;  %3801 = vrot.lane.b32.xlu0 %v3644_v53, %s6385_s27  ;;  %v13138_v34 = vld [vmem:[#allocation146_spill] sm:$0xff]  ;;  %v4181_v59 = vrot.slane %v13139_v60, 7  ;;  %v4375_v55 = vsel %vm10122_vm12, %v4366_v2, %v4374_v52  ;;  %v13140_v2 = vld [vmem:[#allocation163_spill] sm:$0xff] }
 0x6f4   :  { %4985 = vrot.lane.b32.xlu2 %v4775_v14, %s6387_s29  ;;  %v4180_v41 = vrot.slane %v13138_v34, 6  ;;  %v4179_v14 = vrot.slane %v11344_v31, 4  ;;  %v4933_v1 = vrot.slane %v11406_v54, 7  ;;  %v5898_v22 = vmax.f32 %v5716_v25, 0.0  ;;  %v13141_v54 = vld [vmem:[#allocation135_spill] sm:$0xff]  ;;  %v13143_v25 = vld [vmem:[#allocation180_spill] sm:$0xff] }
 0x6f5   :  { %v11459_v40 = vor.u32 %v4236_v13, %v4235_v0  ;;  %v5711_v13 = vadd.f32 %v11411_v43, %v11272_v44  ;;  %v4857_v31 = vrot.slane %v4855_v33, 4  ;;  %v4858_v52 = vrot.slane %v13140_v2, 7 }
 0x6f6   :  { %v5725_v45 = vpop.f32.mrf.mxu0  ;;  %v4182_v11 = vor.u32 %v4181_v59, %v4180_v41  ;;  %v5897_v63 = vmax.f32 %v5714_v51, 0.0  ;;  %v4825_v21 = vrot.slane %v13141_v54, 7  ;;  %v4934_v33 = vsel %vm10141_vm15, %v4932_v39, %v4933_v1 }
 0x6f7   :  { %6040 = vmatpush.bf16.msrb.mxu2 %v5980_v49  ;;  %v5726_v20 = vadd.f32 %v11411_v43, %v5725_v45  ;;  %v4525_v53 = vpop.permute.xlu2 %4524  ;;  %v4238_v58 = vsel %vm10122_vm12, %v4234_v12, %v11459_v40  ;;  %v5973_v45 = vpack.c.bf16 %v5900_v18, %v5899_v23  ;;  %v13142_v34 = vrot.slane %v13129_v17, 7 }
 0x6f8   :  { %v4976_v26 = vpop.permute.xlu0 %4975  ;;  %5039 = vrot.lane.b32.xlu1 %v4856_v30, %s6387_s29  ;;  %v4183_v44 = vsel %vm10122_vm12, %v4179_v14, %v4182_v11  ;;  %v5972_v37 = vpack.c.bf16 %v5898_v22, %v5897_v63  ;;  %v5895_v30 = vmax.f32 %v5709_v38, 0.0  ;;  %v4827_v12 = vrot.slane %v4825_v21, 4 }
 0x6f9   :  { %v4978_v15 = vpop.permute.xlu1 %4977  ;;  %5193 = vst.msk [vmem:[#allocation2 + $0x50] sm:$0xf] %vm5172_vm1, %v4976_v26  ;;  %v5902_v10 = vmax.f32 %v5726_v20, 0.0  ;;  %v5896_v20 = vmax.f32 %v5711_v13, 0.0  ;;  %v4824_v41 = vrot.slane %v13142_v34, 4  ;;  %v4240_v18 = vrot.slane %v13143_v25, 6 }
 0x6fa   :  { %5194 = vst.msk [vmem:[#allocation2 + $0x54] sm:$0xf] %vm5172_vm1, %v4978_v15  ;;  %v4184_v51 = vrot.slane %v4182_v11, 4  ;;  %v13145_v17 = vrot.slane %v13039_v56, 7  ;;  %v4239_v11 = vrot.slane %v11459_v40, 4  ;;  %v5689_v63 = vadd.f32 %v11411_v43, %v10798_v4 }
 0x6fb   :  { %v5974_v49 = vpack.c.bf16 %v5902_v10, %v5901_v32  ;;  %4532 = vrot.lane.b32.xlu0 %v4375_v55, %s6386_s28  ;;  %v5971_v59 = vpack.c.bf16 %v5896_v20, %v5895_v30  ;;  %v13149_v2 = vrot.slane %v12918_v24, 7  ;;  %vm4692_vm4 = vcmask 256224  }
 0x6fc   :  { %4482 = vrot.lane.b32.xlu2 %v4238_v58, %s6386_s28  ;;  %v4829_v23 = vsel %vm10141_vm15, %v4827_v12, %v13145_v17  ;;  %v4188_v56 = vsel %vm10122_vm12, %v4184_v51, %v10761_v36  ;;  %v5831_v17 = vadd.f32 %v11411_v43, %v11053_v47 }
 0x6fd   :  { %6025 = vmatpush.bf16.msrb.mxu1 %v5974_v49  ;;  %v13144_v49 = vld [vmem:[#allocation174_spill] sm:$0xff] }
 0x6fe   :  { %v4241_v58 = vrot.slane %v13144_v49, 7  ;;  %v5944_v48 = vmax.f32 %v5831_v17, 0.0 }
 0x6ff   :  { %v5086_v26 = vpop.permute.xlu2 %5085 }
 0x700   :  { %v4475_v61 = vpop.permute.xlu0 %4474  ;;  %4460 = vrot.lane.b32.xlu1 %v4183_v44, %s6386_s28 }
 0x701   :  { %v5032_v0 = vpop.permute.xlu1 %5031  ;;  %v6328_v15 = vld [vmem:[#allocation2 + $0x50] sm:$0xff]  ;;  %4663 = vst.msk [vmem:[#allocation2 + $0xc4] sm:$0xf] %vm4613_vm0, %v4475_v61  ;;  %6026 = vmatpush.bf16.msrb.mxu1 %v5973_v45  ;;  %v5691_v45 = vadd.f32 %v11411_v43, %v10823_v19 }
 0x702   :  { %5221 = vst.msk [vmem:[#allocation2 + $0xc0] sm:$0xf] %vm5172_vm1, %v5032_v0  ;;  %6287 = vmatmul.msk.bf16.gmra.mxu0 %vm5554_vm2, %v6328_v15  ;;  %v4826_v0 = vsel %vm10141_vm15, %v4824_v41, %v4825_v21  ;;  %v4860_v41 = vrot.slane %v4858_v52, 4 }
 0x703   :  { %5222 = vst.msk [vmem:[#allocation2 + $0xc4] sm:$0xf] %vm5172_vm1, %v5034_v42  ;;  %v4859_v42 = vsel %vm10141_vm15, %v4857_v31, %v4858_v52  ;;  %5091 = vrot.lane.b32.xlu0 %v4934_v33, %s6387_s29  ;;  %v13146_v33 = vld [vmem:[#allocation170_spill] sm:$0xff] }
 0x704   :  { %v5858_v46 = vpop.f32.mrf.mxu3  ;;  %5041 = vrot.lane.b32.xlu2 %v4859_v42, %s6387_s29  ;;  %v4861_v20 = vrot.slane %v13146_v33, 7  ;;  %v5841_v42 = vadd.f32 %v11411_v43, %v11156_v6 }
 0x705   :  { %6027 = vmatpush.bf16.msrb.mxu1 %v5972_v37  ;;  %v5859_v39 = vadd.f32 %v11411_v43, %v5858_v46  ;;  %v5888_v37 = vmax.f32 %v5691_v45, 0.0 }
 0x706   :  { %v4863_v12 = vrot.slane %v4861_v20, 4  ;;  %v4862_v51 = vsel %vm10141_vm15, %v4860_v41, %v4861_v20 }
 0x707   :  { %v5768_v10 = vpop.f32.mrf.mxu1  ;;  %v5012_v14 = vpop.permute.xlu2 %5011  ;;  %v5955_v40 = vmax.f32 %v5859_v39, 0.0 }
 0x708   :  { %v3794_v60 = vpop.permute.xlu0 %3793  ;;  %5021 = vrot.lane.b32.xlu1 %v4829_v23, %s6387_s29  ;;  %v5769_v13 = vadd.f32 %v11411_v43, %v5768_v10  ;;  %v4865_v52 = vsel %vm10141_vm15, %v4863_v12, %v13149_v2 }
 0x709   :  { %v3796_v32 = vpop.permute.xlu1 %3795  ;;  %3957 = vst.msk [vmem:[#allocation2 + $0x128] sm:$0xf] %vm3882_vm8, %v3794_v60  ;;  %6028 = vmatpush.bf16.msrb.mxu1 %v5971_v59  ;;  %v13148_v59 = vld [vmem:[#allocation248_spill] sm:$0xff] }
 0x70a   :  { %3958 = vst.msk [vmem:[#allocation2 + $0x12c] sm:$0xf] %vm3882_vm8, %v3796_v32  ;;  %v6342_v55 = vld [vmem:[#allocation2 + $0xc0] sm:$0xff]  ;;  %v5919_v44 = vmax.f32 %v5769_v13, 0.0 }
 0x70b   :  { %4688 = vst.msk [vmem:[#allocation2 + $0x128] sm:$0xf] %vm4613_vm0, %v4525_v53  ;;  %6301 = vmatmul.msk.bf16.gmra.mxu2 %vm5554_vm2, %v6342_v55  ;;  %v11517_v53 = vor.u32 %v4241_v58, %v4240_v18  ;;  %5019 = vrot.lane.b32.xlu0 %v4826_v0, %s6387_s29  ;;  %v5948_v55 = vmax.f32 %v5841_v42, 0.0  ;;  %v5834_v58 = vadd.f32 %v11411_v43, %v11074_v62 }
 0x70c   :  { %v5860_v1 = vpop.f32.mrf.mxu3  ;;  %4462 = vrot.lane.b32.xlu2 %v4188_v56, %s6386_s28  ;;  %v5829_v0 = vadd.f32 %v11411_v43, %v11020_v27 }
 0x70d   :  { %v5861_v22 = vadd.f32 %v11411_v43, %v5860_v1  ;;  %6029 = vmatpush.bf16.msrb.mxu1 %v11024_v50  ;;  %v5846_v50 = vadd.f32 %v11411_v43, %v11206_v9  ;;  %v4243_v19 = vsel %vm10122_vm12, %v4239_v11, %v11517_v53  ;;  %v5844_v9 = vadd.f32 %v11411_v43, %v11179_v8 }
 0x70e   :  { %v5839_v8 = vadd.f32 %v11411_v43, %v11122_v16  ;;  %v4244_v18 = vrot.slane %v11517_v53, 4  ;;  %v5945_v29 = vmax.f32 %v5834_v58, 0.0  ;;  %v5943_v13 = vmax.f32 %v5829_v0, 0.0 }
 0x70f   :  { %v5770_v15 = vpop.f32.mrf.mxu1  ;;  %v5956_v31 = vmax.f32 %v5861_v22, 0.0  ;;  %v4423_v4 = vpop.permute.xlu2 %4422  ;;  %v5950_v30 = vmax.f32 %v5846_v50, 0.0  ;;  %v5949_v32 = vmax.f32 %v5844_v9, 0.0 }
 0x710   :  { %v5771_v38 = vadd.f32 %v11411_v43, %v5770_v15  ;;  %v4527_v36 = vpop.permute.xlu0 %4526  ;;  %4637 = vst.msk [vmem:[#allocation2 + $0x5c] sm:$0xf] %vm4613_vm0, %v4423_v4  ;;  %4484 = vrot.lane.b32.xlu1 %v4243_v19, %s6386_s28  ;;  %v4248_v24 = vsel %vm10122_vm12, %v4244_v18, %v10186_v5 }
 0x711   :  { %v5084_v61 = vpop.permute.xlu1 %5083  ;;  %4689 = vst.msk [vmem:[#allocation2 + $0x12c] sm:$0xf] %vm4613_vm0, %v4527_v36  ;;  %v11539_v54 = vpack.c.bf16 %v5956_v31, %v5955_v40  ;;  %6030 = vmatpush.bf16.msrb.mxu1 %v10949_v3  ;;  %v13147_v3 = vld [vmem:[#allocation247_spill] sm:$0xff]  ;;  %v5998_v25 = vpack.c.bf16 %v5950_v30, %v5949_v32 }
 0x712   :  { %5247 = vst.msk [vmem:[#allocation2 + $0x128] sm:$0xf] %vm5172_vm1, %v5084_v61  ;;  %v5920_v21 = vmax.f32 %v5771_v38, 0.0  ;;  %v5995_v61 = vpack.c.bf16 %v5944_v48, %v5943_v13 }
 0x713   :  { %5248 = vst.msk [vmem:[#allocation2 + $0x12c] sm:$0xf] %vm5172_vm1, %v5086_v26  ;;  %v5887_v26 = vmax.f32 %v5689_v63, 0.0  ;;  %3755 = vrot.lane.b32.xlu0 %v13147_v3, %s6385_s27 }
 0x714   :  { %v11547_v46 = vpack.c.bf16 %v5920_v21, %v5919_v44  ;;  %3753 = vrot.lane.b32.xlu2 %v13148_v59, %s6385_s27 }
 0x715   :  { %6031 = vmatpush.bf16.msrb.mxu1 %v10890_v35  ;;  %v5967_v60 = vpack.c.bf16 %v5888_v37, %v5887_v26  ;;  %v5836_v35 = vadd.f32 %v11411_v43, %v11100_v57  ;;  %v5947_v57 = vmax.f32 %v5839_v8, 0.0 }
 0x716   :  { %v5728_v34 = vpop.f32.mrf.mxu0 }
 0x717   :  { %v4980_v49 = vpop.permute.xlu2 %4979  ;;  %v5946_v23 = vmax.f32 %v5836_v35, 0.0  ;;  %v5729_v62 = vadd.f32 %v11411_v43, %v5728_v34 }
 0x718   :  { %v4453_v6 = vpop.permute.xlu0 %4452  ;;  %5045 = vrot.lane.b32.xlu1 %v4865_v52, %s6387_s29 }
 0x719   :  { %v4455_v10 = vpop.permute.xlu1 %4454  ;;  %4652 = vst.msk [vmem:[#allocation2 + $0x98] sm:$0xf] %vm4613_vm0, %v4453_v6  ;;  %6032 = vmatpush.bf16.msrb.mxu1 %v5967_v60  ;;  %v5996_v5 = vpack.c.bf16 %v5946_v23, %v5945_v29  ;;  %v5903_v53 = vmax.f32 %v5729_v62, 0.0 }
 0x71a   :  { %4653 = vst.msk [vmem:[#allocation2 + $0x9c] sm:$0xf] %vm4613_vm0, %v4455_v10  ;;  %v6355_v16 = vld [vmem:[#allocation2 + $0x128] sm:$0xff] }
 0x71b   :  { %5211 = vst.msk [vmem:[#allocation2 + $0x98] sm:$0xf] %vm5172_vm1, %v5012_v14  ;;  %6314 = vmatmul.msk.bf16.gmra.mxu3 %vm5554_vm2, %v6355_v16  ;;  %v5997_v14 = vpack.c.bf16 %v5948_v55, %v5947_v57  ;;  %5043 = vrot.lane.b32.xlu0 %v4862_v51, %s6387_s29 }
 0x71c   :  { %4486 = vrot.lane.b32.xlu2 %v4248_v24, %s6386_s28 }
 0x71d   :  { %6064 = vmatpush.bf16.msra.mxu1 %v5998_v25 }
 0x71e   :  { %v5730_v1 = vpop.f32.mrf.mxu0 }
 0x71f   :  { %v5731_v11 = vadd.f32 %v11411_v43, %v5730_v1  ;;  %v4479_v27 = vpop.permute.xlu2 %4478 }
 0x720   :  { %v5014_v47 = vpop.permute.xlu0 %5013 }
 0x721   :  { %v4421_v39 = vpop.permute.xlu1 %4420  ;;  %6065 = vmatpush.bf16.msra.mxu1 %v5997_v14  ;;  %5212 = vst.msk [vmem:[#allocation2 + $0x9c] sm:$0xf] %vm5172_vm1, %v5014_v47  ;;  %v5904_v56 = vmax.f32 %v5731_v11, 0.0 }
 0x722   :  { %4636 = vst.msk [vmem:[#allocation2 + $0x58] sm:$0xf] %vm4613_vm0, %v4421_v39 }
 0x723   :  { %5195 = vst.msk [vmem:[#allocation2 + $0x58] sm:$0xf] %vm5172_vm1, %v4980_v49  ;;  %v11591_v22 = vpack.c.bf16 %v5904_v56, %v5903_v53 }
 0x725   :  { %6066 = vmatpush.bf16.msra.mxu1 %v5996_v5  ;;  %v5798_v16 = vpop.f32.mrf.mxu2 }
 0x726   :  { %v5799_v5 = vadd.f32 %v11411_v43, %v5798_v16 }
 0x727   :  { %v3798_v31 = vpop.permute.xlu2 %3797 }
 0x728   :  { %v3746_v45 = vpop.permute.xlu0 %3745  ;;  %v6337_v40 = vld [vmem:[#allocation2 + $0x98] sm:$0xff]  ;;  %3959 = vst.msk [vmem:[#allocation2 + $0x130] sm:$0xf] %vm3882_vm8, %v3798_v31 }
 0x729   :  { %v3748_v15 = vpop.permute.xlu1 %3747  ;;  %6067 = vmatpush.bf16.msra.mxu1 %v5995_v61  ;;  %3933 = vst.msk [vmem:[#allocation2 + $0xc8] sm:$0xf] %vm3882_vm8, %v3746_v45  ;;  %v5931_v45 = vmax.f32 %v5799_v5, 0.0 }
 0x72a   :  { %3934 = vst.msk [vmem:[#allocation2 + $0xcc] sm:$0xf] %vm3882_vm8, %v3748_v15  ;;  %6296 = vmatmul.msk.bf16.gmra.mxu1 %vm5554_vm2, %v6337_v40 }
 0x72b   :  { %4665 = vst.msk [vmem:[#allocation2 + $0xcc] sm:$0xf] %vm4613_vm0, %v4479_v27 }
 0x72d   :  { %v5800_v58 = vpop.f32.mrf.mxu2 }
 0x72e   :  { %v5801_v1 = vadd.f32 %v11411_v43, %v5800_v58 }
 0x72f   :  { %v4531_v63 = vpop.permute.xlu2 %4530 }
 0x730   :  { %v4982_v36 = vpop.permute.xlu0 %4981  ;;  %v5932_v13 = vmax.f32 %v5801_v1, 0.0 }
 0x731   :  { %v4477_v38 = vpop.permute.xlu1 %4476  ;;  %5196 = vst.msk [vmem:[#allocation2 + $0x5c] sm:$0xf] %vm5172_vm1, %v4982_v36 }
 0x732   :  { %4664 = vst.msk [vmem:[#allocation2 + $0xc8] sm:$0xf] %vm4613_vm0, %v4477_v38  ;;  %v5989_v40 = vpack.c.bf16 %v5932_v13, %v5931_v45 }
 0x735   :  { %v5863_v50 = vpop.f32.mrf.mxu3 }
 0x736   :  { %v5864_v4 = vadd.f32 %v11411_v43, %v5863_v50 }
 0x737   :  { %v4457_v20 = vpop.permute.xlu2 %4456 }
 0x738   :  { %v5036_v44 = vpop.permute.xlu0 %5035  ;;  %v5773_v21 = vpop.f32.mrf.mxu1  ;;  %v6329_v33 = vld [vmem:[#allocation2 + $0x58] sm:$0xff]  ;;  %4654 = vst.msk [vmem:[#allocation2 + $0xa0] sm:$0xf] %vm4613_vm0, %v4457_v20  ;;  %v5957_v26 = vmax.f32 %v5864_v4, 0.0 }
 0x739   :  { %v5038_v19 = vpop.permute.xlu1 %5037  ;;  %5223 = vst.msk [vmem:[#allocation2 + $0xc8] sm:$0xf] %vm5172_vm1, %v5036_v44  ;;  %6288 = vmatmul.msk.bf16.gmra.mxu0 %vm5554_vm2, %v6329_v33  ;;  %v5774_v42 = vadd.f32 %v11411_v43, %v5773_v21 }
 0x73a   :  { %5224 = vst.msk [vmem:[#allocation2 + $0xcc] sm:$0xf] %vm5172_vm1, %v5038_v19 }
 0x73b   :  { %v5921_v6 = vmax.f32 %v5774_v42, 0.0 }
 0x73d   :  { %v5865_v9 = vpop.f32.mrf.mxu3 }
 0x73e   :  { %v5866_v37 = vadd.f32 %v11411_v43, %v5865_v9 }
 0x73f   :  { %v5018_v41 = vpop.permute.xlu2 %5017 }
 0x740   :  { %v5958_v3 = vmax.f32 %v5866_v37, 0.0  ;;  %v3800_v12 = vpop.permute.xlu0 %3799  ;;  %v5775_v8 = vpop.f32.mrf.mxu1 }
 0x741   :  { %v4529_v30 = vpop.permute.xlu1 %4528  ;;  %v6343_v32 = vld [vmem:[#allocation2 + $0xc8] sm:$0xff]  ;;  %3960 = vst.msk [vmem:[#allocation2 + $0x134] sm:$0xf] %vm3882_vm8, %v3800_v12  ;;  %v5776_v10 = vadd.f32 %v11411_v43, %v5775_v8 }
 0x742   :  { %4690 = vst.msk [vmem:[#allocation2 + $0x130] sm:$0xf] %vm4613_vm0, %v4529_v30  ;;  %v11610_v34 = vpack.c.bf16 %v5958_v3, %v5957_v26  ;;  %6302 = vmatmul.msk.bf16.gmra.mxu2 %vm5554_vm2, %v6343_v32 }
 0x743   :  { %4691 = vst.msk [vmem:[#allocation2 + $0x134] sm:$0xf] %vm4613_vm0, %v4531_v63  ;;  %v5922_v60 = vmax.f32 %v5776_v10, 0.0 }
 0x745   :  { %v11614_v59 = vpack.c.bf16 %v5922_v60, %v5921_v6 }
 0x747   :  { %v3750_v25 = vpop.permute.xlu2 %3749  ;;  %v5733_v8 = vpop.f32.mrf.mxu0 }
 0x748   :  { %v5088_v55 = vpop.permute.xlu0 %5087  ;;  %3935 = vst.msk [vmem:[#allocation2 + $0xd0] sm:$0xf] %vm3882_vm8, %v3750_v25 }
 0x749   :  { %v5090_v35 = vpop.permute.xlu1 %5089  ;;  %5249 = vst.msk [vmem:[#allocation2 + $0x130] sm:$0xf] %vm5172_vm1, %v5088_v55 }
 0x74a   :  { %5250 = vst.msk [vmem:[#allocation2 + $0x134] sm:$0xf] %vm5172_vm1, %v5090_v35 }
 0x74f   :  { %v4986_v49 = vpop.permute.xlu2 %4985  ;;  %v5735_v32 = vpop.f32.mrf.mxu0 }
 0x750   :  { %v4459_v2 = vpop.permute.xlu0 %4458 }
 0x751   :  { %v5016_v18 = vpop.permute.xlu1 %5015  ;;  %v6356_v52 = vld [vmem:[#allocation2 + $0x130] sm:$0xff]  ;;  %4655 = vst.msk [vmem:[#allocation2 + $0xa4] sm:$0xf] %vm4613_vm0, %v4459_v2 }
 0x752   :  { %5213 = vst.msk [vmem:[#allocation2 + $0xa0] sm:$0xf] %vm5172_vm1, %v5016_v18  ;;  %6315 = vmatmul.msk.bf16.gmra.mxu3 %vm5554_vm2, %v6356_v52 }
 0x753   :  { %5214 = vst.msk [vmem:[#allocation2 + $0xa4] sm:$0xf] %vm5172_vm1, %v5018_v41 }
 0x757   :  { %v4483_v23 = vpop.permute.xlu2 %4482 }
 0x758   :  { %v4425_v51 = vpop.permute.xlu0 %4424 }
 0x759   :  { %v4427_v57 = vpop.permute.xlu1 %4426  ;;  %4638 = vst.msk [vmem:[#allocation2 + $0x60] sm:$0xf] %vm4613_vm0, %v4425_v51 }
 0x75a   :  { %4639 = vst.msk [vmem:[#allocation2 + $0x64] sm:$0xf] %vm4613_vm0, %v4427_v57  ;;  %v6338_v17 = vld [vmem:[#allocation2 + $0xa0] sm:$0xff] }
 0x75b   :  { %5198 = vst.msk [vmem:[#allocation2 + $0x64] sm:$0xf] %vm5172_vm1, %v4986_v49  ;;  %6297 = vmatmul.msk.bf16.gmra.mxu1 %vm5554_vm2, %v6338_v17 }
 0x75c   :  { %v5803_v14 = vpop.f32.mrf.mxu2 }
 0x75d   :  { %v5804_v29 = vadd.f32 %v11411_v43, %v5803_v14 }
 0x75f   :  { %v5042_v0 = vpop.permute.xlu2 %5041  ;;  %v5933_v53 = vmax.f32 %v5804_v29, 0.0 }
 0x760   :  { %v3752_v62 = vpop.permute.xlu0 %3751 }
 0x761   :  { %v4984_v24 = vpop.permute.xlu1 %4983  ;;  %3936 = vst.msk [vmem:[#allocation2 + $0xd4] sm:$0xf] %vm3882_vm8, %v3752_v62 }
 0x762   :  { %5197 = vst.msk [vmem:[#allocation2 + $0x60] sm:$0xf] %vm5172_vm1, %v4984_v24 }
 0x763   :  { %4667 = vst.msk [vmem:[#allocation2 + $0xd4] sm:$0xf] %vm4613_vm0, %v4483_v23 }
 0x764   :  { %5226 = vst.msk [vmem:[#allocation2 + $0xd4] sm:$0xf] %vm5172_vm1, %v5042_v0  ;;  %v5805_v39 = vpop.f32.mrf.mxu2 }
 0x765   :  { %v5806_v47 = vadd.f32 %v11411_v43, %v5805_v39 }
 0x767   :  { %v5934_v56 = vmax.f32 %v5806_v47, 0.0  ;;  %v4463_v15 = vpop.permute.xlu2 %4462 }
 0x768   :  { %v3802_v27 = vpop.permute.xlu0 %3801  ;;  %4657 = vst.msk [vmem:[#allocation2 + $0xac] sm:$0xf] %vm4613_vm0, %v4463_v15 }
 0x769   :  { %v4481_v11 = vpop.permute.xlu1 %4480  ;;  %v6330_v48 = vld [vmem:[#allocation2 + $0x60] sm:$0xff]  ;;  %3962 = vst.msk [vmem:[#allocation2 + $0x138] sm:$0x7] %vm3961_vm3, %v3802_v27  ;;  %v5990_v61 = vpack.c.bf16 %v5934_v56, %v5933_v53  ;;  %v5736_v56 = vadd.f32 %v11411_v43, %v5735_v32 }
 0x76a   :  { %4666 = vst.msk [vmem:[#allocation2 + $0xd0] sm:$0xf] %vm4613_vm0, %v4481_v11  ;;  %6289 = vmatmul.msk.bf16.gmra.mxu0 %vm5554_vm2, %v6330_v48 }
 0x76b   :  { %6051 = vmatpush.bf16.msrb.mxu3 %v5990_v61  ;;  %v5734_v61 = vadd.f32 %v11411_v43, %v5733_v8 }
 0x76c   :  { %v11654_v60 = vpop.f32.mrf.mxu3 }
 0x76f   :  { %6052 = vmatpush.bf16.msrb.mxu3 %v5989_v40  ;;  %v3754_v36 = vpop.permute.xlu2 %3753  ;;  %v11652_v6 = vpop.f32.mrf.mxu1  ;;  %v5906_v40 = vmax.f32 %v5736_v56, 0.0 }
 0x770   :  { %v4533_v38 = vpop.permute.xlu0 %4532  ;;  %3937 = vst.msk [vmem:[#allocation2 + $0xd8] sm:$0xf] %vm3882_vm8, %v3754_v36 }
 0x771   :  { %v5040_v31 = vpop.permute.xlu1 %5039  ;;  %4693 = vst.msk [vmem:[#allocation2 + $0x138] sm:$0x7] %vm4692_vm4, %v4533_v38  ;;  %v5905_v38 = vmax.f32 %v5734_v61, 0.0 }
 0x772   :  { %5225 = vst.msk [vmem:[#allocation2 + $0xd0] sm:$0xf] %vm5172_vm1, %v5040_v31 }
 0x774   :  { %v11658_v25 = vpop.f32.mrf.mxu3 }
 0x777   :  { %v4487_v37 = vpop.permute.xlu2 %4486  ;;  %v11656_v55 = vpop.f32.mrf.mxu1 }
 0x778   :  { %v5092_v19 = vpop.permute.xlu0 %5091 }
 0x779   :  { %v4461_v63 = vpop.permute.xlu1 %4460  ;;  %v6344_v50 = vld [vmem:[#allocation2 + $0xd0] sm:$0xff]  ;;  %5252 = vst.msk [vmem:[#allocation2 + $0x138] sm:$0x7] %vm5251_vm6, %v5092_v19 }
 0x77a   :  { %4656 = vst.msk [vmem:[#allocation2 + $0xa8] sm:$0xf] %vm4613_vm0, %v4461_v63  ;;  %6303 = vmatmul.msk.bf16.gmra.mxu2 %vm5554_vm2, %v6344_v50  ;;  %v5976_v63 = vpack.c.bf16 %v5906_v40, %v5905_v38 }
 0x77f   :  { %v5738_v10 = vpop.f32.mrf.mxu0 }
 0x780   :  { %v5020_v21 = vpop.permute.xlu0 %5019  ;;  %v5331_v33 = vld [vmem:[#allocation2 + $0x138] sm:$0x7]  ;;  %v5739_v11 = vadd.f32 %v11411_v43, %v5738_v10 }
 0x781   :  { %v5022_v44 = vpop.permute.xlu1 %5021  ;;  %5215 = vst.msk [vmem:[#allocation2 + $0xa8] sm:$0xf] %vm5172_vm1, %v5020_v21  ;;  %v5498_v20 = vunpack.c.l.b16 %v5331_v33 }
 0x782   :  { %5216 = vst.msk [vmem:[#allocation2 + $0xac] sm:$0xf] %vm5172_vm1, %v5022_v44  ;;  %v5907_v15 = vmax.f32 %v5739_v11, 0.0  ;;  %v5966_v44 = vld [vmem:[%s11736_s3] sm:$0x1f] }
 0x783   :  { %v5538_v4 = vpack.c.b16 %v5498_v20, %v5498_v20  ;;  %6008 = vst [vmem:[#allocation1] ss:$9 sm:$0xff] %v5966_v44 }
 0x785   :  { %6316 = vmatmul.msk.bf16.gmra.mxu3 %vm5554_vm2, %v5538_v4 }
 0x787   :  { %v5740_v41 = vpop.f32.mrf.mxu0 }
 0x788   :  { %v3756_v42 = vpop.permute.xlu0 %3755  ;;  %v5741_v39 = vadd.f32 %v11411_v43, %v5740_v41 }
 0x789   :  { %v4485_v9 = vpop.permute.xlu1 %4484  ;;  %v6339_v30 = vld [vmem:[#allocation2 + $0xa8] sm:$0xff]  ;;  %3938 = vst.msk [vmem:[#allocation2 + $0xdc] sm:$0xf] %vm3882_vm8, %v3756_v42  ;;  %vm6104_vm8 = vcmask 1024  }
 0x78a   :  { %4668 = vst.msk [vmem:[#allocation2 + $0xd8] sm:$0xf] %vm4613_vm0, %v4485_v9  ;;  %6298 = vmatmul.msk.bf16.gmra.mxu1 %vm5554_vm2, %v6339_v30  ;;  %v5908_v27 = vmax.f32 %v5741_v39, 0.0  ;;  %v6010_v42 = vld [vmem:[#allocation1 + $0x9] sm:$0xff]  ;;  %v6009_v10 = vld [vmem:[#allocation1] sm:$0xff] }
 0x78b   :  { %4669 = vst.msk [vmem:[#allocation2 + $0xdc] sm:$0xf] %vm4613_vm0, %v4487_v37 }
 0x78c   :  { %v5977_v31 = vpack.c.bf16 %v5908_v27, %v5907_v15  ;;  %v5781_v27 = vadd.f32 %v11411_v43, %v11656_v55 }
 0x78e   :  { %v11662_v49 = vpop.f32.mrf.mxu2  ;;  %v5924_v40 = vmax.f32 %v5781_v27, 0.0 }
 0x790   :  { %v5044_v3 = vpop.permute.xlu0 %5043 }
 0x791   :  { %v5046_v26 = vpop.permute.xlu1 %5045  ;;  %5227 = vst.msk [vmem:[#allocation2 + $0xd8] sm:$0xf] %vm5172_vm1, %v5044_v3 }
 0x792   :  { %5228 = vst.msk [vmem:[#allocation2 + $0xdc] sm:$0xf] %vm5172_vm1, %v5046_v26 }
 0x796   :  { %v11669_v24 = vpop.f32.mrf.mxu2 }
 0x799   :  { %v6345_v12 = vld [vmem:[#allocation2 + $0xd8] sm:$0xff] }
 0x79a   :  { %6304 = vmatmul.msk.bf16.gmra.mxu2 %vm5554_vm2, %v6345_v12  ;;  %6033 = vmatmul.bf16.vlgmr.msrb.gmra.mxu1 %v6009_v10  ;;  %v11_v10 = vstv %s11738_s5 }
 0x79b   :  { %12 = vst [vmem:[#allocation3] sm:$0x1] %v11_v10 }
 0x79e   :  { %v5873_v2 = vpop.f32.mrf.mxu3 }
 0x79f   :  { %v5874_v41 = vadd.f32 %v11411_v43, %v5873_v2  ;;  %v5869_v2 = vadd.f32 %v11411_v43, %v11654_v60 }
 0x7a1   :  { %v5959_v56 = vmax.f32 %v5869_v2, 0.0 }
 0x7a2   :  { %v6378_v2 = vld [vmem:[#allocation3] ss:$0 sm:$0xff] }
 0x7a6   :  { %v5875_v51 = vpop.f32.mrf.mxu3 }
 0x7a7   :  { %v11660_v18 = vpop.f32.mrf.mxu1  ;;  %v5876_v26 = vadd.f32 %v11411_v43, %v5875_v51  ;;  %v5871_v51 = vadd.f32 %v11411_v43, %v11658_v25 }
 0x7a8   :  { %v5784_v25 = vadd.f32 %v11411_v43, %v11660_v18 }
 0x7aa   :  { %v5925_v15 = vmax.f32 %v5784_v25, 0.0 }
 0x7af   :  { %v11664_v58 = vpop.f32.mrf.mxu1 }
 0x7b0   :  { %v5786_v39 = vadd.f32 %v11411_v43, %v11664_v58  ;;  %v5779_v58 = vadd.f32 %v11411_v43, %v11652_v6 }
 0x7b2   :  { %v5926_v60 = vmax.f32 %v5786_v39, 0.0  ;;  %v5923_v18 = vmax.f32 %v5779_v58, 0.0 }
 0x7b6   :  { %v5743_v35 = vpop.f32.mrf.mxu0 }
 0x7b7   :  { %v5744_v62 = vadd.f32 %v11411_v43, %v5743_v35 }
 0x7b9   :  { %v5909_v48 = vmax.f32 %v5744_v62, 0.0 }
 0x7be   :  { %v5745_v16 = vpop.f32.mrf.mxu0 }
 0x7bf   :  { %v5746_v23 = vadd.f32 %v11411_v43, %v5745_v16 }
 0x7c1   :  { %v5910_v1 = vmax.f32 %v5746_v23, 0.0 }
 0x7c3   :  { %v5978_v13 = vpack.c.bf16 %v5910_v1, %v5909_v48  ;;  %v5960_v48 = vmax.f32 %v5871_v51, 0.0  ;;  %v6377_v51 = vld [vmem:[%s11737_s4] ss:$0 sm:$0xff] }
 0x7c5   :  { %v11676_v45 = vpop.f32.mrf.mxu2  ;;  %v6003_v61 = vpack.c.bf16 %v5960_v48, %v5959_v56 }
 0x7cd   :  { %v11678_v19 = vpop.f32.mrf.mxu2 }
 0x7d5   :  { %v5878_v53 = vpop.f32.mrf.mxu3 }
 0x7d6   :  { %v5879_v30 = vadd.f32 %v11411_v43, %v5878_v53 }
 0x7d8   :  { %v5788_v5 = vpop.f32.mrf.mxu1  ;;  %v5963_v35 = vmax.f32 %v5879_v30, 0.0 }
 0x7d9   :  { %v5789_v23 = vadd.f32 %v11411_v43, %v5788_v5 }
 0x7db   :  { %v5927_v5 = vmax.f32 %v5789_v23, 0.0 }
 0x7dd   :  { %v5880_v50 = vpop.f32.mrf.mxu3 }
 0x7de   :  { %v5881_v4 = vadd.f32 %v11411_v43, %v5880_v50 }
 0x7e0   :  { %v5790_v36 = vpop.f32.mrf.mxu1  ;;  %v5964_v12 = vmax.f32 %v5881_v4, 0.0 }
 0x7e1   :  { %v5791_v16 = vadd.f32 %v11411_v43, %v5790_v36  ;;  %v5985_v36 = vpack.c.bf16 %v5924_v40, %v5923_v18 }
 0x7e3   :  { %v5928_v1 = vmax.f32 %v5791_v16, 0.0 }
 0x7e7   :  { %v5748_v52 = vpop.f32.mrf.mxu0 }
 0x7e8   :  { %v5749_v57 = vadd.f32 %v11411_v43, %v5748_v52 }
 0x7ea   :  { %v5911_v0 = vmax.f32 %v5749_v57, 0.0 }
 0x7ef   :  { %v5750_v17 = vpop.f32.mrf.mxu0 }
 0x7f0   :  { %v5751_v14 = vadd.f32 %v11411_v43, %v5750_v17  ;;  %v5962_v17 = vmax.f32 %v5876_v26, 0.0 }
 0x7f2   :  { %v5912_v29 = vmax.f32 %v5751_v14, 0.0  ;;  %v6005_v14 = vpack.c.bf16 %v5964_v12, %v5963_v35  ;;  %v6012_v12 = vld [vmem:[#allocation1 + $0x1b] sm:$0xff] }
 0x7f4   :  { %v5979_v47 = vpack.c.bf16 %v5912_v29, %v5911_v0  ;;  %v5961_v29 = vmax.f32 %v5874_v41, 0.0 }
 0x7f6   :  { %6041 = vmatpush.bf16.msrb.mxu2 %v5979_v47  ;;  %v6004_v53 = vpack.c.bf16 %v5962_v17, %v5961_v29 }
 0x7fa   :  { %6042 = vmatpush.bf16.msrb.mxu2 %v5978_v13  ;;  %v5987_v13 = vpack.c.bf16 %v5928_v1, %v5927_v5 }
 0x7fd   :  { %v5818_v9 = vpop.f32.mrf.mxu2 }
 0x7fe   :  { %6043 = vmatpush.bf16.msrb.mxu2 %v5977_v31  ;;  %v5986_v31 = vpack.c.bf16 %v5926_v60, %v5925_v15  ;;  %v5819_v44 = vadd.f32 %v11411_v43, %v5818_v9 }
 0x802   :  { %6044 = vmatpush.bf16.msrb.mxu2 %v5976_v63 }
 0x805   :  { %v5820_v11 = vpop.f32.mrf.mxu2 }
 0x806   :  { %6045 = vmatpush.bf16.msrb.mxu2 %v11591_v22  ;;  %v5821_v6 = vadd.f32 %v11411_v43, %v5820_v11 }
 0x807   :  { %v5793_v21 = vpop.f32.mrf.mxu1 }
 0x808   :  { %v5883_v33 = vpop.f32.mrf.mxu3  ;;  %v5794_v8 = vadd.f32 %v11411_v43, %v5793_v21 }
 0x809   :  { %v5884_v20 = vadd.f32 %v11411_v43, %v5883_v33  ;;  %6046 = vmatmul.bf16.vlgmr.msrb.gmra.mxu2 %v6010_v42  ;;  %v5939_v42 = vmax.f32 %v5819_v44, 0.0 }
 0x80a   :  { %v5929_v62 = vmax.f32 %v5794_v8, 0.0 }
 0x80b   :  { %v5965_v37 = vmax.f32 %v5884_v20, 0.0  ;;  %v5940_v20 = vmax.f32 %v5821_v6, 0.0 }
 0x80d   :  { %v6006_v3 = vpack.c.bf16 %v5965_v37, %v5965_v37  ;;  %v5814_v37 = vadd.f32 %v11411_v43, %v11676_v45 }
 0x80f   :  { %v5795_v32 = vpop.f32.mrf.mxu1  ;;  %v6023_v22 = vsel %vm1459_vm5, %v6006_v3, 0  ;;  %vm6018_vm5 = vcmask 965632   ;;  %v5937_v30 = vmax.f32 %v5814_v37, 0.0 }
 0x810   :  { %v5796_v52 = vadd.f32 %v11411_v43, %v5795_v32  ;;  %v5885_v57 = vpop.f32.mrf.mxu3  ;;  %6077 = vmatpush.bf16.msra.mxu2 %v6023_v22 }
 0x812   :  { %v5930_v0 = vmax.f32 %v5796_v52, 0.0 }
 0x814   :  { %6078 = vmatpush.bf16.msra.mxu2 %v6005_v14  ;;  %v5988_v47 = vpack.c.bf16 %v5930_v0, %v5929_v62 }
 0x816   :  { %6053 = vmatpush.bf16.msrb.mxu3 %v5988_v47 }
 0x817   :  { %v6034_v8 = vpop.f32.mrf.mxu1 }
 0x818   :  { %6079 = vmatpush.bf16.msra.mxu2 %v6004_v53 }
 0x81a   :  { %6054 = vmatpush.bf16.msrb.mxu3 %v5987_v13 }
 0x81c   :  { %6080 = vmatpush.bf16.msra.mxu2 %v6003_v61 }
 0x81d   :  { %v5823_v38 = vpop.f32.mrf.mxu2 }
 0x81e   :  { %6055 = vmatpush.bf16.msrb.mxu3 %v5986_v31  ;;  %v5824_v55 = vadd.f32 %v11411_v43, %v5823_v38 }
 0x81f   :  { %v6036_v22 = vpop.f32.mrf.mxu1 }
 0x820   :  { %6081 = vmatpush.bf16.msra.mxu2 %v11610_v34  ;;  %v5941_v21 = vmax.f32 %v5824_v55, 0.0  ;;  %v5816_v34 = vadd.f32 %v11411_v43, %v11678_v19  ;;  %v5993_v19 = vpack.c.bf16 %v5940_v20, %v5939_v42 }
 0x822   :  { %6056 = vmatpush.bf16.msrb.mxu3 %v5985_v36  ;;  %v5938_v9 = vmax.f32 %v5816_v34, 0.0 }
 0x824   :  { %6082 = vmatpush.bf16.msra.mxu2 %v11539_v54  ;;  %v6011_v54 = vld [vmem:[#allocation1 + $0x12] sm:$0xff]  ;;  %v5992_v45 = vpack.c.bf16 %v5938_v9, %v5937_v30 }
 0x825   :  { %v5825_v63 = vpop.f32.mrf.mxu2 }
 0x826   :  { %v5826_v50 = vadd.f32 %v11411_v43, %v5825_v63  ;;  %6057 = vmatpush.bf16.msrb.mxu3 %v11614_v59  ;;  %v6013_v59 = vld [vmem:[#allocation1 + $0x24] sm:$0xff] }
 0x828   :  { %v5942_v33 = vmax.f32 %v5826_v50, 0.0  ;;  %6083 = vmatpush.bf16.msra.mxu2 %v11399_v28  ;;  %v5811_v28 = vadd.f32 %v11411_v43, %v11669_v24 }
 0x82a   :  { %v5994_v4 = vpack.c.bf16 %v5942_v33, %v5941_v21  ;;  %6058 = vmatpush.bf16.msrb.mxu3 %v11547_v46  ;;  %v5809_v46 = vadd.f32 %v11411_v43, %v11662_v49  ;;  %v5936_v26 = vmax.f32 %v5811_v28, 0.0 }
 0x82c   :  { %6084 = vmatpush.bf16.msra.mxu2 %v11274_v7  ;;  %6068 = vmatpush.bf16.msra.mxu1 %v5994_v4  ;;  %v5935_v3 = vmax.f32 %v5809_v46, 0.0 }
 0x82d   :  { %6059 = vmatmul.bf16.vlgmr.msrb.gmra.mxu3 %v6011_v54 }
 0x82e   :  { %v5991_v7 = vpack.c.bf16 %v5936_v26, %v5935_v3 }
 0x82f   :  { %6317 = vmatmul.msk.bf16.vlgmr.msra.gmra.mxu2 %vm6018_vm5, %v6013_v59 }
 0x830   :  { %6069 = vmatpush.bf16.msra.mxu1 %v5993_v19 }
 0x834   :  { %6070 = vmatpush.bf16.msra.mxu1 %v5992_v45 }
 0x838   :  { %6071 = vmatpush.bf16.msra.mxu1 %v5991_v7 }
 0x83b   :  { %6072 = vmatmul.bf16.vlgmr.msra.gmra.mxu1 %v6012_v12 }
 0x88c   :  { %v6047_v32 = vpop.f32.mrf.mxu2 }
 0x88d   :  { %v6048_v41 = vadd.f32 %v6047_v32, %v6034_v8 }
 0x894   :  { %v6049_v24 = vpop.f32.mrf.mxu2 }
 0x8b0   :  { %v6060_v43 = vpop.f32.mrf.mxu3 }
 0x8b1   :  { %v6061_v35 = vadd.f32 %v6060_v43, %v6048_v41 }
 0x8b2   :  { %v6086_v49 = vpop.f32.mrf.mxu2 }
 0x8b8   :  { %v6073_v16 = vpop.f32.mrf.mxu1  ;;  %v6062_v52 = vpop.f32.mrf.mxu3 }
 0x8b9   :  { %v6074_v57 = vadd.f32 %v6073_v16, %v6061_v35 }
 0x8ba   :  { %v6088_v17 = vpop.f32.mrf.mxu2 }
 0x8bb   :  { %v6087_v23 = vadd.f32 %v6086_v49, %v6074_v57 }
 0x8bd   :  { %v6094_v14 = vmul.f32 %v6377_v51, %v6087_v23 }
 0x8bf   :  { %v6096_v62 = vsel %vm6095_vm7, %v6094_v14, 0.0 }
 0x8c0   :  { %6097 = vadd.xlane.f32.xlu2 %v6096_v62  ;;  %v6075_v0 = vpop.f32.mrf.mxu1 }
 0x933   :  { %v6098_v29 = vpop.xlane.xlu2 %6097 }
 0x934   :  { %v6103_v39 = vadd.f32 %v6378_v2, %v6098_v29 }
 0x936   :  { %6105 = vst.msk [vmem:[%s11739_s6] sm:$0x3] %vm6104_vm8, %v6103_v39 }

</bundles_post_ra>
